<compile_context>
chip_gen: v7x
topology: tpu7x:2x2x1
jax: 0.10.0
libtpu: 0.0.40
codegen_flags: <defaults>
</compile_context>

<pallas_src>
import functools

import jax
import jax.numpy as jnp
from jax.experimental import pallas as pl
from jax.experimental.pallas import tpu as pltpu


NPAD = 128          # lane-dense padding for the final logits / wf3 / bf3
BBLK_MAX = 64       # max batch elements per grid step (multiple of 8)


def _round_up(x, m):
    return (x + m - 1) // m * m


def _geometry(maze_width):
    H = 2 * maze_width + 1            # spatial size (13)
    W = H                             # flat-row width, kept at H for every layer
    lin = H - 6                       # conv3 output height/width (7)
    o1 = H - 2                        # conv1 output height (11)
    # Flat row p = oh*W + ow.  Row budgets chosen so each buffer is fully
    # WRITTEN before it is read (no uninitialized VMEM is ever consumed):
    #   FC1 reads a3 rows              <= (lin-1)*(W+1)
    #   conv3 (computes R3 rows) reads a2 rows <= R3-1 + 2*W + 2
    #   conv2 (computes R2 rows) reads a1 rows <= R2-1 + 2*W + 2
    R3 = _round_up((lin - 1) * (W + 1) + 1, 8)      # 88  for maze_width=6
    R2 = _round_up(R3 + 2 * W + 2, 8)               # 120
    R1 = _round_up(R2 + 2 * W + 2, 8)               # 152
    return dict(H=H, W=W, lin=lin, o1=o1, R1=R1, R2=R2, R3=R3)


def _const_index(*args, n):
    return (0,) * n


# ----------------------------------------------------------------------------
# The fused kernel (one grid step == Bblk batch elements)
# ----------------------------------------------------------------------------
def _fused_cnn_kernel(x_ref,
                      wc1, bc1, wc2, bc2, wc3, bc3,
                      wf1, bf1, wf2, bf2, wf3, bf3,
                      o_ref, a1, a2, a3, flat, *, geom, bblk):
    W = geom["W"]
    lin = geom["lin"]
    R2, R3 = geom["R2"], geom["R3"]

    # ---- conv1: input was im2col'd in the wrapper -> ONE matmul with K=27.
    a1[...] = jnp.maximum(
        jnp.dot(x_ref[...], wc1[...], preferred_element_type=jnp.float32)
        + bc1[...], 0.0).astype(a1.dtype)

    # ---- conv2 / conv3: nine accumulating MXU matmuls per layer.  Batch is
    # folded into M (scratch row = flat_row*bblk + b), taps are sublane-aligned
    # leading-dim slices, and three independent per-kh accumulators keep MXU
    # pushes from serializing behind VPU adds (while bounding live f32 temps).
    def conv3x3(src, w_ref, b_ref, dst, rows_out):
        m = rows_out * bblk
        accs = []
        for kh in range(3):
            acc = None
            for kw in range(3):
                t = (kh * W + kw) * bblk
                part = jnp.dot(src[t:t + m, :], w_ref[kh * 3 + kw],
                               preferred_element_type=jnp.float32)
                acc = part if acc is None else acc + part
            accs.append(acc)
        total = (accs[0] + accs[1]) + accs[2]
        dst[...] = jnp.maximum(total + b_ref[...], 0.0).astype(dst.dtype)

    conv3x3(a1, wc2, bc2, a2, R2)     # (.,16) -> (.,32)
    conv3x3(a2, wc3, bc3, a3, R3)     # (.,32) -> (.,64)

    # ---- Flatten: pack the lin*lin valid conv3 positions into a lane-dense
    # (bblk, lin*lin*64) bf16 slab so FC1 is one fat matmul instead of 49
    # skinny ones.  wf1 was repacked so row s*64+c matches slot s = oh*lin+ow.
    for oh in range(lin):
        for ow in range(lin):
            r = oh * W + ow
            s = oh * lin + ow
            flat[:, s * 64:(s + 1) * 64] = a3[r * bblk:(r + 1) * bblk, :]

    h = jnp.maximum(jnp.dot(flat[...], wf1[...],
                            preferred_element_type=jnp.float32) + bf1[...], 0.0)
    h = jnp.maximum(jnp.dot(h.astype(jnp.bfloat16), wf2[...],
                            preferred_element_type=jnp.float32) + bf2[...], 0.0)
    o_ref[...] = jnp.dot(h.astype(jnp.bfloat16), wf3[...],
                         preferred_element_type=jnp.float32) + bf3[...]


# ----------------------------------------------------------------------------
# Wrapper
# ----------------------------------------------------------------------------
def _batch_blocking(batch):
    b8 = _round_up(max(batch, 1), 8)
    if b8 <= 8:
        bblk = b8
    elif b8 <= 2 * BBLK_MAX:
        bblk = _round_up((b8 + 1) // 2, 8)   # >= 2 grid steps (v7x megacore)
    else:
        bblk = BBLK_MAX
    b_pad = _round_up(b8, bblk)
    return bblk, b_pad // bblk


def _prep_input(obs, geom, bblk, nb):
    """NCHW obs -> im2col'd, flat-row, batch-blocked bf16 kernel input."""
    B = obs.shape[0]
    W, o1, R1 = geom["W"], geom["o1"], geom["R1"]
    img = jnp.transpose(obs.astype(jnp.float32), (0, 2, 3, 1))      # (B,H,W,3)
    taps = [img[:, kh:kh + o1, kw:kw + o1, :]
            for kh in range(3) for kw in range(3)]                  # kh-major
    pat = jnp.concatenate(taps, axis=-1)                            # (B,o1,o1,27)
    pat = jnp.pad(pat, ((0, 0), (0, 0), (0, W - o1), (0, 0)))       # pad ow -> W
    pat = pat.reshape(B, o1 * W, 27)                                # flat rows
    rows = o1 * W
    if rows < R1:
        pat = jnp.pad(pat, ((0, 0), (0, R1 - rows), (0, 0)))
    else:
        pat = pat[:, :R1, :]
    pat = jnp.pad(pat, ((0, nb * bblk - B), (0, 0), (0, 0)))        # batch pad
    # (B_pad, R1, 27) -> (nb, R1*bblk, 27) with kernel row = p*bblk + b_local
    x = jnp.transpose(pat, (1, 0, 2)).reshape(R1, nb, bblk, 27)
    x = jnp.transpose(x, (1, 0, 2, 3)).reshape(nb, R1 * bblk, 27)
    return x.astype(jnp.bfloat16)


@functools.partial(jax.jit, static_argnames=("maze_width", "max_actions"))
def cnn_forward(obs, params, state=None, *, maze_width=6, max_actions=5):
    geom = _geometry(maze_width)
    B = obs.shape[0]
    bblk, nb = _batch_blocking(B)
    x = _prep_input(obs, geom, bblk, nb)

    weight_names = ("wc1", "bc1", "wc2", "bc2", "wc3", "bc3",
                    "wf1", "bf1", "wf2", "bf2", "wf3", "bf3")
    weights = [params[k] for k in weight_names]
    w_specs = [pl.BlockSpec(w.shape, functools.partial(_const_index, n=w.ndim))
               for w in weights]

    kernel = functools.partial(_fused_cnn_kernel, geom=geom, bblk=bblk)
    R1, R2, R3, lin = geom["R1"], geom["R2"], geom["R3"], geom["lin"]

    out = pl.pallas_call(
        kernel,
        out_shape=jax.ShapeDtypeStruct((nb * bblk, NPAD), jnp.float32),
        grid=(nb,),
        in_specs=[pl.BlockSpec((None, R1 * bblk, 27), lambda i: (i, 0, 0))]
                 + w_specs,
        out_specs=pl.BlockSpec((bblk, NPAD), lambda i: (i, 0)),
        scratch_shapes=[
            pltpu.VMEM((R1 * bblk, 16), jnp.bfloat16),           # conv1 out
            pltpu.VMEM((R2 * bblk, 32), jnp.bfloat16),           # conv2 out
            pltpu.VMEM((R3 * bblk, 64), jnp.bfloat16),           # conv3 out
            pltpu.VMEM((bblk, lin * lin * 64), jnp.bfloat16),    # FC1 flatten
        ],
        compiler_params=pltpu.CompilerParams(
            dimension_semantics=("parallel",),
            vmem_limit_bytes=48 * 1024 * 1024),
    )(x, *weights)

    logits = out[:B, :max_actions]
    return logits, state


# ----------------------------------------------------------------------------
# Parameters: PyTorch-default-style init (raw layout) + kernel-layout prep
# ----------------------------------------------------------------------------
def init_params(key, maze_width=6, max_actions=5):
    lin = 2 * maze_width + 1 - 6
    keys = jax.random.split(key, 6)

    def uni(rng, fan_in, shape):
        bound = 1.0 / float(fan_in) ** 0.5
        return jax.random.uniform(rng, shape, jnp.float32, -bound, bound)

    def conv_p(rng, cin, cout):
        kw_, kb_ = jax.random.split(rng)
        return uni(kw_, cin * 9, (cout, cin, 3, 3)), uni(kb_, cin * 9, (cout,))

    def lin_p(rng, fin, fout):
        kw_, kb_ = jax.random.split(rng)
        return uni(kw_, fin, (fout, fin)), uni(kb_, fin, (fout,))

    raw = {}
    raw["c1w"], raw["c1b"] = conv_p(keys[0], 3, 16)
    raw["c2w"], raw["c2b"] = conv_p(keys[1], 16, 32)
    raw["c3w"], raw["c3b"] = conv_p(keys[2], 32, 64)
    raw["f1w"], raw["f1b"] = lin_p(keys[3], 64 * lin * lin, 128)
    raw["f2w"], raw["f2b"] = lin_p(keys[4], 128, 64)
    raw["f3w"], raw["f3b"] = lin_p(keys[5], 64, max_actions)
    return raw


def prepare_params(raw, maze_width=6, max_actions=5):
    """One-time repack of PyTorch-layout params into the kernel's layout."""
    lin = 2 * maze_width + 1 - 6

    def conv_taps(w):   # (Cout,Cin,3,3) -> (9, Cin, Cout), tap t = kh*3 + kw
        return jnp.transpose(w, (2, 3, 1, 0)).reshape(
            9, w.shape[1], w.shape[0]).astype(jnp.bfloat16)

    def bias(b):
        return b.reshape(1, -1).astype(jnp.float32)

    p = {}
    # conv1 folded to im2col layout: row index = (kh*3+kw)*3 + cin
    p["wc1"] = jnp.transpose(raw["c1w"], (2, 3, 1, 0)).reshape(27, 16) \
                  .astype(jnp.bfloat16)
    p["bc1"] = bias(raw["c1b"])
    p["wc2"] = conv_taps(raw["c2w"]); p["bc2"] = bias(raw["c2b"])
    p["wc3"] = conv_taps(raw["c3w"]); p["bc3"] = bias(raw["c3b"])

    # FC1: fold the PyTorch NCHW flatten order (c*lin*lin + oh*lin + ow) into a
    # (lin*lin*64, 128) matrix whose row index is s*64 + c with s = oh*lin+ow,
    # matching the kernel's lane-dense flatten buffer.
    wf1 = raw["f1w"].reshape(128, 64, lin, lin).transpose(2, 3, 1, 0)
    p["wf1"] = wf1.reshape(lin * lin * 64, 128).astype(jnp.bfloat16)
    p["bf1"] = bias(raw["f1b"])

    p["wf2"] = raw["f2w"].T.astype(jnp.bfloat16)                       # (128,64)
    p["bf2"] = bias(raw["f2b"])

    wf3 = raw["f3w"].T                                                 # (64, A)
    p["wf3"] = jnp.pad(wf3, ((0, 0), (0, NPAD - max_actions))).astype(jnp.bfloat16)
    p["bf3"] = jnp.pad(raw["f3b"], (0, NPAD - max_actions)) \
                  .reshape(1, -1).astype(jnp.float32)
    return p


# ----------------------------------------------------------------------------
# Plain-JAX reference (same bf16-operand / f32-accumulate recipe)
# ----------------------------------------------------------------------------
def cnn_reference(obs, raw):
    def conv(x, w, b):
        y = jax.lax.conv_general_dilated(
            x.astype(jnp.bfloat16), w.astype(jnp.bfloat16),
            window_strides=(1, 1), padding="VALID",
            dimension_numbers=("NCHW", "OIHW", "NCHW"),
            preferred_element_type=jnp.float32)
        return jnp.maximum(y + b.reshape(1, -1, 1, 1), 0.0)

    def dense(x, w, b, relu):
        y = jnp.dot(x.astype(jnp.bfloat16), w.T.astype(jnp.bfloat16),
                    preferred_element_type=jnp.float32) + b
        return jnp.maximum(y, 0.0) if relu else y

    x = obs.astype(jnp.float32)
    x = conv(x, raw["c1w"], raw["c1b"])
    x = conv(x, raw["c2w"], raw["c2b"])
    x = conv(x, raw["c3w"], raw["c3b"])
    f = x.reshape(x.shape[0], -1)                     # NCHW flatten
    h = dense(f, raw["f1w"], raw["f1b"], True)
    h = dense(h, raw["f2w"], raw["f2b"], True)
    return dense(h, raw["f3w"], raw["f3b"], False)


if __name__ == "__main__":
    key = jax.random.PRNGKey(0)
    k_param, k_obs = jax.random.split(key)

    maze_width, max_actions, batch = 6, 5, 2
    spatial = 2 * maze_width + 1                      # 13

    raw = init_params(k_param, maze_width, max_actions)
    params = prepare_params(raw, maze_width, max_actions)
    obs = jax.random.normal(k_obs, (batch, 3, spatial, spatial), jnp.float32)

    logits, state = cnn_forward(obs, params,
                                maze_width=maze_width, max_actions=max_actions)
    logits = jax.block_until_ready(logits)

    assert logits.shape == (batch, max_actions), logits.shape
    assert bool(jnp.all(jnp.isfinite(logits)))

    ref = cnn_reference(obs, raw)
    # Same bf16 operand rounding in both paths; only f32 summation-order differs.
    assert jnp.allclose(logits, ref, rtol=2e-2, atol=2e-2), (logits, ref)

    print("KERNEL_OK")
</pallas_src>

<mosaic_0001>
module attributes {stable_mosaic.version = 11 : i64} {
  func.func @_fused_cnn_kernel(%arg0: i32, %arg1: memref<1x1216x27xbf16, #tpu.memory_space<vmem>>, %arg2: memref<27x16xbf16, #tpu.memory_space<vmem>>, %arg3: memref<1x16xf32, #tpu.memory_space<vmem>>, %arg4: memref<9x16x32xbf16, #tpu.memory_space<vmem>>, %arg5: memref<1x32xf32, #tpu.memory_space<vmem>>, %arg6: memref<9x32x64xbf16, #tpu.memory_space<vmem>>, %arg7: memref<1x64xf32, #tpu.memory_space<vmem>>, %arg8: memref<3136x128xbf16, #tpu.memory_space<vmem>>, %arg9: memref<1x128xf32, #tpu.memory_space<vmem>>, %arg10: memref<128x64xbf16, #tpu.memory_space<vmem>>, %arg11: memref<1x64xf32, #tpu.memory_space<vmem>>, %arg12: memref<64x128xbf16, #tpu.memory_space<vmem>>, %arg13: memref<1x128xf32, #tpu.memory_space<vmem>>, %arg14: memref<8x128xf32, #tpu.memory_space<vmem>>, %arg15: memref<1216x16xbf16, #tpu.memory_space<vmem>>, %arg16: memref<960x32xbf16, #tpu.memory_space<vmem>>, %arg17: memref<704x64xbf16, #tpu.memory_space<vmem>>, %arg18: memref<8x3136xbf16, #tpu.memory_space<vmem>>) attributes {dimension_semantics = [#tpu.dimension_semantics<parallel>], iteration_bounds = array<i64: 1>, scalar_prefetch = 0 : i64, scratch_operands = 4 : i64, tpu.core_type = #tpu.core_type<tc>, window_params = [{transform_indices = @transform_0, window_bounds = array<i64: 1, 1216, 27>}, {pipeline_mode = #tpu.pipeline_mode<synchronous>, transform_indices = @transform_1, window_bounds = array<i64: 27, 16>}, {pipeline_mode = #tpu.pipeline_mode<synchronous>, transform_indices = @transform_2, window_bounds = array<i64: 1, 16>}, {pipeline_mode = #tpu.pipeline_mode<synchronous>, transform_indices = @transform_3, window_bounds = array<i64: 9, 16, 32>}, {pipeline_mode = #tpu.pipeline_mode<synchronous>, transform_indices = @transform_4, window_bounds = array<i64: 1, 32>}, {pipeline_mode = #tpu.pipeline_mode<synchronous>, transform_indices = @transform_5, window_bounds = array<i64: 9, 32, 64>}, {pipeline_mode = #tpu.pipeline_mode<synchronous>, transform_indices = @transform_6, window_bounds = array<i64: 1, 64>}, {pipeline_mode = #tpu.pipeline_mode<synchronous>, transform_indices = @transform_7, window_bounds = array<i64: 3136, 128>}, {pipeline_mode = #tpu.pipeline_mode<synchronous>, transform_indices = @transform_8, window_bounds = array<i64: 1, 128>}, {pipeline_mode = #tpu.pipeline_mode<synchronous>, transform_indices = @transform_9, window_bounds = array<i64: 128, 64>}, {pipeline_mode = #tpu.pipeline_mode<synchronous>, transform_indices = @transform_10, window_bounds = array<i64: 1, 64>}, {pipeline_mode = #tpu.pipeline_mode<synchronous>, transform_indices = @transform_11, window_bounds = array<i64: 64, 128>}, {pipeline_mode = #tpu.pipeline_mode<synchronous>, transform_indices = @transform_12, window_bounds = array<i64: 1, 128>}, {transform_indices = @transform_13, window_bounds = array<i64: 8, 128>}]} {
    %c0 = arith.constant 0 : index
    %c0_0 = arith.constant 0 : index
    %c0_1 = arith.constant 0 : index
    %0 = vector.load %arg1[%c0, %c0_0, %c0_1] : memref<1x1216x27xbf16, #tpu.memory_space<vmem>>, vector<1x1216x27xbf16>
    %1 = vector.shape_cast %0 : vector<1x1216x27xbf16> to vector<1216x27xbf16>
    %c0_2 = arith.constant 0 : index
    %c0_3 = arith.constant 0 : index
    %2 = vector.load %arg2[%c0_2, %c0_3] : memref<27x16xbf16, #tpu.memory_space<vmem>>, vector<27x16xbf16>
    %cst = arith.constant dense<0.000000e+00> : vector<1216x16xf32>
    %3 = tpu.matmul %1, %2, %cst {dimension_numbers = #tpu.dot_dimension_numbers<[1], [0], [0], [1], [0, 0, 1, 1], [], []>} : vector<1216x27xbf16>, vector<27x16xbf16>, vector<1216x16xf32> -> vector<1216x16xf32>
    %c0_4 = arith.constant 0 : index
    %c0_5 = arith.constant 0 : index
    %4 = vector.load %arg3[%c0_4, %c0_5] : memref<1x16xf32, #tpu.memory_space<vmem>>, vector<1x16xf32>
    %5 = vector.broadcast %4 : vector<1x16xf32> to vector<1216x16xf32>
    %6 = arith.addf %3, %5 : vector<1216x16xf32>
    %cst_6 = arith.constant 0.000000e+00 : f32
    %7 = vector.broadcast %cst_6 : f32 to vector<1216x16xf32>
    %8 = arith.maximumf %6, %7 : vector<1216x16xf32>
    %9 = arith.truncf %8 : vector<1216x16xf32> to vector<1216x16xbf16>
    %c0_7 = arith.constant 0 : index
    %c0_8 = arith.constant 0 : index
    %10 = vector.load %arg15[%c0_7, %c0_8] : memref<1216x16xbf16, #tpu.memory_space<vmem>>, vector<1216x16xbf16>
    tpu.vector_store %arg15[%c0_7, %c0_8], %9 {strides = array<i32>} : memref<1216x16xbf16, #tpu.memory_space<vmem>>, vector<1216x16xbf16>,
    %c0_9 = arith.constant 0 : index
    %c0_10 = arith.constant 0 : index
    %11 = vector.load %arg15[%c0_9, %c0_10] : memref<1216x16xbf16, #tpu.memory_space<vmem>>, vector<960x16xbf16>
    %c0_11 = arith.constant 0 : index
    %c0_12 = arith.constant 0 : index
    %c0_13 = arith.constant 0 : index
    %12 = vector.load %arg4[%c0_11, %c0_12, %c0_13] : memref<9x16x32xbf16, #tpu.memory_space<vmem>>, vector<1x16x32xbf16>
    %13 = vector.shape_cast %12 : vector<1x16x32xbf16> to vector<16x32xbf16>
    %cst_14 = arith.constant dense<0.000000e+00> : vector<960x32xf32>
    %14 = tpu.matmul %11, %13, %cst_14 {dimension_numbers = #tpu.dot_dimension_numbers<[1], [0], [0], [1], [0, 0, 1, 1], [], []>} : vector<960x16xbf16>, vector<16x32xbf16>, vector<960x32xf32> -> vector<960x32xf32>
    %c8 = arith.constant 8 : index
    %c0_15 = arith.constant 0 : index
    %15 = vector.load %arg15[%c8, %c0_15] : memref<1216x16xbf16, #tpu.memory_space<vmem>>, vector<960x16xbf16>
    %c1 = arith.constant 1 : index
    %c0_16 = arith.constant 0 : index
    %c0_17 = arith.constant 0 : index
    %16 = vector.load %arg4[%c1, %c0_16, %c0_17] : memref<9x16x32xbf16, #tpu.memory_space<vmem>>, vector<1x16x32xbf16>
    %17 = vector.shape_cast %16 : vector<1x16x32xbf16> to vector<16x32xbf16>
    %cst_18 = arith.constant dense<0.000000e+00> : vector<960x32xf32>
    %18 = tpu.matmul %15, %17, %cst_18 {dimension_numbers = #tpu.dot_dimension_numbers<[1], [0], [0], [1], [0, 0, 1, 1], [], []>} : vector<960x16xbf16>, vector<16x32xbf16>, vector<960x32xf32> -> vector<960x32xf32>
    %19 = arith.addf %14, %18 : vector<960x32xf32>
    %c16 = arith.constant 16 : index
    %c0_19 = arith.constant 0 : index
    %20 = vector.load %arg15[%c16, %c0_19] : memref<1216x16xbf16, #tpu.memory_space<vmem>>, vector<960x16xbf16>
    %c2 = arith.constant 2 : index
    %c0_20 = arith.constant 0 : index
    %c0_21 = arith.constant 0 : index
    %21 = vector.load %arg4[%c2, %c0_20, %c0_21] : memref<9x16x32xbf16, #tpu.memory_space<vmem>>, vector<1x16x32xbf16>
    %22 = vector.shape_cast %21 : vector<1x16x32xbf16> to vector<16x32xbf16>
    %cst_22 = arith.constant dense<0.000000e+00> : vector<960x32xf32>
    %23 = tpu.matmul %20, %22, %cst_22 {dimension_numbers = #tpu.dot_dimension_numbers<[1], [0], [0], [1], [0, 0, 1, 1], [], []>} : vector<960x16xbf16>, vector<16x32xbf16>, vector<960x32xf32> -> vector<960x32xf32>
    %24 = arith.addf %19, %23 : vector<960x32xf32>
    %c104 = arith.constant 104 : index
    %c0_23 = arith.constant 0 : index
    %25 = vector.load %arg15[%c104, %c0_23] : memref<1216x16xbf16, #tpu.memory_space<vmem>>, vector<960x16xbf16>
    %c3 = arith.constant 3 : index
    %c0_24 = arith.constant 0 : index
    %c0_25 = arith.constant 0 : index
    %26 = vector.load %arg4[%c3, %c0_24, %c0_25] : memref<9x16x32xbf16, #tpu.memory_space<vmem>>, vector<1x16x32xbf16>
    %27 = vector.shape_cast %26 : vector<1x16x32xbf16> to vector<16x32xbf16>
    %cst_26 = arith.constant dense<0.000000e+00> : vector<960x32xf32>
    %28 = tpu.matmul %25, %27, %cst_26 {dimension_numbers = #tpu.dot_dimension_numbers<[1], [0], [0], [1], [0, 0, 1, 1], [], []>} : vector<960x16xbf16>, vector<16x32xbf16>, vector<960x32xf32> -> vector<960x32xf32>
    %c112 = arith.constant 112 : index
    %c0_27 = arith.constant 0 : index
    %29 = vector.load %arg15[%c112, %c0_27] : memref<1216x16xbf16, #tpu.memory_space<vmem>>, vector<960x16xbf16>
    %c4 = arith.constant 4 : index
    %c0_28 = arith.constant 0 : index
    %c0_29 = arith.constant 0 : index
    %30 = vector.load %arg4[%c4, %c0_28, %c0_29] : memref<9x16x32xbf16, #tpu.memory_space<vmem>>, vector<1x16x32xbf16>
    %31 = vector.shape_cast %30 : vector<1x16x32xbf16> to vector<16x32xbf16>
    %cst_30 = arith.constant dense<0.000000e+00> : vector<960x32xf32>
    %32 = tpu.matmul %29, %31, %cst_30 {dimension_numbers = #tpu.dot_dimension_numbers<[1], [0], [0], [1], [0, 0, 1, 1], [], []>} : vector<960x16xbf16>, vector<16x32xbf16>, vector<960x32xf32> -> vector<960x32xf32>
    %33 = arith.addf %28, %32 : vector<960x32xf32>
    %c120 = arith.constant 120 : index
    %c0_31 = arith.constant 0 : index
    %34 = vector.load %arg15[%c120, %c0_31] : memref<1216x16xbf16, #tpu.memory_space<vmem>>, vector<960x16xbf16>
    %c5 = arith.constant 5 : index
    %c0_32 = arith.constant 0 : index
    %c0_33 = arith.constant 0 : index
    %35 = vector.load %arg4[%c5, %c0_32, %c0_33] : memref<9x16x32xbf16, #tpu.memory_space<vmem>>, vector<1x16x32xbf16>
    %36 = vector.shape_cast %35 : vector<1x16x32xbf16> to vector<16x32xbf16>
    %cst_34 = arith.constant dense<0.000000e+00> : vector<960x32xf32>
    %37 = tpu.matmul %34, %36, %cst_34 {dimension_numbers = #tpu.dot_dimension_numbers<[1], [0], [0], [1], [0, 0, 1, 1], [], []>} : vector<960x16xbf16>, vector<16x32xbf16>, vector<960x32xf32> -> vector<960x32xf32>
    %38 = arith.addf %33, %37 : vector<960x32xf32>
    %c208 = arith.constant 208 : index
    %c0_35 = arith.constant 0 : index
    %39 = vector.load %arg15[%c208, %c0_35] : memref<1216x16xbf16, #tpu.memory_space<vmem>>, vector<960x16xbf16>
    %c6 = arith.constant 6 : index
    %c0_36 = arith.constant 0 : index
    %c0_37 = arith.constant 0 : index
    %40 = vector.load %arg4[%c6, %c0_36, %c0_37] : memref<9x16x32xbf16, #tpu.memory_space<vmem>>, vector<1x16x32xbf16>
    %41 = vector.shape_cast %40 : vector<1x16x32xbf16> to vector<16x32xbf16>
    %cst_38 = arith.constant dense<0.000000e+00> : vector<960x32xf32>
    %42 = tpu.matmul %39, %41, %cst_38 {dimension_numbers = #tpu.dot_dimension_numbers<[1], [0], [0], [1], [0, 0, 1, 1], [], []>} : vector<960x16xbf16>, vector<16x32xbf16>, vector<960x32xf32> -> vector<960x32xf32>
    %c216 = arith.constant 216 : index
    %c0_39 = arith.constant 0 : index
    %43 = vector.load %arg15[%c216, %c0_39] : memref<1216x16xbf16, #tpu.memory_space<vmem>>, vector<960x16xbf16>
    %c7 = arith.constant 7 : index
    %c0_40 = arith.constant 0 : index
    %c0_41 = arith.constant 0 : index
    %44 = vector.load %arg4[%c7, %c0_40, %c0_41] : memref<9x16x32xbf16, #tpu.memory_space<vmem>>, vector<1x16x32xbf16>
    %45 = vector.shape_cast %44 : vector<1x16x32xbf16> to vector<16x32xbf16>
    %cst_42 = arith.constant dense<0.000000e+00> : vector<960x32xf32>
    %46 = tpu.matmul %43, %45, %cst_42 {dimension_numbers = #tpu.dot_dimension_numbers<[1], [0], [0], [1], [0, 0, 1, 1], [], []>} : vector<960x16xbf16>, vector<16x32xbf16>, vector<960x32xf32> -> vector<960x32xf32>
    %47 = arith.addf %42, %46 : vector<960x32xf32>
    %c224 = arith.constant 224 : index
    %c0_43 = arith.constant 0 : index
    %48 = vector.load %arg15[%c224, %c0_43] : memref<1216x16xbf16, #tpu.memory_space<vmem>>, vector<960x16xbf16>
    %c8_44 = arith.constant 8 : index
    %c0_45 = arith.constant 0 : index
    %c0_46 = arith.constant 0 : index
    %49 = vector.load %arg4[%c8_44, %c0_45, %c0_46] : memref<9x16x32xbf16, #tpu.memory_space<vmem>>, vector<1x16x32xbf16>
    %50 = vector.shape_cast %49 : vector<1x16x32xbf16> to vector<16x32xbf16>
    %cst_47 = arith.constant dense<0.000000e+00> : vector<960x32xf32>
    %51 = tpu.matmul %48, %50, %cst_47 {dimension_numbers = #tpu.dot_dimension_numbers<[1], [0], [0], [1], [0, 0, 1, 1], [], []>} : vector<960x16xbf16>, vector<16x32xbf16>, vector<960x32xf32> -> vector<960x32xf32>
    %52 = arith.addf %47, %51 : vector<960x32xf32>
    %53 = arith.addf %24, %38 : vector<960x32xf32>
    %54 = arith.addf %53, %52 : vector<960x32xf32>
    %c0_48 = arith.constant 0 : index
    %c0_49 = arith.constant 0 : index
    %55 = vector.load %arg5[%c0_48, %c0_49] : memref<1x32xf32, #tpu.memory_space<vmem>>, vector<1x32xf32>
    %56 = vector.broadcast %55 : vector<1x32xf32> to vector<960x32xf32>
    %57 = arith.addf %54, %56 : vector<960x32xf32>
    %cst_50 = arith.constant 0.000000e+00 : f32
    %58 = vector.broadcast %cst_50 : f32 to vector<960x32xf32>
    %59 = arith.maximumf %57, %58 : vector<960x32xf32>
    %60 = arith.truncf %59 : vector<960x32xf32> to vector<960x32xbf16>
    %c0_51 = arith.constant 0 : index
    %c0_52 = arith.constant 0 : index
    %61 = vector.load %arg16[%c0_51, %c0_52] : memref<960x32xbf16, #tpu.memory_space<vmem>>, vector<960x32xbf16>
    tpu.vector_store %arg16[%c0_51, %c0_52], %60 {strides = array<i32>} : memref<960x32xbf16, #tpu.memory_space<vmem>>, vector<960x32xbf16>,
    %c0_53 = arith.constant 0 : index
    %c0_54 = arith.constant 0 : index
    %62 = vector.load %arg16[%c0_53, %c0_54] : memref<960x32xbf16, #tpu.memory_space<vmem>>, vector<704x32xbf16>
    %c0_55 = arith.constant 0 : index
    %c0_56 = arith.constant 0 : index
    %c0_57 = arith.constant 0 : index
    %63 = vector.load %arg6[%c0_55, %c0_56, %c0_57] : memref<9x32x64xbf16, #tpu.memory_space<vmem>>, vector<1x32x64xbf16>
    %64 = vector.shape_cast %63 : vector<1x32x64xbf16> to vector<32x64xbf16>
    %cst_58 = arith.constant dense<0.000000e+00> : vector<704x64xf32>
    %65 = tpu.matmul %62, %64, %cst_58 {dimension_numbers = #tpu.dot_dimension_numbers<[1], [0], [0], [1], [0, 0, 1, 1], [], []>} : vector<704x32xbf16>, vector<32x64xbf16>, vector<704x64xf32> -> vector<704x64xf32>
    %c8_59 = arith.constant 8 : index
    %c0_60 = arith.constant 0 : index
    %66 = vector.load %arg16[%c8_59, %c0_60] : memref<960x32xbf16, #tpu.memory_space<vmem>>, vector<704x32xbf16>
    %c1_61 = arith.constant 1 : index
    %c0_62 = arith.constant 0 : index
    %c0_63 = arith.constant 0 : index
    %67 = vector.load %arg6[%c1_61, %c0_62, %c0_63] : memref<9x32x64xbf16, #tpu.memory_space<vmem>>, vector<1x32x64xbf16>
    %68 = vector.shape_cast %67 : vector<1x32x64xbf16> to vector<32x64xbf16>
    %cst_64 = arith.constant dense<0.000000e+00> : vector<704x64xf32>
    %69 = tpu.matmul %66, %68, %cst_64 {dimension_numbers = #tpu.dot_dimension_numbers<[1], [0], [0], [1], [0, 0, 1, 1], [], []>} : vector<704x32xbf16>, vector<32x64xbf16>, vector<704x64xf32> -> vector<704x64xf32>
    %70 = arith.addf %65, %69 : vector<704x64xf32>
    %c16_65 = arith.constant 16 : index
    %c0_66 = arith.constant 0 : index
    %71 = vector.load %arg16[%c16_65, %c0_66] : memref<960x32xbf16, #tpu.memory_space<vmem>>, vector<704x32xbf16>
    %c2_67 = arith.constant 2 : index
    %c0_68 = arith.constant 0 : index
    %c0_69 = arith.constant 0 : index
    %72 = vector.load %arg6[%c2_67, %c0_68, %c0_69] : memref<9x32x64xbf16, #tpu.memory_space<vmem>>, vector<1x32x64xbf16>
    %73 = vector.shape_cast %72 : vector<1x32x64xbf16> to vector<32x64xbf16>
    %cst_70 = arith.constant dense<0.000000e+00> : vector<704x64xf32>
    %74 = tpu.matmul %71, %73, %cst_70 {dimension_numbers = #tpu.dot_dimension_numbers<[1], [0], [0], [1], [0, 0, 1, 1], [], []>} : vector<704x32xbf16>, vector<32x64xbf16>, vector<704x64xf32> -> vector<704x64xf32>
    %75 = arith.addf %70, %74 : vector<704x64xf32>
    %c104_71 = arith.constant 104 : index
    %c0_72 = arith.constant 0 : index
    %76 = vector.load %arg16[%c104_71, %c0_72] : memref<960x32xbf16, #tpu.memory_space<vmem>>, vector<704x32xbf16>
    %c3_73 = arith.constant 3 : index
    %c0_74 = arith.constant 0 : index
    %c0_75 = arith.constant 0 : index
    %77 = vector.load %arg6[%c3_73, %c0_74, %c0_75] : memref<9x32x64xbf16, #tpu.memory_space<vmem>>, vector<1x32x64xbf16>
    %78 = vector.shape_cast %77 : vector<1x32x64xbf16> to vector<32x64xbf16>
    %cst_76 = arith.constant dense<0.000000e+00> : vector<704x64xf32>
    %79 = tpu.matmul %76, %78, %cst_76 {dimension_numbers = #tpu.dot_dimension_numbers<[1], [0], [0], [1], [0, 0, 1, 1], [], []>} : vector<704x32xbf16>, vector<32x64xbf16>, vector<704x64xf32> -> vector<704x64xf32>
    %c112_77 = arith.constant 112 : index
    %c0_78 = arith.constant 0 : index
    %80 = vector.load %arg16[%c112_77, %c0_78] : memref<960x32xbf16, #tpu.memory_space<vmem>>, vector<704x32xbf16>
    %c4_79 = arith.constant 4 : index
    %c0_80 = arith.constant 0 : index
    %c0_81 = arith.constant 0 : index
    %81 = vector.load %arg6[%c4_79, %c0_80, %c0_81] : memref<9x32x64xbf16, #tpu.memory_space<vmem>>, vector<1x32x64xbf16>
    %82 = vector.shape_cast %81 : vector<1x32x64xbf16> to vector<32x64xbf16>
    %cst_82 = arith.constant dense<0.000000e+00> : vector<704x64xf32>
    %83 = tpu.matmul %80, %82, %cst_82 {dimension_numbers = #tpu.dot_dimension_numbers<[1], [0], [0], [1], [0, 0, 1, 1], [], []>} : vector<704x32xbf16>, vector<32x64xbf16>, vector<704x64xf32> -> vector<704x64xf32>
    %84 = arith.addf %79, %83 : vector<704x64xf32>
    %c120_83 = arith.constant 120 : index
    %c0_84 = arith.constant 0 : index
    %85 = vector.load %arg16[%c120_83, %c0_84] : memref<960x32xbf16, #tpu.memory_space<vmem>>, vector<704x32xbf16>
    %c5_85 = arith.constant 5 : index
    %c0_86 = arith.constant 0 : index
    %c0_87 = arith.constant 0 : index
    %86 = vector.load %arg6[%c5_85, %c0_86, %c0_87] : memref<9x32x64xbf16, #tpu.memory_space<vmem>>, vector<1x32x64xbf16>
    %87 = vector.shape_cast %86 : vector<1x32x64xbf16> to vector<32x64xbf16>
    %cst_88 = arith.constant dense<0.000000e+00> : vector<704x64xf32>
    %88 = tpu.matmul %85, %87, %cst_88 {dimension_numbers = #tpu.dot_dimension_numbers<[1], [0], [0], [1], [0, 0, 1, 1], [], []>} : vector<704x32xbf16>, vector<32x64xbf16>, vector<704x64xf32> -> vector<704x64xf32>
    %89 = arith.addf %84, %88 : vector<704x64xf32>
    %c208_89 = arith.constant 208 : index
    %c0_90 = arith.constant 0 : index
    %90 = vector.load %arg16[%c208_89, %c0_90] : memref<960x32xbf16, #tpu.memory_space<vmem>>, vector<704x32xbf16>
    %c6_91 = arith.constant 6 : index
    %c0_92 = arith.constant 0 : index
    %c0_93 = arith.constant 0 : index
    %91 = vector.load %arg6[%c6_91, %c0_92, %c0_93] : memref<9x32x64xbf16, #tpu.memory_space<vmem>>, vector<1x32x64xbf16>
    %92 = vector.shape_cast %91 : vector<1x32x64xbf16> to vector<32x64xbf16>
    %cst_94 = arith.constant dense<0.000000e+00> : vector<704x64xf32>
    %93 = tpu.matmul %90, %92, %cst_94 {dimension_numbers = #tpu.dot_dimension_numbers<[1], [0], [0], [1], [0, 0, 1, 1], [], []>} : vector<704x32xbf16>, vector<32x64xbf16>, vector<704x64xf32> -> vector<704x64xf32>
    %c216_95 = arith.constant 216 : index
    %c0_96 = arith.constant 0 : index
    %94 = vector.load %arg16[%c216_95, %c0_96] : memref<960x32xbf16, #tpu.memory_space<vmem>>, vector<704x32xbf16>
    %c7_97 = arith.constant 7 : index
    %c0_98 = arith.constant 0 : index
    %c0_99 = arith.constant 0 : index
    %95 = vector.load %arg6[%c7_97, %c0_98, %c0_99] : memref<9x32x64xbf16, #tpu.memory_space<vmem>>, vector<1x32x64xbf16>
    %96 = vector.shape_cast %95 : vector<1x32x64xbf16> to vector<32x64xbf16>
    %cst_100 = arith.constant dense<0.000000e+00> : vector<704x64xf32>
    %97 = tpu.matmul %94, %96, %cst_100 {dimension_numbers = #tpu.dot_dimension_numbers<[1], [0], [0], [1], [0, 0, 1, 1], [], []>} : vector<704x32xbf16>, vector<32x64xbf16>, vector<704x64xf32> -> vector<704x64xf32>
    %98 = arith.addf %93, %97 : vector<704x64xf32>
    %c224_101 = arith.constant 224 : index
    %c0_102 = arith.constant 0 : index
    %99 = vector.load %arg16[%c224_101, %c0_102] : memref<960x32xbf16, #tpu.memory_space<vmem>>, vector<704x32xbf16>
    %c8_103 = arith.constant 8 : index
    %c0_104 = arith.constant 0 : index
    %c0_105 = arith.constant 0 : index
    %100 = vector.load %arg6[%c8_103, %c0_104, %c0_105] : memref<9x32x64xbf16, #tpu.memory_space<vmem>>, vector<1x32x64xbf16>
    %101 = vector.shape_cast %100 : vector<1x32x64xbf16> to vector<32x64xbf16>
    %cst_106 = arith.constant dense<0.000000e+00> : vector<704x64xf32>
    %102 = tpu.matmul %99, %101, %cst_106 {dimension_numbers = #tpu.dot_dimension_numbers<[1], [0], [0], [1], [0, 0, 1, 1], [], []>} : vector<704x32xbf16>, vector<32x64xbf16>, vector<704x64xf32> -> vector<704x64xf32>
    %103 = arith.addf %98, %102 : vector<704x64xf32>
    %104 = arith.addf %75, %89 : vector<704x64xf32>
    %105 = arith.addf %104, %103 : vector<704x64xf32>
    %c0_107 = arith.constant 0 : index
    %c0_108 = arith.constant 0 : index
    %106 = vector.load %arg7[%c0_107, %c0_108] : memref<1x64xf32, #tpu.memory_space<vmem>>, vector<1x64xf32>
    %107 = vector.broadcast %106 : vector<1x64xf32> to vector<704x64xf32>
    %108 = arith.addf %105, %107 : vector<704x64xf32>
    %cst_109 = arith.constant 0.000000e+00 : f32
    %109 = vector.broadcast %cst_109 : f32 to vector<704x64xf32>
    %110 = arith.maximumf %108, %109 : vector<704x64xf32>
    %111 = arith.truncf %110 : vector<704x64xf32> to vector<704x64xbf16>
    %c0_110 = arith.constant 0 : index
    %c0_111 = arith.constant 0 : index
    %112 = vector.load %arg17[%c0_110, %c0_111] : memref<704x64xbf16, #tpu.memory_space<vmem>>, vector<704x64xbf16>
    tpu.vector_store %arg17[%c0_110, %c0_111], %111 {strides = array<i32>} : memref<704x64xbf16, #tpu.memory_space<vmem>>, vector<704x64xbf16>,
    %c0_112 = arith.constant 0 : index
    %c0_113 = arith.constant 0 : index
    %113 = vector.load %arg17[%c0_112, %c0_113] : memref<704x64xbf16, #tpu.memory_space<vmem>>, vector<8x64xbf16>
    %c0_114 = arith.constant 0 : index
    %c0_115 = arith.constant 0 : index
    %114 = vector.load %arg18[%c0_114, %c0_115] : memref<8x3136xbf16, #tpu.memory_space<vmem>>, vector<8x64xbf16>
    tpu.vector_store %arg18[%c0_114, %c0_115], %113 {strides = array<i32>} : memref<8x3136xbf16, #tpu.memory_space<vmem>>, vector<8x64xbf16>,
    %c8_116 = arith.constant 8 : index
    %c0_117 = arith.constant 0 : index
    %115 = vector.load %arg17[%c8_116, %c0_117] : memref<704x64xbf16, #tpu.memory_space<vmem>>, vector<8x64xbf16>
    %c0_118 = arith.constant 0 : index
    %c64 = arith.constant 64 : index
    %116 = vector.load %arg18[%c0_118, %c64] : memref<8x3136xbf16, #tpu.memory_space<vmem>>, vector<8x64xbf16>
    tpu.vector_store %arg18[%c0_118, %c64], %115 {strides = array<i32>} : memref<8x3136xbf16, #tpu.memory_space<vmem>>, vector<8x64xbf16>,
    %c16_119 = arith.constant 16 : index
    %c0_120 = arith.constant 0 : index
    %117 = vector.load %arg17[%c16_119, %c0_120] : memref<704x64xbf16, #tpu.memory_space<vmem>>, vector<8x64xbf16>
    %c0_121 = arith.constant 0 : index
    %c128 = arith.constant 128 : index
    %118 = vector.load %arg18[%c0_121, %c128] : memref<8x3136xbf16, #tpu.memory_space<vmem>>, vector<8x64xbf16>
    tpu.vector_store %arg18[%c0_121, %c128], %117 {strides = array<i32>} : memref<8x3136xbf16, #tpu.memory_space<vmem>>, vector<8x64xbf16>,
    %c24 = arith.constant 24 : index
    %c0_122 = arith.constant 0 : index
    %119 = vector.load %arg17[%c24, %c0_122] : memref<704x64xbf16, #tpu.memory_space<vmem>>, vector<8x64xbf16>
    %c0_123 = arith.constant 0 : index
    %c192 = arith.constant 192 : index
    %120 = vector.load %arg18[%c0_123, %c192] : memref<8x3136xbf16, #tpu.memory_space<vmem>>, vector<8x64xbf16>
    tpu.vector_store %arg18[%c0_123, %c192], %119 {strides = array<i32>} : memref<8x3136xbf16, #tpu.memory_space<vmem>>, vector<8x64xbf16>,
    %c32 = arith.constant 32 : index
    %c0_124 = arith.constant 0 : index
    %121 = vector.load %arg17[%c32, %c0_124] : memref<704x64xbf16, #tpu.memory_space<vmem>>, vector<8x64xbf16>
    %c0_125 = arith.constant 0 : index
    %c256 = arith.constant 256 : index
    %122 = vector.load %arg18[%c0_125, %c256] : memref<8x3136xbf16, #tpu.memory_space<vmem>>, vector<8x64xbf16>
    tpu.vector_store %arg18[%c0_125, %c256], %121 {strides = array<i32>} : memref<8x3136xbf16, #tpu.memory_space<vmem>>, vector<8x64xbf16>,
    %c40 = arith.constant 40 : index
    %c0_126 = arith.constant 0 : index
    %123 = vector.load %arg17[%c40, %c0_126] : memref<704x64xbf16, #tpu.memory_space<vmem>>, vector<8x64xbf16>
    %c0_127 = arith.constant 0 : index
    %c320 = arith.constant 320 : index
    %124 = vector.load %arg18[%c0_127, %c320] : memref<8x3136xbf16, #tpu.memory_space<vmem>>, vector<8x64xbf16>
    tpu.vector_store %arg18[%c0_127, %c320], %123 {strides = array<i32>} : memref<8x3136xbf16, #tpu.memory_space<vmem>>, vector<8x64xbf16>,
    %c48 = arith.constant 48 : index
    %c0_128 = arith.constant 0 : index
    %125 = vector.load %arg17[%c48, %c0_128] : memref<704x64xbf16, #tpu.memory_space<vmem>>, vector<8x64xbf16>
    %c0_129 = arith.constant 0 : index
    %c384 = arith.constant 384 : index
    %126 = vector.load %arg18[%c0_129, %c384] : memref<8x3136xbf16, #tpu.memory_space<vmem>>, vector<8x64xbf16>
    tpu.vector_store %arg18[%c0_129, %c384], %125 {strides = array<i32>} : memref<8x3136xbf16, #tpu.memory_space<vmem>>, vector<8x64xbf16>,
    %c104_130 = arith.constant 104 : index
    %c0_131 = arith.constant 0 : index
    %127 = vector.load %arg17[%c104_130, %c0_131] : memref<704x64xbf16, #tpu.memory_space<vmem>>, vector<8x64xbf16>
    %c0_132 = arith.constant 0 : index
    %c448 = arith.constant 448 : index
    %128 = vector.load %arg18[%c0_132, %c448] : memref<8x3136xbf16, #tpu.memory_space<vmem>>, vector<8x64xbf16>
    tpu.vector_store %arg18[%c0_132, %c448], %127 {strides = array<i32>} : memref<8x3136xbf16, #tpu.memory_space<vmem>>, vector<8x64xbf16>,
    %c112_133 = arith.constant 112 : index
    %c0_134 = arith.constant 0 : index
    %129 = vector.load %arg17[%c112_133, %c0_134] : memref<704x64xbf16, #tpu.memory_space<vmem>>, vector<8x64xbf16>
    %c0_135 = arith.constant 0 : index
    %c512 = arith.constant 512 : index
    %130 = vector.load %arg18[%c0_135, %c512] : memref<8x3136xbf16, #tpu.memory_space<vmem>>, vector<8x64xbf16>
    tpu.vector_store %arg18[%c0_135, %c512], %129 {strides = array<i32>} : memref<8x3136xbf16, #tpu.memory_space<vmem>>, vector<8x64xbf16>,
    %c120_136 = arith.constant 120 : index
    %c0_137 = arith.constant 0 : index
    %131 = vector.load %arg17[%c120_136, %c0_137] : memref<704x64xbf16, #tpu.memory_space<vmem>>, vector<8x64xbf16>
    %c0_138 = arith.constant 0 : index
    %c576 = arith.constant 576 : index
    %132 = vector.load %arg18[%c0_138, %c576] : memref<8x3136xbf16, #tpu.memory_space<vmem>>, vector<8x64xbf16>
    tpu.vector_store %arg18[%c0_138, %c576], %131 {strides = array<i32>} : memref<8x3136xbf16, #tpu.memory_space<vmem>>, vector<8x64xbf16>,
    %c128_139 = arith.constant 128 : index
    %c0_140 = arith.constant 0 : index
    %133 = vector.load %arg17[%c128_139, %c0_140] : memref<704x64xbf16, #tpu.memory_space<vmem>>, vector<8x64xbf16>
    %c0_141 = arith.constant 0 : index
    %c640 = arith.constant 640 : index
    %134 = vector.load %arg18[%c0_141, %c640] : memref<8x3136xbf16, #tpu.memory_space<vmem>>, vector<8x64xbf16>
    tpu.vector_store %arg18[%c0_141, %c640], %133 {strides = array<i32>} : memref<8x3136xbf16, #tpu.memory_space<vmem>>, vector<8x64xbf16>,
    %c136 = arith.constant 136 : index
    %c0_142 = arith.constant 0 : index
    %135 = vector.load %arg17[%c136, %c0_142] : memref<704x64xbf16, #tpu.memory_space<vmem>>, vector<8x64xbf16>
    %c0_143 = arith.constant 0 : index
    %c704 = arith.constant 704 : index
    %136 = vector.load %arg18[%c0_143, %c704] : memref<8x3136xbf16, #tpu.memory_space<vmem>>, vector<8x64xbf16>
    tpu.vector_store %arg18[%c0_143, %c704], %135 {strides = array<i32>} : memref<8x3136xbf16, #tpu.memory_space<vmem>>, vector<8x64xbf16>,
    %c144 = arith.constant 144 : index
    %c0_144 = arith.constant 0 : index
    %137 = vector.load %arg17[%c144, %c0_144] : memref<704x64xbf16, #tpu.memory_space<vmem>>, vector<8x64xbf16>
    %c0_145 = arith.constant 0 : index
    %c768 = arith.constant 768 : index
    %138 = vector.load %arg18[%c0_145, %c768] : memref<8x3136xbf16, #tpu.memory_space<vmem>>, vector<8x64xbf16>
    tpu.vector_store %arg18[%c0_145, %c768], %137 {strides = array<i32>} : memref<8x3136xbf16, #tpu.memory_space<vmem>>, vector<8x64xbf16>,
    %c152 = arith.constant 152 : index
    %c0_146 = arith.constant 0 : index
    %139 = vector.load %arg17[%c152, %c0_146] : memref<704x64xbf16, #tpu.memory_space<vmem>>, vector<8x64xbf16>
    %c0_147 = arith.constant 0 : index
    %c832 = arith.constant 832 : index
    %140 = vector.load %arg18[%c0_147, %c832] : memref<8x3136xbf16, #tpu.memory_space<vmem>>, vector<8x64xbf16>
    tpu.vector_store %arg18[%c0_147, %c832], %139 {strides = array<i32>} : memref<8x3136xbf16, #tpu.memory_space<vmem>>, vector<8x64xbf16>,
    %c208_148 = arith.constant 208 : index
    %c0_149 = arith.constant 0 : index
    %141 = vector.load %arg17[%c208_148, %c0_149] : memref<704x64xbf16, #tpu.memory_space<vmem>>, vector<8x64xbf16>
    %c0_150 = arith.constant 0 : index
    %c896 = arith.constant 896 : index
    %142 = vector.load %arg18[%c0_150, %c896] : memref<8x3136xbf16, #tpu.memory_space<vmem>>, vector<8x64xbf16>
    tpu.vector_store %arg18[%c0_150, %c896], %141 {strides = array<i32>} : memref<8x3136xbf16, #tpu.memory_space<vmem>>, vector<8x64xbf16>,
    %c216_151 = arith.constant 216 : index
    %c0_152 = arith.constant 0 : index
    %143 = vector.load %arg17[%c216_151, %c0_152] : memref<704x64xbf16, #tpu.memory_space<vmem>>, vector<8x64xbf16>
    %c0_153 = arith.constant 0 : index
    %c960 = arith.constant 960 : index
    %144 = vector.load %arg18[%c0_153, %c960] : memref<8x3136xbf16, #tpu.memory_space<vmem>>, vector<8x64xbf16>
    tpu.vector_store %arg18[%c0_153, %c960], %143 {strides = array<i32>} : memref<8x3136xbf16, #tpu.memory_space<vmem>>, vector<8x64xbf16>,
    %c224_154 = arith.constant 224 : index
    %c0_155 = arith.constant 0 : index
    %145 = vector.load %arg17[%c224_154, %c0_155] : memref<704x64xbf16, #tpu.memory_space<vmem>>, vector<8x64xbf16>
    %c0_156 = arith.constant 0 : index
    %c1024 = arith.constant 1024 : index
    %146 = vector.load %arg18[%c0_156, %c1024] : memref<8x3136xbf16, #tpu.memory_space<vmem>>, vector<8x64xbf16>
    tpu.vector_store %arg18[%c0_156, %c1024], %145 {strides = array<i32>} : memref<8x3136xbf16, #tpu.memory_space<vmem>>, vector<8x64xbf16>,
    %c232 = arith.constant 232 : index
    %c0_157 = arith.constant 0 : index
    %147 = vector.load %arg17[%c232, %c0_157] : memref<704x64xbf16, #tpu.memory_space<vmem>>, vector<8x64xbf16>
    %c0_158 = arith.constant 0 : index
    %c1088 = arith.constant 1088 : index
    %148 = vector.load %arg18[%c0_158, %c1088] : memref<8x3136xbf16, #tpu.memory_space<vmem>>, vector<8x64xbf16>
    tpu.vector_store %arg18[%c0_158, %c1088], %147 {strides = array<i32>} : memref<8x3136xbf16, #tpu.memory_space<vmem>>, vector<8x64xbf16>,
    %c240 = arith.constant 240 : index
    %c0_159 = arith.constant 0 : index
    %149 = vector.load %arg17[%c240, %c0_159] : memref<704x64xbf16, #tpu.memory_space<vmem>>, vector<8x64xbf16>
    %c0_160 = arith.constant 0 : index
    %c1152 = arith.constant 1152 : index
    %150 = vector.load %arg18[%c0_160, %c1152] : memref<8x3136xbf16, #tpu.memory_space<vmem>>, vector<8x64xbf16>
    tpu.vector_store %arg18[%c0_160, %c1152], %149 {strides = array<i32>} : memref<8x3136xbf16, #tpu.memory_space<vmem>>, vector<8x64xbf16>,
    %c248 = arith.constant 248 : index
    %c0_161 = arith.constant 0 : index
    %151 = vector.load %arg17[%c248, %c0_161] : memref<704x64xbf16, #tpu.memory_space<vmem>>, vector<8x64xbf16>
    %c0_162 = arith.constant 0 : index
    %c1216 = arith.constant 1216 : index
    %152 = vector.load %arg18[%c0_162, %c1216] : memref<8x3136xbf16, #tpu.memory_space<vmem>>, vector<8x64xbf16>
    tpu.vector_store %arg18[%c0_162, %c1216], %151 {strides = array<i32>} : memref<8x3136xbf16, #tpu.memory_space<vmem>>, vector<8x64xbf16>,
    %c256_163 = arith.constant 256 : index
    %c0_164 = arith.constant 0 : index
    %153 = vector.load %arg17[%c256_163, %c0_164] : memref<704x64xbf16, #tpu.memory_space<vmem>>, vector<8x64xbf16>
    %c0_165 = arith.constant 0 : index
    %c1280 = arith.constant 1280 : index
    %154 = vector.load %arg18[%c0_165, %c1280] : memref<8x3136xbf16, #tpu.memory_space<vmem>>, vector<8x64xbf16>
    tpu.vector_store %arg18[%c0_165, %c1280], %153 {strides = array<i32>} : memref<8x3136xbf16, #tpu.memory_space<vmem>>, vector<8x64xbf16>,
    %c312 = arith.constant 312 : index
    %c0_166 = arith.constant 0 : index
    %155 = vector.load %arg17[%c312, %c0_166] : memref<704x64xbf16, #tpu.memory_space<vmem>>, vector<8x64xbf16>
    %c0_167 = arith.constant 0 : index
    %c1344 = arith.constant 1344 : index
    %156 = vector.load %arg18[%c0_167, %c1344] : memref<8x3136xbf16, #tpu.memory_space<vmem>>, vector<8x64xbf16>
    tpu.vector_store %arg18[%c0_167, %c1344], %155 {strides = array<i32>} : memref<8x3136xbf16, #tpu.memory_space<vmem>>, vector<8x64xbf16>,
    %c320_168 = arith.constant 320 : index
    %c0_169 = arith.constant 0 : index
    %157 = vector.load %arg17[%c320_168, %c0_169] : memref<704x64xbf16, #tpu.memory_space<vmem>>, vector<8x64xbf16>
    %c0_170 = arith.constant 0 : index
    %c1408 = arith.constant 1408 : index
    %158 = vector.load %arg18[%c0_170, %c1408] : memref<8x3136xbf16, #tpu.memory_space<vmem>>, vector<8x64xbf16>
    tpu.vector_store %arg18[%c0_170, %c1408], %157 {strides = array<i32>} : memref<8x3136xbf16, #tpu.memory_space<vmem>>, vector<8x64xbf16>,
    %c328 = arith.constant 328 : index
    %c0_171 = arith.constant 0 : index
    %159 = vector.load %arg17[%c328, %c0_171] : memref<704x64xbf16, #tpu.memory_space<vmem>>, vector<8x64xbf16>
    %c0_172 = arith.constant 0 : index
    %c1472 = arith.constant 1472 : index
    %160 = vector.load %arg18[%c0_172, %c1472] : memref<8x3136xbf16, #tpu.memory_space<vmem>>, vector<8x64xbf16>
    tpu.vector_store %arg18[%c0_172, %c1472], %159 {strides = array<i32>} : memref<8x3136xbf16, #tpu.memory_space<vmem>>, vector<8x64xbf16>,
    %c336 = arith.constant 336 : index
    %c0_173 = arith.constant 0 : index
    %161 = vector.load %arg17[%c336, %c0_173] : memref<704x64xbf16, #tpu.memory_space<vmem>>, vector<8x64xbf16>
    %c0_174 = arith.constant 0 : index
    %c1536 = arith.constant 1536 : index
    %162 = vector.load %arg18[%c0_174, %c1536] : memref<8x3136xbf16, #tpu.memory_space<vmem>>, vector<8x64xbf16>
    tpu.vector_store %arg18[%c0_174, %c1536], %161 {strides = array<i32>} : memref<8x3136xbf16, #tpu.memory_space<vmem>>, vector<8x64xbf16>,
    %c344 = arith.constant 344 : index
    %c0_175 = arith.constant 0 : index
    %163 = vector.load %arg17[%c344, %c0_175] : memref<704x64xbf16, #tpu.memory_space<vmem>>, vector<8x64xbf16>
    %c0_176 = arith.constant 0 : index
    %c1600 = arith.constant 1600 : index
    %164 = vector.load %arg18[%c0_176, %c1600] : memref<8x3136xbf16, #tpu.memory_space<vmem>>, vector<8x64xbf16>
    tpu.vector_store %arg18[%c0_176, %c1600], %163 {strides = array<i32>} : memref<8x3136xbf16, #tpu.memory_space<vmem>>, vector<8x64xbf16>,
    %c352 = arith.constant 352 : index
    %c0_177 = arith.constant 0 : index
    %165 = vector.load %arg17[%c352, %c0_177] : memref<704x64xbf16, #tpu.memory_space<vmem>>, vector<8x64xbf16>
    %c0_178 = arith.constant 0 : index
    %c1664 = arith.constant 1664 : index
    %166 = vector.load %arg18[%c0_178, %c1664] : memref<8x3136xbf16, #tpu.memory_space<vmem>>, vector<8x64xbf16>
    tpu.vector_store %arg18[%c0_178, %c1664], %165 {strides = array<i32>} : memref<8x3136xbf16, #tpu.memory_space<vmem>>, vector<8x64xbf16>,
    %c360 = arith.constant 360 : index
    %c0_179 = arith.constant 0 : index
    %167 = vector.load %arg17[%c360, %c0_179] : memref<704x64xbf16, #tpu.memory_space<vmem>>, vector<8x64xbf16>
    %c0_180 = arith.constant 0 : index
    %c1728 = arith.constant 1728 : index
    %168 = vector.load %arg18[%c0_180, %c1728] : memref<8x3136xbf16, #tpu.memory_space<vmem>>, vector<8x64xbf16>
    tpu.vector_store %arg18[%c0_180, %c1728], %167 {strides = array<i32>} : memref<8x3136xbf16, #tpu.memory_space<vmem>>, vector<8x64xbf16>,
    %c416 = arith.constant 416 : index
    %c0_181 = arith.constant 0 : index
    %169 = vector.load %arg17[%c416, %c0_181] : memref<704x64xbf16, #tpu.memory_space<vmem>>, vector<8x64xbf16>
    %c0_182 = arith.constant 0 : index
    %c1792 = arith.constant 1792 : index
    %170 = vector.load %arg18[%c0_182, %c1792] : memref<8x3136xbf16, #tpu.memory_space<vmem>>, vector<8x64xbf16>
    tpu.vector_store %arg18[%c0_182, %c1792], %169 {strides = array<i32>} : memref<8x3136xbf16, #tpu.memory_space<vmem>>, vector<8x64xbf16>,
    %c424 = arith.constant 424 : index
    %c0_183 = arith.constant 0 : index
    %171 = vector.load %arg17[%c424, %c0_183] : memref<704x64xbf16, #tpu.memory_space<vmem>>, vector<8x64xbf16>
    %c0_184 = arith.constant 0 : index
    %c1856 = arith.constant 1856 : index
    %172 = vector.load %arg18[%c0_184, %c1856] : memref<8x3136xbf16, #tpu.memory_space<vmem>>, vector<8x64xbf16>
    tpu.vector_store %arg18[%c0_184, %c1856], %171 {strides = array<i32>} : memref<8x3136xbf16, #tpu.memory_space<vmem>>, vector<8x64xbf16>,
    %c432 = arith.constant 432 : index
    %c0_185 = arith.constant 0 : index
    %173 = vector.load %arg17[%c432, %c0_185] : memref<704x64xbf16, #tpu.memory_space<vmem>>, vector<8x64xbf16>
    %c0_186 = arith.constant 0 : index
    %c1920 = arith.constant 1920 : index
    %174 = vector.load %arg18[%c0_186, %c1920] : memref<8x3136xbf16, #tpu.memory_space<vmem>>, vector<8x64xbf16>
    tpu.vector_store %arg18[%c0_186, %c1920], %173 {strides = array<i32>} : memref<8x3136xbf16, #tpu.memory_space<vmem>>, vector<8x64xbf16>,
    %c440 = arith.constant 440 : index
    %c0_187 = arith.constant 0 : index
    %175 = vector.load %arg17[%c440, %c0_187] : memref<704x64xbf16, #tpu.memory_space<vmem>>, vector<8x64xbf16>
    %c0_188 = arith.constant 0 : index
    %c1984 = arith.constant 1984 : index
    %176 = vector.load %arg18[%c0_188, %c1984] : memref<8x3136xbf16, #tpu.memory_space<vmem>>, vector<8x64xbf16>
    tpu.vector_store %arg18[%c0_188, %c1984], %175 {strides = array<i32>} : memref<8x3136xbf16, #tpu.memory_space<vmem>>, vector<8x64xbf16>,
    %c448_189 = arith.constant 448 : index
    %c0_190 = arith.constant 0 : index
    %177 = vector.load %arg17[%c448_189, %c0_190] : memref<704x64xbf16, #tpu.memory_space<vmem>>, vector<8x64xbf16>
    %c0_191 = arith.constant 0 : index
    %c2048 = arith.constant 2048 : index
    %178 = vector.load %arg18[%c0_191, %c2048] : memref<8x3136xbf16, #tpu.memory_space<vmem>>, vector<8x64xbf16>
    tpu.vector_store %arg18[%c0_191, %c2048], %177 {strides = array<i32>} : memref<8x3136xbf16, #tpu.memory_space<vmem>>, vector<8x64xbf16>,
    %c456 = arith.constant 456 : index
    %c0_192 = arith.constant 0 : index
    %179 = vector.load %arg17[%c456, %c0_192] : memref<704x64xbf16, #tpu.memory_space<vmem>>, vector<8x64xbf16>
    %c0_193 = arith.constant 0 : index
    %c2112 = arith.constant 2112 : index
    %180 = vector.load %arg18[%c0_193, %c2112] : memref<8x3136xbf16, #tpu.memory_space<vmem>>, vector<8x64xbf16>
    tpu.vector_store %arg18[%c0_193, %c2112], %179 {strides = array<i32>} : memref<8x3136xbf16, #tpu.memory_space<vmem>>, vector<8x64xbf16>,
    %c464 = arith.constant 464 : index
    %c0_194 = arith.constant 0 : index
    %181 = vector.load %arg17[%c464, %c0_194] : memref<704x64xbf16, #tpu.memory_space<vmem>>, vector<8x64xbf16>
    %c0_195 = arith.constant 0 : index
    %c2176 = arith.constant 2176 : index
    %182 = vector.load %arg18[%c0_195, %c2176] : memref<8x3136xbf16, #tpu.memory_space<vmem>>, vector<8x64xbf16>
    tpu.vector_store %arg18[%c0_195, %c2176], %181 {strides = array<i32>} : memref<8x3136xbf16, #tpu.memory_space<vmem>>, vector<8x64xbf16>,
    %c520 = arith.constant 520 : index
    %c0_196 = arith.constant 0 : index
    %183 = vector.load %arg17[%c520, %c0_196] : memref<704x64xbf16, #tpu.memory_space<vmem>>, vector<8x64xbf16>
    %c0_197 = arith.constant 0 : index
    %c2240 = arith.constant 2240 : index
    %184 = vector.load %arg18[%c0_197, %c2240] : memref<8x3136xbf16, #tpu.memory_space<vmem>>, vector<8x64xbf16>
    tpu.vector_store %arg18[%c0_197, %c2240], %183 {strides = array<i32>} : memref<8x3136xbf16, #tpu.memory_space<vmem>>, vector<8x64xbf16>,
    %c528 = arith.constant 528 : index
    %c0_198 = arith.constant 0 : index
    %185 = vector.load %arg17[%c528, %c0_198] : memref<704x64xbf16, #tpu.memory_space<vmem>>, vector<8x64xbf16>
    %c0_199 = arith.constant 0 : index
    %c2304 = arith.constant 2304 : index
    %186 = vector.load %arg18[%c0_199, %c2304] : memref<8x3136xbf16, #tpu.memory_space<vmem>>, vector<8x64xbf16>
    tpu.vector_store %arg18[%c0_199, %c2304], %185 {strides = array<i32>} : memref<8x3136xbf16, #tpu.memory_space<vmem>>, vector<8x64xbf16>,
    %c536 = arith.constant 536 : index
    %c0_200 = arith.constant 0 : index
    %187 = vector.load %arg17[%c536, %c0_200] : memref<704x64xbf16, #tpu.memory_space<vmem>>, vector<8x64xbf16>
    %c0_201 = arith.constant 0 : index
    %c2368 = arith.constant 2368 : index
    %188 = vector.load %arg18[%c0_201, %c2368] : memref<8x3136xbf16, #tpu.memory_space<vmem>>, vector<8x64xbf16>
    tpu.vector_store %arg18[%c0_201, %c2368], %187 {strides = array<i32>} : memref<8x3136xbf16, #tpu.memory_space<vmem>>, vector<8x64xbf16>,
    %c544 = arith.constant 544 : index
    %c0_202 = arith.constant 0 : index
    %189 = vector.load %arg17[%c544, %c0_202] : memref<704x64xbf16, #tpu.memory_space<vmem>>, vector<8x64xbf16>
    %c0_203 = arith.constant 0 : index
    %c2432 = arith.constant 2432 : index
    %190 = vector.load %arg18[%c0_203, %c2432] : memref<8x3136xbf16, #tpu.memory_space<vmem>>, vector<8x64xbf16>
    tpu.vector_store %arg18[%c0_203, %c2432], %189 {strides = array<i32>} : memref<8x3136xbf16, #tpu.memory_space<vmem>>, vector<8x64xbf16>,
    %c552 = arith.constant 552 : index
    %c0_204 = arith.constant 0 : index
    %191 = vector.load %arg17[%c552, %c0_204] : memref<704x64xbf16, #tpu.memory_space<vmem>>, vector<8x64xbf16>
    %c0_205 = arith.constant 0 : index
    %c2496 = arith.constant 2496 : index
    %192 = vector.load %arg18[%c0_205, %c2496] : memref<8x3136xbf16, #tpu.memory_space<vmem>>, vector<8x64xbf16>
    tpu.vector_store %arg18[%c0_205, %c2496], %191 {strides = array<i32>} : memref<8x3136xbf16, #tpu.memory_space<vmem>>, vector<8x64xbf16>,
    %c560 = arith.constant 560 : index
    %c0_206 = arith.constant 0 : index
    %193 = vector.load %arg17[%c560, %c0_206] : memref<704x64xbf16, #tpu.memory_space<vmem>>, vector<8x64xbf16>
    %c0_207 = arith.constant 0 : index
    %c2560 = arith.constant 2560 : index
    %194 = vector.load %arg18[%c0_207, %c2560] : memref<8x3136xbf16, #tpu.memory_space<vmem>>, vector<8x64xbf16>
    tpu.vector_store %arg18[%c0_207, %c2560], %193 {strides = array<i32>} : memref<8x3136xbf16, #tpu.memory_space<vmem>>, vector<8x64xbf16>,
    %c568 = arith.constant 568 : index
    %c0_208 = arith.constant 0 : index
    %195 = vector.load %arg17[%c568, %c0_208] : memref<704x64xbf16, #tpu.memory_space<vmem>>, vector<8x64xbf16>
    %c0_209 = arith.constant 0 : index
    %c2624 = arith.constant 2624 : index
    %196 = vector.load %arg18[%c0_209, %c2624] : memref<8x3136xbf16, #tpu.memory_space<vmem>>, vector<8x64xbf16>
    tpu.vector_store %arg18[%c0_209, %c2624], %195 {strides = array<i32>} : memref<8x3136xbf16, #tpu.memory_space<vmem>>, vector<8x64xbf16>,
    %c624 = arith.constant 624 : index
    %c0_210 = arith.constant 0 : index
    %197 = vector.load %arg17[%c624, %c0_210] : memref<704x64xbf16, #tpu.memory_space<vmem>>, vector<8x64xbf16>
    %c0_211 = arith.constant 0 : index
    %c2688 = arith.constant 2688 : index
    %198 = vector.load %arg18[%c0_211, %c2688] : memref<8x3136xbf16, #tpu.memory_space<vmem>>, vector<8x64xbf16>
    tpu.vector_store %arg18[%c0_211, %c2688], %197 {strides = array<i32>} : memref<8x3136xbf16, #tpu.memory_space<vmem>>, vector<8x64xbf16>,
    %c632 = arith.constant 632 : index
    %c0_212 = arith.constant 0 : index
    %199 = vector.load %arg17[%c632, %c0_212] : memref<704x64xbf16, #tpu.memory_space<vmem>>, vector<8x64xbf16>
    %c0_213 = arith.constant 0 : index
    %c2752 = arith.constant 2752 : index
    %200 = vector.load %arg18[%c0_213, %c2752] : memref<8x3136xbf16, #tpu.memory_space<vmem>>, vector<8x64xbf16>
    tpu.vector_store %arg18[%c0_213, %c2752], %199 {strides = array<i32>} : memref<8x3136xbf16, #tpu.memory_space<vmem>>, vector<8x64xbf16>,
    %c640_214 = arith.constant 640 : index
    %c0_215 = arith.constant 0 : index
    %201 = vector.load %arg17[%c640_214, %c0_215] : memref<704x64xbf16, #tpu.memory_space<vmem>>, vector<8x64xbf16>
    %c0_216 = arith.constant 0 : index
    %c2816 = arith.constant 2816 : index
    %202 = vector.load %arg18[%c0_216, %c2816] : memref<8x3136xbf16, #tpu.memory_space<vmem>>, vector<8x64xbf16>
    tpu.vector_store %arg18[%c0_216, %c2816], %201 {strides = array<i32>} : memref<8x3136xbf16, #tpu.memory_space<vmem>>, vector<8x64xbf16>,
    %c648 = arith.constant 648 : index
    %c0_217 = arith.constant 0 : index
    %203 = vector.load %arg17[%c648, %c0_217] : memref<704x64xbf16, #tpu.memory_space<vmem>>, vector<8x64xbf16>
    %c0_218 = arith.constant 0 : index
    %c2880 = arith.constant 2880 : index
    %204 = vector.load %arg18[%c0_218, %c2880] : memref<8x3136xbf16, #tpu.memory_space<vmem>>, vector<8x64xbf16>
    tpu.vector_store %arg18[%c0_218, %c2880], %203 {strides = array<i32>} : memref<8x3136xbf16, #tpu.memory_space<vmem>>, vector<8x64xbf16>,
    %c656 = arith.constant 656 : index
    %c0_219 = arith.constant 0 : index
    %205 = vector.load %arg17[%c656, %c0_219] : memref<704x64xbf16, #tpu.memory_space<vmem>>, vector<8x64xbf16>
    %c0_220 = arith.constant 0 : index
    %c2944 = arith.constant 2944 : index
    %206 = vector.load %arg18[%c0_220, %c2944] : memref<8x3136xbf16, #tpu.memory_space<vmem>>, vector<8x64xbf16>
    tpu.vector_store %arg18[%c0_220, %c2944], %205 {strides = array<i32>} : memref<8x3136xbf16, #tpu.memory_space<vmem>>, vector<8x64xbf16>,
    %c664 = arith.constant 664 : index
    %c0_221 = arith.constant 0 : index
    %207 = vector.load %arg17[%c664, %c0_221] : memref<704x64xbf16, #tpu.memory_space<vmem>>, vector<8x64xbf16>
    %c0_222 = arith.constant 0 : index
    %c3008 = arith.constant 3008 : index
    %208 = vector.load %arg18[%c0_222, %c3008] : memref<8x3136xbf16, #tpu.memory_space<vmem>>, vector<8x64xbf16>
    tpu.vector_store %arg18[%c0_222, %c3008], %207 {strides = array<i32>} : memref<8x3136xbf16, #tpu.memory_space<vmem>>, vector<8x64xbf16>,
    %c672 = arith.constant 672 : index
    %c0_223 = arith.constant 0 : index
    %209 = vector.load %arg17[%c672, %c0_223] : memref<704x64xbf16, #tpu.memory_space<vmem>>, vector<8x64xbf16>
    %c0_224 = arith.constant 0 : index
    %c3072 = arith.constant 3072 : index
    %210 = vector.load %arg18[%c0_224, %c3072] : memref<8x3136xbf16, #tpu.memory_space<vmem>>, vector<8x64xbf16>
    tpu.vector_store %arg18[%c0_224, %c3072], %209 {strides = array<i32>} : memref<8x3136xbf16, #tpu.memory_space<vmem>>, vector<8x64xbf16>,
    %c0_225 = arith.constant 0 : index
    %c0_226 = arith.constant 0 : index
    %211 = vector.load %arg18[%c0_225, %c0_226] : memref<8x3136xbf16, #tpu.memory_space<vmem>>, vector<8x3136xbf16>
    %c0_227 = arith.constant 0 : index
    %c0_228 = arith.constant 0 : index
    %212 = vector.load %arg8[%c0_227, %c0_228] : memref<3136x128xbf16, #tpu.memory_space<vmem>>, vector<3136x128xbf16>
    %cst_229 = arith.constant dense<0.000000e+00> : vector<8x128xf32>
    %213 = tpu.matmul %211, %212, %cst_229 {dimension_numbers = #tpu.dot_dimension_numbers<[1], [0], [0], [1], [0, 0, 1, 1], [], []>} : vector<8x3136xbf16>, vector<3136x128xbf16>, vector<8x128xf32> -> vector<8x128xf32>
    %c0_230 = arith.constant 0 : index
    %c0_231 = arith.constant 0 : index
    %214 = vector.load %arg9[%c0_230, %c0_231] : memref<1x128xf32, #tpu.memory_space<vmem>>, vector<1x128xf32>
    %215 = vector.broadcast %214 : vector<1x128xf32> to vector<8x128xf32>
    %216 = arith.addf %213, %215 : vector<8x128xf32>
    %cst_232 = arith.constant 0.000000e+00 : f32
    %217 = vector.broadcast %cst_232 : f32 to vector<8x128xf32>
    %218 = arith.maximumf %216, %217 : vector<8x128xf32>
    %219 = arith.truncf %218 : vector<8x128xf32> to vector<8x128xbf16>
    %c0_233 = arith.constant 0 : index
    %c0_234 = arith.constant 0 : index
    %220 = vector.load %arg10[%c0_233, %c0_234] : memref<128x64xbf16, #tpu.memory_space<vmem>>, vector<128x64xbf16>
    %cst_235 = arith.constant dense<0.000000e+00> : vector<8x64xf32>
    %221 = tpu.matmul %219, %220, %cst_235 {dimension_numbers = #tpu.dot_dimension_numbers<[1], [0], [0], [1], [0, 0, 1, 1], [], []>} : vector<8x128xbf16>, vector<128x64xbf16>, vector<8x64xf32> -> vector<8x64xf32>
    %c0_236 = arith.constant 0 : index
    %c0_237 = arith.constant 0 : index
    %222 = vector.load %arg11[%c0_236, %c0_237] : memref<1x64xf32, #tpu.memory_space<vmem>>, vector<1x64xf32>
    %223 = vector.broadcast %222 : vector<1x64xf32> to vector<8x64xf32>
    %224 = arith.addf %221, %223 : vector<8x64xf32>
    %cst_238 = arith.constant 0.000000e+00 : f32
    %225 = vector.broadcast %cst_238 : f32 to vector<8x64xf32>
    %226 = arith.maximumf %224, %225 : vector<8x64xf32>
    %227 = arith.truncf %226 : vector<8x64xf32> to vector<8x64xbf16>
    %c0_239 = arith.constant 0 : index
    %c0_240 = arith.constant 0 : index
    %228 = vector.load %arg12[%c0_239, %c0_240] : memref<64x128xbf16, #tpu.memory_space<vmem>>, vector<64x128xbf16>
    %cst_241 = arith.constant dense<0.000000e+00> : vector<8x128xf32>
    %229 = tpu.matmul %227, %228, %cst_241 {dimension_numbers = #tpu.dot_dimension_numbers<[1], [0], [0], [1], [0, 0, 1, 1], [], []>} : vector<8x64xbf16>, vector<64x128xbf16>, vector<8x128xf32> -> vector<8x128xf32>
    %c0_242 = arith.constant 0 : index
    %c0_243 = arith.constant 0 : index
    %230 = vector.load %arg13[%c0_242, %c0_243] : memref<1x128xf32, #tpu.memory_space<vmem>>, vector<1x128xf32>
    %231 = vector.broadcast %230 : vector<1x128xf32> to vector<8x128xf32>
    %232 = arith.addf %229, %231 : vector<8x128xf32>
    %c0_244 = arith.constant 0 : index
    %c0_245 = arith.constant 0 : index
    %233 = vector.load %arg14[%c0_244, %c0_245] : memref<8x128xf32, #tpu.memory_space<vmem>>, vector<8x128xf32>
    tpu.vector_store %arg14[%c0_244, %c0_245], %232 {strides = array<i32>} : memref<8x128xf32, #tpu.memory_space<vmem>>, vector<8x128xf32>,
    return
  }
  func.func @transform_0(%arg0: i32) -> (i32, i32, i32) {
    %c0_i32 = arith.constant 0 : i32
    %c0_i32_0 = arith.constant 0 : i32
    %c0_i32_1 = arith.constant 0 : i32
    return %arg0, %c0_i32, %c0_i32_0 : i32, i32, i32
  }
  func.func @transform_1(%arg0: i32) -> (i32, i32) {
    %c0_i32 = arith.constant 0 : i32
    %c0_i32_0 = arith.constant 0 : i32
    %c0_i32_1 = arith.constant 0 : i32
    return %c0_i32, %c0_i32_0 : i32, i32
  }
  func.func @transform_2(%arg0: i32) -> (i32, i32) {
    %c0_i32 = arith.constant 0 : i32
    %c0_i32_0 = arith.constant 0 : i32
    %c0_i32_1 = arith.constant 0 : i32
    return %c0_i32, %c0_i32_0 : i32, i32
  }
  func.func @transform_3(%arg0: i32) -> (i32, i32, i32) {
    %c0_i32 = arith.constant 0 : i32
    %c0_i32_0 = arith.constant 0 : i32
    %c0_i32_1 = arith.constant 0 : i32
    %c0_i32_2 = arith.constant 0 : i32
    return %c0_i32, %c0_i32_0, %c0_i32_1 : i32, i32, i32
  }
  func.func @transform_4(%arg0: i32) -> (i32, i32) {
    %c0_i32 = arith.constant 0 : i32
    %c0_i32_0 = arith.constant 0 : i32
    %c0_i32_1 = arith.constant 0 : i32
    return %c0_i32, %c0_i32_0 : i32, i32
  }
  func.func @transform_5(%arg0: i32) -> (i32, i32, i32) {
    %c0_i32 = arith.constant 0 : i32
    %c0_i32_0 = arith.constant 0 : i32
    %c0_i32_1 = arith.constant 0 : i32
    %c0_i32_2 = arith.constant 0 : i32
    return %c0_i32, %c0_i32_0, %c0_i32_1 : i32, i32, i32
  }
  func.func @transform_6(%arg0: i32) -> (i32, i32) {
    %c0_i32 = arith.constant 0 : i32
    %c0_i32_0 = arith.constant 0 : i32
    %c0_i32_1 = arith.constant 0 : i32
    return %c0_i32, %c0_i32_0 : i32, i32
  }
  func.func @transform_7(%arg0: i32) -> (i32, i32) {
    %c0_i32 = arith.constant 0 : i32
    %c0_i32_0 = arith.constant 0 : i32
    %c0_i32_1 = arith.constant 0 : i32
    return %c0_i32, %c0_i32_0 : i32, i32
  }
  func.func @transform_8(%arg0: i32) -> (i32, i32) {
    %c0_i32 = arith.constant 0 : i32
    %c0_i32_0 = arith.constant 0 : i32
    %c0_i32_1 = arith.constant 0 : i32
    return %c0_i32, %c0_i32_0 : i32, i32
  }
  func.func @transform_9(%arg0: i32) -> (i32, i32) {
    %c0_i32 = arith.constant 0 : i32
    %c0_i32_0 = arith.constant 0 : i32
    %c0_i32_1 = arith.constant 0 : i32
    return %c0_i32, %c0_i32_0 : i32, i32
  }
  func.func @transform_10(%arg0: i32) -> (i32, i32) {
    %c0_i32 = arith.constant 0 : i32
    %c0_i32_0 = arith.constant 0 : i32
    %c0_i32_1 = arith.constant 0 : i32
    return %c0_i32, %c0_i32_0 : i32, i32
  }
  func.func @transform_11(%arg0: i32) -> (i32, i32) {
    %c0_i32 = arith.constant 0 : i32
    %c0_i32_0 = arith.constant 0 : i32
    %c0_i32_1 = arith.constant 0 : i32
    return %c0_i32, %c0_i32_0 : i32, i32
  }
  func.func @transform_12(%arg0: i32) -> (i32, i32) {
    %c0_i32 = arith.constant 0 : i32
    %c0_i32_0 = arith.constant 0 : i32
    %c0_i32_1 = arith.constant 0 : i32
    return %c0_i32, %c0_i32_0 : i32, i32
  }
  func.func @transform_13(%arg0: i32) -> (i32, i32) {
    %c0_i32 = arith.constant 0 : i32
    %c0_i32_0 = arith.constant 0 : i32
    return %arg0, %c0_i32 : i32, i32
  }
}

</mosaic_0001>

<bundles_post_ra>
// kernel: cnn_forward.1
= control target key start
LH: loop header
LB: loop body
LE: loop exit
PB: predicated region body
PF: predicated region fallthrough
CT: control target
= control target key end

     0   :  { %vm828_vm0 = vcmask 1044480   ;;  %vm829_vm1 = vcmask 1045504   ;;  %vm599_vm2 = vcmask 220160   ;;  %v25285_v1 = vmov 65535   ;;  %s30051_s1 = inlined_call_operand.vmem [shape: bf16[27,16], index: 1, kind: input, shape index: {}]   ;;  %s30052_s0 = inlined_call_operand.vmem [shape: bf16[1,1216,27], index: 0, kind: input, shape index: {}]   ;;  %s30053_s3 = inlined_call_operand.vmem [shape: bf16[9,16,32], index: 3, kind: input, shape index: {}]   ;;  %s30054_s2 = inlined_call_operand.vmem [shape: f32[1,16], index: 2, kind: input, shape index: {}]   ;;  %s30055_s5 = inlined_call_operand.vmem [shape: bf16[9,32,64], index: 5, kind: input, shape index: {}]   ;;  %s30056_s4 = inlined_call_operand.vmem [shape: f32[1,32], index: 4, kind: input, shape index: {}]   ;;  %s30057_s7 = inlined_call_operand.vmem [shape: bf16[3136,128], index: 7, kind: input, shape index: {}]   ;;  %s30058_s6 = inlined_call_operand.vmem [shape: f32[1,64], index: 6, kind: input, shape index: {}]   ;;  %s30059_s8 = inlined_call_operand.vmem [shape: f32[1,128], index: 8, kind: input, shape index: {}]   ;;  %s30060_s9 = inlined_call_operand.vmem [shape: bf16[128,64], index: 9, kind: input, shape index: {}]   ;;  %s30061_s11 = inlined_call_operand.vmem [shape: bf16[64,128], index: 11, kind: input, shape index: {}]   ;;  %s30062_s10 = inlined_call_operand.vmem [shape: f32[1,64], index: 10, kind: input, shape index: {}]   ;;  %s30063_s12 = inlined_call_operand.vmem [shape: f32[1,128], index: 12, kind: input, shape index: {}]   ;;  %s30064_s13 = inlined_call_operand.vmem [shape: f32[8,128], index: 13, kind: output, shape index: {}]  }
   0x1   :  { %v24862_v0 = vld [vmem:[%s30051_s1] sm:$0xff]   ;;  %v830_v2 = vsel %vm828_vm0, 4294967295, %v25285_v1  ;;  %v24863_v3 = vld [vmem:[%s30051_s1 + $0x8] sm:$0x3f]   ;;  %v24866_v8 = vld [vmem:[%s30052_s0 + $0x10] sm:$0xff]   ;;  %vm1704_vm3 = vcmask 130048  }
   0x2   :  { %21068 = vmatprep.subr.bf16.mxu0 %v24862_v0  ;;  %v831_v4 = vsel %vm829_vm1, %v830_v2, 0  ;;  %v24864_v5 = vld [vmem:[%s30052_s0] sm:$0xff]   ;;  %v24865_v7 = vld [vmem:[%s30052_s0 + $0x8] sm:$0xff]   ;;  %v24867_v9 = vld [vmem:[%s30052_s0 + $0x18] sm:$0xff]   ;;  %vm1909_vm4 = vcmask 1043456   ;;  %vm9629_vm5 = vcmask 261120  }
   0x3   :  { %21069 = vmatpush3.bf16.msra.mxu0 %v24862_v0  ;;  %v833_v6 = vand.u32 %v24863_v3, %v831_v4  ;;  %21072 = vmatprep.mubr.msk.bf16.mxu0 %vm599_vm2, %v24864_v5  ;;  %v24868_v10 = vld [vmem:[%s30052_s0 + $0x20] sm:$0xff]   ;;  %v24869_v11 = vld [vmem:[%s30052_s0 + $0x28] sm:$0xff]   ;;  %v24870_v12 = vld [vmem:[%s30052_s0 + $0x30] sm:$0xff]   ;;  %vm15625_vm6 = vcmask 523264   ;;  %vm15671_vm7 = vcmask 519168   ;;  %vm15680_vm8 = vcmask 1043968  }
   0x4   :  { %v24871_v13 = vld [vmem:[%s30052_s0 + $0x38] sm:$0xff]   ;;  %v24872_v14 = vld [vmem:[%s30052_s0 + $0x40] sm:$0xff]   ;;  %v24873_v15 = vld [vmem:[%s30052_s0 + $0x48] sm:$0xff]   ;;  %vm25288_vm9 = vmmov 0  }
   0x5   :  { %21070 = vmatprep.subr.bf16.mxu0 %v833_v6  ;;  %v24874_v16 = vld [vmem:[%s30052_s0 + $0x50] sm:$0xff]   ;;  %v24875_v17 = vld [vmem:[%s30052_s0 + $0x58] sm:$0xff]   ;;  %v24876_v18 = vld [vmem:[%s30052_s0 + $0x60] sm:$0xff]  }
   0x6   :  { %v24877_v19 = vld [vmem:[%s30052_s0 + $0x68] sm:$0xff]   ;;  %v24878_v20 = vld [vmem:[%s30052_s0 + $0x70] sm:$0xff]   ;;  %v24879_v21 = vld [vmem:[%s30052_s0 + $0x78] sm:$0xff]  }
   0x7   :  { %21071 = vmatpush3.bf16.msra.mxu0 %v833_v6  ;;  %v24880_v22 = vld [vmem:[%s30052_s0 + $0x80] sm:$0xff]   ;;  %v24881_v23 = vld [vmem:[%s30052_s0 + $0x88] sm:$0xff]   ;;  %v24882_v24 = vld [vmem:[%s30052_s0 + $0x90] sm:$0xff]  }
   0x8   :  { %v24883_v25 = vld [vmem:[%s30052_s0 + $0x98] sm:$0xff]   ;;  %v24884_v26 = vld [vmem:[%s30052_s0 + $0xa0] sm:$0xff]   ;;  %v24885_v27 = vld [vmem:[%s30052_s0 + $0xa8] sm:$0xff]  }
   0x9   :  { %v24886_v28 = vld [vmem:[%s30052_s0 + $0xb0] sm:$0xff]   ;;  %v24887_v29 = vld [vmem:[%s30052_s0 + $0xb8] sm:$0xff]   ;;  %v24888_v30 = vld [vmem:[%s30052_s0 + $0xc0] sm:$0xff]  }
   0xa   :  { %21073 = vmatmul.mubr.msk.bf16.vlgmr.msra.gmra.mrb[0].mxu0 %vm599_vm2, %v24865_v7  ;;  %v24889_v31 = vld [vmem:[%s30052_s0 + $0xc8] sm:$0xff]   ;;  %v24890_v32 = vld [vmem:[%s30052_s0 + $0xd0] sm:$0xff]   ;;  %v24891_v33 = vld [vmem:[%s30052_s0 + $0xd8] sm:$0xff]  }
   0xb   :  { %21076 = vmatprep.mubr.msk.bf16.mxu0 %vm599_vm2, %v24866_v8  ;;  %v24892_v34 = vld [vmem:[%s30052_s0 + $0xe0] sm:$0xff]   ;;  %v24893_v35 = vld [vmem:[%s30052_s0 + $0xe8] sm:$0xff]   ;;  %v24894_v37 = vld [vmem:[%s30052_s0 + $0xf0] sm:$0xff]  }
   0xc   :  { %v24924_v36 = vld [vmem:[%s30053_s3 + $0x8] sm:$0xff]   ;;  %v24895_v38 = vld [vmem:[%s30052_s0 + $0xf8] sm:$0xff]   ;;  %v24896_v39 = vld [vmem:[%s30052_s0 + $0x100] sm:$0xff]  }
   0xd   :  { %21224 = vmatprep.subr.bf16.mxu1 %v24924_v36  ;;  %v25501_v40 = vld [vmem:[%s30053_s3] sm:$0xff]   ;;  %v24897_v41 = vld [vmem:[%s30052_s0 + $0x108] sm:$0xff]   ;;  %v24898_v42 = vld [vmem:[%s30052_s0 + $0x110] sm:$0xff]  }
   0xe   :  { %21225 = vmatpush3.bf16.msra.mxu1 %v24924_v36  ;;  %v24899_v43 = vld [vmem:[%s30052_s0 + $0x118] sm:$0xff]   ;;  %v24900_v44 = vld [vmem:[%s30052_s0 + $0x120] sm:$0xff]   ;;  %v24901_v45 = vld [vmem:[%s30052_s0 + $0x128] sm:$0xff]  }
   0xf   :  { %21346 = vmatprep.subr.bf16.mxu1 %v25501_v40  ;;  %v24902_v46 = vld [vmem:[%s30052_s0 + $0x130] sm:$0xff]   ;;  %v24903_v47 = vld [vmem:[%s30052_s0 + $0x138] sm:$0xff]   ;;  %v24904_v48 = vld [vmem:[%s30052_s0 + $0x140] sm:$0xff]  }
  0x10   :  { %v24905_v49 = vld [vmem:[%s30052_s0 + $0x148] sm:$0xff]   ;;  %v24906_v50 = vld [vmem:[%s30052_s0 + $0x150] sm:$0xff]   ;;  %v24907_v51 = vld [vmem:[%s30052_s0 + $0x158] sm:$0xff]  }
  0x11   :  { %v24908_v52 = vld [vmem:[%s30052_s0 + $0x160] sm:$0xff]   ;;  %v24909_v53 = vld [vmem:[%s30052_s0 + $0x168] sm:$0xff]   ;;  %v24910_v54 = vld [vmem:[%s30052_s0 + $0x170] sm:$0xff]  }
  0x12   :  { %21077 = vmatmul.mubr.msk.bf16.gmra.mrb[4].mxu0 %vm599_vm2, %v24867_v9  ;;  %v24911_v55 = vld [vmem:[%s30052_s0 + $0x178] sm:$0xff]   ;;  %v24912_v56 = vld [vmem:[%s30052_s0 + $0x180] sm:$0xff]   ;;  %v24913_v57 = vld [vmem:[%s30052_s0 + $0x188] sm:$0xff]  }
  0x13   :  { %21080 = vmatprep.mubr.msk.bf16.mxu0 %vm599_vm2, %v24868_v10  ;;  %v24914_v58 = vld [vmem:[%s30052_s0 + $0x190] sm:$0xff]   ;;  %v24915_v59 = vld [vmem:[%s30052_s0 + $0x198] sm:$0xff]   ;;  %v24916_v60 = vld [vmem:[%s30052_s0 + $0x1a0] sm:$0xff]  }
  0x14   :  { %v24917_v61 = vld [vmem:[%s30052_s0 + $0x1a8] sm:$0xff]   ;;  %v24918_v62 = vld [vmem:[%s30052_s0 + $0x1b0] sm:$0xff]   ;;  %v25596_v63 = vld [vmem:[%s30054_s2] ss:$0 sm:$0xff] }
  0x15   :  { %v24919_v3 = vld [vmem:[%s30052_s0 + $0x1b8] sm:$0xff]   ;;  %v24920_v6 = vld [vmem:[%s30052_s0 + $0x1c0] sm:$0xff]  }
  0x16   :  { %v24923_v36 = vld [vmem:[%s30052_s0 + $0x1d8] sm:$0xff]  }
  0x1a   :  { %21081 = vmatmul.mubr.msk.bf16.gmra.mrb[8].mxu0 %vm599_vm2, %v24869_v11 }
  0x1b   :  { %21084 = vmatprep.mubr.msk.bf16.mxu0 %vm599_vm2, %v24870_v12 }
  0x22   :  { %21085 = vmatmul.mubr.msk.bf16.gmra.mrb[12].mxu0 %vm599_vm2, %v24871_v13 }
  0x23   :  { %21088 = vmatprep.mubr.msk.bf16.mxu0 %vm599_vm2, %v24872_v14 }
  0x2a   :  { %21089 = vmatmul.mubr.msk.bf16.gmra.mrb[16].mxu0 %vm599_vm2, %v24873_v15 }
  0x2b   :  { %21092 = vmatprep.mubr.msk.bf16.mxu0 %vm599_vm2, %v24874_v16 }
  0x32   :  { %21093 = vmatmul.mubr.msk.bf16.gmra.mrb[20].mxu0 %vm599_vm2, %v24875_v17 }
  0x33   :  { %21096 = vmatprep.mubr.msk.bf16.mxu0 %vm599_vm2, %v24876_v18 }
  0x3a   :  { %21097 = vmatmul.mubr.msk.bf16.gmra.mrb[24].mxu0 %vm599_vm2, %v24877_v19  ;;  %v24921_v19 = vld [vmem:[%s30052_s0 + $0x1c8] sm:$0xff]  }
  0x3b   :  { %21100 = vmatprep.mubr.msk.bf16.mxu0 %vm599_vm2, %v24878_v20 }
  0x42   :  { %21101 = vmatmul.mubr.msk.bf16.gmra.mrb[28].mxu0 %vm599_vm2, %v24879_v21 }
  0x43   :  { %21104 = vmatprep.mubr.msk.bf16.mxu0 %vm599_vm2, %v24880_v22  ;;  %v24922_v22 = vld [vmem:[%s30052_s0 + $0x1d0] sm:$0xff]  }
  0x4a   :  { %21105 = vmatmul.mubr.msk.bf16.gmra.mrb[32].mxu0 %vm599_vm2, %v24881_v23 }
  0x4b   :  { %21108 = vmatprep.mubr.msk.bf16.mxu0 %vm599_vm2, %v24882_v24 }
  0x52   :  { %21109 = vmatmul.mubr.msk.bf16.gmra.mrb[36].mxu0 %vm599_vm2, %v24883_v25 }
  0x53   :  { %21112 = vmatprep.mubr.msk.bf16.mxu0 %vm599_vm2, %v24884_v26 }
  0x5a   :  { %21113 = vmatmul.mubr.msk.bf16.gmra.mrb[40].mxu0 %vm599_vm2, %v24885_v27 }
  0x5b   :  { %21116 = vmatprep.mubr.msk.bf16.mxu0 %vm599_vm2, %v24886_v28 }
  0x62   :  { %21117 = vmatmul.mubr.msk.bf16.gmra.mrb[44].mxu0 %vm599_vm2, %v24887_v29 }
  0x63   :  { %21120 = vmatprep.mubr.msk.bf16.mxu0 %vm599_vm2, %v24888_v30 }
  0x6a   :  { %21121 = vmatmul.mubr.msk.bf16.gmra.mrb[48].mxu0 %vm599_vm2, %v24889_v31 }
  0x6b   :  { %21124 = vmatprep.mubr.msk.bf16.mxu0 %vm599_vm2, %v24890_v32 }
  0x72   :  { %21125 = vmatmul.mubr.msk.bf16.gmra.mrb[52].mxu0 %vm599_vm2, %v24891_v33 }
  0x73   :  { %21128 = vmatprep.mubr.msk.bf16.mxu0 %vm599_vm2, %v24892_v34 }
  0x7a   :  { %21129 = vmatmul.mubr.msk.bf16.gmra.mrb[56].mxu0 %vm599_vm2, %v24893_v35 }
  0x7b   :  { %21132 = vmatprep.mubr.msk.bf16.mxu0 %vm599_vm2, %v24894_v37 }
  0x82   :  { %21133 = vmatmul.mubr.msk.bf16.gmra.mrb[60].mxu0 %vm599_vm2, %v24895_v38 }
  0x83   :  { %21136 = vmatprep.mubr.msk.bf16.mxu0 %vm599_vm2, %v24896_v39 }
  0x8a   :  { %21137 = vmatmul.mubr.msk.bf16.gmra.mrb[64].mxu0 %vm599_vm2, %v24897_v41 }
  0x8b   :  { %21140 = vmatprep.mubr.msk.bf16.mxu0 %vm599_vm2, %v24898_v42 }
  0x92   :  { %21141 = vmatmul.mubr.msk.bf16.gmra.mrb[68].mxu0 %vm599_vm2, %v24899_v43  ;;  %v24925_v43 = vld [vmem:[%s30052_s0 + $0x1e0] sm:$0xff]  }
  0x93   :  { %21144 = vmatprep.mubr.msk.bf16.mxu0 %vm599_vm2, %v24900_v44 }
  0x9a   :  { %21145 = vmatmul.mubr.msk.bf16.gmra.mrb[72].mxu0 %vm599_vm2, %v24901_v45 }
  0x9b   :  { %21148 = vmatprep.mubr.msk.bf16.mxu0 %vm599_vm2, %v24902_v46 }
  0xa2   :  { %21149 = vmatmul.mubr.msk.bf16.gmra.mrb[76].mxu0 %vm599_vm2, %v24903_v47 }
  0xa3   :  { %21152 = vmatprep.mubr.msk.bf16.mxu0 %vm599_vm2, %v24904_v48 }
  0xaa   :  { %21153 = vmatmul.mubr.msk.bf16.gmra.mrb[80].mxu0 %vm599_vm2, %v24905_v49 }
  0xab   :  { %21156 = vmatprep.mubr.msk.bf16.mxu0 %vm599_vm2, %v24906_v50 }
  0xb2   :  { %21157 = vmatmul.mubr.msk.bf16.gmra.mrb[84].mxu0 %vm599_vm2, %v24907_v51 }
  0xb3   :  { %21160 = vmatprep.mubr.msk.bf16.mxu0 %vm599_vm2, %v24908_v52 }
  0xba   :  { %21161 = vmatmul.mubr.msk.bf16.gmra.mrb[88].mxu0 %vm599_vm2, %v24909_v53 }
  0xbb   :  { %21164 = vmatprep.mubr.msk.bf16.mxu0 %vm599_vm2, %v24910_v54 }
  0xc2   :  { %21165 = vmatmul.mubr.msk.bf16.gmra.mrb[92].mxu0 %vm599_vm2, %v24911_v55 }
  0xc3   :  { %21168 = vmatprep.mubr.msk.bf16.mxu0 %vm599_vm2, %v24912_v56 }
  0xca   :  { %21169 = vmatmul.mubr.msk.bf16.gmra.mrb[96].mxu0 %vm599_vm2, %v24913_v57 }
  0xcb   :  { %21172 = vmatprep.mubr.msk.bf16.mxu0 %vm599_vm2, %v24914_v58  ;;  %v24927_v58 = vld [vmem:[%s30052_s0 + $0x1e8] sm:$0xff]  }
  0xd2   :  { %21173 = vmatmul.mubr.msk.bf16.gmra.mrb[100].mxu0 %vm599_vm2, %v24915_v59 }
  0xd3   :  { %21176 = vmatprep.mubr.msk.bf16.mxu0 %vm599_vm2, %v24916_v60 }
  0xda   :  { %21177 = vmatmul.mubr.msk.bf16.gmra.mrb[104].mxu0 %vm599_vm2, %v24917_v61 }
  0xdb   :  { %21180 = vmatprep.mubr.msk.bf16.mxu0 %vm599_vm2, %v24918_v62 }
  0xdd   :  { %v21074_v0 = vpop.f32.mrb[0].mxu0 }
  0xde   :  { %v878_v1 = vadd.f32 %v21074_v0, %v25596_v63  ;;  %v869_v2 = vpop.f32.mrb[1].mxu0 }
  0xdf   :  { %v870_v4 = vadd.f32 %v25596_v63, %v869_v2  ;;  %v21075_v5 = vpop.f32.mrb[2].mxu0 }
  0xe0   :  { %v881_v7 = vadd.f32 %v21075_v5, %v25596_v63  ;;  %v872_v8 = vpop.f32.mrb[3].mxu0  ;;  %v1478_v10 = vmax.f32 %v878_v1, 0.0 }
  0xe1   :  { %v873_v9 = vadd.f32 %v25596_v63, %v872_v8  ;;  %v1476_v12 = vmax.f32 %v870_v4, 0.0 }
  0xe2   :  { %v1479_v11 = vmax.f32 %v881_v7, 0.0  ;;  %21181 = vmatmul.mubr.msk.bf16.gmra.mrb[108].mxu0 %vm599_vm2, %v24919_v3  ;;  %v24928_v3 = vld [vmem:[%s30052_s0 + $0x1f0] sm:$0xff]  }
  0xe3   :  { %v1477_v13 = vmax.f32 %v873_v9, 0.0  ;;  %21184 = vmatprep.mubr.msk.bf16.mxu0 %vm599_vm2, %v24920_v6 }
  0xe4   :  { %v1629_v14 = vpack.c.bf16 %v1479_v11, %v1478_v10 }
  0xe5   :  { %v1628_v15 = vpack.c.bf16 %v1477_v13, %v1476_v12  ;;  %v21078_v16 = vpop.f32.mrb[4].mxu0 }
  0xe6   :  { %1706 = vst.msk [vmem:[#allocation2 + $0x8] sm:$0xff] %vm1704_vm3, %v1629_v14  ;;  %v894_v17 = vadd.f32 %v21078_v16, %v25596_v63  ;;  %v885_v18 = vpop.f32.mrb[5].mxu0 }
  0xe7   :  { %1705 = vst.msk [vmem:[#allocation2] sm:$0xff] %vm1704_vm3, %v1628_v15  ;;  %v886_v20 = vadd.f32 %v25596_v63, %v885_v18  ;;  %v21079_v21 = vpop.f32.mrb[6].mxu0 }
  0xe8   :  { %v897_v23 = vadd.f32 %v21079_v21, %v25596_v63  ;;  %v888_v24 = vpop.f32.mrb[7].mxu0  ;;  %v1482_v26 = vmax.f32 %v894_v17, 0.0  ;;  %v24929_v17 = vld [vmem:[%s30052_s0 + $0x1f8] sm:$0xff]  }
  0xe9   :  { %v889_v25 = vadd.f32 %v25596_v63, %v888_v24  ;;  %v1480_v28 = vmax.f32 %v886_v20, 0.0 }
  0xea   :  { %v1483_v27 = vmax.f32 %v897_v23, 0.0  ;;  %21185 = vmatmul.mubr.msk.bf16.gmra.mrb[112].mxu0 %vm599_vm2, %v24921_v19 }
  0xeb   :  { %v1481_v29 = vmax.f32 %v889_v25, 0.0  ;;  %21188 = vmatprep.mubr.msk.bf16.mxu0 %vm599_vm2, %v24922_v22 }
  0xec   :  { %v1631_v30 = vpack.c.bf16 %v1483_v27, %v1482_v26 }
  0xed   :  { %v1630_v31 = vpack.c.bf16 %v1481_v29, %v1480_v28  ;;  %v21082_v32 = vpop.f32.mrb[8].mxu0  ;;  %v1782_v33 = vld [vmem:[#allocation2 + $0x8] sm:$0xff] }
  0xee   :  { %1708 = vst.msk [vmem:[#allocation2 + $0x18] sm:$0xff] %vm1704_vm3, %v1631_v30  ;;  %v910_v34 = vadd.f32 %v21082_v32, %v25596_v63  ;;  %v901_v35 = vpop.f32.mrb[9].mxu0  ;;  %v1843_v37 = vld [vmem:[#allocation2] sm:$0xf0]  ;;  %v1911_v38 = vrot.slane %v1782_v33, 4 }
  0xef   :  { %1707 = vst.msk [vmem:[#allocation2 + $0x10] sm:$0xff] %vm1704_vm3, %v1630_v31  ;;  %v902_v39 = vadd.f32 %v25596_v63, %v901_v35  ;;  %v21083_v41 = vpop.f32.mrb[10].mxu0  ;;  %v1910_v42 = vrot.slane %v1843_v37, 4 }
  0xf0   :  { %v913_v44 = vadd.f32 %v21083_v41, %v25596_v63  ;;  %v904_v45 = vpop.f32.mrb[11].mxu0  ;;  %v1486_v48 = vmax.f32 %v910_v34, 0.0 }
  0xf1   :  { %v905_v46 = vadd.f32 %v25596_v63, %v904_v45  ;;  %v1912_v47 = vsel %vm1909_vm4, %v1910_v42, %v1911_v38  ;;  %v1484_v50 = vmax.f32 %v902_v39, 0.0 }
  0xf2   :  { %v1487_v49 = vmax.f32 %v913_v44, 0.0  ;;  %21189 = vmatmul.mubr.msk.bf16.gmra.mrb[116].mxu0 %vm599_vm2, %v24923_v36  ;;  %21226 = vmatprep.mubr.msk.bf16.mxu1 %vm1704_vm3, %v1912_v47 }
  0xf3   :  { %v1485_v51 = vmax.f32 %v905_v46, 0.0  ;;  %21192 = vmatprep.mubr.msk.bf16.mxu0 %vm599_vm2, %v24925_v43 }
  0xf4   :  { %v1633_v52 = vpack.c.bf16 %v1487_v49, %v1486_v48 }
  0xf5   :  { %v1632_v53 = vpack.c.bf16 %v1485_v51, %v1484_v50  ;;  %v21086_v54 = vpop.f32.mrb[12].mxu0  ;;  %v1784_v55 = vld [vmem:[#allocation2 + $0x18] sm:$0xff] }
  0xf6   :  { %1710 = vst.msk [vmem:[#allocation2 + $0x28] sm:$0xff] %vm1704_vm3, %v1633_v52  ;;  %v926_v56 = vadd.f32 %v21086_v54, %v25596_v63  ;;  %v917_v57 = vpop.f32.mrb[13].mxu0  ;;  %v1783_v59 = vld [vmem:[#allocation2 + $0x10] sm:$0xff]  ;;  %v1915_v60 = vrot.slane %v1784_v55, 4 }
  0xf7   :  { %1709 = vst.msk [vmem:[#allocation2 + $0x20] sm:$0xff] %vm1704_vm3, %v1632_v53  ;;  %v918_v61 = vadd.f32 %v25596_v63, %v917_v57  ;;  %v21087_v62 = vpop.f32.mrb[14].mxu0  ;;  %v1913_v0 = vrot.slane %v1783_v59, 4 }
  0xf8   :  { %v929_v1 = vadd.f32 %v21087_v62, %v25596_v63  ;;  %v920_v2 = vpop.f32.mrb[15].mxu0  ;;  %v1490_v7 = vmax.f32 %v926_v56, 0.0 }
  0xf9   :  { %v921_v4 = vadd.f32 %v25596_v63, %v920_v2  ;;  %v1914_v5 = vsel %vm1909_vm4, %v1911_v38, %v1913_v0  ;;  %v1916_v6 = vsel %vm1909_vm4, %v1913_v0, %v1915_v60  ;;  %v1488_v9 = vmax.f32 %v918_v61, 0.0 }
  0xfa   :  { %v1491_v8 = vmax.f32 %v929_v1, 0.0  ;;  %21193 = vmatmul.mubr.msk.bf16.gmra.mrb[120].mxu0 %vm599_vm2, %v24927_v58  ;;  %21227 = vmatmul.mubr.msk.bf16.vlgmr.msra.gmra.mrb[0].mxu1 %vm1704_vm3, %v1914_v5 }
  0xfb   :  { %v1489_v10 = vmax.f32 %v921_v4, 0.0  ;;  %21347 = vmatpush3.bf16.msra.mxu1 %v25501_v40  ;;  %21230 = vmatprep.mubr.msk.bf16.mxu1 %vm1704_vm3, %v1916_v6 }
  0xfc   :  { %v1635_v11 = vpack.c.bf16 %v1491_v8, %v1490_v7  ;;  %21196 = vmatprep.mubr.msk.bf16.mxu0 %vm599_vm2, %v24928_v3 }
  0xfd   :  { %v1634_v12 = vpack.c.bf16 %v1489_v10, %v1488_v9  ;;  %v21090_v13 = vpop.f32.mrb[16].mxu0  ;;  %v1786_v14 = vld [vmem:[#allocation2 + $0x28] sm:$0xff] }
  0xfe   :  { %1712 = vst.msk [vmem:[#allocation2 + $0x38] sm:$0xff] %vm1704_vm3, %v1635_v11  ;;  %v942_v15 = vadd.f32 %v21090_v13, %v25596_v63  ;;  %v933_v16 = vpop.f32.mrb[17].mxu0  ;;  %v1785_v18 = vld [vmem:[#allocation2 + $0x20] sm:$0xff]  ;;  %v1919_v19 = vrot.slane %v1786_v14, 4 }
  0xff   :  { %1711 = vst.msk [vmem:[#allocation2 + $0x30] sm:$0xff] %vm1704_vm3, %v1634_v12  ;;  %v934_v40 = vadd.f32 %v25596_v63, %v933_v16  ;;  %v21091_v20 = vpop.f32.mrb[18].mxu0  ;;  %v1917_v21 = vrot.slane %v1785_v18, 4 }
 0x100   :  { %v945_v22 = vadd.f32 %v21091_v20, %v25596_v63  ;;  %v936_v23 = vpop.f32.mrb[19].mxu0  ;;  %v1494_v27 = vmax.f32 %v942_v15, 0.0 }
 0x101   :  { %v937_v24 = vadd.f32 %v25596_v63, %v936_v23  ;;  %v1918_v25 = vsel %vm1909_vm4, %v1915_v60, %v1917_v21  ;;  %v1920_v26 = vsel %vm1909_vm4, %v1917_v21, %v1919_v19  ;;  %v1492_v29 = vmax.f32 %v934_v40, 0.0 }
 0x102   :  { %v1495_v28 = vmax.f32 %v945_v22, 0.0  ;;  %21197 = vmatmul.mubr.msk.bf16.gmra.mrb[124].mxu0 %vm599_vm2, %v24929_v17  ;;  %21231 = vmatmul.mubr.msk.bf16.gmra.mrb[4].mxu1 %vm1704_vm3, %v1918_v25 }
 0x103   :  { %v1493_v30 = vmax.f32 %v937_v24, 0.0  ;;  %21234 = vmatprep.mubr.msk.bf16.mxu1 %vm1704_vm3, %v1920_v26 }
 0x104   :  { %v1637_v31 = vpack.c.bf16 %v1495_v28, %v1494_v27 }
 0x105   :  { %v1636_v32 = vpack.c.bf16 %v1493_v30, %v1492_v29  ;;  %v21094_v33 = vpop.f32.mrb[20].mxu0  ;;  %v1788_v34 = vld [vmem:[#allocation2 + $0x38] sm:$0xff] }
 0x106   :  { %1714 = vst.msk [vmem:[#allocation2 + $0x48] sm:$0xff] %vm1704_vm3, %v1637_v31  ;;  %v958_v35 = vadd.f32 %v21094_v33, %v25596_v63  ;;  %v949_v36 = vpop.f32.mrb[21].mxu0  ;;  %v1787_v37 = vld [vmem:[#allocation2 + $0x30] sm:$0xff]  ;;  %v1923_v38 = vrot.slane %v1788_v34, 4 }
 0x107   :  { %1713 = vst.msk [vmem:[#allocation2 + $0x40] sm:$0xff] %vm1704_vm3, %v1636_v32  ;;  %v950_v39 = vadd.f32 %v25596_v63, %v949_v36  ;;  %v21095_v41 = vpop.f32.mrb[22].mxu0  ;;  %v1921_v42 = vrot.slane %v1787_v37, 4 }
 0x108   :  { %v961_v43 = vadd.f32 %v21095_v41, %v25596_v63  ;;  %v952_v44 = vpop.f32.mrb[23].mxu0  ;;  %v1498_v48 = vmax.f32 %v958_v35, 0.0 }
 0x109   :  { %v953_v45 = vadd.f32 %v25596_v63, %v952_v44  ;;  %v1922_v46 = vsel %vm1909_vm4, %v1919_v19, %v1921_v42  ;;  %v1924_v47 = vsel %vm1909_vm4, %v1921_v42, %v1923_v38  ;;  %v1496_v50 = vmax.f32 %v950_v39, 0.0 }
 0x10a   :  { %v1499_v49 = vmax.f32 %v961_v43, 0.0  ;;  %21235 = vmatmul.mubr.msk.bf16.gmra.mrb[8].mxu1 %vm1704_vm3, %v1922_v46 }
 0x10b   :  { %v1497_v51 = vmax.f32 %v953_v45, 0.0  ;;  %21238 = vmatprep.mubr.msk.bf16.mxu1 %vm1704_vm3, %v1924_v47 }
 0x10c   :  { %v1639_v52 = vpack.c.bf16 %v1499_v49, %v1498_v48 }
 0x10d   :  { %v1638_v53 = vpack.c.bf16 %v1497_v51, %v1496_v50  ;;  %v21098_v54 = vpop.f32.mrb[24].mxu0  ;;  %v1790_v55 = vld [vmem:[#allocation2 + $0x48] sm:$0xff] }
 0x10e   :  { %1716 = vst.msk [vmem:[#allocation2 + $0x58] sm:$0xff] %vm1704_vm3, %v1639_v52  ;;  %v974_v56 = vadd.f32 %v21098_v54, %v25596_v63  ;;  %v965_v57 = vpop.f32.mrb[25].mxu0  ;;  %v1789_v58 = vld [vmem:[#allocation2 + $0x40] sm:$0xff]  ;;  %v1927_v59 = vrot.slane %v1790_v55, 4 }
 0x10f   :  { %1715 = vst.msk [vmem:[#allocation2 + $0x50] sm:$0xff] %vm1704_vm3, %v1638_v53  ;;  %v966_v60 = vadd.f32 %v25596_v63, %v965_v57  ;;  %v21099_v61 = vpop.f32.mrb[26].mxu0  ;;  %v1925_v62 = vrot.slane %v1789_v58, 4 }
 0x110   :  { %v977_v0 = vadd.f32 %v21099_v61, %v25596_v63  ;;  %v968_v1 = vpop.f32.mrb[27].mxu0  ;;  %v1502_v5 = vmax.f32 %v974_v56, 0.0 }
 0x111   :  { %v969_v2 = vadd.f32 %v25596_v63, %v968_v1  ;;  %v1926_v3 = vsel %vm1909_vm4, %v1923_v38, %v1925_v62  ;;  %v1928_v4 = vsel %vm1909_vm4, %v1925_v62, %v1927_v59  ;;  %v1500_v7 = vmax.f32 %v966_v60, 0.0 }
 0x112   :  { %v1503_v6 = vmax.f32 %v977_v0, 0.0  ;;  %21239 = vmatmul.mubr.msk.bf16.gmra.mrb[12].mxu1 %vm1704_vm3, %v1926_v3 }
 0x113   :  { %v1501_v8 = vmax.f32 %v969_v2, 0.0  ;;  %21242 = vmatprep.mubr.msk.bf16.mxu1 %vm1704_vm3, %v1928_v4 }
 0x114   :  { %v1641_v9 = vpack.c.bf16 %v1503_v6, %v1502_v5 }
 0x115   :  { %v1640_v10 = vpack.c.bf16 %v1501_v8, %v1500_v7  ;;  %v21102_v11 = vpop.f32.mrb[28].mxu0  ;;  %v1792_v12 = vld [vmem:[#allocation2 + $0x58] sm:$0xff] }
 0x116   :  { %1718 = vst.msk [vmem:[#allocation2 + $0x68] sm:$0xff] %vm1704_vm3, %v1641_v9  ;;  %v990_v13 = vadd.f32 %v21102_v11, %v25596_v63  ;;  %v981_v14 = vpop.f32.mrb[29].mxu0  ;;  %v1791_v15 = vld [vmem:[#allocation2 + $0x50] sm:$0xff]  ;;  %v1931_v16 = vrot.slane %v1792_v12, 4 }
 0x117   :  { %1717 = vst.msk [vmem:[#allocation2 + $0x60] sm:$0xff] %vm1704_vm3, %v1640_v10  ;;  %v982_v17 = vadd.f32 %v25596_v63, %v981_v14  ;;  %v21103_v18 = vpop.f32.mrb[30].mxu0  ;;  %v1929_v19 = vrot.slane %v1791_v15, 4 }
 0x118   :  { %v993_v40 = vadd.f32 %v21103_v18, %v25596_v63  ;;  %v984_v20 = vpop.f32.mrb[31].mxu0  ;;  %v1506_v24 = vmax.f32 %v990_v13, 0.0 }
 0x119   :  { %v985_v21 = vadd.f32 %v25596_v63, %v984_v20  ;;  %v1930_v22 = vsel %vm1909_vm4, %v1927_v59, %v1929_v19  ;;  %v1932_v23 = vsel %vm1909_vm4, %v1929_v19, %v1931_v16  ;;  %v1504_v26 = vmax.f32 %v982_v17, 0.0 }
 0x11a   :  { %v1507_v25 = vmax.f32 %v993_v40, 0.0  ;;  %21243 = vmatmul.mubr.msk.bf16.gmra.mrb[16].mxu1 %vm1704_vm3, %v1930_v22 }
 0x11b   :  { %v1505_v27 = vmax.f32 %v985_v21, 0.0  ;;  %21246 = vmatprep.mubr.msk.bf16.mxu1 %vm1704_vm3, %v1932_v23 }
 0x11c   :  { %v1643_v28 = vpack.c.bf16 %v1507_v25, %v1506_v24 }
 0x11d   :  { %v1642_v29 = vpack.c.bf16 %v1505_v27, %v1504_v26  ;;  %v21106_v30 = vpop.f32.mrb[32].mxu0  ;;  %v1794_v31 = vld [vmem:[#allocation2 + $0x68] sm:$0xff] }
 0x11e   :  { %1720 = vst.msk [vmem:[#allocation2 + $0x78] sm:$0xff] %vm1704_vm3, %v1643_v28  ;;  %v1006_v32 = vadd.f32 %v21106_v30, %v25596_v63  ;;  %v997_v33 = vpop.f32.mrb[33].mxu0  ;;  %v1793_v34 = vld [vmem:[#allocation2 + $0x60] sm:$0xff]  ;;  %v1935_v35 = vrot.slane %v1794_v31, 4 }
 0x11f   :  { %1719 = vst.msk [vmem:[#allocation2 + $0x70] sm:$0xff] %vm1704_vm3, %v1642_v29  ;;  %v998_v36 = vadd.f32 %v25596_v63, %v997_v33  ;;  %v21107_v37 = vpop.f32.mrb[34].mxu0  ;;  %v1933_v38 = vrot.slane %v1793_v34, 4 }
 0x120   :  { %v1009_v39 = vadd.f32 %v21107_v37, %v25596_v63  ;;  %v1000_v41 = vpop.f32.mrb[35].mxu0  ;;  %v1510_v45 = vmax.f32 %v1006_v32, 0.0 }
 0x121   :  { %v1001_v42 = vadd.f32 %v25596_v63, %v1000_v41  ;;  %v1934_v43 = vsel %vm1909_vm4, %v1931_v16, %v1933_v38  ;;  %v1936_v44 = vsel %vm1909_vm4, %v1933_v38, %v1935_v35  ;;  %v1508_v47 = vmax.f32 %v998_v36, 0.0 }
 0x122   :  { %v1511_v46 = vmax.f32 %v1009_v39, 0.0  ;;  %21247 = vmatmul.mubr.msk.bf16.gmra.mrb[20].mxu1 %vm1704_vm3, %v1934_v43 }
 0x123   :  { %v1509_v48 = vmax.f32 %v1001_v42, 0.0  ;;  %21250 = vmatprep.mubr.msk.bf16.mxu1 %vm1704_vm3, %v1936_v44 }
 0x124   :  { %v1645_v49 = vpack.c.bf16 %v1511_v46, %v1510_v45 }
 0x125   :  { %v1644_v50 = vpack.c.bf16 %v1509_v48, %v1508_v47  ;;  %v21110_v51 = vpop.f32.mrb[36].mxu0  ;;  %v1796_v52 = vld [vmem:[#allocation2 + $0x78] sm:$0xff] }
 0x126   :  { %1722 = vst.msk [vmem:[#allocation2 + $0x88] sm:$0xff] %vm1704_vm3, %v1645_v49  ;;  %v1022_v53 = vadd.f32 %v21110_v51, %v25596_v63  ;;  %v1013_v54 = vpop.f32.mrb[37].mxu0  ;;  %v1795_v55 = vld [vmem:[#allocation2 + $0x70] sm:$0xff]  ;;  %v1939_v56 = vrot.slane %v1796_v52, 4 }
 0x127   :  { %1721 = vst.msk [vmem:[#allocation2 + $0x80] sm:$0xff] %vm1704_vm3, %v1644_v50  ;;  %v1014_v57 = vadd.f32 %v25596_v63, %v1013_v54  ;;  %v21111_v58 = vpop.f32.mrb[38].mxu0  ;;  %v1937_v59 = vrot.slane %v1795_v55, 4 }
 0x128   :  { %v1025_v60 = vadd.f32 %v21111_v58, %v25596_v63  ;;  %v1016_v61 = vpop.f32.mrb[39].mxu0  ;;  %v1514_v2 = vmax.f32 %v1022_v53, 0.0 }
 0x129   :  { %v1017_v62 = vadd.f32 %v25596_v63, %v1016_v61  ;;  %v1938_v0 = vsel %vm1909_vm4, %v1935_v35, %v1937_v59  ;;  %v1940_v1 = vsel %vm1909_vm4, %v1937_v59, %v1939_v56  ;;  %v1512_v4 = vmax.f32 %v1014_v57, 0.0 }
 0x12a   :  { %v1515_v3 = vmax.f32 %v1025_v60, 0.0  ;;  %21251 = vmatmul.mubr.msk.bf16.gmra.mrb[24].mxu1 %vm1704_vm3, %v1938_v0 }
 0x12b   :  { %v1513_v5 = vmax.f32 %v1017_v62, 0.0  ;;  %21254 = vmatprep.mubr.msk.bf16.mxu1 %vm1704_vm3, %v1940_v1 }
 0x12c   :  { %v1647_v6 = vpack.c.bf16 %v1515_v3, %v1514_v2 }
 0x12d   :  { %v1646_v7 = vpack.c.bf16 %v1513_v5, %v1512_v4  ;;  %v21114_v8 = vpop.f32.mrb[40].mxu0  ;;  %v1798_v9 = vld [vmem:[#allocation2 + $0x88] sm:$0xff] }
 0x12e   :  { %1724 = vst.msk [vmem:[#allocation2 + $0x98] sm:$0xff] %vm1704_vm3, %v1647_v6  ;;  %v1038_v10 = vadd.f32 %v21114_v8, %v25596_v63  ;;  %v1029_v11 = vpop.f32.mrb[41].mxu0  ;;  %v1797_v12 = vld [vmem:[#allocation2 + $0x80] sm:$0xff]  ;;  %v1943_v13 = vrot.slane %v1798_v9, 4 }
 0x12f   :  { %1723 = vst.msk [vmem:[#allocation2 + $0x90] sm:$0xff] %vm1704_vm3, %v1646_v7  ;;  %v1030_v14 = vadd.f32 %v25596_v63, %v1029_v11  ;;  %v21115_v15 = vpop.f32.mrb[42].mxu0  ;;  %v1941_v16 = vrot.slane %v1797_v12, 4 }
 0x130   :  { %v1041_v17 = vadd.f32 %v21115_v15, %v25596_v63  ;;  %v1032_v18 = vpop.f32.mrb[43].mxu0  ;;  %v1518_v21 = vmax.f32 %v1038_v10, 0.0 }
 0x131   :  { %v1033_v19 = vadd.f32 %v25596_v63, %v1032_v18  ;;  %v1942_v40 = vsel %vm1909_vm4, %v1939_v56, %v1941_v16  ;;  %v1944_v20 = vsel %vm1909_vm4, %v1941_v16, %v1943_v13  ;;  %v1516_v23 = vmax.f32 %v1030_v14, 0.0 }
 0x132   :  { %v1519_v22 = vmax.f32 %v1041_v17, 0.0  ;;  %21255 = vmatmul.mubr.msk.bf16.gmra.mrb[28].mxu1 %vm1704_vm3, %v1942_v40 }
 0x133   :  { %v1517_v24 = vmax.f32 %v1033_v19, 0.0  ;;  %21258 = vmatprep.mubr.msk.bf16.mxu1 %vm1704_vm3, %v1944_v20 }
 0x134   :  { %v1649_v25 = vpack.c.bf16 %v1519_v22, %v1518_v21 }
 0x135   :  { %v1648_v26 = vpack.c.bf16 %v1517_v24, %v1516_v23  ;;  %v21118_v27 = vpop.f32.mrb[44].mxu0  ;;  %v1800_v28 = vld [vmem:[#allocation2 + $0x98] sm:$0xff] }
 0x136   :  { %1726 = vst.msk [vmem:[#allocation2 + $0xa8] sm:$0xff] %vm1704_vm3, %v1649_v25  ;;  %v1054_v29 = vadd.f32 %v21118_v27, %v25596_v63  ;;  %v1045_v30 = vpop.f32.mrb[45].mxu0  ;;  %v1799_v31 = vld [vmem:[#allocation2 + $0x90] sm:$0xff]  ;;  %v1947_v32 = vrot.slane %v1800_v28, 4 }
 0x137   :  { %1725 = vst.msk [vmem:[#allocation2 + $0xa0] sm:$0xff] %vm1704_vm3, %v1648_v26  ;;  %v1046_v33 = vadd.f32 %v25596_v63, %v1045_v30  ;;  %v21119_v34 = vpop.f32.mrb[46].mxu0  ;;  %v1945_v35 = vrot.slane %v1799_v31, 4 }
 0x138   :  { %v1057_v36 = vadd.f32 %v21119_v34, %v25596_v63  ;;  %v1048_v37 = vpop.f32.mrb[47].mxu0  ;;  %v1522_v42 = vmax.f32 %v1054_v29, 0.0 }
 0x139   :  { %v1049_v38 = vadd.f32 %v25596_v63, %v1048_v37  ;;  %v1946_v39 = vsel %vm1909_vm4, %v1943_v13, %v1945_v35  ;;  %v1948_v41 = vsel %vm1909_vm4, %v1945_v35, %v1947_v32  ;;  %v1520_v44 = vmax.f32 %v1046_v33, 0.0 }
 0x13a   :  { %v1523_v43 = vmax.f32 %v1057_v36, 0.0  ;;  %21259 = vmatmul.mubr.msk.bf16.gmra.mrb[32].mxu1 %vm1704_vm3, %v1946_v39 }
 0x13b   :  { %v1521_v45 = vmax.f32 %v1049_v38, 0.0  ;;  %21262 = vmatprep.mubr.msk.bf16.mxu1 %vm1704_vm3, %v1948_v41 }
 0x13c   :  { %v1651_v46 = vpack.c.bf16 %v1523_v43, %v1522_v42 }
 0x13d   :  { %v1650_v47 = vpack.c.bf16 %v1521_v45, %v1520_v44  ;;  %v21122_v48 = vpop.f32.mrb[48].mxu0  ;;  %v1802_v49 = vld [vmem:[#allocation2 + $0xa8] sm:$0xff] }
 0x13e   :  { %1728 = vst.msk [vmem:[#allocation2 + $0xb8] sm:$0xff] %vm1704_vm3, %v1651_v46  ;;  %v1070_v50 = vadd.f32 %v21122_v48, %v25596_v63  ;;  %v1061_v51 = vpop.f32.mrb[49].mxu0  ;;  %v1801_v52 = vld [vmem:[#allocation2 + $0xa0] sm:$0xff]  ;;  %v1951_v53 = vrot.slane %v1802_v49, 4 }
 0x13f   :  { %1727 = vst.msk [vmem:[#allocation2 + $0xb0] sm:$0xff] %vm1704_vm3, %v1650_v47  ;;  %v1062_v54 = vadd.f32 %v25596_v63, %v1061_v51  ;;  %v21123_v55 = vpop.f32.mrb[50].mxu0  ;;  %v1949_v56 = vrot.slane %v1801_v52, 4 }
 0x140   :  { %v1073_v57 = vadd.f32 %v21123_v55, %v25596_v63  ;;  %v1064_v58 = vpop.f32.mrb[51].mxu0  ;;  %v1526_v62 = vmax.f32 %v1070_v50, 0.0 }
 0x141   :  { %v1065_v59 = vadd.f32 %v25596_v63, %v1064_v58  ;;  %v1950_v60 = vsel %vm1909_vm4, %v1947_v32, %v1949_v56  ;;  %v1952_v61 = vsel %vm1909_vm4, %v1949_v56, %v1951_v53  ;;  %v1524_v1 = vmax.f32 %v1062_v54, 0.0 }
 0x142   :  { %v1527_v0 = vmax.f32 %v1073_v57, 0.0  ;;  %21263 = vmatmul.mubr.msk.bf16.gmra.mrb[36].mxu1 %vm1704_vm3, %v1950_v60 }
 0x143   :  { %v1525_v2 = vmax.f32 %v1065_v59, 0.0  ;;  %21266 = vmatprep.mubr.msk.bf16.mxu1 %vm1704_vm3, %v1952_v61 }
 0x144   :  { %v1653_v3 = vpack.c.bf16 %v1527_v0, %v1526_v62 }
 0x145   :  { %v1652_v4 = vpack.c.bf16 %v1525_v2, %v1524_v1  ;;  %v21126_v5 = vpop.f32.mrb[52].mxu0  ;;  %v25754_v6 = vld [vmem:[#allocation2 + $0xb8] sm:$0xff] }
 0x146   :  { %1730 = vst.msk [vmem:[#allocation2 + $0xc8] sm:$0xff] %vm1704_vm3, %v1653_v3  ;;  %v1086_v7 = vadd.f32 %v21126_v5, %v25596_v63  ;;  %v1077_v8 = vpop.f32.mrb[53].mxu0  ;;  %v25758_v9 = vld [vmem:[#allocation2 + $0xb0] sm:$0xff]  ;;  %v1955_v10 = vrot.slane %v25754_v6, 4 }
 0x147   :  { %1729 = vst.msk [vmem:[#allocation2 + $0xc0] sm:$0xff] %vm1704_vm3, %v1652_v4  ;;  %v1078_v11 = vadd.f32 %v25596_v63, %v1077_v8  ;;  %v21127_v12 = vpop.f32.mrb[54].mxu0  ;;  %v1953_v13 = vrot.slane %v25758_v9, 4 }
 0x148   :  { %v1089_v14 = vadd.f32 %v21127_v12, %v25596_v63  ;;  %v1080_v15 = vpop.f32.mrb[55].mxu0  ;;  %v1530_v19 = vmax.f32 %v1086_v7, 0.0 }
 0x149   :  { %v1081_v16 = vadd.f32 %v25596_v63, %v1080_v15  ;;  %v1954_v17 = vsel %vm1909_vm4, %v1951_v53, %v1953_v13  ;;  %v1956_v18 = vsel %vm1909_vm4, %v1953_v13, %v1955_v10  ;;  %v1528_v20 = vmax.f32 %v1078_v11, 0.0 }
 0x14a   :  { %v1531_v40 = vmax.f32 %v1089_v14, 0.0  ;;  %21267 = vmatmul.mubr.msk.bf16.gmra.mrb[40].mxu1 %vm1704_vm3, %v1954_v17 }
 0x14b   :  { %v1529_v21 = vmax.f32 %v1081_v16, 0.0  ;;  %21270 = vmatprep.mubr.msk.bf16.mxu1 %vm1704_vm3, %v1956_v18 }
 0x14c   :  { %v1655_v22 = vpack.c.bf16 %v1531_v40, %v1530_v19 }
 0x14d   :  { %v1654_v23 = vpack.c.bf16 %v1529_v21, %v1528_v20  ;;  %v21130_v24 = vpop.f32.mrb[56].mxu0  ;;  %v25770_v25 = vld [vmem:[#allocation2 + $0xc8] sm:$0xff]  ;;  %v25821_v21 = vld [vmem:[%s30053_s3 + $0x10] sm:$0xff]  }
 0x14e   :  { %1732 = vst.msk [vmem:[#allocation2 + $0xd8] sm:$0xff] %vm1704_vm3, %v1655_v22  ;;  %v1102_v26 = vadd.f32 %v21130_v24, %v25596_v63  ;;  %v1093_v27 = vpop.f32.mrb[57].mxu0  ;;  %v25774_v28 = vld [vmem:[#allocation2 + $0xc0] sm:$0xff]  ;;  %v1959_v29 = vrot.slane %v25770_v25, 4  ;;  %21468 = vmatprep.subr.bf16.mxu1 %v25821_v21 }
 0x14f   :  { %1731 = vst.msk [vmem:[#allocation2 + $0xd0] sm:$0xff] %vm1704_vm3, %v1654_v23  ;;  %v1094_v30 = vadd.f32 %v25596_v63, %v1093_v27  ;;  %v21131_v31 = vpop.f32.mrb[58].mxu0  ;;  %v1957_v32 = vrot.slane %v25774_v28, 4 }
 0x150   :  { %v1105_v33 = vadd.f32 %v21131_v31, %v25596_v63  ;;  %v1096_v34 = vpop.f32.mrb[59].mxu0  ;;  %v1534_v38 = vmax.f32 %v1102_v26, 0.0 }
 0x151   :  { %v1097_v35 = vadd.f32 %v25596_v63, %v1096_v34  ;;  %v1958_v36 = vsel %vm1909_vm4, %v1955_v10, %v1957_v32  ;;  %v1960_v37 = vsel %vm1909_vm4, %v1957_v32, %v1959_v29  ;;  %v1532_v41 = vmax.f32 %v1094_v30, 0.0 }
 0x152   :  { %v1535_v39 = vmax.f32 %v1105_v33, 0.0  ;;  %21271 = vmatmul.mubr.msk.bf16.gmra.mrb[44].mxu1 %vm1704_vm3, %v1958_v36 }
 0x153   :  { %v1533_v42 = vmax.f32 %v1097_v35, 0.0  ;;  %21274 = vmatprep.mubr.msk.bf16.mxu1 %vm1704_vm3, %v1960_v37 }
 0x154   :  { %v1657_v43 = vpack.c.bf16 %v1535_v39, %v1534_v38 }
 0x155   :  { %v1656_v44 = vpack.c.bf16 %v1533_v42, %v1532_v41  ;;  %v21134_v45 = vpop.f32.mrb[60].mxu0  ;;  %v25786_v46 = vld [vmem:[#allocation2 + $0xd8] sm:$0xff] }
 0x156   :  { %1734 = vst.msk [vmem:[#allocation2 + $0xe8] sm:$0xff] %vm1704_vm3, %v1657_v43  ;;  %v1118_v47 = vadd.f32 %v21134_v45, %v25596_v63  ;;  %v1109_v48 = vpop.f32.mrb[61].mxu0  ;;  %v25790_v49 = vld [vmem:[#allocation2 + $0xd0] sm:$0xff]  ;;  %v1963_v50 = vrot.slane %v25786_v46, 4 }
 0x157   :  { %1733 = vst.msk [vmem:[#allocation2 + $0xe0] sm:$0xff] %vm1704_vm3, %v1656_v44  ;;  %v1110_v51 = vadd.f32 %v25596_v63, %v1109_v48  ;;  %v21135_v52 = vpop.f32.mrb[62].mxu0  ;;  %v1961_v53 = vrot.slane %v25790_v49, 4 }
 0x158   :  { %v1121_v54 = vadd.f32 %v21135_v52, %v25596_v63  ;;  %v1112_v55 = vpop.f32.mrb[63].mxu0  ;;  %v1538_v59 = vmax.f32 %v1118_v47, 0.0 }
 0x159   :  { %v1113_v56 = vadd.f32 %v25596_v63, %v1112_v55  ;;  %v1962_v57 = vsel %vm1909_vm4, %v1959_v29, %v1961_v53  ;;  %v1964_v58 = vsel %vm1909_vm4, %v1961_v53, %v1963_v50  ;;  %v1536_v61 = vmax.f32 %v1110_v51, 0.0 }
 0x15a   :  { %v1539_v60 = vmax.f32 %v1121_v54, 0.0  ;;  %21275 = vmatmul.mubr.msk.bf16.gmra.mrb[48].mxu1 %vm1704_vm3, %v1962_v57 }
 0x15b   :  { %v1537_v62 = vmax.f32 %v1113_v56, 0.0  ;;  %21278 = vmatprep.mubr.msk.bf16.mxu1 %vm1704_vm3, %v1964_v58 }
 0x15c   :  { %v1659_v0 = vpack.c.bf16 %v1539_v60, %v1538_v59 }
 0x15d   :  { %v1658_v1 = vpack.c.bf16 %v1537_v62, %v1536_v61  ;;  %v21138_v2 = vpop.f32.mrb[64].mxu0  ;;  %v25802_v3 = vld [vmem:[#allocation2 + $0xe8] sm:$0xff] }
 0x15e   :  { %1736 = vst.msk [vmem:[#allocation2 + $0xf8] sm:$0xff] %vm1704_vm3, %v1659_v0  ;;  %v1134_v4 = vadd.f32 %v21138_v2, %v25596_v63  ;;  %v1125_v5 = vpop.f32.mrb[65].mxu0  ;;  %v25806_v7 = vld [vmem:[#allocation2 + $0xe0] sm:$0xff]  ;;  %v1967_v8 = vrot.slane %v25802_v3, 4 }
 0x15f   :  { %1735 = vst.msk [vmem:[#allocation2 + $0xf0] sm:$0xff] %vm1704_vm3, %v1658_v1  ;;  %v1126_v10 = vadd.f32 %v25596_v63, %v1125_v5  ;;  %v21139_v11 = vpop.f32.mrb[66].mxu0  ;;  %v1965_v12 = vrot.slane %v25806_v7, 4 }
 0x160   :  { %v1137_v13 = vadd.f32 %v21139_v11, %v25596_v63  ;;  %v1128_v14 = vpop.f32.mrb[67].mxu0  ;;  %v1542_v18 = vmax.f32 %v1134_v4, 0.0 }
 0x161   :  { %v1129_v15 = vadd.f32 %v25596_v63, %v1128_v14  ;;  %v1966_v16 = vsel %vm1909_vm4, %v1963_v50, %v1965_v12  ;;  %v1968_v17 = vsel %vm1909_vm4, %v1965_v12, %v1967_v8  ;;  %v1540_v40 = vmax.f32 %v1126_v10, 0.0 }
 0x162   :  { %v1543_v19 = vmax.f32 %v1137_v13, 0.0  ;;  %21279 = vmatmul.mubr.msk.bf16.gmra.mrb[52].mxu1 %vm1704_vm3, %v1966_v16 }
 0x163   :  { %v1541_v20 = vmax.f32 %v1129_v15, 0.0  ;;  %21282 = vmatprep.mubr.msk.bf16.mxu1 %vm1704_vm3, %v1968_v17 }
 0x164   :  { %v1661_v22 = vpack.c.bf16 %v1543_v19, %v1542_v18 }
 0x165   :  { %v1660_v23 = vpack.c.bf16 %v1541_v20, %v1540_v40  ;;  %v21142_v24 = vpop.f32.mrb[68].mxu0  ;;  %v25823_v26 = vld [vmem:[#allocation2 + $0xf8] sm:$0xff] }
 0x166   :  { %1738 = vst.msk [vmem:[#allocation2 + $0x108] sm:$0xff] %vm1704_vm3, %v1661_v22  ;;  %v1150_v27 = vadd.f32 %v21142_v24, %v25596_v63  ;;  %v1141_v29 = vpop.f32.mrb[69].mxu0  ;;  %v25828_v30 = vld [vmem:[#allocation2 + $0xf0] sm:$0xff]  ;;  %v1971_v31 = vrot.slane %v25823_v26, 4 }
 0x167   :  { %1737 = vst.msk [vmem:[#allocation2 + $0x100] sm:$0xff] %vm1704_vm3, %v1660_v23  ;;  %v1142_v32 = vadd.f32 %v25596_v63, %v1141_v29  ;;  %v21143_v33 = vpop.f32.mrb[70].mxu0  ;;  %v1969_v34 = vrot.slane %v25828_v30, 4 }
 0x168   :  { %v1153_v35 = vadd.f32 %v21143_v33, %v25596_v63  ;;  %v1144_v36 = vpop.f32.mrb[71].mxu0  ;;  %v1546_v41 = vmax.f32 %v1150_v27, 0.0 }
 0x169   :  { %v1145_v37 = vadd.f32 %v25596_v63, %v1144_v36  ;;  %v1970_v38 = vsel %vm1909_vm4, %v1967_v8, %v1969_v34  ;;  %v1972_v39 = vsel %vm1909_vm4, %v1969_v34, %v1971_v31  ;;  %v1544_v43 = vmax.f32 %v1142_v32, 0.0 }
 0x16a   :  { %v1547_v42 = vmax.f32 %v1153_v35, 0.0  ;;  %21283 = vmatmul.mubr.msk.bf16.gmra.mrb[56].mxu1 %vm1704_vm3, %v1970_v38 }
 0x16b   :  { %v1545_v44 = vmax.f32 %v1145_v37, 0.0  ;;  %21286 = vmatprep.mubr.msk.bf16.mxu1 %vm1704_vm3, %v1972_v39 }
 0x16c   :  { %v1663_v45 = vpack.c.bf16 %v1547_v42, %v1546_v41 }
 0x16d   :  { %v1662_v47 = vpack.c.bf16 %v1545_v44, %v1544_v43  ;;  %v21146_v48 = vpop.f32.mrb[72].mxu0  ;;  %v25840_v50 = vld [vmem:[#allocation2 + $0x108] sm:$0xff] }
 0x16e   :  { %1740 = vst.msk [vmem:[#allocation2 + $0x118] sm:$0xff] %vm1704_vm3, %v1663_v45  ;;  %v1166_v51 = vadd.f32 %v21146_v48, %v25596_v63  ;;  %v1157_v52 = vpop.f32.mrb[73].mxu0  ;;  %v25844_v53 = vld [vmem:[#allocation2 + $0x100] sm:$0xff]  ;;  %v1975_v54 = vrot.slane %v25840_v50, 4 }
 0x16f   :  { %1739 = vst.msk [vmem:[#allocation2 + $0x110] sm:$0xff] %vm1704_vm3, %v1662_v47  ;;  %v1158_v55 = vadd.f32 %v25596_v63, %v1157_v52  ;;  %v21147_v56 = vpop.f32.mrb[74].mxu0  ;;  %v1973_v57 = vrot.slane %v25844_v53, 4 }
 0x170   :  { %v1169_v58 = vadd.f32 %v21147_v56, %v25596_v63  ;;  %v1160_v59 = vpop.f32.mrb[75].mxu0  ;;  %v1550_v0 = vmax.f32 %v1166_v51, 0.0 }
 0x171   :  { %v1161_v60 = vadd.f32 %v25596_v63, %v1160_v59  ;;  %v1974_v61 = vsel %vm1909_vm4, %v1971_v31, %v1973_v57  ;;  %v1976_v62 = vsel %vm1909_vm4, %v1973_v57, %v1975_v54  ;;  %v1548_v2 = vmax.f32 %v1158_v55, 0.0 }
 0x172   :  { %v1551_v1 = vmax.f32 %v1169_v58, 0.0  ;;  %21287 = vmatmul.mubr.msk.bf16.gmra.mrb[60].mxu1 %vm1704_vm3, %v1974_v61 }
 0x173   :  { %v1549_v4 = vmax.f32 %v1161_v60, 0.0  ;;  %21290 = vmatprep.mubr.msk.bf16.mxu1 %vm1704_vm3, %v1976_v62 }
 0x174   :  { %v1665_v5 = vpack.c.bf16 %v1551_v1, %v1550_v0 }
 0x175   :  { %v1664_v8 = vpack.c.bf16 %v1549_v4, %v1548_v2  ;;  %v21150_v10 = vpop.f32.mrb[76].mxu0  ;;  %v25856_v11 = vld [vmem:[#allocation2 + $0x118] sm:$0xff] }
 0x176   :  { %1742 = vst.msk [vmem:[#allocation2 + $0x128] sm:$0xff] %vm1704_vm3, %v1665_v5  ;;  %v1182_v12 = vadd.f32 %v21150_v10, %v25596_v63  ;;  %v1173_v13 = vpop.f32.mrb[77].mxu0  ;;  %v25860_v14 = vld [vmem:[#allocation2 + $0x110] sm:$0xff]  ;;  %v1979_v15 = vrot.slane %v25856_v11, 4 }
 0x177   :  { %1741 = vst.msk [vmem:[#allocation2 + $0x120] sm:$0xff] %vm1704_vm3, %v1664_v8  ;;  %v1174_v16 = vadd.f32 %v25596_v63, %v1173_v13  ;;  %v21151_v17 = vpop.f32.mrb[78].mxu0  ;;  %v1977_v18 = vrot.slane %v25860_v14, 4 }
 0x178   :  { %v1185_v19 = vadd.f32 %v21151_v17, %v25596_v63  ;;  %v1176_v40 = vpop.f32.mrb[79].mxu0  ;;  %v1554_v24 = vmax.f32 %v1182_v12, 0.0 }
 0x179   :  { %v1177_v20 = vadd.f32 %v25596_v63, %v1176_v40  ;;  %v1978_v22 = vsel %vm1909_vm4, %v1975_v54, %v1977_v18  ;;  %v1980_v23 = vsel %vm1909_vm4, %v1977_v18, %v1979_v15  ;;  %v1552_v29 = vmax.f32 %v1174_v16, 0.0 }
 0x17a   :  { %v1555_v27 = vmax.f32 %v1185_v19, 0.0  ;;  %21291 = vmatmul.mubr.msk.bf16.gmra.mrb[64].mxu1 %vm1704_vm3, %v1978_v22 }
 0x17b   :  { %v1553_v31 = vmax.f32 %v1177_v20, 0.0  ;;  %21294 = vmatprep.mubr.msk.bf16.mxu1 %vm1704_vm3, %v1980_v23 }
 0x17c   :  { %v1667_v32 = vpack.c.bf16 %v1555_v27, %v1554_v24 }
 0x17d   :  { %v1666_v33 = vpack.c.bf16 %v1553_v31, %v1552_v29  ;;  %v21154_v34 = vpop.f32.mrb[80].mxu0  ;;  %v25872_v35 = vld [vmem:[#allocation2 + $0x128] sm:$0xff] }
 0x17e   :  { %1744 = vst.msk [vmem:[#allocation2 + $0x138] sm:$0xff] %vm1704_vm3, %v1667_v32  ;;  %v1198_v36 = vadd.f32 %v21154_v34, %v25596_v63  ;;  %v1189_v37 = vpop.f32.mrb[81].mxu0  ;;  %v25876_v38 = vld [vmem:[#allocation2 + $0x120] sm:$0xff]  ;;  %v1983_v39 = vrot.slane %v25872_v35, 4 }
 0x17f   :  { %1743 = vst.msk [vmem:[#allocation2 + $0x130] sm:$0xff] %vm1704_vm3, %v1666_v33  ;;  %v1190_v41 = vadd.f32 %v25596_v63, %v1189_v37  ;;  %v21155_v42 = vpop.f32.mrb[82].mxu0  ;;  %v1981_v43 = vrot.slane %v25876_v38, 4 }
 0x180   :  { %v1201_v44 = vadd.f32 %v21155_v42, %v25596_v63  ;;  %v1192_v45 = vpop.f32.mrb[83].mxu0  ;;  %v1558_v52 = vmax.f32 %v1198_v36, 0.0 }
 0x181   :  { %v1193_v47 = vadd.f32 %v25596_v63, %v1192_v45  ;;  %v1982_v48 = vsel %vm1909_vm4, %v1979_v15, %v1981_v43  ;;  %v1984_v51 = vsel %vm1909_vm4, %v1981_v43, %v1983_v39  ;;  %v1556_v55 = vmax.f32 %v1190_v41, 0.0  ;;  %v25894_v63 = vld [vmem:[%s30054_s2] ss:$0 sm:$0xff] }
 0x182   :  { %v1559_v54 = vmax.f32 %v1201_v44, 0.0  ;;  %21295 = vmatmul.mubr.msk.bf16.gmra.mrb[68].mxu1 %vm1704_vm3, %v1982_v48 }
 0x183   :  { %v1557_v56 = vmax.f32 %v1193_v47, 0.0  ;;  %21298 = vmatprep.mubr.msk.bf16.mxu1 %vm1704_vm3, %v1984_v51 }
 0x184   :  { %v1669_v57 = vpack.c.bf16 %v1559_v54, %v1558_v52 }
 0x185   :  { %v1668_v58 = vpack.c.bf16 %v1557_v56, %v1556_v55  ;;  %v21158_v59 = vpop.f32.mrb[84].mxu0  ;;  %v25888_v60 = vld [vmem:[#allocation2 + $0x138] sm:$0xff] }
 0x186   :  { %1746 = vst.msk [vmem:[#allocation2 + $0x148] sm:$0xff] %vm1704_vm3, %v1669_v57  ;;  %v1214_v61 = vadd.f32 %v25894_v63, %v21158_v59  ;;  %v1205_v62 = vpop.f32.mrb[85].mxu0  ;;  %v25897_v0 = vld [vmem:[#allocation2 + $0x130] sm:$0xff]  ;;  %v1987_v1 = vrot.slane %v25888_v60, 4 }
 0x187   :  { %1745 = vst.msk [vmem:[#allocation2 + $0x140] sm:$0xff] %vm1704_vm3, %v1668_v58  ;;  %v1206_v2 = vadd.f32 %v25894_v63, %v1205_v62  ;;  %v21159_v4 = vpop.f32.mrb[86].mxu0  ;;  %v25903_v5 = vrot.slane %v25897_v0, 4 }
 0x188   :  { %v1217_v8 = vadd.f32 %v25894_v63, %v21159_v4  ;;  %v1208_v10 = vpop.f32.mrb[87].mxu0  ;;  %v1562_v16 = vmax.f32 %v1214_v61, 0.0 }
 0x189   :  { %v1209_v12 = vadd.f32 %v25894_v63, %v1208_v10  ;;  %v1986_v13 = vsel %vm1909_vm4, %v1983_v39, %v25903_v5  ;;  %v25911_v15 = vsel %vm1909_vm4, %v25903_v5, %v1987_v1  ;;  %v1560_v18 = vmax.f32 %v1206_v2, 0.0 }
 0x18a   :  { %v1563_v17 = vmax.f32 %v1217_v8, 0.0  ;;  %21299 = vmatmul.mubr.msk.bf16.gmra.mrb[72].mxu1 %vm1704_vm3, %v1986_v13 }
 0x18b   :  { %v1561_v19 = vmax.f32 %v1209_v12, 0.0  ;;  %21302 = vmatprep.mubr.msk.bf16.mxu1 %vm1704_vm3, %v25911_v15 }
 0x18c   :  { %v1671_v40 = vpack.c.bf16 %v1563_v17, %v1562_v16 }
 0x18d   :  { %v1670_v20 = vpack.c.bf16 %v1561_v19, %v1560_v18  ;;  %v21162_v22 = vpop.f32.mrb[88].mxu0  ;;  %v25916_v23 = vld [vmem:[#allocation2 + $0x148] sm:$0xff] }
 0x18e   :  { %1748 = vst.msk [vmem:[#allocation2 + $0x158] sm:$0xff] %vm1704_vm3, %v1671_v40  ;;  %v1230_v24 = vadd.f32 %v25894_v63, %v21162_v22  ;;  %v1221_v27 = vpop.f32.mrb[89].mxu0  ;;  %v25920_v29 = vld [vmem:[#allocation2 + $0x140] sm:$0xff]  ;;  %v1991_v31 = vrot.slane %v25916_v23, 4 }
 0x18f   :  { %1747 = vst.msk [vmem:[#allocation2 + $0x150] sm:$0xff] %vm1704_vm3, %v1670_v20  ;;  %v1222_v32 = vadd.f32 %v25894_v63, %v1221_v27  ;;  %v21163_v33 = vpop.f32.mrb[90].mxu0  ;;  %v1989_v34 = vrot.slane %v25920_v29, 4 }
 0x190   :  { %v1233_v36 = vadd.f32 %v25894_v63, %v21163_v33  ;;  %v1224_v37 = vpop.f32.mrb[91].mxu0  ;;  %v1566_v43 = vmax.f32 %v1230_v24, 0.0 }
 0x191   :  { %v1225_v39 = vadd.f32 %v25894_v63, %v1224_v37  ;;  %v25929_v41 = vsel %vm1909_vm4, %v1987_v1, %v1989_v34  ;;  %v25932_v42 = vsel %vm1909_vm4, %v1989_v34, %v1991_v31  ;;  %v1564_v45 = vmax.f32 %v1222_v32, 0.0 }
 0x192   :  { %v1567_v44 = vmax.f32 %v1233_v36, 0.0  ;;  %21303 = vmatmul.mubr.msk.bf16.gmra.mrb[76].mxu1 %vm1704_vm3, %v25929_v41 }
 0x193   :  { %v1565_v47 = vmax.f32 %v1225_v39, 0.0  ;;  %21306 = vmatprep.mubr.msk.bf16.mxu1 %vm1704_vm3, %v25932_v42 }
 0x194   :  { %v1673_v48 = vpack.c.bf16 %v1567_v44, %v1566_v43 }
 0x195   :  { %v1672_v51 = vpack.c.bf16 %v1565_v47, %v1564_v45  ;;  %v21166_v52 = vpop.f32.mrb[92].mxu0  ;;  %v25938_v54 = vld [vmem:[#allocation2 + $0x158] sm:$0xff] }
 0x196   :  { %1750 = vst.msk [vmem:[#allocation2 + $0x168] sm:$0xff] %vm1704_vm3, %v1673_v48  ;;  %v1246_v55 = vadd.f32 %v25894_v63, %v21166_v52  ;;  %v1237_v56 = vpop.f32.mrb[93].mxu0  ;;  %v25942_v57 = vld [vmem:[#allocation2 + $0x150] sm:$0xff]  ;;  %v1995_v58 = vrot.slane %v25938_v54, 4 }
 0x197   :  { %1749 = vst.msk [vmem:[#allocation2 + $0x160] sm:$0xff] %vm1704_vm3, %v1672_v51  ;;  %v1238_v59 = vadd.f32 %v25894_v63, %v1237_v56  ;;  %v21167_v61 = vpop.f32.mrb[94].mxu0  ;;  %v1993_v62 = vrot.slane %v25942_v57, 4 }
 0x198   :  { %v1249_v1 = vadd.f32 %v25894_v63, %v21167_v61  ;;  %v1240_v2 = vpop.f32.mrb[95].mxu0  ;;  %v1570_v12 = vmax.f32 %v1246_v55, 0.0 }
 0x199   :  { %v1241_v4 = vadd.f32 %v25894_v63, %v1240_v2  ;;  %v25951_v8 = vsel %vm1909_vm4, %v1991_v31, %v1993_v62  ;;  %v25954_v10 = vsel %vm1909_vm4, %v1993_v62, %v1995_v58  ;;  %v1568_v16 = vmax.f32 %v1238_v59, 0.0 }
 0x19a   :  { %30171 = vst [vmem:[#allocation6_spill] sm:$0xff] %v25951_v8  ;;  %30172 = vst [vmem:[#allocation7_spill] sm:$0xff] %v25954_v10  ;;  %v1571_v13 = vmax.f32 %v1249_v1, 0.0  ;;  %21307 = vmatmul.mubr.msk.bf16.gmra.mrb[80].mxu1 %vm1704_vm3, %v25951_v8  ;;  %v26226_v8 = vld [vmem:[#allocation2 + $0xa8] sm:$0xff] }
 0x19b   :  { %v1569_v17 = vmax.f32 %v1241_v4, 0.0  ;;  %21310 = vmatprep.mubr.msk.bf16.mxu1 %vm1704_vm3, %v25954_v10  ;;  %v26222_v10 = vld [vmem:[#allocation2 + $0xa0] sm:$0xff] }
 0x19c   :  { %v1675_v18 = vpack.c.bf16 %v1571_v13, %v1570_v12 }
 0x19d   :  { %v1674_v19 = vpack.c.bf16 %v1569_v17, %v1568_v16  ;;  %v21170_v40 = vpop.f32.mrb[96].mxu0  ;;  %v25960_v20 = vld [vmem:[#allocation2 + $0x168] sm:$0xff] }
 0x19e   :  { %1752 = vst.msk [vmem:[#allocation2 + $0x178] sm:$0xff] %vm1704_vm3, %v1675_v18  ;;  %v1262_v22 = vadd.f32 %v25894_v63, %v21170_v40  ;;  %v1253_v24 = vpop.f32.mrb[97].mxu0  ;;  %v25964_v27 = vld [vmem:[#allocation2 + $0x160] sm:$0xff]  ;;  %v1999_v31 = vrot.slane %v25960_v20, 4 }
 0x19f   :  { %1751 = vst.msk [vmem:[#allocation2 + $0x170] sm:$0xff] %vm1704_vm3, %v1674_v19  ;;  %v1254_v32 = vadd.f32 %v25894_v63, %v1253_v24  ;;  %v21171_v33 = vpop.f32.mrb[98].mxu0  ;;  %v1997_v34 = vrot.slane %v25964_v27, 4 }
 0x1a0   :  { %v1265_v36 = vadd.f32 %v25894_v63, %v21171_v33  ;;  %v1256_v37 = vpop.f32.mrb[99].mxu0  ;;  %v1574_v45 = vmax.f32 %v1262_v22, 0.0 }
 0x1a1   :  { %v1257_v39 = vadd.f32 %v25894_v63, %v1256_v37  ;;  %v25973_v43 = vsel %vm1909_vm4, %v1995_v58, %v1997_v34  ;;  %v25976_v44 = vsel %vm1909_vm4, %v1997_v34, %v1999_v31  ;;  %v1572_v48 = vmax.f32 %v1254_v32, 0.0 }
 0x1a2   :  { %30173 = vst [vmem:[#allocation8_spill] sm:$0xff] %v25973_v43  ;;  %30174 = vst [vmem:[#allocation9_spill] sm:$0xff] %v25976_v44  ;;  %v1575_v47 = vmax.f32 %v1265_v36, 0.0  ;;  %21311 = vmatmul.mubr.msk.bf16.gmra.mrb[84].mxu1 %vm1704_vm3, %v25973_v43  ;;  %v26218_v43 = vld [vmem:[#allocation2 + $0x98] sm:$0xff] }
 0x1a3   :  { %v1573_v51 = vmax.f32 %v1257_v39, 0.0  ;;  %21314 = vmatprep.mubr.msk.bf16.mxu1 %vm1704_vm3, %v25976_v44  ;;  %v26214_v44 = vld [vmem:[#allocation2 + $0x90] sm:$0xff] }
 0x1a4   :  { %v1677_v52 = vpack.c.bf16 %v1575_v47, %v1574_v45 }
 0x1a5   :  { %v1676_v55 = vpack.c.bf16 %v1573_v51, %v1572_v48  ;;  %v21174_v56 = vpop.f32.mrb[100].mxu0  ;;  %v25982_v59 = vld [vmem:[#allocation2 + $0x178] sm:$0xff] }
 0x1a6   :  { %1754 = vst.msk [vmem:[#allocation2 + $0x188] sm:$0xff] %vm1704_vm3, %v1677_v52  ;;  %v1278_v58 = vadd.f32 %v25894_v63, %v21174_v56  ;;  %v1269_v61 = vpop.f32.mrb[101].mxu0  ;;  %v25986_v62 = vld [vmem:[#allocation2 + $0x170] sm:$0xff]  ;;  %v2003_v1 = vrot.slane %v25982_v59, 4 }
 0x1a7   :  { %1753 = vst.msk [vmem:[#allocation2 + $0x180] sm:$0xff] %vm1704_vm3, %v1676_v55  ;;  %v1270_v2 = vadd.f32 %v25894_v63, %v1269_v61  ;;  %v21175_v4 = vpop.f32.mrb[102].mxu0  ;;  %v2001_v12 = vrot.slane %v25986_v62, 4 }
 0x1a8   :  { %v1281_v13 = vadd.f32 %v25894_v63, %v21175_v4  ;;  %v1272_v16 = vpop.f32.mrb[103].mxu0  ;;  %v1578_v40 = vmax.f32 %v1278_v58, 0.0 }
 0x1a9   :  { %v1273_v17 = vadd.f32 %v25894_v63, %v1272_v16  ;;  %v25995_v18 = vsel %vm1909_vm4, %v1999_v31, %v2001_v12  ;;  %v25998_v19 = vsel %vm1909_vm4, %v2001_v12, %v2003_v1  ;;  %v1576_v24 = vmax.f32 %v1270_v2, 0.0 }
 0x1aa   :  { %30175 = vst [vmem:[#allocation10_spill] sm:$0xff] %v25995_v18  ;;  %30176 = vst [vmem:[#allocation11_spill] sm:$0xff] %v25998_v19  ;;  %v1579_v22 = vmax.f32 %v1281_v13, 0.0  ;;  %21315 = vmatmul.mubr.msk.bf16.gmra.mrb[88].mxu1 %vm1704_vm3, %v25995_v18  ;;  %v26210_v18 = vld [vmem:[#allocation2 + $0x88] sm:$0xff] }
 0x1ab   :  { %v1577_v32 = vmax.f32 %v1273_v17, 0.0  ;;  %21318 = vmatprep.mubr.msk.bf16.mxu1 %vm1704_vm3, %v25998_v19 }
 0x1ac   :  { %v1679_v33 = vpack.c.bf16 %v1579_v22, %v1578_v40 }
 0x1ad   :  { %v1678_v34 = vpack.c.bf16 %v1577_v32, %v1576_v24  ;;  %v21178_v36 = vpop.f32.mrb[104].mxu0  ;;  %v26004_v37 = vld [vmem:[#allocation2 + $0x188] sm:$0xff] }
 0x1ae   :  { %1756 = vst.msk [vmem:[#allocation2 + $0x198] sm:$0xff] %vm1704_vm3, %v1679_v33  ;;  %v1294_v31 = vadd.f32 %v25894_v63, %v21178_v36  ;;  %v1285_v39 = vpop.f32.mrb[105].mxu0  ;;  %v26008_v45 = vld [vmem:[#allocation2 + $0x180] sm:$0xff]  ;;  %v2007_v47 = vrot.slane %v26004_v37, 4 }
 0x1af   :  { %1755 = vst.msk [vmem:[#allocation2 + $0x190] sm:$0xff] %vm1704_vm3, %v1678_v34  ;;  %v1286_v48 = vadd.f32 %v25894_v63, %v1285_v39  ;;  %v21179_v51 = vpop.f32.mrb[106].mxu0  ;;  %v2005_v52 = vrot.slane %v26008_v45, 4 }
 0x1b0   :  { %v1297_v55 = vadd.f32 %v25894_v63, %v21179_v51  ;;  %v1288_v56 = vpop.f32.mrb[107].mxu0  ;;  %v1582_v4 = vmax.f32 %v1294_v31, 0.0 }
 0x1b1   :  { %v1289_v58 = vadd.f32 %v25894_v63, %v1288_v56  ;;  %v26017_v61 = vsel %vm1909_vm4, %v2003_v1, %v2005_v52  ;;  %v26020_v2 = vsel %vm1909_vm4, %v2005_v52, %v2007_v47  ;;  %v1580_v13 = vmax.f32 %v1286_v48, 0.0 }
 0x1b2   :  { %30177 = vst [vmem:[#allocation12_spill] sm:$0xff] %v26017_v61  ;;  %30178 = vst [vmem:[#allocation13_spill] sm:$0xff] %v26020_v2  ;;  %v1583_v12 = vmax.f32 %v1297_v55, 0.0  ;;  %21319 = vmatmul.mubr.msk.bf16.gmra.mrb[92].mxu1 %vm1704_vm3, %v26017_v61 }
 0x1b3   :  { %v1581_v16 = vmax.f32 %v1289_v58, 0.0  ;;  %21322 = vmatprep.mubr.msk.bf16.mxu1 %vm1704_vm3, %v26020_v2 }
 0x1b4   :  { %v1681_v17 = vpack.c.bf16 %v1583_v12, %v1582_v4 }
 0x1b5   :  { %v1680_v40 = vpack.c.bf16 %v1581_v16, %v1580_v13  ;;  %v21182_v22 = vpop.f32.mrb[108].mxu0  ;;  %v26026_v24 = vld [vmem:[#allocation2 + $0x198] sm:$0xff] }
 0x1b6   :  { %1758 = vst.msk [vmem:[#allocation2 + $0x1a8] sm:$0xff] %vm1704_vm3, %v1681_v17  ;;  %v1310_v1 = vadd.f32 %v25894_v63, %v21182_v22  ;;  %v1301_v32 = vpop.f32.mrb[109].mxu0  ;;  %v26030_v33 = vld [vmem:[#allocation2 + $0x190] sm:$0xff]  ;;  %v2011_v34 = vrot.slane %v26026_v24, 4 }
 0x1b7   :  { %1757 = vst.msk [vmem:[#allocation2 + $0x1a0] sm:$0xff] %vm1704_vm3, %v1680_v40  ;;  %v1302_v36 = vadd.f32 %v25894_v63, %v1301_v32  ;;  %v21183_v31 = vpop.f32.mrb[110].mxu0  ;;  %v2009_v39 = vrot.slane %v26030_v33, 4 }
 0x1b8   :  { %v1313_v48 = vadd.f32 %v25894_v63, %v21183_v31  ;;  %v1304_v51 = vpop.f32.mrb[111].mxu0  ;;  %v1586_v58 = vmax.f32 %v1310_v1, 0.0 }
 0x1b9   :  { %v1305_v52 = vadd.f32 %v25894_v63, %v1304_v51  ;;  %v26039_v55 = vsel %vm1909_vm4, %v2007_v47, %v2009_v39  ;;  %v26042_v56 = vsel %vm1909_vm4, %v2009_v39, %v2011_v34  ;;  %v1584_v12 = vmax.f32 %v1302_v36, 0.0 }
 0x1ba   :  { %30179 = vst [vmem:[#allocation14_spill] sm:$0xff] %v26039_v55  ;;  %30180 = vst [vmem:[#allocation15_spill] sm:$0xff] %v26042_v56  ;;  %v1587_v4 = vmax.f32 %v1313_v48, 0.0  ;;  %21323 = vmatmul.mubr.msk.bf16.gmra.mrb[96].mxu1 %vm1704_vm3, %v26039_v55 }
 0x1bb   :  { %v1585_v13 = vmax.f32 %v1305_v52, 0.0  ;;  %21326 = vmatprep.mubr.msk.bf16.mxu1 %vm1704_vm3, %v26042_v56 }
 0x1bc   :  { %v1683_v16 = vpack.c.bf16 %v1587_v4, %v1586_v58 }
 0x1bd   :  { %v1682_v17 = vpack.c.bf16 %v1585_v13, %v1584_v12  ;;  %v21186_v40 = vpop.f32.mrb[112].mxu0  ;;  %v26048_v22 = vld [vmem:[#allocation2 + $0x1a8] sm:$0xff] }
 0x1be   :  { %1760 = vst.msk [vmem:[#allocation2 + $0x1b8] sm:$0xff] %vm1704_vm3, %v1683_v16  ;;  %v1326_v47 = vadd.f32 %v25894_v63, %v21186_v40  ;;  %v1317_v32 = vpop.f32.mrb[113].mxu0  ;;  %v26052_v1 = vld [vmem:[#allocation2 + $0x1a0] sm:$0xff]  ;;  %v2015_v31 = vrot.slane %v26048_v22, 4 }
 0x1bf   :  { %1759 = vst.msk [vmem:[#allocation2 + $0x1b0] sm:$0xff] %vm1704_vm3, %v1682_v17  ;;  %v1318_v36 = vadd.f32 %v25894_v63, %v1317_v32  ;;  %v21187_v39 = vpop.f32.mrb[114].mxu0  ;;  %v2013_v48 = vrot.slane %v26052_v1, 4 }
 0x1c0   :  { %v1329_v51 = vadd.f32 %v25894_v63, %v21187_v39  ;;  %v1320_v52 = vpop.f32.mrb[115].mxu0  ;;  %v1590_v13 = vmax.f32 %v1326_v47, 0.0 }
 0x1c1   :  { %v1321_v58 = vadd.f32 %v25894_v63, %v1320_v52  ;;  %v26061_v4 = vsel %vm1909_vm4, %v2011_v34, %v2013_v48  ;;  %v26064_v12 = vsel %vm1909_vm4, %v2013_v48, %v2015_v31  ;;  %v1588_v17 = vmax.f32 %v1318_v36, 0.0 }
 0x1c2   :  { %30181 = vst [vmem:[#allocation16_spill] sm:$0xff] %v26061_v4  ;;  %30182 = vst [vmem:[#allocation17_spill] sm:$0xff] %v26064_v12  ;;  %v1591_v16 = vmax.f32 %v1329_v51, 0.0  ;;  %21327 = vmatmul.mubr.msk.bf16.gmra.mrb[100].mxu1 %vm1704_vm3, %v26061_v4 }
 0x1c3   :  { %v1589_v40 = vmax.f32 %v1321_v58, 0.0  ;;  %21330 = vmatprep.mubr.msk.bf16.mxu1 %vm1704_vm3, %v26064_v12 }
 0x1c4   :  { %v1685_v32 = vpack.c.bf16 %v1591_v16, %v1590_v13 }
 0x1c5   :  { %v1684_v39 = vpack.c.bf16 %v1589_v40, %v1588_v17  ;;  %v21190_v56 = vpop.f32.mrb[116].mxu0  ;;  %v26070_v52 = vld [vmem:[#allocation2 + $0x1b8] sm:$0xff] }
 0x1c6   :  { %1762 = vst.msk [vmem:[#allocation2 + $0x1c8] sm:$0xff] %vm1704_vm3, %v1685_v32  ;;  %v1342_v34 = vadd.f32 %v25894_v63, %v21190_v56  ;;  %v1333_v48 = vpop.f32.mrb[117].mxu0  ;;  %v26074_v47 = vld [vmem:[#allocation2 + $0x1b0] sm:$0xff]  ;;  %v2019_v51 = vrot.slane %v26070_v52, 4 }
 0x1c7   :  { %1761 = vst.msk [vmem:[#allocation2 + $0x1c0] sm:$0xff] %vm1704_vm3, %v1684_v39  ;;  %v1334_v36 = vadd.f32 %v25894_v63, %v1333_v48  ;;  %v21191_v58 = vpop.f32.mrb[118].mxu0  ;;  %v2017_v13 = vrot.slane %v26074_v47, 4 }
 0x1c8   :  { %v1345_v16 = vadd.f32 %v25894_v63, %v21191_v58  ;;  %v1336_v17 = vpop.f32.mrb[119].mxu0  ;;  %v1594_v12 = vmax.f32 %v1342_v34, 0.0 }
 0x1c9   :  { %v1337_v40 = vadd.f32 %v25894_v63, %v1336_v17  ;;  %v26083_v32 = vsel %vm1909_vm4, %v2015_v31, %v2017_v13  ;;  %v26086_v56 = vsel %vm1909_vm4, %v2017_v13, %v2019_v51  ;;  %v1592_v39 = vmax.f32 %v1334_v36, 0.0 }
 0x1ca   :  { %30183 = vst [vmem:[#allocation18_spill] sm:$0xff] %v26083_v32  ;;  %30184 = vst [vmem:[#allocation19_spill] sm:$0xff] %v26086_v56  ;;  %v1595_v4 = vmax.f32 %v1345_v16, 0.0  ;;  %21331 = vmatmul.mubr.msk.bf16.gmra.mrb[104].mxu1 %vm1704_vm3, %v26083_v32 }
 0x1cb   :  { %v1593_v48 = vmax.f32 %v1337_v40, 0.0  ;;  %21334 = vmatprep.mubr.msk.bf16.mxu1 %vm1704_vm3, %v26086_v56 }
 0x1cc   :  { %v1687_v58 = vpack.c.bf16 %v1595_v4, %v1594_v12 }
 0x1cd   :  { %v1686_v55 = vpack.c.bf16 %v1593_v48, %v1592_v39  ;;  %v21194_v2 = vpop.f32.mrb[120].mxu0  ;;  %v26092_v17 = vld [vmem:[#allocation2 + $0x1c8] sm:$0xff] }
 0x1ce   :  { %1764 = vst.msk [vmem:[#allocation2 + $0x1d8] sm:$0xff] %vm1704_vm3, %v1687_v58  ;;  %v1358_v31 = vadd.f32 %v25894_v63, %v21194_v2  ;;  %v1349_v13 = vpop.f32.mrb[121].mxu0  ;;  %v26096_v34 = vld [vmem:[#allocation2 + $0x1c0] sm:$0xff]  ;;  %v2023_v16 = vrot.slane %v26092_v17, 4 }
 0x1cf   :  { %1763 = vst.msk [vmem:[#allocation2 + $0x1d0] sm:$0xff] %vm1704_vm3, %v1686_v55  ;;  %v1350_v36 = vadd.f32 %v25894_v63, %v1349_v13  ;;  %v21195_v40 = vpop.f32.mrb[122].mxu0  ;;  %v2021_v4 = vrot.slane %v26096_v34, 4 }
 0x1d0   :  { %v1361_v12 = vadd.f32 %v25894_v63, %v21195_v40  ;;  %v1352_v39 = vpop.f32.mrb[123].mxu0  ;;  %v1598_v56 = vmax.f32 %v1358_v31, 0.0 }
 0x1d1   :  { %v1353_v48 = vadd.f32 %v25894_v63, %v1352_v39  ;;  %v26105_v58 = vsel %vm1909_vm4, %v2019_v51, %v2021_v4  ;;  %v26108_v2 = vsel %vm1909_vm4, %v2021_v4, %v2023_v16  ;;  %v1596_v55 = vmax.f32 %v1350_v36, 0.0 }
 0x1d2   :  { %30185 = vst [vmem:[#allocation20_spill] sm:$0xff] %v26105_v58  ;;  %30186 = vst [vmem:[#allocation21_spill] sm:$0xff] %v26108_v2  ;;  %v1599_v32 = vmax.f32 %v1361_v12, 0.0  ;;  %21335 = vmatmul.mubr.msk.bf16.gmra.mrb[108].mxu1 %vm1704_vm3, %v26105_v58 }
 0x1d3   :  { %v1597_v13 = vmax.f32 %v1353_v48, 0.0  ;;  %21338 = vmatprep.mubr.msk.bf16.mxu1 %vm1704_vm3, %v26108_v2 }
 0x1d4   :  { %v1689_v40 = vpack.c.bf16 %v1599_v32, %v1598_v56 }
 0x1d5   :  { %v1688_v61 = vpack.c.bf16 %v1597_v13, %v1596_v55  ;;  %v21198_v19 = vpop.f32.mrb[124].mxu0  ;;  %v26114_v39 = vld [vmem:[#allocation2 + $0x1d8] sm:$0xff] }
 0x1d6   :  { %1766 = vst.msk [vmem:[#allocation2 + $0x1e8] sm:$0xff] %vm1704_vm3, %v1689_v40  ;;  %v1374_v51 = vadd.f32 %v25894_v63, %v21198_v19  ;;  %v1365_v4 = vpop.f32.mrb[125].mxu0  ;;  %v26118_v31 = vld [vmem:[#allocation2 + $0x1d0] sm:$0xff]  ;;  %v26121_v12 = vrot.slane %v26114_v39, 4 }
 0x1d7   :  { %1765 = vst.msk [vmem:[#allocation2 + $0x1e0] sm:$0xff] %vm1704_vm3, %v1688_v61  ;;  %v1366_v36 = vadd.f32 %v25894_v63, %v1365_v4  ;;  %v21199_v48 = vpop.f32.mrb[126].mxu0  ;;  %v2025_v32 = vrot.slane %v26118_v31, 4 }
 0x1d8   :  { %30187 = vst [vmem:[#allocation22_spill] sm:$0xff] %v26121_v12  ;;  %v1602_v56 = vmax.f32 %v1374_v51, 0.0  ;;  %v1377_v55 = vadd.f32 %v25894_v63, %v21199_v48  ;;  %v1368_v13 = vpop.f32.mrb[127].mxu0 }
 0x1d9   :  { %v1600_v40 = vmax.f32 %v1366_v36, 0.0  ;;  %v1369_v19 = vadd.f32 %v25894_v63, %v1368_v13  ;;  %v26129_v2 = vsel %vm1909_vm4, %v2023_v16, %v2025_v32  ;;  %v26133_v58 = vsel %vm1909_vm4, %v2025_v32, %v26121_v12  ;;  %v26145_v13 = vld [vmem:[#allocation2 + $0x8] sm:$0xff] }
 0x1da   :  { %30188 = vst [vmem:[#allocation23_spill] sm:$0xff] %v26129_v2  ;;  %30189 = vst [vmem:[#allocation24_spill] sm:$0xff] %v26133_v58  ;;  %v1603_v61 = vmax.f32 %v1377_v55, 0.0  ;;  %21339 = vmatmul.mubr.msk.bf16.gmra.mrb[112].mxu1 %vm1704_vm3, %v26129_v2  ;;  %v1781_v55 = vld [vmem:[#allocation2] sm:$0xff] }
 0x1db   :  { %v1601_v4 = vmax.f32 %v1369_v19, 0.0  ;;  %21342 = vmatprep.mubr.msk.bf16.mxu1 %vm1704_vm3, %v26133_v58  ;;  %v26158_v19 = vld [vmem:[#allocation2 + $0x20] sm:$0xff]  ;;  %v26202_v58 = vld [vmem:[#allocation2 + $0x78] sm:$0xff] }
 0x1dc   :  { %v1691_v51 = vpack.c.bf16 %v1603_v61, %v1602_v56  ;;  %v26150_v56 = vld [vmem:[#allocation2 + $0x10] sm:$0xff]  ;;  %v26162_v61 = vld [vmem:[#allocation2 + $0x28] sm:$0xff]  ;;  %v26206_v2 = vld [vmem:[#allocation2 + $0x80] sm:$0xff] }
 0x1dd   :  { %v1690_v48 = vpack.c.bf16 %v1601_v4, %v1600_v40  ;;  %v26154_v40 = vld [vmem:[#allocation2 + $0x18] sm:$0xff] }
 0x1de   :  { %1768 = vst.msk [vmem:[#allocation2 + $0x1f8] sm:$0xff] %vm1704_vm3, %v1691_v51  ;;  %v1844_v36 = vld [vmem:[#allocation2 + $0x1e0] sm:$0xf]  ;;  %v26170_v4 = vld [vmem:[#allocation2 + $0x38] sm:$0xff] }
 0x1df   :  { %1767 = vst.msk [vmem:[#allocation2 + $0x1f0] sm:$0xff] %vm1704_vm3, %v1690_v48  ;;  %v2029_v16 = vrot.slane %v1844_v36, 4  ;;  %v26174_v51 = vld [vmem:[#allocation2 + $0x40] sm:$0xff]  ;;  %v26178_v48 = vld [vmem:[#allocation2 + $0x48] sm:$0xff]  ;;  %v26182_v36 = vld [vmem:[#allocation2 + $0x50] sm:$0xff] }
 0x1e1   :  { %v2030_v32 = vsel %vm1909_vm4, %v26121_v12, %v2029_v16  ;;  %v26186_v16 = vld [vmem:[#allocation2 + $0x58] sm:$0xff]  ;;  %v26198_v12 = vld [vmem:[#allocation2 + $0x70] sm:$0xff] }
 0x1e2   :  { %21343 = vmatmul.mubr.msk.bf16.gmra.mrb[116].mxu1 %vm1704_vm3, %v2030_v32  ;;  %v26190_v32 = vld [vmem:[#allocation2 + $0x60] sm:$0xff] }
 0x1e3   :  { %21348 = vmatprep.mubr.msk.bf16.mxu1 %vm1704_vm3, %v1781_v55  ;;  %v26194_v55 = vld [vmem:[#allocation2 + $0x68] sm:$0xff] }
 0x1ea   :  { %21349 = vmatmul.mubr.msk.bf16.vlgmr.msra.gmra.mrb[0].mxu1 %vm1704_vm3, %v26145_v13 }
 0x1eb   :  { %21469 = vmatpush3.bf16.msra.mxu1 %v25821_v21  ;;  %21352 = vmatprep.mubr.msk.bf16.mxu1 %vm1704_vm3, %v26150_v56  ;;  %v26166_v21 = vld [vmem:[#allocation2 + $0x30] sm:$0xff] }
 0x1f2   :  { %21353 = vmatmul.mubr.msk.bf16.gmra.mrb[4].mxu1 %vm1704_vm3, %v26154_v40 }
 0x1f3   :  { %21356 = vmatprep.mubr.msk.bf16.mxu1 %vm1704_vm3, %v26158_v19 }
 0x1fa   :  { %21357 = vmatmul.mubr.msk.bf16.gmra.mrb[8].mxu1 %vm1704_vm3, %v26162_v61 }
 0x1fb   :  { %21360 = vmatprep.mubr.msk.bf16.mxu1 %vm1704_vm3, %v26166_v21 }
 0x202   :  { %21361 = vmatmul.mubr.msk.bf16.gmra.mrb[12].mxu1 %vm1704_vm3, %v26170_v4 }
 0x203   :  { %21364 = vmatprep.mubr.msk.bf16.mxu1 %vm1704_vm3, %v26174_v51 }
 0x20a   :  { %21365 = vmatmul.mubr.msk.bf16.gmra.mrb[16].mxu1 %vm1704_vm3, %v26178_v48 }
 0x20b   :  { %21368 = vmatprep.mubr.msk.bf16.mxu1 %vm1704_vm3, %v26182_v36 }
 0x212   :  { %21369 = vmatmul.mubr.msk.bf16.gmra.mrb[20].mxu1 %vm1704_vm3, %v26186_v16 }
 0x213   :  { %21372 = vmatprep.mubr.msk.bf16.mxu1 %vm1704_vm3, %v26190_v32 }
 0x21a   :  { %21373 = vmatmul.mubr.msk.bf16.gmra.mrb[24].mxu1 %vm1704_vm3, %v26194_v55 }
 0x21b   :  { %21376 = vmatprep.mubr.msk.bf16.mxu1 %vm1704_vm3, %v26198_v12 }
 0x222   :  { %21377 = vmatmul.mubr.msk.bf16.gmra.mrb[28].mxu1 %vm1704_vm3, %v26202_v58 }
 0x223   :  { %21380 = vmatprep.mubr.msk.bf16.mxu1 %vm1704_vm3, %v26206_v2 }
 0x22a   :  { %21381 = vmatmul.mubr.msk.bf16.gmra.mrb[32].mxu1 %vm1704_vm3, %v26210_v18 }
 0x22b   :  { %21384 = vmatprep.mubr.msk.bf16.mxu1 %vm1704_vm3, %v26214_v44 }
 0x232   :  { %21385 = vmatmul.mubr.msk.bf16.gmra.mrb[36].mxu1 %vm1704_vm3, %v26218_v43 }
 0x233   :  { %21388 = vmatprep.mubr.msk.bf16.mxu1 %vm1704_vm3, %v26222_v10 }
 0x23a   :  { %21389 = vmatmul.mubr.msk.bf16.gmra.mrb[40].mxu1 %vm1704_vm3, %v26226_v8 }
 0x23b   :  { %21392 = vmatprep.mubr.msk.bf16.mxu1 %vm1704_vm3, %v25758_v9  ;;  %v24931_v9 = vld [vmem:[%s30053_s3 + $0x20] sm:$0xff]  }
 0x23c   :  { %21590 = vmatprep.subr.bf16.mxu1 %v24931_v9 }
 0x242   :  { %21393 = vmatmul.mubr.msk.bf16.gmra.mrb[44].mxu1 %vm1704_vm3, %v25754_v6  ;;  %v25246_v6 = vld [vmem:[#allocation2 + $0xb0] sm:$0xff] }
 0x243   :  { %21396 = vmatprep.mubr.msk.bf16.mxu1 %vm1704_vm3, %v25774_v28  ;;  %v25248_v28 = vld [vmem:[#allocation2 + $0xc0] sm:$0xff] }
 0x24a   :  { %21397 = vmatmul.mubr.msk.bf16.gmra.mrb[48].mxu1 %vm1704_vm3, %v25770_v25  ;;  %v25247_v25 = vld [vmem:[#allocation2 + $0xb8] sm:$0xff] }
 0x24b   :  { %21400 = vmatprep.mubr.msk.bf16.mxu1 %vm1704_vm3, %v25790_v49  ;;  %v24932_v49 = vld [vmem:[%s30052_s0 + $0x200] sm:$0xff]  }
 0x24c   :  { %21200 = vmatprep.mubr.msk.bf16.mxu0 %vm599_vm2, %v24932_v49 }
 0x252   :  { %21401 = vmatmul.mubr.msk.bf16.gmra.mrb[52].mxu1 %vm1704_vm3, %v25786_v46  ;;  %v25249_v46 = vld [vmem:[#allocation2 + $0xc8] sm:$0xff] }
 0x253   :  { %21404 = vmatprep.mubr.msk.bf16.mxu1 %vm1704_vm3, %v25806_v7 }
 0x25a   :  { %21405 = vmatmul.mubr.msk.bf16.gmra.mrb[56].mxu1 %vm1704_vm3, %v25802_v3 }
 0x25b   :  { %21408 = vmatprep.mubr.msk.bf16.mxu1 %vm1704_vm3, %v25828_v30 }
 0x262   :  { %21409 = vmatmul.mubr.msk.bf16.gmra.mrb[60].mxu1 %vm1704_vm3, %v25823_v26 }
 0x263   :  { %21412 = vmatprep.mubr.msk.bf16.mxu1 %vm1704_vm3, %v25844_v53 }
 0x26a   :  { %21413 = vmatmul.mubr.msk.bf16.gmra.mrb[64].mxu1 %vm1704_vm3, %v25840_v50 }
 0x26b   :  { %21416 = vmatprep.mubr.msk.bf16.mxu1 %vm1704_vm3, %v25860_v14 }
 0x272   :  { %21417 = vmatmul.mubr.msk.bf16.gmra.mrb[68].mxu1 %vm1704_vm3, %v25856_v11 }
 0x273   :  { %21420 = vmatprep.mubr.msk.bf16.mxu1 %vm1704_vm3, %v25876_v38 }
 0x27a   :  { %21421 = vmatmul.mubr.msk.bf16.gmra.mrb[72].mxu1 %vm1704_vm3, %v25872_v35 }
 0x27b   :  { %21424 = vmatprep.mubr.msk.bf16.mxu1 %vm1704_vm3, %v25897_v0 }
 0x282   :  { %21425 = vmatmul.mubr.msk.bf16.gmra.mrb[76].mxu1 %vm1704_vm3, %v25888_v60 }
 0x283   :  { %21428 = vmatprep.mubr.msk.bf16.mxu1 %vm1704_vm3, %v25920_v29 }
 0x28a   :  { %21429 = vmatmul.mubr.msk.bf16.gmra.mrb[80].mxu1 %vm1704_vm3, %v25916_v23 }
 0x28b   :  { %21432 = vmatprep.mubr.msk.bf16.mxu1 %vm1704_vm3, %v25942_v57 }
 0x292   :  { %21433 = vmatmul.mubr.msk.bf16.gmra.mrb[84].mxu1 %vm1704_vm3, %v25938_v54 }
 0x293   :  { %21436 = vmatprep.mubr.msk.bf16.mxu1 %vm1704_vm3, %v25964_v27 }
 0x29a   :  { %21437 = vmatmul.mubr.msk.bf16.gmra.mrb[88].mxu1 %vm1704_vm3, %v25960_v20 }
 0x29b   :  { %21440 = vmatprep.mubr.msk.bf16.mxu1 %vm1704_vm3, %v25986_v62 }
 0x2a2   :  { %21441 = vmatmul.mubr.msk.bf16.gmra.mrb[92].mxu1 %vm1704_vm3, %v25982_v59 }
 0x2a3   :  { %21444 = vmatprep.mubr.msk.bf16.mxu1 %vm1704_vm3, %v26008_v45 }
 0x2aa   :  { %21445 = vmatmul.mubr.msk.bf16.gmra.mrb[96].mxu1 %vm1704_vm3, %v26004_v37 }
 0x2ab   :  { %21448 = vmatprep.mubr.msk.bf16.mxu1 %vm1704_vm3, %v26030_v33 }
 0x2b2   :  { %21449 = vmatmul.mubr.msk.bf16.gmra.mrb[100].mxu1 %vm1704_vm3, %v26026_v24 }
 0x2b3   :  { %21452 = vmatprep.mubr.msk.bf16.mxu1 %vm1704_vm3, %v26052_v1 }
 0x2ba   :  { %21453 = vmatmul.mubr.msk.bf16.gmra.mrb[104].mxu1 %vm1704_vm3, %v26048_v22 }
 0x2bb   :  { %21456 = vmatprep.mubr.msk.bf16.mxu1 %vm1704_vm3, %v26074_v47 }
 0x2c2   :  { %21457 = vmatmul.mubr.msk.bf16.gmra.mrb[108].mxu1 %vm1704_vm3, %v26070_v52 }
 0x2c3   :  { %21460 = vmatprep.mubr.msk.bf16.mxu1 %vm1704_vm3, %v26096_v34 }
 0x2ca   :  { %21461 = vmatmul.mubr.msk.bf16.gmra.mrb[112].mxu1 %vm1704_vm3, %v26092_v17 }
 0x2cb   :  { %21464 = vmatprep.mubr.msk.bf16.mxu1 %vm1704_vm3, %v26118_v31 }
 0x2d2   :  { %21465 = vmatmul.mubr.msk.bf16.gmra.mrb[116].mxu1 %vm1704_vm3, %v26114_v39 }
 0x2d3   :  { %21470 = vmatprep.mubr.msk.bf16.mxu1 %vm1704_vm3, %v26145_v13  ;;  %v26504_v13 = vld [vmem:[#allocation2 + $0xa0] sm:$0xff] }
 0x2da   :  { %21471 = vmatmul.mubr.msk.bf16.vlgmr.msra.gmra.mrb[0].mxu1 %vm1704_vm3, %v26150_v56  ;;  %v26508_v56 = vld [vmem:[#allocation2 + $0xa8] sm:$0xff] }
 0x2db   :  { %21591 = vmatpush3.bf16.msra.mxu1 %v24931_v9  ;;  %21474 = vmatprep.mubr.msk.bf16.mxu1 %vm1704_vm3, %v26154_v40  ;;  %v26512_v40 = vld [vmem:[#allocation2 + $0xb0] sm:$0xff] }
 0x2e2   :  { %21475 = vmatmul.mubr.msk.bf16.gmra.mrb[4].mxu1 %vm1704_vm3, %v26158_v19  ;;  %v26516_v19 = vld [vmem:[#allocation2 + $0xb8] sm:$0xff] }
 0x2e3   :  { %21478 = vmatprep.mubr.msk.bf16.mxu1 %vm1704_vm3, %v26162_v61  ;;  %v26520_v61 = vld [vmem:[#allocation2 + $0xc0] sm:$0xff] }
 0x2ea   :  { %21479 = vmatmul.mubr.msk.bf16.gmra.mrb[8].mxu1 %vm1704_vm3, %v26166_v21  ;;  %v26524_v21 = vld [vmem:[#allocation2 + $0xc8] sm:$0xff] }
 0x2eb   :  { %21482 = vmatprep.mubr.msk.bf16.mxu1 %vm1704_vm3, %v26170_v4 }
 0x2f2   :  { %21483 = vmatmul.mubr.msk.bf16.gmra.mrb[12].mxu1 %vm1704_vm3, %v26174_v51 }
 0x2f3   :  { %21486 = vmatprep.mubr.msk.bf16.mxu1 %vm1704_vm3, %v26178_v48 }
 0x2fa   :  { %21487 = vmatmul.mubr.msk.bf16.gmra.mrb[16].mxu1 %vm1704_vm3, %v26182_v36 }
 0x2fb   :  { %21490 = vmatprep.mubr.msk.bf16.mxu1 %vm1704_vm3, %v26186_v16 }
 0x302   :  { %21491 = vmatmul.mubr.msk.bf16.gmra.mrb[20].mxu1 %vm1704_vm3, %v26190_v32 }
 0x303   :  { %21494 = vmatprep.mubr.msk.bf16.mxu1 %vm1704_vm3, %v26194_v55 }
 0x30a   :  { %21495 = vmatmul.mubr.msk.bf16.gmra.mrb[24].mxu1 %vm1704_vm3, %v26198_v12  ;;  %v24938_v12 = vld [vmem:[%s30052_s0 + $0x228] sm:$0xff]  }
 0x30b   :  { %21498 = vmatprep.mubr.msk.bf16.mxu1 %vm1704_vm3, %v26202_v58  ;;  %v24936_v58 = vld [vmem:[%s30052_s0 + $0x220] sm:$0xff]  }
 0x312   :  { %21499 = vmatmul.mubr.msk.bf16.gmra.mrb[28].mxu1 %vm1704_vm3, %v26206_v2  ;;  %v24937_v2 = vld [vmem:[%s30053_s3 + $0x18] sm:$0xff]  }
 0x313   :  { %21502 = vmatprep.mubr.msk.bf16.mxu1 %vm1704_vm3, %v26210_v18  ;;  %v24935_v18 = vld [vmem:[%s30052_s0 + $0x218] sm:$0xff]   ;;  %21712 = vmatprep.subr.bf16.mxu1 %v24937_v2 }
 0x31a   :  { %21503 = vmatmul.mubr.msk.bf16.gmra.mrb[32].mxu1 %vm1704_vm3, %v26214_v44  ;;  %v24934_v44 = vld [vmem:[%s30052_s0 + $0x210] sm:$0xff]  }
 0x31b   :  { %21506 = vmatprep.mubr.msk.bf16.mxu1 %vm1704_vm3, %v26218_v43  ;;  %v25251_v43 = vld [vmem:[#allocation2 + $0xd8] sm:$0xff] }
 0x322   :  { %21507 = vmatmul.mubr.msk.bf16.gmra.mrb[36].mxu1 %vm1704_vm3, %v26222_v10  ;;  %v25250_v10 = vld [vmem:[#allocation2 + $0xd0] sm:$0xff] }
 0x323   :  { %21510 = vmatprep.mubr.msk.bf16.mxu1 %vm1704_vm3, %v26226_v8  ;;  %v24933_v8 = vld [vmem:[%s30052_s0 + $0x208] sm:$0xff]  }
 0x324   :  { %21201 = vmatmul.mubr.msk.bf16.gmra.mrb[128].mxu0 %vm599_vm2, %v24933_v8  ;;  %v26536_v8 = vld [vmem:[#allocation2 + $0xd8] sm:$0xff] }
 0x325   :  { %21204 = vmatprep.mubr.msk.bf16.mxu0 %vm599_vm2, %v24934_v44 }
 0x32a   :  { %21511 = vmatmul.mubr.msk.bf16.gmra.mrb[40].mxu1 %vm1704_vm3, %v25246_v6 }
 0x32b   :  { %21514 = vmatprep.mubr.msk.bf16.mxu1 %vm1704_vm3, %v25247_v25 }
 0x32c   :  { %21205 = vmatmul.mubr.msk.bf16.gmra.mrb[132].mxu0 %vm599_vm2, %v24935_v18 }
 0x32d   :  { %21208 = vmatprep.mubr.msk.bf16.mxu0 %vm599_vm2, %v24936_v58 }
 0x332   :  { %21515 = vmatmul.mubr.msk.bf16.gmra.mrb[44].mxu1 %vm1704_vm3, %v25248_v28 }
 0x333   :  { %21518 = vmatprep.mubr.msk.bf16.mxu1 %vm1704_vm3, %v25249_v46  ;;  %v26532_v46 = vld [vmem:[#allocation2 + $0xd0] sm:$0xff] }
 0x334   :  { %21209 = vmatmul.mubr.msk.bf16.gmra.mrb[136].mxu0 %vm599_vm2, %v24938_v12 }
 0x33a   :  { %21519 = vmatmul.mubr.msk.bf16.gmra.mrb[48].mxu1 %vm1704_vm3, %v25250_v10 }
 0x33b   :  { %21522 = vmatprep.mubr.msk.bf16.mxu1 %vm1704_vm3, %v25251_v43 }
 0x342   :  { %21523 = vmatmul.mubr.msk.bf16.gmra.mrb[52].mxu1 %vm1704_vm3, %v25806_v7  ;;  %v26452_v7 = vld [vmem:[#allocation2 + $0x38] sm:$0xff] }
 0x343   :  { %21526 = vmatprep.mubr.msk.bf16.mxu1 %vm1704_vm3, %v25802_v3  ;;  %v26448_v3 = vld [vmem:[#allocation2 + $0x1e0] sm:$0xff] }
 0x34a   :  { %21527 = vmatmul.mubr.msk.bf16.gmra.mrb[56].mxu1 %vm1704_vm3, %v25828_v30  ;;  %v26460_v30 = vld [vmem:[#allocation2 + $0x48] sm:$0xff] }
 0x34b   :  { %21530 = vmatprep.mubr.msk.bf16.mxu1 %vm1704_vm3, %v25823_v26  ;;  %v26456_v26 = vld [vmem:[#allocation2 + $0x40] sm:$0xff] }
 0x352   :  { %21531 = vmatmul.mubr.msk.bf16.gmra.mrb[60].mxu1 %vm1704_vm3, %v25844_v53  ;;  %v26468_v53 = vld [vmem:[#allocation2 + $0x58] sm:$0xff] }
 0x353   :  { %21534 = vmatprep.mubr.msk.bf16.mxu1 %vm1704_vm3, %v25840_v50  ;;  %v26464_v50 = vld [vmem:[#allocation2 + $0x50] sm:$0xff] }
 0x35a   :  { %21535 = vmatmul.mubr.msk.bf16.gmra.mrb[64].mxu1 %vm1704_vm3, %v25860_v14  ;;  %v26476_v14 = vld [vmem:[#allocation2 + $0x68] sm:$0xff] }
 0x35b   :  { %21538 = vmatprep.mubr.msk.bf16.mxu1 %vm1704_vm3, %v25856_v11  ;;  %v26472_v11 = vld [vmem:[#allocation2 + $0x60] sm:$0xff] }
 0x362   :  { %21539 = vmatmul.mubr.msk.bf16.gmra.mrb[68].mxu1 %vm1704_vm3, %v25876_v38  ;;  %v26484_v38 = vld [vmem:[#allocation2 + $0x78] sm:$0xff] }
 0x363   :  { %21542 = vmatprep.mubr.msk.bf16.mxu1 %vm1704_vm3, %v25872_v35  ;;  %v26480_v35 = vld [vmem:[#allocation2 + $0x70] sm:$0xff] }
 0x36a   :  { %21543 = vmatmul.mubr.msk.bf16.gmra.mrb[72].mxu1 %vm1704_vm3, %v25897_v0  ;;  %v26492_v0 = vld [vmem:[#allocation2 + $0x88] sm:$0xff] }
 0x36b   :  { %21546 = vmatprep.mubr.msk.bf16.mxu1 %vm1704_vm3, %v25888_v60  ;;  %v26488_v60 = vld [vmem:[#allocation2 + $0x80] sm:$0xff] }
 0x372   :  { %21547 = vmatmul.mubr.msk.bf16.gmra.mrb[76].mxu1 %vm1704_vm3, %v25920_v29  ;;  %v26500_v29 = vld [vmem:[#allocation2 + $0x98] sm:$0xff] }
 0x373   :  { %21550 = vmatprep.mubr.msk.bf16.mxu1 %vm1704_vm3, %v25916_v23  ;;  %v26496_v23 = vld [vmem:[#allocation2 + $0x90] sm:$0xff] }
 0x37a   :  { %21551 = vmatmul.mubr.msk.bf16.gmra.mrb[80].mxu1 %vm1704_vm3, %v25942_v57 }
 0x37b   :  { %21554 = vmatprep.mubr.msk.bf16.mxu1 %vm1704_vm3, %v25938_v54 }
 0x382   :  { %21555 = vmatmul.mubr.msk.bf16.gmra.mrb[84].mxu1 %vm1704_vm3, %v25964_v27 }
 0x383   :  { %21558 = vmatprep.mubr.msk.bf16.mxu1 %vm1704_vm3, %v25960_v20 }
 0x38a   :  { %21559 = vmatmul.mubr.msk.bf16.gmra.mrb[88].mxu1 %vm1704_vm3, %v25986_v62 }
 0x38b   :  { %21562 = vmatprep.mubr.msk.bf16.mxu1 %vm1704_vm3, %v25982_v59 }
 0x392   :  { %21563 = vmatmul.mubr.msk.bf16.gmra.mrb[92].mxu1 %vm1704_vm3, %v26008_v45 }
 0x393   :  { %21566 = vmatprep.mubr.msk.bf16.mxu1 %vm1704_vm3, %v26004_v37 }
 0x39a   :  { %21567 = vmatmul.mubr.msk.bf16.gmra.mrb[96].mxu1 %vm1704_vm3, %v26030_v33 }
 0x39b   :  { %21570 = vmatprep.mubr.msk.bf16.mxu1 %vm1704_vm3, %v26026_v24 }
 0x3a2   :  { %21571 = vmatmul.mubr.msk.bf16.gmra.mrb[100].mxu1 %vm1704_vm3, %v26052_v1 }
 0x3a3   :  { %21574 = vmatprep.mubr.msk.bf16.mxu1 %vm1704_vm3, %v26048_v22 }
 0x3aa   :  { %21575 = vmatmul.mubr.msk.bf16.gmra.mrb[104].mxu1 %vm1704_vm3, %v26074_v47 }
 0x3ab   :  { %21578 = vmatprep.mubr.msk.bf16.mxu1 %vm1704_vm3, %v26070_v52 }
 0x3b2   :  { %21579 = vmatmul.mubr.msk.bf16.gmra.mrb[108].mxu1 %vm1704_vm3, %v26096_v34 }
 0x3b3   :  { %21582 = vmatprep.mubr.msk.bf16.mxu1 %vm1704_vm3, %v26092_v17 }
 0x3ba   :  { %21583 = vmatmul.mubr.msk.bf16.gmra.mrb[112].mxu1 %vm1704_vm3, %v26118_v31 }
 0x3bb   :  { %21586 = vmatprep.mubr.msk.bf16.mxu1 %vm1704_vm3, %v26114_v39 }
 0x3c2   :  { %21587 = vmatmul.mubr.msk.bf16.gmra.mrb[116].mxu1 %vm1704_vm3, %v26448_v3 }
 0x3c3   :  { %21592 = vmatprep.mubr.msk.bf16.mxu1 %vm1704_vm3, %v26452_v7 }
 0x3ca   :  { %21593 = vmatmul.mubr.msk.bf16.vlgmr.msra.gmra.mrb[0].mxu1 %vm1704_vm3, %v26456_v26 }
 0x3cb   :  { %21713 = vmatpush3.bf16.msra.mxu1 %v24937_v2  ;;  %21596 = vmatprep.mubr.msk.bf16.mxu1 %vm1704_vm3, %v26460_v30 }
 0x3d2   :  { %21597 = vmatmul.mubr.msk.bf16.gmra.mrb[4].mxu1 %vm1704_vm3, %v26464_v50 }
 0x3d3   :  { %21600 = vmatprep.mubr.msk.bf16.mxu1 %vm1704_vm3, %v26468_v53 }
 0x3da   :  { %21601 = vmatmul.mubr.msk.bf16.gmra.mrb[8].mxu1 %vm1704_vm3, %v26472_v11 }
 0x3db   :  { %21604 = vmatprep.mubr.msk.bf16.mxu1 %vm1704_vm3, %v26476_v14 }
 0x3e2   :  { %21605 = vmatmul.mubr.msk.bf16.gmra.mrb[12].mxu1 %vm1704_vm3, %v26480_v35 }
 0x3e3   :  { %21608 = vmatprep.mubr.msk.bf16.mxu1 %vm1704_vm3, %v26484_v38 }
 0x3ea   :  { %21609 = vmatmul.mubr.msk.bf16.gmra.mrb[16].mxu1 %vm1704_vm3, %v26488_v60 }
 0x3eb   :  { %21612 = vmatprep.mubr.msk.bf16.mxu1 %vm1704_vm3, %v26492_v0 }
 0x3f2   :  { %21613 = vmatmul.mubr.msk.bf16.gmra.mrb[20].mxu1 %vm1704_vm3, %v26496_v23 }
 0x3f3   :  { %21616 = vmatprep.mubr.msk.bf16.mxu1 %vm1704_vm3, %v26500_v29 }
 0x3f7   :  { %v21202_v4 = vpop.f32.mrb[128].mxu0 }
 0x3f8   :  { %v1390_v51 = vadd.f32 %v25894_v63, %v21202_v4  ;;  %v1381_v48 = vpop.f32.mrb[129].mxu0 }
 0x3f9   :  { %v1382_v36 = vadd.f32 %v25894_v63, %v1381_v48  ;;  %v21203_v16 = vpop.f32.mrb[130].mxu0 }
 0x3fa   :  { %21617 = vmatmul.mubr.msk.bf16.gmra.mrb[24].mxu1 %vm1704_vm3, %v26504_v13  ;;  %v1606_v32 = vmax.f32 %v1390_v51, 0.0  ;;  %v1393_v55 = vadd.f32 %v25894_v63, %v21203_v16  ;;  %v1384_v9 = vpop.f32.mrb[131].mxu0 }
 0x3fb   :  { %21620 = vmatprep.mubr.msk.bf16.mxu1 %vm1704_vm3, %v26508_v56  ;;  %v1604_v6 = vmax.f32 %v1382_v36, 0.0  ;;  %v1385_v25 = vadd.f32 %v25894_v63, %v1384_v9 }
 0x3fc   :  { %v1607_v28 = vmax.f32 %v1393_v55, 0.0  ;;  %v26546_v55 = vld [vmem:[#allocation2 + $0xe0] sm:$0xff] }
 0x3fd   :  { %v1605_v49 = vmax.f32 %v1385_v25, 0.0 }
 0x3fe   :  { %v1693_v10 = vpack.c.bf16 %v1607_v28, %v1606_v32 }
 0x3ff   :  { %v1692_v43 = vpack.c.bf16 %v1605_v49, %v1604_v6  ;;  %v21206_v44 = vpop.f32.mrb[132].mxu0  ;;  %v26550_v6 = vld [vmem:[#allocation2 + $0xe8] sm:$0xff] }
 0x400   :  { %1770 = vst.msk [vmem:[#allocation2 + $0x208] sm:$0xff] %vm1704_vm3, %v1693_v10  ;;  %v1406_v18 = vadd.f32 %v25894_v63, %v21206_v44  ;;  %v1397_v58 = vpop.f32.mrb[133].mxu0 }
 0x401   :  { %1769 = vst.msk [vmem:[#allocation2 + $0x200] sm:$0xff] %vm1704_vm3, %v1692_v43  ;;  %v1398_v2 = vadd.f32 %v25894_v63, %v1397_v58  ;;  %v21207_v12 = vpop.f32.mrb[134].mxu0 }
 0x402   :  { %21621 = vmatmul.mubr.msk.bf16.gmra.mrb[28].mxu1 %vm1704_vm3, %v26512_v40  ;;  %v1610_v4 = vmax.f32 %v1406_v18, 0.0  ;;  %v1409_v51 = vadd.f32 %v25894_v63, %v21207_v12  ;;  %v1400_v48 = vpop.f32.mrb[135].mxu0 }
 0x403   :  { %21624 = vmatprep.mubr.msk.bf16.mxu1 %vm1704_vm3, %v26516_v19  ;;  %v1608_v36 = vmax.f32 %v1398_v2, 0.0  ;;  %v1401_v16 = vadd.f32 %v25894_v63, %v1400_v48 }
 0x404   :  { %v1611_v32 = vmax.f32 %v1409_v51, 0.0  ;;  %v26562_v51 = vld [vmem:[%s30054_s2] ss:$0 sm:$0xff] }
 0x405   :  { %v1609_v9 = vmax.f32 %v1401_v16, 0.0  ;;  %v26565_v16 = vld [vmem:[#allocation2 + $0xf0] sm:$0xff] }
 0x406   :  { %v1695_v25 = vpack.c.bf16 %v1611_v32, %v1610_v4 }
 0x407   :  { %v1694_v28 = vpack.c.bf16 %v1609_v9, %v1608_v36  ;;  %v21210_v49 = vpop.f32.mrb[136].mxu0  ;;  %v26569_v9 = vld [vmem:[#allocation2 + $0xf8] sm:$0xff] }
 0x408   :  { %1772 = vst.msk [vmem:[#allocation2 + $0x218] sm:$0xff] %vm1704_vm3, %v1695_v25  ;;  %v1422_v10 = vadd.f32 %v25894_v63, %v21210_v49  ;;  %v1413_v43 = vpop.f32.mrb[137].mxu0  ;;  %v26579_v49 = vld [vmem:[#allocation2 + $0x108] sm:$0xff] }
 0x409   :  { %1771 = vst.msk [vmem:[#allocation2 + $0x210] sm:$0xff] %vm1704_vm3, %v1694_v28  ;;  %v1414_v44 = vadd.f32 %v25894_v63, %v1413_v43  ;;  %v21211_v18 = vpop.f32.mrb[138].mxu0  ;;  %v26575_v28 = vld [vmem:[#allocation2 + $0x100] sm:$0xff]  ;;  %v26587_v43 = vld [vmem:[#allocation2 + $0x118] sm:$0xff] }
 0x40a   :  { %21625 = vmatmul.mubr.msk.bf16.gmra.mrb[32].mxu1 %vm1704_vm3, %v26520_v61  ;;  %v1614_v58 = vmax.f32 %v1422_v10, 0.0  ;;  %v1425_v2 = vadd.f32 %v25894_v63, %v21211_v18  ;;  %v1416_v12 = vpop.f32.mrb[139].mxu0  ;;  %v26583_v10 = vld [vmem:[#allocation2 + $0x110] sm:$0xff]  ;;  %v26594_v18 = vld [vmem:[#allocation2 + $0x120] sm:$0xff] }
 0x40b   :  { %21628 = vmatprep.mubr.msk.bf16.mxu1 %vm1704_vm3, %v26524_v21  ;;  %v1612_v4 = vmax.f32 %v1414_v44, 0.0  ;;  %v1417_v48 = vadd.f32 %v26562_v51, %v1416_v12  ;;  %v24939_v44 = vld [vmem:[%s30053_s3 + $0x28] sm:$0xff]   ;;  %v25254_v12 = vld [vmem:[#allocation2 + $0x138] sm:$0xff] }
 0x40c   :  { %v1615_v36 = vmax.f32 %v1425_v2, 0.0  ;;  %21834 = vmatprep.subr.bf16.mxu1 %v24939_v44  ;;  %v25253_v2 = vld [vmem:[#allocation2 + $0x130] sm:$0xff] }
 0x40d   :  { %v1613_v32 = vmax.f32 %v1417_v48, 0.0  ;;  %v25256_v48 = vld [vmem:[#allocation2 + $0x148] sm:$0xff] }
 0x40e   :  { %v1697_v25 = vpack.c.bf16 %v1615_v36, %v1614_v58  ;;  %v26598_v58 = vld [vmem:[#allocation2 + $0x128] sm:$0xff]  ;;  %v4920_v36 = vrot.slane %v26484_v38, 4 }
 0x40f   :  { %v1696_v63 = vpack.c.bf16 %v1613_v32, %v1612_v4  ;;  %v25255_v4 = vld [vmem:[#allocation2 + $0x140] sm:$0xff]  ;;  %v4922_v32 = vrot.slane %v26488_v60, 4 }
 0x410   :  { %1774 = vst.msk [vmem:[#allocation2 + $0x228] sm:$0xff] %vm1704_vm3, %v1697_v25  ;;  %v4924_v25 = vrot.slane %v26492_v0, 4 }
 0x411   :  { %1773 = vst.msk [vmem:[#allocation2 + $0x220] sm:$0xff] %vm1704_vm3, %v1696_v63  ;;  %v4926_v63 = vrot.slane %v26496_v23, 4 }
 0x412   :  { %21629 = vmatmul.mubr.msk.bf16.gmra.mrb[36].mxu1 %vm1704_vm3, %v26532_v46  ;;  %v26728_v38 = vsel %vm1909_vm4, %v4922_v32, %v4924_v25 }
 0x413   :  { %21632 = vmatprep.mubr.msk.bf16.mxu1 %vm1704_vm3, %v26536_v8  ;;  %v26735_v60 = vsel %vm1909_vm4, %v4924_v25, %v4926_v63 }
 0x41a   :  { %21633 = vmatmul.mubr.msk.bf16.gmra.mrb[40].mxu1 %vm1704_vm3, %v26546_v55 }
 0x41b   :  { %21636 = vmatprep.mubr.msk.bf16.mxu1 %vm1704_vm3, %v26550_v6 }
 0x422   :  { %21637 = vmatmul.mubr.msk.bf16.gmra.mrb[44].mxu1 %vm1704_vm3, %v26565_v16 }
 0x423   :  { %21640 = vmatprep.mubr.msk.bf16.mxu1 %vm1704_vm3, %v26569_v9 }
 0x42a   :  { %21641 = vmatmul.mubr.msk.bf16.gmra.mrb[48].mxu1 %vm1704_vm3, %v26575_v28 }
 0x42b   :  { %21644 = vmatprep.mubr.msk.bf16.mxu1 %vm1704_vm3, %v26579_v49 }
 0x432   :  { %21645 = vmatmul.mubr.msk.bf16.gmra.mrb[52].mxu1 %vm1704_vm3, %v26583_v10 }
 0x433   :  { %21648 = vmatprep.mubr.msk.bf16.mxu1 %vm1704_vm3, %v26587_v43 }
 0x43a   :  { %21649 = vmatmul.mubr.msk.bf16.gmra.mrb[56].mxu1 %vm1704_vm3, %v26594_v18 }
 0x43b   :  { %21652 = vmatprep.mubr.msk.bf16.mxu1 %vm1704_vm3, %v26598_v58 }
 0x442   :  { %21653 = vmatmul.mubr.msk.bf16.gmra.mrb[60].mxu1 %vm1704_vm3, %v25253_v2  ;;  %v4930_v2 = vrot.slane %v26504_v13, 4 }
 0x443   :  { %21656 = vmatprep.mubr.msk.bf16.mxu1 %vm1704_vm3, %v25254_v12  ;;  %v4932_v12 = vrot.slane %v26508_v56, 4 }
 0x44a   :  { %21657 = vmatmul.mubr.msk.bf16.gmra.mrb[64].mxu1 %vm1704_vm3, %v25255_v4  ;;  %v4934_v4 = vrot.slane %v26512_v40, 4 }
 0x44b   :  { %21660 = vmatprep.mubr.msk.bf16.mxu1 %vm1704_vm3, %v25256_v48  ;;  %v4936_v48 = vrot.slane %v26516_v19, 4 }
 0x44c   :  { %v26759_v13 = vsel %vm1909_vm4, %v4932_v12, %v4934_v4 }
 0x44d   :  { %v26764_v56 = vsel %vm1909_vm4, %v4934_v4, %v4936_v48  ;;  %v30198_v4 = vld [vmem:[#allocation14_spill] sm:$0xff] }
 0x452   :  { %21661 = vmatmul.mubr.msk.bf16.gmra.mrb[68].mxu1 %vm1704_vm3, %v25942_v57  ;;  %v26648_v57 = vld [vmem:[#allocation2 + $0x1f0] sm:$0xff] }
 0x453   :  { %21664 = vmatprep.mubr.msk.bf16.mxu1 %vm1704_vm3, %v25938_v54  ;;  %v26644_v54 = vld [vmem:[#allocation2 + $0x1e8] sm:$0xff] }
 0x45a   :  { %21665 = vmatmul.mubr.msk.bf16.gmra.mrb[72].mxu1 %vm1704_vm3, %v25964_v27  ;;  %v26656_v27 = vld [vmem:[#allocation2 + $0x200] sm:$0xff] }
 0x45b   :  { %21668 = vmatprep.mubr.msk.bf16.mxu1 %vm1704_vm3, %v25960_v20  ;;  %v26652_v20 = vld [vmem:[#allocation2 + $0x1f8] sm:$0xff] }
 0x462   :  { %21669 = vmatmul.mubr.msk.bf16.gmra.mrb[76].mxu1 %vm1704_vm3, %v25986_v62  ;;  %v4075_v62 = vld [vmem:[#allocation2 + $0x30] sm:$0xf0] }
 0x463   :  { %21672 = vmatprep.mubr.msk.bf16.mxu1 %vm1704_vm3, %v25982_v59  ;;  %v26660_v59 = vld [vmem:[#allocation2 + $0x208] sm:$0xff] }
 0x46a   :  { %21673 = vmatmul.mubr.msk.bf16.gmra.mrb[80].mxu1 %vm1704_vm3, %v26008_v45  ;;  %v4903_v45 = vrot.slane %v4075_v62, 4  ;;  %v4938_v62 = vrot.slane %v26520_v61, 4 }
 0x46b   :  { %21676 = vmatprep.mubr.msk.bf16.mxu1 %vm1704_vm3, %v26004_v37  ;;  %v4904_v37 = vrot.slane %v26452_v7, 4  ;;  %v4914_v7 = vrot.slane %v26472_v11, 4 }
 0x46c   :  { %v26771_v40 = vsel %vm1909_vm4, %v4936_v48, %v4938_v62  ;;  %v30199_v48 = vld [vmem:[#allocation15_spill] sm:$0xff] }
 0x472   :  { %21677 = vmatmul.mubr.msk.bf16.gmra.mrb[84].mxu1 %vm1704_vm3, %v26030_v33  ;;  %v4905_v33 = vsel %vm1909_vm4, %v4903_v45, %v4904_v37  ;;  %v4942_v45 = vrot.slane %v26532_v46, 4 }
 0x473   :  { %21680 = vmatprep.mubr.msk.bf16.mxu1 %vm1704_vm3, %v26026_v24  ;;  %v26665_v24 = vld [vmem:[#allocation2 + $0x210] sm:$0xff] }
 0x47a   :  { %21681 = vmatmul.mubr.msk.bf16.gmra.mrb[88].mxu1 %vm1704_vm3, %v26052_v1  ;;  %v4908_v1 = vrot.slane %v26460_v30, 4 }
 0x47b   :  { %21684 = vmatprep.mubr.msk.bf16.mxu1 %vm1704_vm3, %v26048_v22  ;;  %v26672_v22 = vrot.slane %v26456_v26, 4  ;;  %v4916_v26 = vrot.slane %v26476_v14, 4 }
 0x482   :  { %21685 = vmatmul.mubr.msk.bf16.gmra.mrb[92].mxu1 %vm1704_vm3, %v26074_v47  ;;  %v26680_v47 = vsel %vm1909_vm4, %v26672_v22, %v4908_v1 }
 0x483   :  { %21688 = vmatprep.mubr.msk.bf16.mxu1 %vm1704_vm3, %v26070_v52  ;;  %v4907_v52 = vsel %vm1909_vm4, %v4904_v37, %v26672_v22  ;;  %v4940_v37 = vrot.slane %v26524_v21, 4 }
 0x485   :  { %v26776_v19 = vsel %vm1909_vm4, %v4938_v62, %v4940_v37  ;;  %v26783_v61 = vsel %vm1909_vm4, %v4940_v37, %v4942_v45  ;;  %v30200_v62 = vld [vmem:[#allocation16_spill] sm:$0xff]  ;;  %v30201_v37 = vld [vmem:[#allocation17_spill] sm:$0xff] }
 0x48a   :  { %21689 = vmatmul.mubr.msk.bf16.gmra.mrb[96].mxu1 %vm1704_vm3, %v26096_v34  ;;  %v4912_v34 = vrot.slane %v26468_v53, 4  ;;  %v4918_v53 = vrot.slane %v26480_v35, 4  ;;  %v26723_v35 = vsel %vm1909_vm4, %v4920_v36, %v4922_v32  ;;  %v24940_v32 = vld [vmem:[%s30053_s3 + $0x38] sm:$0xff]  }
 0x48b   :  { %21692 = vmatprep.mubr.msk.bf16.mxu1 %vm1704_vm3, %v26092_v17  ;;  %v4910_v17 = vrot.slane %v26464_v50, 4  ;;  %v26704_v50 = vsel %vm1909_vm4, %v4914_v7, %v4916_v26 }
 0x48c   :  { %v26699_v30 = vsel %vm1909_vm4, %v4912_v34, %v4914_v7  ;;  %v26711_v11 = vsel %vm1909_vm4, %v4916_v26, %v4918_v53  ;;  %v26716_v14 = vsel %vm1909_vm4, %v4918_v53, %v4920_v36  ;;  %v4954_v7 = vrot.slane %v26575_v28, 4 }
 0x48d   :  { %v4956_v26 = vrot.slane %v26579_v49, 4  ;;  %v4958_v53 = vrot.slane %v26583_v10, 4  ;;  %v4960_v36 = vrot.slane %v26587_v43, 4  ;;  %v4962_v10 = vrot.slane %v26594_v18, 4 }
 0x48e   :  { %v26845_v43 = vrot.slane %v26598_v58, 4  ;;  %v30190_v58 = vld [vmem:[#allocation6_spill] sm:$0xff] }
 0x48f   :  { %v26831_v28 = vsel %vm1909_vm4, %v4956_v26, %v4958_v53  ;;  %v26836_v49 = vsel %vm1909_vm4, %v4958_v53, %v4960_v36  ;;  %v26848_v25 = vsel %vm1909_vm4, %v4960_v36, %v4962_v10  ;;  %v30208_v53 = vld [vmem:[#allocation22_spill] sm:$0xff] }
 0x490   :  { %v4967_v18 = vsel %vm1909_vm4, %v26845_v43, %v25903_v5  ;;  %v30193_v5 = vld [vmem:[#allocation9_spill] sm:$0xff] }
 0x492   :  { %21693 = vmatmul.mubr.msk.bf16.gmra.mrb[100].mxu1 %vm1704_vm3, %v26118_v31  ;;  %v26692_v31 = vsel %vm1909_vm4, %v4910_v17, %v4912_v34  ;;  %v4952_v34 = vrot.slane %v26569_v9, 4  ;;  %v26824_v9 = vsel %vm1909_vm4, %v4954_v7, %v4956_v26  ;;  %v26906_v26 = vrot.slane %v26644_v54, 4 }
 0x493   :  { %21696 = vmatprep.mubr.msk.bf16.mxu1 %vm1704_vm3, %v26114_v39  ;;  %v26687_v39 = vsel %vm1909_vm4, %v4908_v1, %v4910_v17  ;;  %v4946_v1 = vrot.slane %v26546_v55, 4  ;;  %v4950_v17 = vrot.slane %v26565_v16, 4 }
 0x494   :  { %v26819_v16 = vsel %vm1909_vm4, %v4952_v34, %v4954_v7  ;;  %v5010_v7 = vrot.slane %v26448_v3, 4 }
 0x496   :  { %v5011_v36 = vsel %vm1909_vm4, %v30208_v53, %v5010_v7  ;;  %v27132_v53 = vld [vmem:[#allocation2 + $0x198] sm:$0xff] }
 0x49a   :  { %21697 = vmatmul.mubr.msk.bf16.gmra.mrb[104].mxu1 %vm1704_vm3, %v26448_v3 }
 0x49b   :  { %21700 = vmatprep.mubr.msk.bf16.mxu1 %vm1704_vm3, %v26644_v54 }
 0x4a2   :  { %21701 = vmatmul.mubr.msk.bf16.gmra.mrb[108].mxu1 %vm1704_vm3, %v26648_v57 }
 0x4a3   :  { %21704 = vmatprep.mubr.msk.bf16.mxu1 %vm1704_vm3, %v26652_v20 }
 0x4aa   :  { %21705 = vmatmul.mubr.msk.bf16.gmra.mrb[112].mxu1 %vm1704_vm3, %v26656_v27 }
 0x4ab   :  { %21708 = vmatprep.mubr.msk.bf16.mxu1 %vm1704_vm3, %v26660_v59 }
 0x4b2   :  { %21709 = vmatmul.mubr.msk.bf16.gmra.mrb[116].mxu1 %vm1704_vm3, %v26665_v24 }
 0x4b3   :  { %21714 = vmatprep.mubr.msk.bf16.mxu1 %vm1704_vm3, %v4905_v33  ;;  %v4944_v33 = vrot.slane %v26536_v8, 4 }
 0x4b5   :  { %v26788_v21 = vsel %vm1909_vm4, %v4942_v45, %v4944_v33  ;;  %v26795_v46 = vsel %vm1909_vm4, %v4944_v33, %v4946_v1  ;;  %v30202_v45 = vld [vmem:[#allocation18_spill] sm:$0xff]  ;;  %v30203_v33 = vld [vmem:[#allocation19_spill] sm:$0xff] }
 0x4b6   :  { %30222 = vst [vmem:[#allocation19_spill] sm:$0xff] %v27132_v53 }
 0x4ba   :  { %21715 = vmatmul.mubr.msk.bf16.vlgmr.msra.gmra.mrb[0].mxu1 %vm1704_vm3, %v4907_v52  ;;  %v4948_v52 = vrot.slane %v26550_v6, 4  ;;  %v26812_v6 = vsel %vm1909_vm4, %v4950_v17, %v4952_v34  ;;  %v30207_v34 = vld [vmem:[#allocation24_spill] sm:$0xff] }
 0x4bb   :  { %21835 = vmatpush3.bf16.msra.mxu1 %v24939_v44  ;;  %21718 = vmatprep.mubr.msk.bf16.mxu1 %vm1704_vm3, %v26680_v47  ;;  %v4928_v44 = vrot.slane %v26500_v29, 4  ;;  %v26752_v29 = vsel %vm1909_vm4, %v4930_v2, %v4932_v12  ;;  %v30194_v12 = vld [vmem:[#allocation10_spill] sm:$0xff] }
 0x4bc   :  { %v26800_v8 = vsel %vm1909_vm4, %v4946_v1, %v4948_v52  ;;  %v26807_v55 = vsel %vm1909_vm4, %v4948_v52, %v4950_v17  ;;  %21956 = vmatprep.subr.bf16.mxu1 %v24940_v32  ;;  %v30204_v1 = vld [vmem:[#allocation20_spill] sm:$0xff]  ;;  %v30205_v52 = vld [vmem:[#allocation21_spill] sm:$0xff]  ;;  %v30206_v17 = vld [vmem:[#allocation23_spill] sm:$0xff] }
 0x4bd   :  { %v26740_v0 = vsel %vm1909_vm4, %v4926_v63, %v4928_v44  ;;  %v26747_v23 = vsel %vm1909_vm4, %v4928_v44, %v4930_v2  ;;  %v26854_v63 = vsel %vm1909_vm4, %v4962_v10, %v26845_v43  ;;  %v30191_v44 = vld [vmem:[#allocation7_spill] sm:$0xff]  ;;  %v30192_v2 = vld [vmem:[#allocation8_spill] sm:$0xff]  ;;  %v5013_v10 = vsel %vm1909_vm4, %v5010_v7, %v26906_v26 }
 0x4c2   :  { %21719 = vmatmul.mubr.msk.bf16.gmra.mrb[4].mxu1 %vm1704_vm3, %v26687_v39 }
 0x4c3   :  { %21722 = vmatprep.mubr.msk.bf16.mxu1 %vm1704_vm3, %v26692_v31 }
 0x4ca   :  { %21723 = vmatmul.mubr.msk.bf16.gmra.mrb[8].mxu1 %vm1704_vm3, %v26699_v30 }
 0x4cb   :  { %21726 = vmatprep.mubr.msk.bf16.mxu1 %vm1704_vm3, %v26704_v50 }
 0x4d2   :  { %21727 = vmatmul.mubr.msk.bf16.gmra.mrb[12].mxu1 %vm1704_vm3, %v26711_v11 }
 0x4d3   :  { %21730 = vmatprep.mubr.msk.bf16.mxu1 %vm1704_vm3, %v26716_v14 }
 0x4da   :  { %21731 = vmatmul.mubr.msk.bf16.gmra.mrb[16].mxu1 %vm1704_vm3, %v26723_v35 }
 0x4db   :  { %21734 = vmatprep.mubr.msk.bf16.mxu1 %vm1704_vm3, %v26728_v38 }
 0x4e2   :  { %21735 = vmatmul.mubr.msk.bf16.gmra.mrb[20].mxu1 %vm1704_vm3, %v26735_v60 }
 0x4e3   :  { %21738 = vmatprep.mubr.msk.bf16.mxu1 %vm1704_vm3, %v26740_v0 }
 0x4ea   :  { %21739 = vmatmul.mubr.msk.bf16.gmra.mrb[24].mxu1 %vm1704_vm3, %v26747_v23 }
 0x4eb   :  { %21742 = vmatprep.mubr.msk.bf16.mxu1 %vm1704_vm3, %v26752_v29 }
 0x4f2   :  { %21743 = vmatmul.mubr.msk.bf16.gmra.mrb[28].mxu1 %vm1704_vm3, %v26759_v13 }
 0x4f3   :  { %21746 = vmatprep.mubr.msk.bf16.mxu1 %vm1704_vm3, %v26764_v56 }
 0x4fa   :  { %21747 = vmatmul.mubr.msk.bf16.gmra.mrb[32].mxu1 %vm1704_vm3, %v26771_v40 }
 0x4fb   :  { %21750 = vmatprep.mubr.msk.bf16.mxu1 %vm1704_vm3, %v26776_v19 }
 0x502   :  { %21751 = vmatmul.mubr.msk.bf16.gmra.mrb[36].mxu1 %vm1704_vm3, %v26783_v61 }
 0x503   :  { %21754 = vmatprep.mubr.msk.bf16.mxu1 %vm1704_vm3, %v26788_v21 }
 0x50a   :  { %21755 = vmatmul.mubr.msk.bf16.gmra.mrb[40].mxu1 %vm1704_vm3, %v26795_v46 }
 0x50b   :  { %21758 = vmatprep.mubr.msk.bf16.mxu1 %vm1704_vm3, %v26800_v8 }
 0x512   :  { %21759 = vmatmul.mubr.msk.bf16.gmra.mrb[44].mxu1 %vm1704_vm3, %v26807_v55 }
 0x513   :  { %21762 = vmatprep.mubr.msk.bf16.mxu1 %vm1704_vm3, %v26812_v6 }
 0x51a   :  { %21763 = vmatmul.mubr.msk.bf16.gmra.mrb[48].mxu1 %vm1704_vm3, %v26819_v16 }
 0x51b   :  { %21766 = vmatprep.mubr.msk.bf16.mxu1 %vm1704_vm3, %v26824_v9 }
 0x522   :  { %21767 = vmatmul.mubr.msk.bf16.gmra.mrb[52].mxu1 %vm1704_vm3, %v26831_v28 }
 0x523   :  { %21770 = vmatprep.mubr.msk.bf16.mxu1 %vm1704_vm3, %v26836_v49 }
 0x52a   :  { %21771 = vmatmul.mubr.msk.bf16.gmra.mrb[56].mxu1 %vm1704_vm3, %v26848_v25 }
 0x52b   :  { %21774 = vmatprep.mubr.msk.bf16.mxu1 %vm1704_vm3, %v26854_v63 }
 0x532   :  { %21775 = vmatmul.mubr.msk.bf16.gmra.mrb[60].mxu1 %vm1704_vm3, %v4967_v18  ;;  %v5014_v18 = vrot.slane %v26648_v57, 4 }
 0x533   :  { %21778 = vmatprep.mubr.msk.bf16.mxu1 %vm1704_vm3, %v25911_v15  ;;  %v30195_v15 = vld [vmem:[#allocation11_spill] sm:$0xff] }
 0x534   :  { %v26918_v3 = vsel %vm1909_vm4, %v26906_v26, %v5014_v18 }
 0x53a   :  { %21779 = vmatmul.mubr.msk.bf16.gmra.mrb[64].mxu1 %vm1704_vm3, %v25929_v41  ;;  %v30196_v41 = vld [vmem:[#allocation12_spill] sm:$0xff] }
 0x53b   :  { %21782 = vmatprep.mubr.msk.bf16.mxu1 %vm1704_vm3, %v25932_v42  ;;  %v30197_v42 = vld [vmem:[#allocation13_spill] sm:$0xff] }
 0x542   :  { %21783 = vmatmul.mubr.msk.bf16.gmra.mrb[68].mxu1 %vm1704_vm3, %v30190_v58  ;;  %v5016_v58 = vrot.slane %v26652_v20, 4 }
 0x543   :  { %21786 = vmatprep.mubr.msk.bf16.mxu1 %vm1704_vm3, %v30191_v44  ;;  %v5018_v44 = vrot.slane %v26656_v27, 4 }
 0x544   :  { %v26923_v54 = vsel %vm1909_vm4, %v5014_v18, %v5016_v58 }
 0x545   :  { %v26932_v57 = vsel %vm1909_vm4, %v5016_v58, %v5018_v44 }
 0x54a   :  { %21787 = vmatmul.mubr.msk.bf16.gmra.mrb[72].mxu1 %vm1704_vm3, %v30192_v2  ;;  %v26929_v2 = vrot.slane %v26660_v59, 4 }
 0x54b   :  { %21790 = vmatprep.mubr.msk.bf16.mxu1 %vm1704_vm3, %v30193_v5  ;;  %v4135_v5 = vld [vmem:[#allocation2 + $0x210] sm:$0xf] }
 0x54c   :  { %v26938_v20 = vsel %vm1909_vm4, %v5018_v44, %v26929_v2 }
 0x552   :  { %21791 = vmatmul.mubr.msk.bf16.gmra.mrb[76].mxu1 %vm1704_vm3, %v30194_v12  ;;  %v5022_v12 = vrot.slane %v4135_v5, 4  ;;  %v27148_v5 = vld [vmem:[#allocation2 + $0x1a8] sm:$0xff] }
 0x553   :  { %21794 = vmatprep.mubr.msk.bf16.mxu1 %vm1704_vm3, %v30195_v15  ;;  %v5723_v15 = vld [vmem:[#allocation2 + $0x38] sm:$0xf0]  ;;  %30224 = vst [vmem:[#allocation21_spill] sm:$0xff] %v27148_v5 }
 0x554   :  { %v5848_v27 = vrot.slane %v5723_v15, 4  ;;  %v5023_v59 = vsel %vm1909_vm4, %v26929_v2, %v5022_v12  ;;  %v27152_v12 = vld [vmem:[#allocation2 + $0x1b0] sm:$0xff]  ;;  %v5939_v15 = vrot.slane %v27148_v5, 4  ;;  %v27310_v5 = vld [vmem:[#allocation2 + $0xe8] sm:$0xff] }
 0x555   :  { %30225 = vst [vmem:[#allocation23_spill] sm:$0xff] %v27152_v12 }
 0x55a   :  { %21795 = vmatmul.mubr.msk.bf16.gmra.mrb[80].mxu1 %vm1704_vm3, %v30196_v41  ;;  %v5850_v41 = vsel %vm1909_vm4, %v5848_v27, %v26672_v22  ;;  %v24941_v22 = vld [vmem:[%s30052_s0 + $0x230] sm:$0xff]   ;;  %v5941_v27 = vrot.slane %v27152_v12, 4 }
 0x55b   :  { %21798 = vmatprep.mubr.msk.bf16.mxu1 %vm1704_vm3, %v30197_v42  ;;  %21212 = vmatprep.mubr.msk.bf16.mxu0 %vm599_vm2, %v24941_v22  ;;  %v27100_v42 = vld [vmem:[#allocation2 + $0x178] sm:$0xff] }
 0x55c   :  { %30218 = vst [vmem:[#allocation15_spill] sm:$0xff] %v27100_v42  ;;  %v27164_v22 = vld [vmem:[#allocation2 + $0x1b8] sm:$0xff] }
 0x55d   :  { %30226 = vst [vmem:[#allocation24_spill] sm:$0xff] %v27164_v22 }
 0x562   :  { %21799 = vmatmul.mubr.msk.bf16.gmra.mrb[84].mxu1 %vm1704_vm3, %v30198_v4  ;;  %v27104_v4 = vld [vmem:[#allocation2 + $0x180] sm:$0xff] }
 0x563   :  { %21802 = vmatprep.mubr.msk.bf16.mxu1 %vm1704_vm3, %v30199_v48  ;;  %30219 = vst [vmem:[#allocation16_spill] sm:$0xff] %v27104_v4  ;;  %v5927_v48 = vrot.slane %v27100_v42, 4 }
 0x56a   :  { %21803 = vmatmul.mubr.msk.bf16.gmra.mrb[88].mxu1 %vm1704_vm3, %v30200_v62  ;;  %v5929_v62 = vrot.slane %v27104_v4, 4 }
 0x56b   :  { %21806 = vmatprep.mubr.msk.bf16.mxu1 %vm1704_vm3, %v30201_v37 }
 0x572   :  { %21807 = vmatmul.mubr.msk.bf16.gmra.mrb[92].mxu1 %vm1704_vm3, %v30202_v45  ;;  %v27114_v45 = vsel %vm1909_vm4, %v5927_v48, %v5929_v62 }
 0x573   :  { %21810 = vmatprep.mubr.msk.bf16.mxu1 %vm1704_vm3, %v30203_v33  ;;  %v27116_v33 = vld [vmem:[#allocation2 + $0x188] sm:$0xff] }
 0x574   :  { %30220 = vst [vmem:[#allocation17_spill] sm:$0xff] %v27116_v33 }
 0x57a   :  { %21811 = vmatmul.mubr.msk.bf16.gmra.mrb[96].mxu1 %vm1704_vm3, %v30204_v1  ;;  %v27120_v1 = vld [vmem:[#allocation2 + $0x190] sm:$0xff] }
 0x57b   :  { %21814 = vmatprep.mubr.msk.bf16.mxu1 %vm1704_vm3, %v30205_v52  ;;  %30221 = vst [vmem:[#allocation18_spill] sm:$0xff] %v27120_v1  ;;  %v5931_v52 = vrot.slane %v27116_v33, 4 }
 0x582   :  { %21815 = vmatmul.mubr.msk.bf16.gmra.mrb[100].mxu1 %vm1704_vm3, %v30206_v17  ;;  %v5933_v17 = vrot.slane %v27120_v1, 4 }
 0x583   :  { %21818 = vmatprep.mubr.msk.bf16.mxu1 %vm1704_vm3, %v30207_v34  ;;  %v27125_v34 = vsel %vm1909_vm4, %v5929_v62, %v5931_v52 }
 0x584   :  { %v27130_v7 = vsel %vm1909_vm4, %v5931_v52, %v5933_v17 }
 0x58a   :  { %21819 = vmatmul.mubr.msk.bf16.gmra.mrb[104].mxu1 %vm1704_vm3, %v5011_v36  ;;  %v27136_v36 = vld [vmem:[#allocation2 + $0x1a0] sm:$0xff] }
 0x58b   :  { %21822 = vmatprep.mubr.msk.bf16.mxu1 %vm1704_vm3, %v5013_v10  ;;  %30223 = vst [vmem:[#allocation20_spill] sm:$0xff] %v27136_v36  ;;  %v5935_v10 = vrot.slane %v27132_v53, 4  ;;  %v5937_v18 = vrot.slane %v27136_v36, 4  ;;  %v27320_v53 = vld [vmem:[#allocation2 + $0xf8] sm:$0xff] }
 0x58d   :  { %v27141_v58 = vsel %vm1909_vm4, %v5933_v17, %v5935_v10  ;;  %v27146_v44 = vsel %vm1909_vm4, %v5935_v10, %v5937_v18 }
 0x592   :  { %21823 = vmatmul.mubr.msk.bf16.gmra.mrb[108].mxu1 %vm1704_vm3, %v26918_v3 }
 0x593   :  { %21826 = vmatprep.mubr.msk.bf16.mxu1 %vm1704_vm3, %v26923_v54 }
 0x59a   :  { %21827 = vmatmul.mubr.msk.bf16.gmra.mrb[112].mxu1 %vm1704_vm3, %v26932_v57 }
 0x59b   :  { %21830 = vmatprep.mubr.msk.bf16.mxu1 %vm1704_vm3, %v26938_v20 }
 0x5a2   :  { %21831 = vmatmul.mubr.msk.bf16.gmra.mrb[116].mxu1 %vm1704_vm3, %v5023_v59  ;;  %v27157_v59 = vsel %vm1909_vm4, %v5937_v18, %v5939_v15 }
 0x5a3   :  { %21836 = vmatprep.mubr.msk.bf16.mxu1 %vm1704_vm3, %v5850_v41  ;;  %v27162_v41 = vsel %vm1909_vm4, %v5939_v15, %v5941_v27  ;;  %v5965_v15 = vrot.slane %v26665_v24, 4 }
 0x5aa   :  { %21837 = vmatmul.mubr.msk.bf16.vlgmr.msra.gmra.mrb[0].mxu1 %vm1704_vm3, %v26680_v47  ;;  %v24942_v47 = vld [vmem:[%s30052_s0 + $0x238] sm:$0xff]  }
 0x5ab   :  { %21957 = vmatpush3.bf16.msra.mxu1 %v24940_v32  ;;  %21840 = vmatprep.mubr.msk.bf16.mxu1 %vm1704_vm3, %v26687_v39  ;;  %v24943_v39 = vld [vmem:[%s30052_s0 + $0x240] sm:$0xff]  }
 0x5ac   :  { %21213 = vmatmul.mubr.msk.bf16.gmra.mrb[140].mxu0 %vm599_vm2, %v24942_v47  ;;  %v27168_v47 = vld [vmem:[#allocation2 + $0x1c0] sm:$0xff] }
 0x5ad   :  { %21216 = vmatprep.mubr.msk.bf16.mxu0 %vm599_vm2, %v24943_v39  ;;  %30227 = vst [vmem:[#allocation22_spill] sm:$0xff] %v27168_v47  ;;  %v5943_v39 = vrot.slane %v27164_v22, 4  ;;  %v27300_v22 = vld [vmem:[#allocation2 + $0xd8] sm:$0xff] }
 0x5b2   :  { %21841 = vmatmul.mubr.msk.bf16.gmra.mrb[4].mxu1 %vm1704_vm3, %v26692_v31  ;;  %v24944_v31 = vld [vmem:[%s30052_s0 + $0x248] sm:$0xff]  }
 0x5b3   :  { %21844 = vmatprep.mubr.msk.bf16.mxu1 %vm1704_vm3, %v26699_v30  ;;  %v27020_v30 = vld [vmem:[#allocation2 + $0x130] sm:$0xff] }
 0x5b4   :  { %21217 = vmatmul.mubr.msk.bf16.gmra.mrb[144].mxu0 %vm599_vm2, %v24944_v31  ;;  %30209 = vst [vmem:[#allocation6_spill] sm:$0xff] %v27020_v30  ;;  %v5945_v31 = vrot.slane %v27168_v47, 4 }
 0x5ba   :  { %21845 = vmatmul.mubr.msk.bf16.gmra.mrb[8].mxu1 %vm1704_vm3, %v26704_v50  ;;  %v27025_v50 = vld [vmem:[%s30053_s3 + $0x30] sm:$0xff]  }
 0x5bb   :  { %21848 = vmatprep.mubr.msk.bf16.mxu1 %vm1704_vm3, %v26711_v11  ;;  %22078 = vmatprep.subr.bf16.mxu1 %v27025_v50  ;;  %v27029_v11 = vrot.slane %v27020_v30, 4 }
 0x5c2   :  { %21849 = vmatmul.mubr.msk.bf16.gmra.mrb[12].mxu1 %vm1704_vm3, %v26716_v14  ;;  %v5910_v14 = vsel %vm1909_vm4, %v26845_v43, %v27029_v11 }
 0x5c3   :  { %21852 = vmatprep.mubr.msk.bf16.mxu1 %vm1704_vm3, %v26723_v35  ;;  %v27036_v35 = vld [vmem:[#allocation2 + $0x138] sm:$0xff] }
 0x5c4   :  { %30210 = vst [vmem:[#allocation7_spill] sm:$0xff] %v27036_v35 }
 0x5ca   :  { %21853 = vmatmul.mubr.msk.bf16.gmra.mrb[16].mxu1 %vm1704_vm3, %v26728_v38  ;;  %v27039_v38 = vld [vmem:[#allocation2 + $0x140] sm:$0xff] }
 0x5cb   :  { %21856 = vmatprep.mubr.msk.bf16.mxu1 %vm1704_vm3, %v26735_v60  ;;  %30211 = vst [vmem:[#allocation8_spill] sm:$0xff] %v27039_v38  ;;  %v5911_v60 = vrot.slane %v27036_v35, 4 }
 0x5d2   :  { %21857 = vmatmul.mubr.msk.bf16.gmra.mrb[20].mxu1 %vm1704_vm3, %v26740_v0  ;;  %v5913_v0 = vrot.slane %v27039_v38, 4 }
 0x5d3   :  { %21860 = vmatprep.mubr.msk.bf16.mxu1 %vm1704_vm3, %v26747_v23  ;;  %v27045_v23 = vsel %vm1909_vm4, %v27029_v11, %v5911_v60 }
 0x5da   :  { %21861 = vmatmul.mubr.msk.bf16.gmra.mrb[24].mxu1 %vm1704_vm3, %v26752_v29  ;;  %v27050_v29 = vsel %vm1909_vm4, %v5911_v60, %v5913_v0  ;;  %v27178_v60 = vsel %vm1909_vm4, %v5943_v39, %v5945_v31 }
 0x5db   :  { %21864 = vmatprep.mubr.msk.bf16.mxu1 %vm1704_vm3, %v26759_v13  ;;  %v27052_v13 = vld [vmem:[#allocation2 + $0x148] sm:$0xff] }
 0x5dc   :  { %30212 = vst [vmem:[#allocation9_spill] sm:$0xff] %v27052_v13 }
 0x5e2   :  { %21865 = vmatmul.mubr.msk.bf16.gmra.mrb[28].mxu1 %vm1704_vm3, %v26764_v56  ;;  %v27056_v56 = vld [vmem:[#allocation2 + $0x150] sm:$0xff] }
 0x5e3   :  { %21868 = vmatprep.mubr.msk.bf16.mxu1 %vm1704_vm3, %v26771_v40  ;;  %30213 = vst [vmem:[#allocation10_spill] sm:$0xff] %v27056_v56  ;;  %v5915_v40 = vrot.slane %v27052_v13, 4 }
 0x5ea   :  { %21869 = vmatmul.mubr.msk.bf16.gmra.mrb[32].mxu1 %vm1704_vm3, %v26776_v19  ;;  %v5917_v19 = vrot.slane %v27056_v56, 4 }
 0x5eb   :  { %21872 = vmatprep.mubr.msk.bf16.mxu1 %vm1704_vm3, %v26783_v61  ;;  %v27061_v61 = vsel %vm1909_vm4, %v5913_v0, %v5915_v40  ;;  %v27180_v0 = vld [vmem:[#allocation2 + $0x1c8] sm:$0xff] }
 0x5ec   :  { %30228 = vst [vmem:[#allocation25_spill] sm:$0xff] %v27180_v0 }
 0x5f2   :  { %21873 = vmatmul.mubr.msk.bf16.gmra.mrb[36].mxu1 %vm1704_vm3, %v26788_v21  ;;  %v27066_v21 = vsel %vm1909_vm4, %v5915_v40, %v5917_v19  ;;  %v27184_v40 = vld [vmem:[#allocation2 + $0x1d0] sm:$0xff] }
 0x5f3   :  { %21876 = vmatprep.mubr.msk.bf16.mxu1 %vm1704_vm3, %v26795_v46  ;;  %v27068_v46 = vld [vmem:[#allocation2 + $0x158] sm:$0xff]  ;;  %30229 = vst [vmem:[#allocation26_spill] sm:$0xff] %v27184_v40 }
 0x5f4   :  { %30214 = vst [vmem:[#allocation11_spill] sm:$0xff] %v27068_v46 }
 0x5fa   :  { %21877 = vmatmul.mubr.msk.bf16.gmra.mrb[40].mxu1 %vm1704_vm3, %v26800_v8  ;;  %v27072_v8 = vld [vmem:[#allocation2 + $0x160] sm:$0xff] }
 0x5fb   :  { %21880 = vmatprep.mubr.msk.bf16.mxu1 %vm1704_vm3, %v26807_v55  ;;  %30215 = vst [vmem:[#allocation12_spill] sm:$0xff] %v27072_v8  ;;  %v5919_v55 = vrot.slane %v27068_v46, 4 }
 0x602   :  { %21881 = vmatmul.mubr.msk.bf16.gmra.mrb[44].mxu1 %vm1704_vm3, %v26812_v6  ;;  %v5921_v6 = vrot.slane %v27072_v8, 4 }
 0x603   :  { %21884 = vmatprep.mubr.msk.bf16.mxu1 %vm1704_vm3, %v26819_v16  ;;  %v27077_v16 = vsel %vm1909_vm4, %v5917_v19, %v5919_v55  ;;  %v5947_v19 = vrot.slane %v27180_v0, 4  ;;  %v27290_v0 = vld [vmem:[#allocation2 + $0xc8] sm:$0xff] }
 0x60a   :  { %21885 = vmatmul.mubr.msk.bf16.gmra.mrb[48].mxu1 %vm1704_vm3, %v26824_v9  ;;  %v27082_v9 = vsel %vm1909_vm4, %v5919_v55, %v5921_v6  ;;  %v5949_v55 = vrot.slane %v27184_v40, 4 }
 0x60b   :  { %21888 = vmatprep.mubr.msk.bf16.mxu1 %vm1704_vm3, %v26831_v28  ;;  %v27084_v28 = vld [vmem:[#allocation2 + $0x168] sm:$0xff] }
 0x60c   :  { %30216 = vst [vmem:[#allocation13_spill] sm:$0xff] %v27084_v28  ;;  %v5923_v32 = vrot.slane %v27084_v28, 4 }
 0x612   :  { %21889 = vmatmul.mubr.msk.bf16.gmra.mrb[52].mxu1 %vm1704_vm3, %v26836_v49  ;;  %v27088_v49 = vld [vmem:[#allocation2 + $0x170] sm:$0xff] }
 0x613   :  { %21892 = vmatprep.mubr.msk.bf16.mxu1 %vm1704_vm3, %v26848_v25  ;;  %30217 = vst [vmem:[#allocation14_spill] sm:$0xff] %v27088_v49  ;;  %v5925_v43 = vrot.slane %v27088_v49, 4  ;;  %v27093_v25 = vsel %vm1909_vm4, %v5921_v6, %v5923_v32  ;;  %v27189_v6 = vsel %vm1909_vm4, %v5945_v31, %v5947_v19  ;;  %v6851_v31 = vld [vmem:[#allocation2 + $0x68] sm:$0xf0] }
 0x615   :  { %v27109_v37 = vsel %vm1909_vm4, %v5925_v43, %v5927_v48  ;;  %v27200_v48 = vld [vmem:[#allocation2 + $0x1e0] sm:$0xff] }
 0x616   :  { %30231 = vst [vmem:[#allocation28_spill] sm:$0xff] %v27200_v48  ;;  %v27204_v52 = vrot.slane %v27200_v48, 4 }
 0x618   :  { %v5956_v18 = vsel %vm1909_vm4, %v27204_v52, %v26906_v26  ;;  %v5783_v26 = vld [vmem:[#allocation2 + $0x218] sm:$0xf] }
 0x61a   :  { %21893 = vmatmul.mubr.msk.bf16.gmra.mrb[56].mxu1 %vm1704_vm3, %v26854_v63  ;;  %v27098_v63 = vsel %vm1909_vm4, %v5923_v32, %v5925_v43  ;;  %v27194_v32 = vsel %vm1909_vm4, %v5947_v19, %v5949_v55  ;;  %v27196_v43 = vld [vmem:[#allocation2 + $0x1d8] sm:$0xff]  ;;  %v6917_v19 = vrot.slane %v6851_v31, 4 }
 0x61b   :  { %21896 = vmatprep.mubr.msk.bf16.mxu1 %vm1704_vm3, %v5910_v14  ;;  %v27173_v14 = vsel %vm1909_vm4, %v5941_v27, %v5943_v39  ;;  %30230 = vst [vmem:[#allocation27_spill] sm:$0xff] %v27196_v43  ;;  %v5951_v62 = vrot.slane %v27196_v43, 4  ;;  %v5966_v27 = vsel %vm1909_vm4, %v26929_v2, %v5965_v15  ;;  %v27233_v39 = vld [vmem:[#allocation2 + $0x70] sm:$0xff]  ;;  %v27242_v2 = vld [vmem:[#allocation2 + $0x80] sm:$0xff]  ;;  %v27280_v43 = vld [vmem:[#allocation2 + $0xb8] sm:$0xff] }
 0x61d   :  { %v27207_v17 = vsel %vm1909_vm4, %v5949_v55, %v5951_v62  ;;  %v27213_v10 = vsel %vm1909_vm4, %v5951_v62, %v27204_v52  ;;  %v6922_v62 = vrot.slane %v27242_v2, 4 }
 0x622   :  { %21897 = vmatmul.mubr.msk.bf16.gmra.mrb[60].mxu1 %vm1704_vm3, %v27045_v23 }
 0x623   :  { %21900 = vmatprep.mubr.msk.bf16.mxu1 %vm1704_vm3, %v27050_v29 }
 0x62a   :  { %21901 = vmatmul.mubr.msk.bf16.gmra.mrb[64].mxu1 %vm1704_vm3, %v27061_v61 }
 0x62b   :  { %21904 = vmatprep.mubr.msk.bf16.mxu1 %vm1704_vm3, %v27066_v21 }
 0x632   :  { %21905 = vmatmul.mubr.msk.bf16.gmra.mrb[68].mxu1 %vm1704_vm3, %v27077_v16 }
 0x633   :  { %21908 = vmatprep.mubr.msk.bf16.mxu1 %vm1704_vm3, %v27082_v9 }
 0x63a   :  { %21909 = vmatmul.mubr.msk.bf16.gmra.mrb[72].mxu1 %vm1704_vm3, %v27093_v25 }
 0x63b   :  { %21912 = vmatprep.mubr.msk.bf16.mxu1 %vm1704_vm3, %v27098_v63 }
 0x642   :  { %21913 = vmatmul.mubr.msk.bf16.gmra.mrb[76].mxu1 %vm1704_vm3, %v27109_v37 }
 0x643   :  { %21916 = vmatprep.mubr.msk.bf16.mxu1 %vm1704_vm3, %v27114_v45 }
 0x64a   :  { %21917 = vmatmul.mubr.msk.bf16.gmra.mrb[80].mxu1 %vm1704_vm3, %v27125_v34 }
 0x64b   :  { %21920 = vmatprep.mubr.msk.bf16.mxu1 %vm1704_vm3, %v27130_v7 }
 0x652   :  { %21921 = vmatmul.mubr.msk.bf16.gmra.mrb[84].mxu1 %vm1704_vm3, %v27141_v58 }
 0x653   :  { %21924 = vmatprep.mubr.msk.bf16.mxu1 %vm1704_vm3, %v27146_v44 }
 0x65a   :  { %21925 = vmatmul.mubr.msk.bf16.gmra.mrb[88].mxu1 %vm1704_vm3, %v27157_v59 }
 0x65b   :  { %21928 = vmatprep.mubr.msk.bf16.mxu1 %vm1704_vm3, %v27162_v41 }
 0x662   :  { %21929 = vmatmul.mubr.msk.bf16.gmra.mrb[92].mxu1 %vm1704_vm3, %v27173_v14 }
 0x663   :  { %21932 = vmatprep.mubr.msk.bf16.mxu1 %vm1704_vm3, %v27178_v60 }
 0x66a   :  { %21933 = vmatmul.mubr.msk.bf16.gmra.mrb[96].mxu1 %vm1704_vm3, %v27189_v6 }
 0x66b   :  { %21936 = vmatprep.mubr.msk.bf16.mxu1 %vm1704_vm3, %v27194_v32 }
 0x672   :  { %21937 = vmatmul.mubr.msk.bf16.gmra.mrb[100].mxu1 %vm1704_vm3, %v27207_v17 }
 0x673   :  { %21940 = vmatprep.mubr.msk.bf16.mxu1 %vm1704_vm3, %v27213_v10 }
 0x67a   :  { %21941 = vmatmul.mubr.msk.bf16.gmra.mrb[104].mxu1 %vm1704_vm3, %v5956_v18 }
 0x67b   :  { %21944 = vmatprep.mubr.msk.bf16.mxu1 %vm1704_vm3, %v26918_v3  ;;  %v5967_v3 = vrot.slane %v5783_v26, 4  ;;  %v27253_v26 = vld [vmem:[#allocation2 + $0x90] sm:$0xff] }
 0x67c   :  { %v6926_v31 = vrot.slane %v27253_v26, 4 }
 0x67f   :  { %v21214_v33 = vpop.f32.mrb[140].mxu0 }
 0x680   :  { %v1429_v4 = vpop.f32.mrb[141].mxu0 }
 0x681   :  { %v1430_v42 = vadd.f32 %v26562_v51, %v1429_v4  ;;  %v21215_v49 = vpop.f32.mrb[142].mxu0 }
 0x682   :  { %21945 = vmatmul.mubr.msk.bf16.gmra.mrb[108].mxu1 %vm1704_vm3, %v26923_v54  ;;  %v6918_v54 = vrot.slane %v27233_v39, 4  ;;  %v1432_v8 = vpop.f32.mrb[143].mxu0 }
 0x683   :  { %21948 = vmatprep.mubr.msk.bf16.mxu1 %vm1704_vm3, %v26932_v57  ;;  %v5968_v57 = vsel %vm1909_vm4, %v5965_v15, %v5967_v3  ;;  %v1616_v46 = vmax.f32 %v1430_v42, 0.0 }
 0x684   :  { %v6919_v24 = vsel %vm1909_vm4, %v6917_v19, %v6918_v54 }
 0x687   :  { %v21218_v30 = vpop.f32.mrb[144].mxu0 }
 0x688   :  { %v1454_v42 = vadd.f32 %v26562_v51, %v21218_v30 }
 0x68a   :  { %21949 = vmatmul.mubr.msk.bf16.gmra.mrb[112].mxu1 %vm1704_vm3, %v26938_v20  ;;  %v27239_v20 = vld [vmem:[#allocation2 + $0x78] sm:$0xff] }
 0x68b   :  { %21952 = vmatprep.mubr.msk.bf16.mxu1 %vm1704_vm3, %v5966_v27  ;;  %v6920_v55 = vrot.slane %v27239_v20, 4  ;;  %v27249_v27 = vld [vmem:[#allocation2 + $0x88] sm:$0xff] }
 0x68c   :  { %v6924_v3 = vrot.slane %v27249_v27, 4 }
 0x68d   :  { %v6921_v18 = vsel %vm1909_vm4, %v6918_v54, %v6920_v55  ;;  %v6923_v15 = vsel %vm1909_vm4, %v6920_v55, %v6922_v62 }
 0x68e   :  { %v6925_v19 = vsel %vm1909_vm4, %v6922_v62, %v6924_v3  ;;  %v6927_v54 = vsel %vm1909_vm4, %v6924_v3, %v6926_v31  ;;  %v27273_v3 = vld [vmem:[#allocation2 + $0xb0] sm:$0xff] }
 0x692   :  { %21953 = vmatmul.mubr.msk.bf16.gmra.mrb[116].mxu1 %vm1704_vm3, %v5968_v57  ;;  %v27260_v57 = vld [vmem:[#allocation2 + $0x98] sm:$0xff] }
 0x693   :  { %21958 = vmatprep.mubr.msk.bf16.mxu1 %vm1704_vm3, %v6919_v24  ;;  %v27263_v24 = vld [vmem:[#allocation2 + $0xa0] sm:$0xff] }
 0x694   :  { %v6930_v55 = vrot.slane %v27263_v24, 4 }
 0x69a   :  { %21959 = vmatmul.mubr.msk.bf16.vlgmr.msra.gmra.mrb[0].mxu1 %vm1704_vm3, %v6921_v18 }
 0x69b   :  { %22079 = vmatpush3.bf16.msra.mxu1 %v27025_v50  ;;  %21962 = vmatprep.mubr.msk.bf16.mxu1 %vm1704_vm3, %v6923_v15  ;;  %v6928_v50 = vrot.slane %v27260_v57, 4  ;;  %v27270_v15 = vld [vmem:[#allocation2 + $0xa8] sm:$0xff] }
 0x69d   :  { %v6929_v18 = vsel %vm1909_vm4, %v6926_v31, %v6928_v50  ;;  %v6931_v62 = vsel %vm1909_vm4, %v6928_v50, %v6930_v55  ;;  %v27283_v50 = vld [vmem:[#allocation2 + $0xc0] sm:$0xff] }
 0x6a2   :  { %21963 = vmatmul.mubr.msk.bf16.gmra.mrb[4].mxu1 %vm1704_vm3, %v6925_v19  ;;  %v6932_v19 = vrot.slane %v27270_v15, 4 }
 0x6a3   :  { %21966 = vmatprep.mubr.msk.bf16.mxu1 %vm1704_vm3, %v6927_v54  ;;  %v6934_v54 = vrot.slane %v27273_v3, 4 }
 0x6a4   :  { %v6933_v48 = vsel %vm1909_vm4, %v6930_v55, %v6932_v19 }
 0x6a5   :  { %v6935_v31 = vsel %vm1909_vm4, %v6932_v19, %v6934_v54  ;;  %v6940_v19 = vrot.slane %v27290_v0, 4 }
 0x6aa   :  { %21967 = vmatmul.mubr.msk.bf16.gmra.mrb[8].mxu1 %vm1704_vm3, %v6929_v18  ;;  %v6936_v18 = vrot.slane %v27280_v43, 4 }
 0x6ab   :  { %21970 = vmatprep.mubr.msk.bf16.mxu1 %vm1704_vm3, %v6931_v62  ;;  %v6938_v62 = vrot.slane %v27283_v50, 4 }
 0x6ac   :  { %v6937_v40 = vsel %vm1909_vm4, %v6934_v54, %v6936_v18 }
 0x6ad   :  { %v6939_v55 = vsel %vm1909_vm4, %v6936_v18, %v6938_v62  ;;  %v6941_v47 = vsel %vm1909_vm4, %v6938_v62, %v6940_v19  ;;  %v6944_v18 = vrot.slane %v27300_v22, 4 }
 0x6b2   :  { %21971 = vmatmul.mubr.msk.bf16.gmra.mrb[12].mxu1 %vm1704_vm3, %v6933_v48  ;;  %v27293_v48 = vld [vmem:[#allocation2 + $0xd0] sm:$0xff] }
 0x6b3   :  { %21974 = vmatprep.mubr.msk.bf16.mxu1 %vm1704_vm3, %v6935_v31  ;;  %v6942_v31 = vrot.slane %v27293_v48, 4 }
 0x6b5   :  { %v6943_v54 = vsel %vm1909_vm4, %v6940_v19, %v6942_v31  ;;  %v6945_v12 = vsel %vm1909_vm4, %v6942_v31, %v6944_v18  ;;  %v6948_v19 = vrot.slane %v27310_v5, 4 }
 0x6ba   :  { %21975 = vmatmul.mubr.msk.bf16.gmra.mrb[16].mxu1 %vm1704_vm3, %v6937_v40  ;;  %v27303_v40 = vld [vmem:[#allocation2 + $0xe0] sm:$0xff] }
 0x6bb   :  { %21978 = vmatprep.mubr.msk.bf16.mxu1 %vm1704_vm3, %v6939_v55  ;;  %v6946_v55 = vrot.slane %v27303_v40, 4 }
 0x6bd   :  { %v6947_v62 = vsel %vm1909_vm4, %v6944_v18, %v6946_v55  ;;  %v6949_v36 = vsel %vm1909_vm4, %v6946_v55, %v6948_v19  ;;  %v6952_v18 = vrot.slane %v27320_v53, 4 }
 0x6c2   :  { %21979 = vmatmul.mubr.msk.bf16.gmra.mrb[20].mxu1 %vm1704_vm3, %v6941_v47  ;;  %v27313_v47 = vld [vmem:[#allocation2 + $0xf0] sm:$0xff] }
 0x6c3   :  { %21982 = vmatprep.mubr.msk.bf16.mxu1 %vm1704_vm3, %v6943_v54  ;;  %v6950_v54 = vrot.slane %v27313_v47, 4 }
 0x6c5   :  { %v6951_v31 = vsel %vm1909_vm4, %v6948_v19, %v6950_v54  ;;  %v6953_v1 = vsel %vm1909_vm4, %v6950_v54, %v6952_v18  ;;  %v1438_v19 = vadd.f32 %v26562_v51, %v21214_v33  ;;  %v1441_v54 = vadd.f32 %v26562_v51, %v21215_v49  ;;  %v27344_v49 = vld [vmem:[#allocation2 + $0x118] sm:$0xff] }
 0x6c7   :  { %v1618_v28 = vmax.f32 %v1438_v19, 0.0  ;;  %v1619_v33 = vmax.f32 %v1441_v54, 0.0  ;;  %v27349_v19 = vld [vmem:[#allocation2 + $0x120] sm:$0xff] }
 0x6c8   :  { %v6962_v30 = vrot.slane %v27349_v19, 4 }
 0x6c9   :  { %v1699_v38 = vpack.c.bf16 %v1619_v33, %v1618_v28  ;;  %v1622_v28 = vmax.f32 %v1454_v42, 0.0 }
 0x6ca   :  { %21983 = vmatmul.mubr.msk.bf16.gmra.mrb[24].mxu1 %vm1704_vm3, %v6945_v12  ;;  %v27323_v12 = vld [vmem:[#allocation2 + $0x100] sm:$0xff] }
 0x6cb   :  { %21986 = vmatprep.mubr.msk.bf16.mxu1 %vm1704_vm3, %v6947_v62  ;;  %v6954_v62 = vrot.slane %v27323_v12, 4  ;;  %1776 = vst.msk [vmem:[#allocation2 + $0x238] sm:$0xff] %vm1704_vm3, %v1699_v38 }
 0x6cd   :  { %v6955_v55 = vsel %vm1909_vm4, %v6952_v18, %v6954_v62  ;;  %v1433_v18 = vadd.f32 %v26562_v51, %v1432_v8  ;;  %v1445_v8 = vpop.f32.mrb[145].mxu0 }
 0x6cf   :  { %v1617_v13 = vmax.f32 %v1433_v18, 0.0 }
 0x6d1   :  { %v1698_v35 = vpack.c.bf16 %v1617_v13, %v1616_v46  ;;  %v1446_v13 = vadd.f32 %v26562_v51, %v1445_v8  ;;  %v21219_v46 = vpop.f32.mrb[146].mxu0  ;;  %v27360_v8 = vld [vmem:[#allocation2 + $0x128] sm:$0xff] }
 0x6d2   :  { %21987 = vmatmul.mubr.msk.bf16.gmra.mrb[28].mxu1 %vm1704_vm3, %v6949_v36  ;;  %v27330_v36 = vld [vmem:[#allocation2 + $0x108] sm:$0xff]  ;;  %v1448_v54 = vpop.f32.mrb[147].mxu0 }
 0x6d3   :  { %21990 = vmatprep.mubr.msk.bf16.mxu1 %vm1704_vm3, %v6951_v31  ;;  %v27334_v31 = vld [vmem:[#allocation2 + $0x110] sm:$0xff]  ;;  %1775 = vst.msk [vmem:[#allocation2 + $0x230] sm:$0xff] %vm1704_vm3, %v1698_v35  ;;  %v1620_v18 = vmax.f32 %v1446_v13, 0.0  ;;  %v1449_v38 = vadd.f32 %v26562_v51, %v1448_v54 }
 0x6d4   :  { %30232 = vst [vmem:[#allocation29_spill] sm:$0xff] %v27334_v31  ;;  %v6958_v56 = vrot.slane %v27334_v31, 4 }
 0x6da   :  { %21991 = vmatmul.mubr.msk.bf16.gmra.mrb[32].mxu1 %vm1704_vm3, %v6953_v1  ;;  %v6956_v1 = vrot.slane %v27330_v36, 4 }
 0x6db   :  { %21994 = vmatprep.mubr.msk.bf16.mxu1 %vm1704_vm3, %v6955_v55 }
 0x6dc   :  { %v6957_v55 = vsel %vm1909_vm4, %v6954_v62, %v6956_v1  ;;  %v6959_v4 = vsel %vm1909_vm4, %v6956_v1, %v6958_v56  ;;  %v1457_v62 = vadd.f32 %v26562_v51, %v21219_v46  ;;  %v6960_v1 = vrot.slane %v27344_v49, 4  ;;  %v27461_v46 = vld [vmem:[#allocation2 + $0x228] sm:$0xff] }
 0x6dd   :  { %v6964_v51 = vrot.slane %v27360_v8, 4 }
 0x6de   :  { %v1623_v33 = vmax.f32 %v1457_v62, 0.0  ;;  %v6961_v31 = vsel %vm1909_vm4, %v6958_v56, %v6960_v1  ;;  %v6963_v42 = vsel %vm1909_vm4, %v6960_v1, %v6962_v30  ;;  %v7028_v62 = vrot.slane %v27461_v46, 4 }
 0x6df   :  { %v6965_v13 = vsel %vm1909_vm4, %v6962_v30, %v6964_v51  ;;  %v6967_v56 = vsel %vm1909_vm4, %v6964_v51, %v27029_v11  ;;  %v27419_v11 = vld [vmem:[#allocation2 + $0x1e8] sm:$0xff] }
 0x6e2   :  { %21995 = vmatmul.mubr.msk.bf16.gmra.mrb[36].mxu1 %vm1704_vm3, %v6957_v55  ;;  %v1621_v55 = vmax.f32 %v1449_v38, 0.0  ;;  %v27471_v38 = vld [vmem:[#allocation2 + $0x238] sm:$0xff] }
 0x6e3   :  { %21998 = vmatprep.mubr.msk.bf16.mxu1 %vm1704_vm3, %v6959_v4  ;;  %v1701_v4 = vpack.c.bf16 %v1623_v33, %v1622_v28  ;;  %v27464_v28 = vld [vmem:[#allocation2 + $0x230] sm:$0xff]  ;;  %v7032_v33 = vrot.slane %v27471_v38, 4 }
 0x6e4   :  { %v1700_v35 = vpack.c.bf16 %v1621_v55, %v1620_v18  ;;  %v7030_v54 = vrot.slane %v27464_v28, 4 }
 0x6e5   :  { %1778 = vst.msk [vmem:[#allocation2 + $0x248] sm:$0xff] %vm1704_vm3, %v1701_v4 }
 0x6e6   :  { %1777 = vst.msk [vmem:[#allocation2 + $0x240] sm:$0xff] %vm1704_vm3, %v1700_v35  ;;  %v7031_v18 = vsel %vm1909_vm4, %v7028_v62, %v7030_v54  ;;  %v7033_v4 = vsel %vm1909_vm4, %v7030_v54, %v7032_v33  ;;  %v30250_v54 = vld [vmem:[#allocation23_spill] sm:$0xff] }
 0x6ea   :  { %21999 = vmatmul.mubr.msk.bf16.gmra.mrb[40].mxu1 %vm1704_vm3, %v6961_v31  ;;  %v27382_v31 = vld [vmem:[%s30053_s3 + $0x40] sm:$0xff]  }
 0x6eb   :  { %22002 = vmatprep.mubr.msk.bf16.mxu1 %vm1704_vm3, %v6963_v42  ;;  %22200 = vmatprep.subr.bf16.mxu1 %v27382_v31 }
 0x6ec   :  { %v6852_v42 = vld [vmem:[#allocation2 + $0x248] sm:$0xf] }
 0x6ed   :  { %v27474_v30 = vld [vmem:[#allocation2 + $0x240] sm:$0xff]  ;;  %v7036_v51 = vrot.slane %v6852_v42, 4  ;;  %v24948_v42 = vld [vmem:[%s30055_s5 + $0x18] sm:$0xff]  }
 0x6ee   :  { %v7034_v55 = vrot.slane %v27474_v30, 4 }
 0x6f0   :  { %v7035_v35 = vsel %vm1909_vm4, %v7032_v33, %v7034_v55  ;;  %v30253_v33 = vld [vmem:[#allocation25_spill] sm:$0xff] }
 0x6f2   :  { %22003 = vmatmul.mubr.msk.bf16.gmra.mrb[44].mxu1 %vm1704_vm3, %v6965_v13  ;;  %v7037_v13 = vsel %vm1909_vm4, %v7034_v55, %v7036_v51  ;;  %v30254_v55 = vld [vmem:[#allocation26_spill] sm:$0xff] }
 0x6f3   :  { %22006 = vmatprep.mubr.msk.bf16.mxu1 %vm1704_vm3, %v6967_v56  ;;  %v6788_v56 = vld [vmem:[#allocation2 + $0x68] sm:$0xff] }
 0x6fa   :  { %22007 = vmatmul.mubr.msk.bf16.gmra.mrb[48].mxu1 %vm1704_vm3, %v27045_v23  ;;  %v27423_v23 = vld [vmem:[#allocation2 + $0x1f0] sm:$0xff] }
 0x6fb   :  { %22010 = vmatprep.mubr.msk.bf16.mxu1 %vm1704_vm3, %v27050_v29  ;;  %v7012_v29 = vrot.slane %v27419_v11, 4 }
 0x702   :  { %22011 = vmatmul.mubr.msk.bf16.gmra.mrb[52].mxu1 %vm1704_vm3, %v27061_v61  ;;  %v7014_v61 = vrot.slane %v27423_v23, 4 }
 0x703   :  { %22014 = vmatprep.mubr.msk.bf16.mxu1 %vm1704_vm3, %v27066_v21  ;;  %v7013_v21 = vsel %vm1909_vm4, %v27204_v52, %v7012_v29 }
 0x70a   :  { %22015 = vmatmul.mubr.msk.bf16.gmra.mrb[56].mxu1 %vm1704_vm3, %v27077_v16  ;;  %v7015_v16 = vsel %vm1909_vm4, %v7012_v29, %v7014_v61  ;;  %v30233_v29 = vld [vmem:[#allocation29_spill] sm:$0xff] }
 0x70b   :  { %22018 = vmatprep.mubr.msk.bf16.mxu1 %vm1704_vm3, %v27082_v9  ;;  %v27431_v9 = vld [vmem:[#allocation2 + $0x1f8] sm:$0xff] }
 0x712   :  { %22019 = vmatmul.mubr.msk.bf16.gmra.mrb[60].mxu1 %vm1704_vm3, %v27093_v25  ;;  %v27434_v25 = vld [vmem:[#allocation2 + $0x200] sm:$0xff] }
 0x713   :  { %22022 = vmatprep.mubr.msk.bf16.mxu1 %vm1704_vm3, %v27098_v63  ;;  %v7016_v63 = vrot.slane %v27431_v9, 4 }
 0x71a   :  { %22023 = vmatmul.mubr.msk.bf16.gmra.mrb[64].mxu1 %vm1704_vm3, %v27109_v37  ;;  %v7018_v37 = vrot.slane %v27434_v25, 4 }
 0x71b   :  { %22026 = vmatprep.mubr.msk.bf16.mxu1 %vm1704_vm3, %v27114_v45  ;;  %v7017_v45 = vsel %vm1909_vm4, %v7014_v61, %v7016_v63  ;;  %v30234_v61 = vld [vmem:[#allocation6_spill] sm:$0xff] }
 0x722   :  { %22027 = vmatmul.mubr.msk.bf16.gmra.mrb[68].mxu1 %vm1704_vm3, %v27125_v34  ;;  %v7019_v34 = vsel %vm1909_vm4, %v7016_v63, %v7018_v37  ;;  %v30237_v63 = vld [vmem:[#allocation9_spill] sm:$0xff] }
 0x723   :  { %22030 = vmatprep.mubr.msk.bf16.mxu1 %vm1704_vm3, %v27130_v7  ;;  %v27441_v7 = vld [vmem:[#allocation2 + $0x208] sm:$0xff] }
 0x72a   :  { %22031 = vmatmul.mubr.msk.bf16.gmra.mrb[72].mxu1 %vm1704_vm3, %v27141_v58  ;;  %v27444_v58 = vld [vmem:[#allocation2 + $0x210] sm:$0xff] }
 0x72b   :  { %22034 = vmatprep.mubr.msk.bf16.mxu1 %vm1704_vm3, %v27146_v44  ;;  %v7020_v44 = vrot.slane %v27441_v7, 4 }
 0x732   :  { %22035 = vmatmul.mubr.msk.bf16.gmra.mrb[76].mxu1 %vm1704_vm3, %v27157_v59  ;;  %v7022_v59 = vrot.slane %v27444_v58, 4 }
 0x733   :  { %22038 = vmatprep.mubr.msk.bf16.mxu1 %vm1704_vm3, %v27162_v41  ;;  %v7021_v41 = vsel %vm1909_vm4, %v7018_v37, %v7020_v44  ;;  %v30238_v37 = vld [vmem:[#allocation10_spill] sm:$0xff] }
 0x73a   :  { %22039 = vmatmul.mubr.msk.bf16.gmra.mrb[80].mxu1 %vm1704_vm3, %v27173_v14  ;;  %v7023_v14 = vsel %vm1909_vm4, %v7020_v44, %v7022_v59  ;;  %v30241_v44 = vld [vmem:[#allocation13_spill] sm:$0xff] }
 0x73b   :  { %22042 = vmatprep.mubr.msk.bf16.mxu1 %vm1704_vm3, %v27178_v60  ;;  %v27451_v60 = vld [vmem:[#allocation2 + $0x218] sm:$0xff] }
 0x742   :  { %22043 = vmatmul.mubr.msk.bf16.gmra.mrb[84].mxu1 %vm1704_vm3, %v27189_v6  ;;  %v27454_v6 = vld [vmem:[#allocation2 + $0x220] sm:$0xff] }
 0x743   :  { %22046 = vmatprep.mubr.msk.bf16.mxu1 %vm1704_vm3, %v27194_v32  ;;  %v7024_v32 = vrot.slane %v27451_v60, 4  ;;  %v7026_v52 = vrot.slane %v27454_v6, 4 }
 0x745   :  { %v7029_v1 = vsel %vm1909_vm4, %v7026_v52, %v7028_v62  ;;  %v30249_v62 = vld [vmem:[#allocation21_spill] sm:$0xff] }
 0x74a   :  { %22047 = vmatmul.mubr.msk.bf16.gmra.mrb[88].mxu1 %vm1704_vm3, %v27207_v17  ;;  %v7025_v17 = vsel %vm1909_vm4, %v7022_v59, %v7024_v32  ;;  %v30242_v59 = vld [vmem:[#allocation14_spill] sm:$0xff] }
 0x74b   :  { %22050 = vmatprep.mubr.msk.bf16.mxu1 %vm1704_vm3, %v27213_v10  ;;  %v7027_v10 = vsel %vm1909_vm4, %v7024_v32, %v7026_v52  ;;  %v30245_v32 = vld [vmem:[#allocation17_spill] sm:$0xff]  ;;  %v30246_v52 = vld [vmem:[#allocation18_spill] sm:$0xff] }
 0x752   :  { %22051 = vmatmul.mubr.msk.bf16.gmra.mrb[92].mxu1 %vm1704_vm3, %v7013_v21  ;;  %v30235_v21 = vld [vmem:[#allocation7_spill] sm:$0xff] }
 0x753   :  { %22054 = vmatprep.mubr.msk.bf16.mxu1 %vm1704_vm3, %v7015_v16  ;;  %v30236_v16 = vld [vmem:[#allocation8_spill] sm:$0xff] }
 0x75a   :  { %22055 = vmatmul.mubr.msk.bf16.gmra.mrb[96].mxu1 %vm1704_vm3, %v7017_v45  ;;  %v30239_v45 = vld [vmem:[#allocation11_spill] sm:$0xff] }
 0x75b   :  { %22058 = vmatprep.mubr.msk.bf16.mxu1 %vm1704_vm3, %v7019_v34  ;;  %v30240_v34 = vld [vmem:[#allocation12_spill] sm:$0xff] }
 0x762   :  { %22059 = vmatmul.mubr.msk.bf16.gmra.mrb[100].mxu1 %vm1704_vm3, %v7021_v41  ;;  %v30243_v41 = vld [vmem:[#allocation15_spill] sm:$0xff] }
 0x763   :  { %22062 = vmatprep.mubr.msk.bf16.mxu1 %vm1704_vm3, %v7023_v14  ;;  %v30244_v14 = vld [vmem:[#allocation16_spill] sm:$0xff] }
 0x76a   :  { %22063 = vmatmul.mubr.msk.bf16.gmra.mrb[104].mxu1 %vm1704_vm3, %v7025_v17  ;;  %v30247_v17 = vld [vmem:[#allocation19_spill] sm:$0xff] }
 0x76b   :  { %22066 = vmatprep.mubr.msk.bf16.mxu1 %vm1704_vm3, %v7027_v10  ;;  %v30248_v10 = vld [vmem:[#allocation20_spill] sm:$0xff] }
 0x772   :  { %22067 = vmatmul.mubr.msk.bf16.gmra.mrb[108].mxu1 %vm1704_vm3, %v7029_v1  ;;  %v30251_v1 = vld [vmem:[#allocation24_spill] sm:$0xff] }
 0x773   :  { %22070 = vmatprep.mubr.msk.bf16.mxu1 %vm1704_vm3, %v7031_v18  ;;  %v30252_v18 = vld [vmem:[#allocation22_spill] sm:$0xff] }
 0x77a   :  { %22071 = vmatmul.mubr.msk.bf16.gmra.mrb[112].mxu1 %vm1704_vm3, %v7033_v4  ;;  %v30255_v4 = vld [vmem:[#allocation27_spill] sm:$0xff] }
 0x77b   :  { %22074 = vmatprep.mubr.msk.bf16.mxu1 %vm1704_vm3, %v7035_v35  ;;  %v30256_v35 = vld [vmem:[#allocation28_spill] sm:$0xff] }
 0x782   :  { %22075 = vmatmul.mubr.msk.bf16.gmra.mrb[116].mxu1 %vm1704_vm3, %v7037_v13 }
 0x783   :  { %22080 = vmatprep.mubr.msk.bf16.mxu1 %vm1704_vm3, %v6788_v56 }
 0x78a   :  { %22081 = vmatmul.mubr.msk.bf16.vlgmr.msra.gmra.mrb[0].mxu1 %vm1704_vm3, %v27233_v39 }
 0x78b   :  { %22201 = vmatpush3.bf16.msra.mxu1 %v27382_v31  ;;  %22084 = vmatprep.mubr.msk.bf16.mxu1 %vm1704_vm3, %v27239_v20  ;;  %v24947_v31 = vld [vmem:[%s30055_s5 + $0x10] sm:$0xff]  }
 0x78c   :  { %22322 = vmatprep.subr.bf16.mxu0 %v24947_v31 }
 0x78d   :  { %22323 = vmatpush3.bf16.msra.mxu0 %v24947_v31 }
 0x78e   :  { %22324 = vmatprep.subr.bf16.mxu0 %v24948_v42 }
 0x791   :  { %22325 = vmatpush3.bf16.msra.mxu0 %v24948_v42  ;;  %v24952_v42 = vld [vmem:[%s30055_s5 + $0x8] sm:$0xff]  }
 0x792   :  { %22085 = vmatmul.mubr.msk.bf16.gmra.mrb[4].mxu1 %vm1704_vm3, %v27242_v2 }
 0x793   :  { %22088 = vmatprep.mubr.msk.bf16.mxu1 %vm1704_vm3, %v27249_v27 }
 0x79a   :  { %22089 = vmatmul.mubr.msk.bf16.gmra.mrb[8].mxu1 %vm1704_vm3, %v27253_v26 }
 0x79b   :  { %22092 = vmatprep.mubr.msk.bf16.mxu1 %vm1704_vm3, %v27260_v57 }
 0x7a2   :  { %22093 = vmatmul.mubr.msk.bf16.gmra.mrb[12].mxu1 %vm1704_vm3, %v27263_v24 }
 0x7a3   :  { %22096 = vmatprep.mubr.msk.bf16.mxu1 %vm1704_vm3, %v27270_v15 }
 0x7aa   :  { %22097 = vmatmul.mubr.msk.bf16.gmra.mrb[16].mxu1 %vm1704_vm3, %v27273_v3 }
 0x7ab   :  { %22100 = vmatprep.mubr.msk.bf16.mxu1 %vm1704_vm3, %v27280_v43 }
 0x7b2   :  { %22101 = vmatmul.mubr.msk.bf16.gmra.mrb[20].mxu1 %vm1704_vm3, %v27283_v50 }
 0x7b3   :  { %22104 = vmatprep.mubr.msk.bf16.mxu1 %vm1704_vm3, %v27290_v0 }
 0x7ba   :  { %22105 = vmatmul.mubr.msk.bf16.gmra.mrb[24].mxu1 %vm1704_vm3, %v27293_v48 }
 0x7bb   :  { %22108 = vmatprep.mubr.msk.bf16.mxu1 %vm1704_vm3, %v27300_v22 }
 0x7c2   :  { %22109 = vmatmul.mubr.msk.bf16.gmra.mrb[28].mxu1 %vm1704_vm3, %v27303_v40 }
 0x7c3   :  { %22112 = vmatprep.mubr.msk.bf16.mxu1 %vm1704_vm3, %v27310_v5 }
 0x7ca   :  { %22113 = vmatmul.mubr.msk.bf16.gmra.mrb[32].mxu1 %vm1704_vm3, %v27313_v47 }
 0x7cb   :  { %22116 = vmatprep.mubr.msk.bf16.mxu1 %vm1704_vm3, %v27320_v53 }
 0x7d2   :  { %22117 = vmatmul.mubr.msk.bf16.gmra.mrb[36].mxu1 %vm1704_vm3, %v27323_v12 }
 0x7d3   :  { %22120 = vmatprep.mubr.msk.bf16.mxu1 %vm1704_vm3, %v27330_v36 }
 0x7da   :  { %22121 = vmatmul.mubr.msk.bf16.gmra.mrb[40].mxu1 %vm1704_vm3, %v30233_v29 }
 0x7db   :  { %22124 = vmatprep.mubr.msk.bf16.mxu1 %vm1704_vm3, %v27344_v49 }
 0x7e2   :  { %22125 = vmatmul.mubr.msk.bf16.gmra.mrb[44].mxu1 %vm1704_vm3, %v27349_v19 }
 0x7e3   :  { %22128 = vmatprep.mubr.msk.bf16.mxu1 %vm1704_vm3, %v27360_v8 }
 0x7ea   :  { %22129 = vmatmul.mubr.msk.bf16.gmra.mrb[48].mxu1 %vm1704_vm3, %v30234_v61 }
 0x7eb   :  { %22132 = vmatprep.mubr.msk.bf16.mxu1 %vm1704_vm3, %v30235_v21 }
 0x7f2   :  { %22133 = vmatmul.mubr.msk.bf16.gmra.mrb[52].mxu1 %vm1704_vm3, %v30236_v16 }
 0x7f3   :  { %22136 = vmatprep.mubr.msk.bf16.mxu1 %vm1704_vm3, %v30237_v63 }
 0x7fa   :  { %22137 = vmatmul.mubr.msk.bf16.gmra.mrb[56].mxu1 %vm1704_vm3, %v30238_v37 }
 0x7fb   :  { %22140 = vmatprep.mubr.msk.bf16.mxu1 %vm1704_vm3, %v30239_v45 }
 0x802   :  { %22141 = vmatmul.mubr.msk.bf16.gmra.mrb[60].mxu1 %vm1704_vm3, %v30240_v34 }
 0x803   :  { %22144 = vmatprep.mubr.msk.bf16.mxu1 %vm1704_vm3, %v30241_v44 }
 0x80a   :  { %22145 = vmatmul.mubr.msk.bf16.gmra.mrb[64].mxu1 %vm1704_vm3, %v30242_v59 }
 0x80b   :  { %22148 = vmatprep.mubr.msk.bf16.mxu1 %vm1704_vm3, %v30243_v41 }
 0x812   :  { %22149 = vmatmul.mubr.msk.bf16.gmra.mrb[68].mxu1 %vm1704_vm3, %v30244_v14 }
 0x813   :  { %22152 = vmatprep.mubr.msk.bf16.mxu1 %vm1704_vm3, %v30245_v32 }
 0x81a   :  { %22153 = vmatmul.mubr.msk.bf16.gmra.mrb[72].mxu1 %vm1704_vm3, %v30246_v52 }
 0x81b   :  { %22156 = vmatprep.mubr.msk.bf16.mxu1 %vm1704_vm3, %v30247_v17 }
 0x822   :  { %22157 = vmatmul.mubr.msk.bf16.gmra.mrb[76].mxu1 %vm1704_vm3, %v30248_v10 }
 0x823   :  { %22160 = vmatprep.mubr.msk.bf16.mxu1 %vm1704_vm3, %v30249_v62 }
 0x82a   :  { %22161 = vmatmul.mubr.msk.bf16.gmra.mrb[80].mxu1 %vm1704_vm3, %v30250_v54 }
 0x82b   :  { %22164 = vmatprep.mubr.msk.bf16.mxu1 %vm1704_vm3, %v30251_v1 }
 0x832   :  { %22165 = vmatmul.mubr.msk.bf16.gmra.mrb[84].mxu1 %vm1704_vm3, %v30252_v18 }
 0x833   :  { %22168 = vmatprep.mubr.msk.bf16.mxu1 %vm1704_vm3, %v30253_v33 }
 0x83a   :  { %22169 = vmatmul.mubr.msk.bf16.gmra.mrb[88].mxu1 %vm1704_vm3, %v30254_v55 }
 0x83b   :  { %22172 = vmatprep.mubr.msk.bf16.mxu1 %vm1704_vm3, %v30255_v4 }
 0x842   :  { %22173 = vmatmul.mubr.msk.bf16.gmra.mrb[92].mxu1 %vm1704_vm3, %v30256_v35 }
 0x843   :  { %22176 = vmatprep.mubr.msk.bf16.mxu1 %vm1704_vm3, %v27419_v11 }
 0x84a   :  { %22177 = vmatmul.mubr.msk.bf16.gmra.mrb[96].mxu1 %vm1704_vm3, %v27423_v23 }
 0x84b   :  { %22180 = vmatprep.mubr.msk.bf16.mxu1 %vm1704_vm3, %v27431_v9 }
 0x852   :  { %22181 = vmatmul.mubr.msk.bf16.gmra.mrb[100].mxu1 %vm1704_vm3, %v27434_v25 }
 0x853   :  { %22184 = vmatprep.mubr.msk.bf16.mxu1 %vm1704_vm3, %v27441_v7 }
 0x85a   :  { %22185 = vmatmul.mubr.msk.bf16.gmra.mrb[104].mxu1 %vm1704_vm3, %v27444_v58 }
 0x85b   :  { %22188 = vmatprep.mubr.msk.bf16.mxu1 %vm1704_vm3, %v27451_v60 }
 0x862   :  { %22189 = vmatmul.mubr.msk.bf16.gmra.mrb[108].mxu1 %vm1704_vm3, %v27454_v6 }
 0x863   :  { %22192 = vmatprep.mubr.msk.bf16.mxu1 %vm1704_vm3, %v27461_v46 }
 0x86a   :  { %22193 = vmatmul.mubr.msk.bf16.gmra.mrb[112].mxu1 %vm1704_vm3, %v27464_v28 }
 0x86b   :  { %22196 = vmatprep.mubr.msk.bf16.mxu1 %vm1704_vm3, %v27471_v38 }
 0x872   :  { %22197 = vmatmul.mubr.msk.bf16.gmra.mrb[116].mxu1 %vm1704_vm3, %v27474_v30 }
 0x873   :  { %22202 = vmatprep.mubr.msk.bf16.mxu1 %vm1704_vm3, %v27233_v39 }
 0x87a   :  { %22203 = vmatmul.mubr.msk.bf16.vlgmr.msra.gmra.mrb[0].mxu1 %vm1704_vm3, %v27239_v20 }
 0x87b   :  { %22206 = vmatprep.mubr.msk.bf16.mxu1 %vm1704_vm3, %v27242_v2 }
 0x882   :  { %22207 = vmatmul.mubr.msk.bf16.gmra.mrb[4].mxu1 %vm1704_vm3, %v27249_v27 }
 0x883   :  { %22210 = vmatprep.mubr.msk.bf16.mxu1 %vm1704_vm3, %v27253_v26 }
 0x88a   :  { %22211 = vmatmul.mubr.msk.bf16.gmra.mrb[8].mxu1 %vm1704_vm3, %v27260_v57 }
 0x88b   :  { %22214 = vmatprep.mubr.msk.bf16.mxu1 %vm1704_vm3, %v27263_v24 }
 0x892   :  { %22215 = vmatmul.mubr.msk.bf16.gmra.mrb[12].mxu1 %vm1704_vm3, %v27270_v15 }
 0x893   :  { %22218 = vmatprep.mubr.msk.bf16.mxu1 %vm1704_vm3, %v27273_v3 }
 0x89a   :  { %22219 = vmatmul.mubr.msk.bf16.gmra.mrb[16].mxu1 %vm1704_vm3, %v27280_v43 }
 0x89b   :  { %22222 = vmatprep.mubr.msk.bf16.mxu1 %vm1704_vm3, %v27283_v50 }
 0x8a2   :  { %22223 = vmatmul.mubr.msk.bf16.gmra.mrb[20].mxu1 %vm1704_vm3, %v27290_v0  ;;  %v27737_v0 = vld [vmem:[%s30056_s4] ss:$0 sm:$0xff] }
 0x8a3   :  { %22226 = vmatprep.mubr.msk.bf16.mxu1 %vm1704_vm3, %v27293_v48 }
 0x8aa   :  { %22227 = vmatmul.mubr.msk.bf16.gmra.mrb[24].mxu1 %vm1704_vm3, %v27300_v22  ;;  %v27683_v22 = vld [vmem:[%s30055_s5] sm:$0xff]  }
 0x8ab   :  { %22230 = vmatprep.mubr.msk.bf16.mxu1 %vm1704_vm3, %v27303_v40  ;;  %22414 = vmatprep.subr.bf16.mxu0 %v27683_v22 }
 0x8b2   :  { %22231 = vmatmul.mubr.msk.bf16.gmra.mrb[28].mxu1 %vm1704_vm3, %v27310_v5  ;;  %v24950_v5 = vld [vmem:[%s30052_s0 + $0x258] sm:$0xff]  }
 0x8b3   :  { %22234 = vmatprep.mubr.msk.bf16.mxu1 %vm1704_vm3, %v27313_v47 }
 0x8ba   :  { %22235 = vmatmul.mubr.msk.bf16.gmra.mrb[32].mxu1 %vm1704_vm3, %v27320_v53  ;;  %v24949_v53 = vld [vmem:[%s30052_s0 + $0x250] sm:$0xff]   ;;  %s25286_s0 = smov 64  }
 0x8bb   :  { %22238 = vmatprep.mubr.msk.bf16.mxu1 %vm1704_vm3, %v27323_v12  ;;  %21220 = vmatprep.mubr.msk.bf16.mxu0 %vm599_vm2, %v24949_v53 }
 0x8bc   :  { %21221 = vmatmul.mubr.msk.bf16.gmra.mrb[148].mxu0 %vm599_vm2, %v24950_v5 }
 0x8c2   :  { %22239 = vmatmul.mubr.msk.bf16.gmra.mrb[36].mxu1 %vm1704_vm3, %v27330_v36 }
 0x8c3   :  { %22242 = vmatprep.mubr.msk.bf16.mxu1 %vm1704_vm3, %v30233_v29 }
 0x8ca   :  { %22243 = vmatmul.mubr.msk.bf16.gmra.mrb[40].mxu1 %vm1704_vm3, %v27344_v49 }
 0x8cb   :  { %22246 = vmatprep.mubr.msk.bf16.mxu1 %vm1704_vm3, %v27349_v19 }
 0x8d2   :  { %22247 = vmatmul.mubr.msk.bf16.gmra.mrb[44].mxu1 %vm1704_vm3, %v27360_v8 }
 0x8d3   :  { %22250 = vmatprep.mubr.msk.bf16.mxu1 %vm1704_vm3, %v30234_v61 }
 0x8da   :  { %22251 = vmatmul.mubr.msk.bf16.gmra.mrb[48].mxu1 %vm1704_vm3, %v30235_v21 }
 0x8db   :  { %22254 = vmatprep.mubr.msk.bf16.mxu1 %vm1704_vm3, %v30236_v16 }
 0x8e2   :  { %22255 = vmatmul.mubr.msk.bf16.gmra.mrb[52].mxu1 %vm1704_vm3, %v30237_v63 }
 0x8e3   :  { %22258 = vmatprep.mubr.msk.bf16.mxu1 %vm1704_vm3, %v30238_v37  ;;  %v8436_v37 = vld [vmem:[#allocation2 + $0x248] sm:$0xff] }
 0x8ea   :  { %22259 = vmatmul.mubr.msk.bf16.gmra.mrb[56].mxu1 %vm1704_vm3, %v30239_v45 }
 0x8eb   :  { %22262 = vmatprep.mubr.msk.bf16.mxu1 %vm1704_vm3, %v30240_v34 }
 0x8f2   :  { %22263 = vmatmul.mubr.msk.bf16.gmra.mrb[60].mxu1 %vm1704_vm3, %v30241_v44 }
 0x8f3   :  { %22266 = vmatprep.mubr.msk.bf16.mxu1 %vm1704_vm3, %v30242_v59 }
 0x8fa   :  { %22267 = vmatmul.mubr.msk.bf16.gmra.mrb[64].mxu1 %vm1704_vm3, %v30243_v41 }
 0x8fb   :  { %22270 = vmatprep.mubr.msk.bf16.mxu1 %vm1704_vm3, %v30244_v14 }
 0x902   :  { %22271 = vmatmul.mubr.msk.bf16.gmra.mrb[68].mxu1 %vm1704_vm3, %v30245_v32 }
 0x903   :  { %22274 = vmatprep.mubr.msk.bf16.mxu1 %vm1704_vm3, %v30246_v52 }
 0x90a   :  { %22275 = vmatmul.mubr.msk.bf16.gmra.mrb[72].mxu1 %vm1704_vm3, %v30247_v17 }
 0x90b   :  { %22278 = vmatprep.mubr.msk.bf16.mxu1 %vm1704_vm3, %v30248_v10 }
 0x912   :  { %22279 = vmatmul.mubr.msk.bf16.gmra.mrb[76].mxu1 %vm1704_vm3, %v30249_v62 }
 0x913   :  { %22282 = vmatprep.mubr.msk.bf16.mxu1 %vm1704_vm3, %v30250_v54 }
 0x91a   :  { %22283 = vmatmul.mubr.msk.bf16.gmra.mrb[80].mxu1 %vm1704_vm3, %v30251_v1 }
 0x91b   :  { %22286 = vmatprep.mubr.msk.bf16.mxu1 %vm1704_vm3, %v30252_v18 }
 0x922   :  { %22287 = vmatmul.mubr.msk.bf16.gmra.mrb[84].mxu1 %vm1704_vm3, %v30253_v33 }
 0x923   :  { %22290 = vmatprep.mubr.msk.bf16.mxu1 %vm1704_vm3, %v30254_v55 }
 0x92a   :  { %22291 = vmatmul.mubr.msk.bf16.gmra.mrb[88].mxu1 %vm1704_vm3, %v30255_v4 }
 0x92b   :  { %22294 = vmatprep.mubr.msk.bf16.mxu1 %vm1704_vm3, %v30256_v35 }
 0x932   :  { %22295 = vmatmul.mubr.msk.bf16.gmra.mrb[92].mxu1 %vm1704_vm3, %v27419_v11 }
 0x933   :  { %22298 = vmatprep.mubr.msk.bf16.mxu1 %vm1704_vm3, %v27423_v23 }
 0x93a   :  { %22299 = vmatmul.mubr.msk.bf16.gmra.mrb[96].mxu1 %vm1704_vm3, %v27431_v9 }
 0x93b   :  { %22302 = vmatprep.mubr.msk.bf16.mxu1 %vm1704_vm3, %v27434_v25 }
 0x942   :  { %22303 = vmatmul.mubr.msk.bf16.gmra.mrb[100].mxu1 %vm1704_vm3, %v27441_v7 }
 0x943   :  { %22306 = vmatprep.mubr.msk.bf16.mxu1 %vm1704_vm3, %v27444_v58 }
 0x94a   :  { %22307 = vmatmul.mubr.msk.bf16.gmra.mrb[104].mxu1 %vm1704_vm3, %v27451_v60 }
 0x94b   :  { %22310 = vmatprep.mubr.msk.bf16.mxu1 %vm1704_vm3, %v27454_v6 }
 0x94d   :  { %v22204_v43 = vpop.f32.mrb[0].mxu1 }
 0x94e   :  { %v9331_v39 = vadd.f32 %v22204_v43, %v27737_v0  ;;  %v8483_v20 = vpop.f32.mrb[1].mxu1 }
 0x94f   :  { %v9329_v2 = vadd.f32 %v27737_v0, %v8483_v20  ;;  %v22205_v27 = vpop.f32.mrb[2].mxu1 }
 0x950   :  { %v9332_v26 = vadd.f32 %v22205_v27, %v27737_v0  ;;  %v8486_v57 = vpop.f32.mrb[3].mxu1  ;;  %v9451_v15 = vmax.f32 %v9331_v39, 0.0 }
 0x951   :  { %v9330_v24 = vadd.f32 %v27737_v0, %v8486_v57  ;;  %v9449_v50 = vmax.f32 %v9329_v2, 0.0 }
 0x952   :  { %v9452_v3 = vmax.f32 %v9332_v26, 0.0  ;;  %22311 = vmatmul.mubr.msk.bf16.gmra.mrb[108].mxu1 %vm1704_vm3, %v27461_v46 }
 0x953   :  { %v9450_v48 = vmax.f32 %v9330_v24, 0.0  ;;  %22314 = vmatprep.mubr.msk.bf16.mxu1 %vm1704_vm3, %v27464_v28 }
 0x954   :  { %v9570_v40 = vpack.c.bf16 %v9452_v3, %v9451_v15 }
 0x955   :  { %v9569_v47 = vpack.c.bf16 %v9450_v48, %v9449_v50  ;;  %v22208_v12 = vpop.f32.mrb[4].mxu1 }
 0x956   :  { %9631 = vst.msk [vmem:[#allocation3 + $0x8] sm:$0xff] %vm9629_vm5, %v9570_v40  ;;  %v9335_v36 = vadd.f32 %v22208_v12, %v27737_v0  ;;  %v8499_v49 = vpop.f32.mrb[5].mxu1 }
 0x957   :  { %9630 = vst.msk [vmem:[#allocation3] sm:$0xff] %vm9629_vm5, %v9569_v47  ;;  %v9333_v19 = vadd.f32 %v27737_v0, %v8499_v49  ;;  %v22209_v8 = vpop.f32.mrb[6].mxu1 }
 0x958   :  { %v9336_v11 = vadd.f32 %v22209_v8, %v27737_v0  ;;  %v8502_v23 = vpop.f32.mrb[7].mxu1  ;;  %v9455_v25 = vmax.f32 %v9335_v36, 0.0 }
 0x959   :  { %v9334_v9 = vadd.f32 %v27737_v0, %v8502_v23  ;;  %v9453_v58 = vmax.f32 %v9333_v19, 0.0 }
 0x95a   :  { %v9456_v7 = vmax.f32 %v9336_v11, 0.0  ;;  %22315 = vmatmul.mubr.msk.bf16.gmra.mrb[112].mxu1 %vm1704_vm3, %v27471_v38 }
 0x95b   :  { %v9454_v60 = vmax.f32 %v9334_v9, 0.0  ;;  %22318 = vmatprep.mubr.msk.bf16.mxu1 %vm1704_vm3, %v27474_v30 }
 0x95c   :  { %v9572_v6 = vpack.c.bf16 %v9456_v7, %v9455_v25 }
 0x95d   :  { %v9571_v46 = vpack.c.bf16 %v9454_v60, %v9453_v58  ;;  %v22212_v28 = vpop.f32.mrb[8].mxu1  ;;  %v9691_v51 = vld [vmem:[#allocation3 + $0x8] sm:$0xff] }
 0x95e   :  { %9633 = vst.msk [vmem:[#allocation3 + $0x18] sm:$0xff] %vm9629_vm5, %v9572_v6  ;;  %v9339_v13 = vadd.f32 %v22212_v28, %v27737_v0  ;;  %v8515_v56 = vpop.f32.mrb[9].mxu1  ;;  %v9738_v31 = vld [vmem:[#allocation3] sm:$0xf0]  ;;  %v9791_v29 = vrot.slane %v9691_v51, 4 }
 0x95f   :  { %9632 = vst.msk [vmem:[#allocation3 + $0x10] sm:$0xff] %vm9629_vm5, %v9571_v46  ;;  %v9337_v38 = vadd.f32 %v27737_v0, %v8515_v56  ;;  %v22213_v61 = vpop.f32.mrb[10].mxu1  ;;  %v9790_v21 = vrot.slane %v9738_v31, 4 }
 0x960   :  { %v9340_v16 = vadd.f32 %v22213_v61, %v27737_v0  ;;  %v8518_v30 = vpop.f32.mrb[11].mxu1  ;;  %v9459_v34 = vmax.f32 %v9339_v13, 0.0 }
 0x961   :  { %v9338_v63 = vadd.f32 %v27737_v0, %v8518_v30  ;;  %v9792_v45 = vsel %vm1909_vm4, %v9790_v21, %v9791_v29  ;;  %v9457_v59 = vmax.f32 %v9337_v38, 0.0 }
 0x962   :  { %v9460_v44 = vmax.f32 %v9340_v16, 0.0  ;;  %22319 = vmatmul.mubr.msk.bf16.gmra.mrb[116].mxu1 %vm1704_vm3, %v8436_v37  ;;  %22326 = vmatprep.mubr.msk.bf16.mxu0 %vm9629_vm5, %v9792_v45 }
 0x963   :  { %v9458_v41 = vmax.f32 %v9338_v63, 0.0 }
 0x964   :  { %v9574_v14 = vpack.c.bf16 %v9460_v44, %v9459_v34 }
 0x965   :  { %v9573_v32 = vpack.c.bf16 %v9458_v41, %v9457_v59  ;;  %v22216_v52 = vpop.f32.mrb[12].mxu1  ;;  %v9693_v17 = vld [vmem:[#allocation3 + $0x18] sm:$0xff] }
 0x966   :  { %9635 = vst.msk [vmem:[#allocation3 + $0x28] sm:$0xff] %vm9629_vm5, %v9574_v14  ;;  %v9343_v10 = vadd.f32 %v22216_v52, %v27737_v0  ;;  %v8531_v62 = vpop.f32.mrb[13].mxu1  ;;  %v9692_v54 = vld [vmem:[#allocation3 + $0x10] sm:$0xff]  ;;  %v9795_v1 = vrot.slane %v9693_v17, 4 }
 0x967   :  { %9634 = vst.msk [vmem:[#allocation3 + $0x20] sm:$0xff] %vm9629_vm5, %v9573_v32  ;;  %v9341_v18 = vadd.f32 %v27737_v0, %v8531_v62  ;;  %v22217_v33 = vpop.f32.mrb[14].mxu1  ;;  %v9793_v55 = vrot.slane %v9692_v54, 4 }
 0x968   :  { %v9344_v4 = vadd.f32 %v22217_v33, %v27737_v0  ;;  %v8534_v35 = vpop.f32.mrb[15].mxu1  ;;  %v9463_v39 = vmax.f32 %v9343_v10, 0.0 }
 0x969   :  { %v9342_v53 = vadd.f32 %v27737_v0, %v8534_v35  ;;  %v9794_v5 = vsel %vm1909_vm4, %v9791_v29, %v9793_v55  ;;  %v9796_v43 = vsel %vm1909_vm4, %v9793_v55, %v9795_v1  ;;  %v9461_v2 = vmax.f32 %v9341_v18, 0.0 }
 0x96a   :  { %v9464_v20 = vmax.f32 %v9344_v4, 0.0  ;;  %22327 = vmatmul.mubr.msk.bf16.vlgmr.msra.gmra.mrb[152].mxu0 %vm9629_vm5, %v9794_v5 }
 0x96b   :  { %v9462_v27 = vmax.f32 %v9342_v53, 0.0  ;;  %22415 = vmatpush3.bf16.msra.mxu0 %v27683_v22  ;;  %22330 = vmatprep.mubr.msk.bf16.mxu0 %vm9629_vm5, %v9796_v43 }
 0x96c   :  { %v9576_v26 = vpack.c.bf16 %v9464_v20, %v9463_v39  ;;  %22416 = vmatprep.subr.bf16.mxu0 %v24952_v42 }
 0x96d   :  { %v9575_v57 = vpack.c.bf16 %v9462_v27, %v9461_v2  ;;  %v22220_v24 = vpop.f32.mrb[16].mxu1  ;;  %v9695_v15 = vld [vmem:[#allocation3 + $0x28] sm:$0xff] }
 0x96e   :  { %9637 = vst.msk [vmem:[#allocation3 + $0x38] sm:$0xff] %vm9629_vm5, %v9576_v26  ;;  %v9347_v3 = vadd.f32 %v22220_v24, %v27737_v0  ;;  %v8547_v50 = vpop.f32.mrb[17].mxu1  ;;  %v9694_v48 = vld [vmem:[#allocation3 + $0x20] sm:$0xff]  ;;  %v9799_v40 = vrot.slane %v9695_v15, 4 }
 0x96f   :  { %9636 = vst.msk [vmem:[#allocation3 + $0x30] sm:$0xff] %vm9629_vm5, %v9575_v57  ;;  %v9345_v47 = vadd.f32 %v27737_v0, %v8547_v50  ;;  %v22221_v12 = vpop.f32.mrb[18].mxu1  ;;  %v9797_v22 = vrot.slane %v9694_v48, 4  ;;  %22417 = vmatpush3.bf16.msra.mxu0 %v24952_v42 }
 0x970   :  { %v9348_v36 = vadd.f32 %v22221_v12, %v27737_v0  ;;  %v8550_v49 = vpop.f32.mrb[19].mxu1  ;;  %v9467_v23 = vmax.f32 %v9347_v3, 0.0 }
 0x971   :  { %v9346_v19 = vadd.f32 %v27737_v0, %v8550_v49  ;;  %v9798_v8 = vsel %vm1909_vm4, %v9795_v1, %v9797_v22  ;;  %v9800_v11 = vsel %vm1909_vm4, %v9797_v22, %v9799_v40  ;;  %v9465_v25 = vmax.f32 %v9345_v47, 0.0 }
 0x972   :  { %v9468_v9 = vmax.f32 %v9348_v36, 0.0  ;;  %22331 = vmatmul.mubr.msk.bf16.gmra.mrb[156].mxu0 %vm9629_vm5, %v9798_v8 }
 0x973   :  { %v9466_v7 = vmax.f32 %v9346_v19, 0.0  ;;  %22334 = vmatprep.mubr.msk.bf16.mxu0 %vm9629_vm5, %v9800_v11 }
 0x974   :  { %v9578_v58 = vpack.c.bf16 %v9468_v9, %v9467_v23 }
 0x975   :  { %v9577_v60 = vpack.c.bf16 %v9466_v7, %v9465_v25  ;;  %v22224_v6 = vpop.f32.mrb[20].mxu1  ;;  %v9697_v46 = vld [vmem:[#allocation3 + $0x38] sm:$0xff] }
 0x976   :  { %9639 = vst.msk [vmem:[#allocation3 + $0x48] sm:$0xff] %vm9629_vm5, %v9578_v58  ;;  %v9351_v28 = vadd.f32 %v22224_v6, %v27737_v0  ;;  %v8563_v51 = vpop.f32.mrb[21].mxu1  ;;  %v9696_v13 = vld [vmem:[#allocation3 + $0x30] sm:$0xff]  ;;  %v9803_v56 = vrot.slane %v9697_v46, 4 }
 0x977   :  { %9638 = vst.msk [vmem:[#allocation3 + $0x40] sm:$0xff] %vm9629_vm5, %v9577_v60  ;;  %v9349_v31 = vadd.f32 %v27737_v0, %v8563_v51  ;;  %v22225_v29 = vpop.f32.mrb[22].mxu1  ;;  %v9801_v38 = vrot.slane %v9696_v13, 4 }
 0x978   :  { %v9352_v61 = vadd.f32 %v22225_v29, %v27737_v0  ;;  %v8566_v21 = vpop.f32.mrb[23].mxu1  ;;  %v9471_v37 = vmax.f32 %v9351_v28, 0.0 }
 0x979   :  { %v9350_v16 = vadd.f32 %v27737_v0, %v8566_v21  ;;  %v9802_v30 = vsel %vm1909_vm4, %v9799_v40, %v9801_v38  ;;  %v9804_v63 = vsel %vm1909_vm4, %v9801_v38, %v9803_v56  ;;  %v9469_v34 = vmax.f32 %v9349_v31, 0.0 }
 0x97a   :  { %v9472_v45 = vmax.f32 %v9352_v61, 0.0  ;;  %22335 = vmatmul.mubr.msk.bf16.gmra.mrb[160].mxu0 %vm9629_vm5, %v9802_v30 }
 0x97b   :  { %v9470_v44 = vmax.f32 %v9350_v16, 0.0  ;;  %22338 = vmatprep.mubr.msk.bf16.mxu0 %vm9629_vm5, %v9804_v63 }
 0x97c   :  { %v9580_v59 = vpack.c.bf16 %v9472_v45, %v9471_v37 }
 0x97d   :  { %v9579_v41 = vpack.c.bf16 %v9470_v44, %v9469_v34  ;;  %v22228_v14 = vpop.f32.mrb[24].mxu1  ;;  %v9699_v32 = vld [vmem:[#allocation3 + $0x48] sm:$0xff] }
 0x97e   :  { %9641 = vst.msk [vmem:[#allocation3 + $0x58] sm:$0xff] %vm9629_vm5, %v9580_v59  ;;  %v9355_v52 = vadd.f32 %v22228_v14, %v27737_v0  ;;  %v8579_v17 = vpop.f32.mrb[25].mxu1  ;;  %v9698_v10 = vld [vmem:[#allocation3 + $0x40] sm:$0xff]  ;;  %v9807_v62 = vrot.slane %v9699_v32, 4 }
 0x97f   :  { %9640 = vst.msk [vmem:[#allocation3 + $0x50] sm:$0xff] %vm9629_vm5, %v9579_v41  ;;  %v9353_v54 = vadd.f32 %v27737_v0, %v8579_v17  ;;  %v22229_v1 = vpop.f32.mrb[26].mxu1  ;;  %v9805_v18 = vrot.slane %v9698_v10, 4 }
 0x980   :  { %v9356_v33 = vadd.f32 %v22229_v1, %v27737_v0  ;;  %v8582_v55 = vpop.f32.mrb[27].mxu1  ;;  %v9475_v53 = vmax.f32 %v9355_v52, 0.0 }
 0x981   :  { %v9354_v4 = vadd.f32 %v27737_v0, %v8582_v55  ;;  %v9806_v35 = vsel %vm1909_vm4, %v9803_v56, %v9805_v18  ;;  %v9808_v42 = vsel %vm1909_vm4, %v9805_v18, %v9807_v62  ;;  %v9473_v43 = vmax.f32 %v9353_v54, 0.0 }
 0x982   :  { %v9476_v5 = vmax.f32 %v9356_v33, 0.0  ;;  %22339 = vmatmul.mubr.msk.bf16.gmra.mrb[164].mxu0 %vm9629_vm5, %v9806_v35 }
 0x983   :  { %v9474_v39 = vmax.f32 %v9354_v4, 0.0  ;;  %22342 = vmatprep.mubr.msk.bf16.mxu0 %vm9629_vm5, %v9808_v42 }
 0x984   :  { %v9582_v20 = vpack.c.bf16 %v9476_v5, %v9475_v53 }
 0x985   :  { %v9581_v2 = vpack.c.bf16 %v9474_v39, %v9473_v43  ;;  %v22232_v27 = vpop.f32.mrb[28].mxu1  ;;  %v9701_v26 = vld [vmem:[#allocation3 + $0x58] sm:$0xff] }
 0x986   :  { %9643 = vst.msk [vmem:[#allocation3 + $0x68] sm:$0xff] %vm9629_vm5, %v9582_v20  ;;  %v9359_v57 = vadd.f32 %v22232_v27, %v27737_v0  ;;  %v8595_v24 = vpop.f32.mrb[29].mxu1  ;;  %v9700_v15 = vld [vmem:[#allocation3 + $0x50] sm:$0xff]  ;;  %v9811_v3 = vrot.slane %v9701_v26, 4 }
 0x987   :  { %9642 = vst.msk [vmem:[#allocation3 + $0x60] sm:$0xff] %vm9629_vm5, %v9581_v2  ;;  %v9357_v50 = vadd.f32 %v27737_v0, %v8595_v24  ;;  %v22233_v48 = vpop.f32.mrb[30].mxu1  ;;  %v9809_v40 = vrot.slane %v9700_v15, 4 }
 0x988   :  { %v9360_v47 = vadd.f32 %v22233_v48, %v27737_v0  ;;  %v8598_v12 = vpop.f32.mrb[31].mxu1  ;;  %v9479_v19 = vmax.f32 %v9359_v57, 0.0 }
 0x989   :  { %v9358_v22 = vadd.f32 %v27737_v0, %v8598_v12  ;;  %v9810_v36 = vsel %vm1909_vm4, %v9807_v62, %v9809_v40  ;;  %v9812_v49 = vsel %vm1909_vm4, %v9809_v40, %v9811_v3  ;;  %v9477_v11 = vmax.f32 %v9357_v50, 0.0  ;;  %v27856_v50 = vld [vmem:[%s30055_s5 + $0x20] sm:$0xff]  }
 0x98a   :  { %v9480_v8 = vmax.f32 %v9360_v47, 0.0  ;;  %22343 = vmatmul.mubr.msk.bf16.gmra.mrb[168].mxu0 %vm9629_vm5, %v9810_v36  ;;  %22506 = vmatprep.subr.bf16.mxu0 %v27856_v50 }
 0x98b   :  { %v9478_v23 = vmax.f32 %v9358_v22, 0.0  ;;  %22346 = vmatprep.mubr.msk.bf16.mxu0 %vm9629_vm5, %v9812_v49 }
 0x98c   :  { %v9584_v9 = vpack.c.bf16 %v9480_v8, %v9479_v19 }
 0x98d   :  { %v9583_v25 = vpack.c.bf16 %v9478_v23, %v9477_v11  ;;  %v22236_v7 = vpop.f32.mrb[32].mxu1  ;;  %v9703_v58 = vld [vmem:[#allocation3 + $0x68] sm:$0xff] }
 0x98e   :  { %9645 = vst.msk [vmem:[#allocation3 + $0x78] sm:$0xff] %vm9629_vm5, %v9584_v9  ;;  %v9363_v60 = vadd.f32 %v22236_v7, %v27737_v0  ;;  %v8611_v6 = vpop.f32.mrb[33].mxu1  ;;  %v9702_v46 = vld [vmem:[#allocation3 + $0x60] sm:$0xff]  ;;  %v9815_v28 = vrot.slane %v9703_v58, 4 }
 0x98f   :  { %9644 = vst.msk [vmem:[#allocation3 + $0x70] sm:$0xff] %vm9629_vm5, %v9583_v25  ;;  %v9361_v51 = vadd.f32 %v27737_v0, %v8611_v6  ;;  %v22237_v13 = vpop.f32.mrb[34].mxu1  ;;  %v9813_v56 = vrot.slane %v9702_v46, 4 }
 0x990   :  { %v9364_v31 = vadd.f32 %v22237_v13, %v27737_v0  ;;  %v8614_v29 = vpop.f32.mrb[35].mxu1  ;;  %v9483_v16 = vmax.f32 %v9363_v60, 0.0 }
 0x991   :  { %v9362_v38 = vadd.f32 %v27737_v0, %v8614_v29  ;;  %v9814_v61 = vsel %vm1909_vm4, %v9811_v3, %v9813_v56  ;;  %v9816_v21 = vsel %vm1909_vm4, %v9813_v56, %v9815_v28  ;;  %v9481_v63 = vmax.f32 %v9361_v51, 0.0 }
 0x992   :  { %v9484_v30 = vmax.f32 %v9364_v31, 0.0  ;;  %22347 = vmatmul.mubr.msk.bf16.gmra.mrb[172].mxu0 %vm9629_vm5, %v9814_v61 }
 0x993   :  { %v9482_v37 = vmax.f32 %v9362_v38, 0.0  ;;  %22350 = vmatprep.mubr.msk.bf16.mxu0 %vm9629_vm5, %v9816_v21 }
 0x994   :  { %v9586_v45 = vpack.c.bf16 %v9484_v30, %v9483_v16 }
 0x995   :  { %v9585_v34 = vpack.c.bf16 %v9482_v37, %v9481_v63  ;;  %v22240_v44 = vpop.f32.mrb[36].mxu1  ;;  %v9705_v59 = vld [vmem:[#allocation3 + $0x78] sm:$0xff] }
 0x996   :  { %9647 = vst.msk [vmem:[#allocation3 + $0x88] sm:$0xff] %vm9629_vm5, %v9586_v45  ;;  %v9367_v41 = vadd.f32 %v22240_v44, %v27737_v0  ;;  %v8627_v14 = vpop.f32.mrb[37].mxu1  ;;  %v27832_v32 = vld [vmem:[#allocation3 + $0x70] sm:$0xff]  ;;  %v9819_v52 = vrot.slane %v9705_v59, 4 }
 0x997   :  { %9646 = vst.msk [vmem:[#allocation3 + $0x80] sm:$0xff] %vm9629_vm5, %v9585_v34  ;;  %v9365_v17 = vadd.f32 %v27737_v0, %v8627_v14  ;;  %v22241_v10 = vpop.f32.mrb[38].mxu1  ;;  %v9817_v62 = vrot.slane %v27832_v32, 4 }
 0x998   :  { %v9368_v54 = vadd.f32 %v22241_v10, %v27737_v0  ;;  %v8630_v1 = vpop.f32.mrb[39].mxu1  ;;  %v9487_v4 = vmax.f32 %v9367_v41, 0.0 }
 0x999   :  { %v9366_v18 = vadd.f32 %v27737_v0, %v8630_v1  ;;  %v9818_v33 = vsel %vm1909_vm4, %v9815_v28, %v9817_v62  ;;  %v9820_v55 = vsel %vm1909_vm4, %v9817_v62, %v9819_v52  ;;  %v9485_v42 = vmax.f32 %v9365_v17, 0.0 }
 0x99a   :  { %v9488_v35 = vmax.f32 %v9368_v54, 0.0  ;;  %22351 = vmatmul.mubr.msk.bf16.gmra.mrb[176].mxu0 %vm9629_vm5, %v9818_v33 }
 0x99b   :  { %v9486_v53 = vmax.f32 %v9366_v18, 0.0  ;;  %22354 = vmatprep.mubr.msk.bf16.mxu0 %vm9629_vm5, %v9820_v55 }
 0x99c   :  { %v9588_v5 = vpack.c.bf16 %v9488_v35, %v9487_v4 }
 0x99d   :  { %v9587_v43 = vpack.c.bf16 %v9486_v53, %v9485_v42  ;;  %v22244_v39 = vpop.f32.mrb[40].mxu1  ;;  %v27843_v20 = vld [vmem:[#allocation3 + $0x88] sm:$0xff] }
 0x99e   :  { %9649 = vst.msk [vmem:[#allocation3 + $0x98] sm:$0xff] %vm9629_vm5, %v9588_v5  ;;  %v9371_v2 = vadd.f32 %v22244_v39, %v27737_v0  ;;  %v8643_v27 = vpop.f32.mrb[41].mxu1  ;;  %v27847_v26 = vld [vmem:[#allocation3 + $0x80] sm:$0xff]  ;;  %v9823_v57 = vrot.slane %v27843_v20, 4  ;;  %v21222_v5 = vpop.f32.mrb[148].mxu0 }
 0x99f   :  { %9648 = vst.msk [vmem:[#allocation3 + $0x90] sm:$0xff] %vm9629_vm5, %v9587_v43  ;;  %v9369_v24 = vadd.f32 %v27737_v0, %v8643_v27  ;;  %v22245_v15 = vpop.f32.mrb[42].mxu1  ;;  %v9821_v3 = vrot.slane %v27847_v26, 4  ;;  %v1461_v27 = vpop.f32.mrb[149].mxu0 }
 0x9a0   :  { %v9372_v48 = vadd.f32 %v22245_v15, %v27737_v0  ;;  %v8646_v40 = vpop.f32.mrb[43].mxu1  ;;  %v9491_v36 = vmax.f32 %v9371_v2, 0.0 }
 0x9a1   :  { %v9370_v47 = vadd.f32 %v27737_v0, %v8646_v40  ;;  %v9822_v12 = vsel %vm1909_vm4, %v9819_v52, %v9821_v3  ;;  %v9824_v22 = vsel %vm1909_vm4, %v9821_v3, %v9823_v57  ;;  %v9489_v19 = vmax.f32 %v9369_v24, 0.0 }
 0x9a2   :  { %v9492_v49 = vmax.f32 %v9372_v48, 0.0  ;;  %22355 = vmatmul.mubr.msk.bf16.gmra.mrb[180].mxu0 %vm9629_vm5, %v9822_v12  ;;  %v21223_v48 = vpop.f32.mrb[150].mxu0 }
 0x9a3   :  { %v9490_v8 = vmax.f32 %v9370_v47, 0.0  ;;  %22358 = vmatprep.mubr.msk.bf16.mxu0 %vm9629_vm5, %v9824_v22  ;;  %v1464_v22 = vpop.f32.mrb[151].mxu0 }
 0x9a4   :  { %v9590_v11 = vpack.c.bf16 %v9492_v49, %v9491_v36 }
 0x9a5   :  { %v9589_v23 = vpack.c.bf16 %v9490_v8, %v9489_v19  ;;  %v22248_v9 = vpop.f32.mrb[44].mxu1  ;;  %v27865_v25 = vld [vmem:[#allocation3 + $0x98] sm:$0xff] }
 0x9a6   :  { %9651 = vst.msk [vmem:[#allocation3 + $0xa8] sm:$0xff] %vm9629_vm5, %v9590_v11  ;;  %v9375_v7 = vadd.f32 %v22248_v9, %v27737_v0  ;;  %v8659_v58 = vpop.f32.mrb[45].mxu1  ;;  %v27869_v60 = vld [vmem:[#allocation3 + $0x90] sm:$0xff]  ;;  %v9827_v6 = vrot.slane %v27865_v25, 4 }
 0x9a7   :  { %9650 = vst.msk [vmem:[#allocation3 + $0xa0] sm:$0xff] %vm9629_vm5, %v9589_v23  ;;  %v9373_v46 = vadd.f32 %v27737_v0, %v8659_v58  ;;  %v22249_v28 = vpop.f32.mrb[46].mxu1  ;;  %v9825_v51 = vrot.slane %v27869_v60, 4 }
 0x9a8   :  { %v9376_v13 = vadd.f32 %v22249_v28, %v27737_v0  ;;  %v8662_v56 = vpop.f32.mrb[47].mxu1  ;;  %v9495_v61 = vmax.f32 %v9375_v7, 0.0 }
 0x9a9   :  { %v9374_v31 = vadd.f32 %v27737_v0, %v8662_v56  ;;  %v9826_v29 = vsel %vm1909_vm4, %v9823_v57, %v9825_v51  ;;  %v9828_v38 = vsel %vm1909_vm4, %v9825_v51, %v9827_v6  ;;  %v9493_v16 = vmax.f32 %v9373_v46, 0.0 }
 0x9aa   :  { %v9496_v21 = vmax.f32 %v9376_v13, 0.0  ;;  %22359 = vmatmul.mubr.msk.bf16.gmra.mrb[184].mxu0 %vm9629_vm5, %v9826_v29 }
 0x9ab   :  { %v9494_v30 = vmax.f32 %v9374_v31, 0.0  ;;  %22362 = vmatprep.mubr.msk.bf16.mxu0 %vm9629_vm5, %v9828_v38 }
 0x9ac   :  { %v9592_v63 = vpack.c.bf16 %v9496_v21, %v9495_v61 }
 0x9ad   :  { %v9591_v37 = vpack.c.bf16 %v9494_v30, %v9493_v16  ;;  %v22252_v45 = vpop.f32.mrb[48].mxu1  ;;  %v27881_v34 = vld [vmem:[#allocation3 + $0xa8] sm:$0xff] }
 0x9ae   :  { %9653 = vst.msk [vmem:[#allocation3 + $0xb8] sm:$0xff] %vm9629_vm5, %v9592_v63  ;;  %v9379_v44 = vadd.f32 %v22252_v45, %v27737_v0  ;;  %v8675_v59 = vpop.f32.mrb[49].mxu1  ;;  %v27885_v41 = vld [vmem:[#allocation3 + $0xa0] sm:$0xff]  ;;  %v9831_v14 = vrot.slane %v27881_v34, 4 }
 0x9af   :  { %9652 = vst.msk [vmem:[#allocation3 + $0xb0] sm:$0xff] %vm9629_vm5, %v9591_v37  ;;  %v9377_v52 = vadd.f32 %v27737_v0, %v8675_v59  ;;  %v22253_v17 = vpop.f32.mrb[50].mxu1  ;;  %v9829_v10 = vrot.slane %v27885_v41, 4 }
 0x9b0   :  { %v9380_v62 = vadd.f32 %v22253_v17, %v27737_v0  ;;  %v8678_v54 = vpop.f32.mrb[51].mxu1  ;;  %v9499_v55 = vmax.f32 %v9379_v44, 0.0 }
 0x9b1   :  { %v9378_v1 = vadd.f32 %v27737_v0, %v8678_v54  ;;  %v9830_v18 = vsel %vm1909_vm4, %v9827_v6, %v9829_v10  ;;  %v9832_v33 = vsel %vm1909_vm4, %v9829_v10, %v9831_v14  ;;  %v9497_v35 = vmax.f32 %v9377_v52, 0.0 }
 0x9b2   :  { %v9500_v4 = vmax.f32 %v9380_v62, 0.0  ;;  %22363 = vmatmul.mubr.msk.bf16.gmra.mrb[188].mxu0 %vm9629_vm5, %v9830_v18 }
 0x9b3   :  { %v9498_v42 = vmax.f32 %v9378_v1, 0.0  ;;  %22366 = vmatprep.mubr.msk.bf16.mxu0 %vm9629_vm5, %v9832_v33 }
 0x9b4   :  { %v9594_v53 = vpack.c.bf16 %v9500_v4, %v9499_v55 }
 0x9b5   :  { %v9593_v43 = vpack.c.bf16 %v9498_v42, %v9497_v35  ;;  %v22256_v39 = vpop.f32.mrb[52].mxu1  ;;  %v27897_v2 = vld [vmem:[#allocation3 + $0xb8] sm:$0xff] }
 0x9b6   :  { %9655 = vst.msk [vmem:[#allocation3 + $0xc8] sm:$0xff] %vm9629_vm5, %v9594_v53  ;;  %v9383_v57 = vadd.f32 %v22256_v39, %v27737_v0  ;;  %v8691_v24 = vpop.f32.mrb[53].mxu1  ;;  %v27901_v15 = vld [vmem:[#allocation3 + $0xb0] sm:$0xff]  ;;  %v9835_v3 = vrot.slane %v27897_v2, 4 }
 0x9b7   :  { %9654 = vst.msk [vmem:[#allocation3 + $0xc0] sm:$0xff] %vm9629_vm5, %v9593_v43  ;;  %v9381_v40 = vadd.f32 %v27737_v0, %v8691_v24  ;;  %v22257_v47 = vpop.f32.mrb[54].mxu1  ;;  %v9833_v12 = vrot.slane %v27901_v15, 4 }
 0x9b8   :  { %v9384_v36 = vadd.f32 %v22257_v47, %v27737_v0  ;;  %v8694_v49 = vpop.f32.mrb[55].mxu1  ;;  %v9503_v19 = vmax.f32 %v9383_v57, 0.0 }
 0x9b9   :  { %v9382_v8 = vadd.f32 %v27737_v0, %v8694_v49  ;;  %v9834_v11 = vsel %vm1909_vm4, %v9831_v14, %v9833_v12  ;;  %v9836_v23 = vsel %vm1909_vm4, %v9833_v12, %v9835_v3  ;;  %v9501_v7 = vmax.f32 %v9381_v40, 0.0 }
 0x9ba   :  { %v9504_v9 = vmax.f32 %v9384_v36, 0.0  ;;  %22367 = vmatmul.mubr.msk.bf16.gmra.mrb[192].mxu0 %vm9629_vm5, %v9834_v11 }
 0x9bb   :  { %v9502_v58 = vmax.f32 %v9382_v8, 0.0  ;;  %22370 = vmatprep.mubr.msk.bf16.mxu0 %vm9629_vm5, %v9836_v23 }
 0x9bc   :  { %v9596_v6 = vpack.c.bf16 %v9504_v9, %v9503_v19 }
 0x9bd   :  { %v9595_v46 = vpack.c.bf16 %v9502_v58, %v9501_v7  ;;  %v22260_v28 = vpop.f32.mrb[56].mxu1  ;;  %v27913_v51 = vld [vmem:[#allocation3 + $0xc8] sm:$0xff] }
 0x9be   :  { %9657 = vst.msk [vmem:[#allocation3 + $0xd8] sm:$0xff] %vm9629_vm5, %v9596_v6  ;;  %v9387_v13 = vadd.f32 %v22260_v28, %v27737_v0  ;;  %v8707_v56 = vpop.f32.mrb[57].mxu1  ;;  %v27917_v31 = vld [vmem:[#allocation3 + $0xc0] sm:$0xff]  ;;  %v9839_v29 = vrot.slane %v27913_v51, 4 }
 0x9bf   :  { %9656 = vst.msk [vmem:[#allocation3 + $0xd0] sm:$0xff] %vm9629_vm5, %v9595_v46  ;;  %v9385_v38 = vadd.f32 %v27737_v0, %v8707_v56  ;;  %v22261_v61 = vpop.f32.mrb[58].mxu1  ;;  %v27923_v21 = vrot.slane %v27917_v31, 4 }
 0x9c0   :  { %v9388_v16 = vadd.f32 %v22261_v61, %v27737_v0  ;;  %v8710_v30 = vpop.f32.mrb[59].mxu1  ;;  %v9507_v44 = vmax.f32 %v9387_v13, 0.0 }
 0x9c1   :  { %v9386_v63 = vadd.f32 %v27737_v0, %v8710_v30  ;;  %v9838_v37 = vsel %vm1909_vm4, %v9835_v3, %v27923_v21  ;;  %v27931_v45 = vsel %vm1909_vm4, %v27923_v21, %v9839_v29  ;;  %v9505_v14 = vmax.f32 %v9385_v38, 0.0 }
 0x9c2   :  { %v9508_v59 = vmax.f32 %v9388_v16, 0.0  ;;  %22371 = vmatmul.mubr.msk.bf16.gmra.mrb[196].mxu0 %vm9629_vm5, %v9838_v37 }
 0x9c3   :  { %v9506_v52 = vmax.f32 %v9386_v63, 0.0  ;;  %22374 = vmatprep.mubr.msk.bf16.mxu0 %vm9629_vm5, %v27931_v45 }
 0x9c4   :  { %v9598_v17 = vpack.c.bf16 %v9508_v59, %v9507_v44 }
 0x9c5   :  { %v9597_v10 = vpack.c.bf16 %v9506_v52, %v9505_v14  ;;  %v22264_v62 = vpop.f32.mrb[60].mxu1  ;;  %v27936_v54 = vld [vmem:[#allocation3 + $0xd8] sm:$0xff] }
 0x9c6   :  { %9659 = vst.msk [vmem:[#allocation3 + $0xe8] sm:$0xff] %vm9629_vm5, %v9598_v17  ;;  %v9391_v1 = vadd.f32 %v22264_v62, %v27737_v0  ;;  %v8723_v18 = vpop.f32.mrb[61].mxu1  ;;  %v27940_v33 = vld [vmem:[#allocation3 + $0xd0] sm:$0xff]  ;;  %v9843_v55 = vrot.slane %v27936_v54, 4 }
 0x9c7   :  { %9658 = vst.msk [vmem:[#allocation3 + $0xe0] sm:$0xff] %vm9629_vm5, %v9597_v10  ;;  %v9389_v4 = vadd.f32 %v27737_v0, %v8723_v18  ;;  %v22265_v35 = vpop.f32.mrb[62].mxu1  ;;  %v9841_v42 = vrot.slane %v27940_v33, 4 }
 0x9c8   :  { %v9392_v53 = vadd.f32 %v22265_v35, %v27737_v0  ;;  %v8726_v5 = vpop.f32.mrb[63].mxu1  ;;  %v9511_v57 = vmax.f32 %v9391_v1, 0.0 }
 0x9c9   :  { %v9390_v43 = vadd.f32 %v27737_v0, %v8726_v5  ;;  %v27949_v39 = vsel %vm1909_vm4, %v9839_v29, %v9841_v42  ;;  %v27952_v27 = vsel %vm1909_vm4, %v9841_v42, %v9843_v55  ;;  %v9509_v3 = vmax.f32 %v9389_v4, 0.0 }
 0x9ca   :  { %v9512_v24 = vmax.f32 %v9392_v53, 0.0  ;;  %22375 = vmatmul.mubr.msk.bf16.gmra.mrb[200].mxu0 %vm9629_vm5, %v27949_v39 }
 0x9cb   :  { %v9510_v48 = vmax.f32 %v9390_v43, 0.0  ;;  %22378 = vmatprep.mubr.msk.bf16.mxu0 %vm9629_vm5, %v27952_v27 }
 0x9cc   :  { %v9600_v40 = vpack.c.bf16 %v9512_v24, %v9511_v57 }
 0x9cd   :  { %v9599_v47 = vpack.c.bf16 %v9510_v48, %v9509_v3  ;;  %v22268_v12 = vpop.f32.mrb[64].mxu1  ;;  %v27958_v22 = vld [vmem:[#allocation3 + $0xe8] sm:$0xff] }
 0x9ce   :  { %9661 = vst.msk [vmem:[#allocation3 + $0xf8] sm:$0xff] %vm9629_vm5, %v9600_v40  ;;  %v9395_v36 = vadd.f32 %v22268_v12, %v27737_v0  ;;  %v8739_v49 = vpop.f32.mrb[65].mxu1  ;;  %v27962_v19 = vld [vmem:[#allocation3 + $0xe0] sm:$0xff]  ;;  %v9847_v8 = vrot.slane %v27958_v22, 4 }
 0x9cf   :  { %9660 = vst.msk [vmem:[#allocation3 + $0xf0] sm:$0xff] %vm9629_vm5, %v9599_v47  ;;  %v9393_v11 = vadd.f32 %v27737_v0, %v8739_v49  ;;  %v22269_v23 = vpop.f32.mrb[66].mxu1  ;;  %v9845_v9 = vrot.slane %v27962_v19, 4 }
 0x9d0   :  { %v9396_v7 = vadd.f32 %v22269_v23, %v27737_v0  ;;  %v8742_v58 = vpop.f32.mrb[67].mxu1  ;;  %v9515_v13 = vmax.f32 %v9395_v36, 0.0 }
 0x9d1   :  { %v9394_v6 = vadd.f32 %v27737_v0, %v8742_v58  ;;  %v27971_v46 = vsel %vm1909_vm4, %v9843_v55, %v9845_v9  ;;  %v27974_v28 = vsel %vm1909_vm4, %v9845_v9, %v9847_v8  ;;  %v9513_v29 = vmax.f32 %v9393_v11, 0.0 }
 0x9d2   :  { %v9516_v56 = vmax.f32 %v9396_v7, 0.0  ;;  %22379 = vmatmul.mubr.msk.bf16.gmra.mrb[204].mxu0 %vm9629_vm5, %v27971_v46 }
 0x9d3   :  { %v9514_v38 = vmax.f32 %v9394_v6, 0.0  ;;  %22382 = vmatprep.mubr.msk.bf16.mxu0 %vm9629_vm5, %v27974_v28 }
 0x9d4   :  { %v9602_v61 = vpack.c.bf16 %v9516_v56, %v9515_v13 }
 0x9d5   :  { %v9601_v16 = vpack.c.bf16 %v9514_v38, %v9513_v29  ;;  %v22272_v30 = vpop.f32.mrb[68].mxu1  ;;  %v27980_v63 = vld [vmem:[#allocation3 + $0xf8] sm:$0xff] }
 0x9d6   :  { %9663 = vst.msk [vmem:[#allocation3 + $0x108] sm:$0xff] %vm9629_vm5, %v9602_v61  ;;  %v9399_v37 = vadd.f32 %v22272_v30, %v27737_v0  ;;  %v8755_v44 = vpop.f32.mrb[69].mxu1  ;;  %v27984_v59 = vld [vmem:[#allocation3 + $0xf0] sm:$0xff]  ;;  %v9851_v14 = vrot.slane %v27980_v63, 4 }
 0x9d7   :  { %9662 = vst.msk [vmem:[#allocation3 + $0x100] sm:$0xff] %vm9629_vm5, %v9601_v16  ;;  %v9397_v52 = vadd.f32 %v27737_v0, %v8755_v44  ;;  %v22273_v17 = vpop.f32.mrb[70].mxu1  ;;  %v9849_v10 = vrot.slane %v27984_v59, 4 }
 0x9d8   :  { %v9400_v62 = vadd.f32 %v22273_v17, %v27737_v0  ;;  %v8758_v1 = vpop.f32.mrb[71].mxu1  ;;  %v9519_v35 = vmax.f32 %v9399_v37, 0.0 }
 0x9d9   :  { %v9398_v18 = vadd.f32 %v27737_v0, %v8758_v1  ;;  %v27993_v55 = vsel %vm1909_vm4, %v9847_v8, %v9849_v10  ;;  %v27996_v4 = vsel %vm1909_vm4, %v9849_v10, %v9851_v14  ;;  %v9517_v53 = vmax.f32 %v9397_v52, 0.0 }
 0x9da   :  { %v9520_v42 = vmax.f32 %v9400_v62, 0.0  ;;  %22383 = vmatmul.mubr.msk.bf16.gmra.mrb[208].mxu0 %vm9629_vm5, %v27993_v55 }
 0x9db   :  { %v9518_v5 = vmax.f32 %v9398_v18, 0.0  ;;  %22386 = vmatprep.mubr.msk.bf16.mxu0 %vm9629_vm5, %v27996_v4 }
 0x9dc   :  { %v9604_v43 = vpack.c.bf16 %v9520_v42, %v9519_v35 }
 0x9dd   :  { %v9603_v57 = vpack.c.bf16 %v9518_v5, %v9517_v53  ;;  %v22276_v24 = vpop.f32.mrb[72].mxu1  ;;  %v28002_v3 = vld [vmem:[#allocation3 + $0x108] sm:$0xff] }
 0x9de   :  { %9665 = vst.msk [vmem:[#allocation3 + $0x118] sm:$0xff] %vm9629_vm5, %v9604_v43  ;;  %v9403_v48 = vadd.f32 %v22276_v24, %v27737_v0  ;;  %v8771_v40 = vpop.f32.mrb[73].mxu1  ;;  %v28006_v47 = vld [vmem:[#allocation3 + $0x100] sm:$0xff]  ;;  %v9855_v12 = vrot.slane %v28002_v3, 4 }
 0x9df   :  { %9664 = vst.msk [vmem:[#allocation3 + $0x110] sm:$0xff] %vm9629_vm5, %v9603_v57  ;;  %v9401_v36 = vadd.f32 %v27737_v0, %v8771_v40  ;;  %v22277_v49 = vpop.f32.mrb[74].mxu1  ;;  %v9853_v8 = vrot.slane %v28006_v47, 4 }
 0x9e0   :  { %v9404_v11 = vadd.f32 %v22277_v49, %v27737_v0  ;;  %v8774_v23 = vpop.f32.mrb[75].mxu1  ;;  %v9523_v6 = vmax.f32 %v9403_v48, 0.0 }
 0x9e1   :  { %v9402_v9 = vadd.f32 %v27737_v0, %v8774_v23  ;;  %v28015_v7 = vsel %vm1909_vm4, %v9851_v14, %v9853_v8  ;;  %v28018_v58 = vsel %vm1909_vm4, %v9853_v8, %v9855_v12  ;;  %v9521_v56 = vmax.f32 %v9401_v36, 0.0 }
 0x9e2   :  { %v9524_v13 = vmax.f32 %v9404_v11, 0.0  ;;  %22387 = vmatmul.mubr.msk.bf16.gmra.mrb[212].mxu0 %vm9629_vm5, %v28015_v7 }
 0x9e3   :  { %v9522_v29 = vmax.f32 %v9402_v9, 0.0  ;;  %22390 = vmatprep.mubr.msk.bf16.mxu0 %vm9629_vm5, %v28018_v58 }
 0x9e4   :  { %v9606_v38 = vpack.c.bf16 %v9524_v13, %v9523_v6 }
 0x9e5   :  { %v9605_v61 = vpack.c.bf16 %v9522_v29, %v9521_v56  ;;  %v22280_v16 = vpop.f32.mrb[76].mxu1  ;;  %v28024_v30 = vld [vmem:[#allocation3 + $0x118] sm:$0xff]  ;;  %v28059_v56 = vld [vmem:[%s30056_s4] ss:$0 sm:$0xff] }
 0x9e6   :  { %9667 = vst.msk [vmem:[#allocation3 + $0x128] sm:$0xff] %vm9629_vm5, %v9606_v38  ;;  %v9407_v37 = vadd.f32 %v22280_v16, %v27737_v0  ;;  %v8787_v44 = vpop.f32.mrb[77].mxu1  ;;  %v28028_v14 = vld [vmem:[#allocation3 + $0x110] sm:$0xff]  ;;  %v9859_v52 = vrot.slane %v28024_v30, 4 }
 0x9e7   :  { %9666 = vst.msk [vmem:[#allocation3 + $0x120] sm:$0xff] %vm9629_vm5, %v9605_v61  ;;  %v9405_v17 = vadd.f32 %v27737_v0, %v8787_v44  ;;  %v22281_v10 = vpop.f32.mrb[78].mxu1  ;;  %v9857_v62 = vrot.slane %v28028_v14, 4 }
 0x9e8   :  { %v9408_v1 = vadd.f32 %v22281_v10, %v27737_v0  ;;  %v8790_v18 = vpop.f32.mrb[79].mxu1  ;;  %v9527_v5 = vmax.f32 %v9407_v37, 0.0 }
 0x9e9   :  { %v9406_v35 = vadd.f32 %v27737_v0, %v8790_v18  ;;  %v28037_v42 = vsel %vm1909_vm4, %v9855_v12, %v9857_v62  ;;  %v28040_v53 = vsel %vm1909_vm4, %v9857_v62, %v9859_v52  ;;  %v9525_v57 = vmax.f32 %v9405_v17, 0.0 }
 0x9ea   :  { %v9528_v43 = vmax.f32 %v9408_v1, 0.0  ;;  %22391 = vmatmul.mubr.msk.bf16.gmra.mrb[216].mxu0 %vm9629_vm5, %v28037_v42 }
 0x9eb   :  { %v9526_v24 = vmax.f32 %v9406_v35, 0.0  ;;  %22394 = vmatprep.mubr.msk.bf16.mxu0 %vm9629_vm5, %v28040_v53 }
 0x9ec   :  { %v9608_v48 = vpack.c.bf16 %v9528_v43, %v9527_v5 }
 0x9ed   :  { %v9607_v40 = vpack.c.bf16 %v9526_v24, %v9525_v57  ;;  %v22284_v36 = vpop.f32.mrb[80].mxu1  ;;  %v28046_v49 = vld [vmem:[#allocation3 + $0x128] sm:$0xff] }
 0x9ee   :  { %9669 = vst.msk [vmem:[#allocation3 + $0x138] sm:$0xff] %vm9629_vm5, %v9608_v48  ;;  %v9411_v12 = vadd.f32 %v22284_v36, %v27737_v0  ;;  %v8803_v8 = vpop.f32.mrb[81].mxu1  ;;  %v28050_v11 = vld [vmem:[#allocation3 + $0x120] sm:$0xff]  ;;  %v9863_v23 = vrot.slane %v28046_v49, 4 }
 0x9ef   :  { %9668 = vst.msk [vmem:[#allocation3 + $0x130] sm:$0xff] %vm9629_vm5, %v9607_v40  ;;  %v9409_v9 = vadd.f32 %v27737_v0, %v8803_v8  ;;  %v22285_v6 = vpop.f32.mrb[82].mxu1  ;;  %v9861_v13 = vrot.slane %v28050_v11, 4 }
 0x9f0   :  { %v9412_v29 = vadd.f32 %v28059_v56, %v22285_v6  ;;  %v8806_v38 = vpop.f32.mrb[83].mxu1  ;;  %v9531_v0 = vmax.f32 %v9411_v12, 0.0 }
 0x9f1   :  { %v9410_v61 = vadd.f32 %v28059_v56, %v8806_v38  ;;  %v28064_v16 = vsel %vm1909_vm4, %v9859_v52, %v9861_v13  ;;  %v28067_v37 = vsel %vm1909_vm4, %v9861_v13, %v9863_v23  ;;  %v9529_v17 = vmax.f32 %v9409_v9, 0.0 }
 0x9f2   :  { %30257 = vst [vmem:[#allocation29_spill] sm:$0xff] %v28064_v16  ;;  %30258 = vst [vmem:[#allocation6_spill] sm:$0xff] %v28067_v37  ;;  %v9532_v44 = vmax.f32 %v9412_v29, 0.0  ;;  %22395 = vmatmul.mubr.msk.bf16.gmra.mrb[220].mxu0 %vm9629_vm5, %v28064_v16 }
 0x9f3   :  { %v9530_v10 = vmax.f32 %v9410_v61, 0.0  ;;  %22398 = vmatprep.mubr.msk.bf16.mxu0 %vm9629_vm5, %v28067_v37 }
 0x9f4   :  { %v9610_v62 = vpack.c.bf16 %v9532_v44, %v9531_v0 }
 0x9f5   :  { %v9609_v1 = vpack.c.bf16 %v9530_v10, %v9529_v17  ;;  %v22288_v18 = vpop.f32.mrb[84].mxu1  ;;  %v28073_v35 = vld [vmem:[#allocation3 + $0x138] sm:$0xff] }
 0x9f6   :  { %9671 = vst.msk [vmem:[#allocation3 + $0x148] sm:$0xff] %vm9629_vm5, %v9610_v62  ;;  %v9415_v52 = vadd.f32 %v28059_v56, %v22288_v18  ;;  %v8819_v5 = vpop.f32.mrb[85].mxu1  ;;  %v28077_v43 = vld [vmem:[#allocation3 + $0x130] sm:$0xff]  ;;  %v9867_v57 = vrot.slane %v28073_v35, 4 }
 0x9f7   :  { %9670 = vst.msk [vmem:[#allocation3 + $0x140] sm:$0xff] %vm9629_vm5, %v9609_v1  ;;  %v9413_v24 = vadd.f32 %v28059_v56, %v8819_v5  ;;  %v22289_v48 = vpop.f32.mrb[86].mxu1  ;;  %v9865_v40 = vrot.slane %v28077_v43, 4 }
 0x9f8   :  { %v9416_v36 = vadd.f32 %v28059_v56, %v22289_v48  ;;  %v8822_v12 = vpop.f32.mrb[87].mxu1  ;;  %v9535_v13 = vmax.f32 %v9415_v52, 0.0 }
 0x9f9   :  { %v9414_v8 = vadd.f32 %v28059_v56, %v8822_v12  ;;  %v28086_v9 = vsel %vm1909_vm4, %v9863_v23, %v9865_v40  ;;  %v28089_v6 = vsel %vm1909_vm4, %v9865_v40, %v9867_v57  ;;  %v9533_v38 = vmax.f32 %v9413_v24, 0.0 }
 0x9fa   :  { %30259 = vst [vmem:[#allocation7_spill] sm:$0xff] %v28086_v9  ;;  %30260 = vst [vmem:[#allocation8_spill] sm:$0xff] %v28089_v6  ;;  %v9536_v29 = vmax.f32 %v9416_v36, 0.0  ;;  %22399 = vmatmul.mubr.msk.bf16.gmra.mrb[224].mxu0 %vm9629_vm5, %v28086_v9 }
 0x9fb   :  { %v9534_v61 = vmax.f32 %v9414_v8, 0.0  ;;  %22402 = vmatprep.mubr.msk.bf16.mxu0 %vm9629_vm5, %v28089_v6 }
 0x9fc   :  { %v9612_v0 = vpack.c.bf16 %v9536_v29, %v9535_v13 }
 0x9fd   :  { %v9611_v44 = vpack.c.bf16 %v9534_v61, %v9533_v38  ;;  %v22292_v17 = vpop.f32.mrb[88].mxu1  ;;  %v28095_v10 = vld [vmem:[#allocation3 + $0x148] sm:$0xff] }
 0x9fe   :  { %9673 = vst.msk [vmem:[#allocation3 + $0x158] sm:$0xff] %vm9629_vm5, %v9612_v0  ;;  %v9419_v23 = vadd.f32 %v28059_v56, %v22292_v17  ;;  %v8835_v62 = vpop.f32.mrb[89].mxu1  ;;  %v28099_v1 = vld [vmem:[#allocation3 + $0x140] sm:$0xff]  ;;  %v9871_v18 = vrot.slane %v28095_v10, 4 }
 0x9ff   :  { %9672 = vst.msk [vmem:[#allocation3 + $0x150] sm:$0xff] %vm9629_vm5, %v9611_v44  ;;  %v9417_v52 = vadd.f32 %v28059_v56, %v8835_v62  ;;  %v22293_v5 = vpop.f32.mrb[90].mxu1  ;;  %v9869_v24 = vrot.slane %v28099_v1, 4 }
 0xa00   :  { %v9420_v48 = vadd.f32 %v28059_v56, %v22293_v5  ;;  %v8838_v40 = vpop.f32.mrb[91].mxu1  ;;  %v9539_v13 = vmax.f32 %v9419_v23, 0.0 }
 0xa01   :  { %v9418_v36 = vadd.f32 %v28059_v56, %v8838_v40  ;;  %v28108_v12 = vsel %vm1909_vm4, %v9867_v57, %v9869_v24  ;;  %v28111_v8 = vsel %vm1909_vm4, %v9869_v24, %v9871_v18  ;;  %v9537_v38 = vmax.f32 %v9417_v52, 0.0 }
 0xa02   :  { %30261 = vst [vmem:[#allocation9_spill] sm:$0xff] %v28108_v12  ;;  %30262 = vst [vmem:[#allocation10_spill] sm:$0xff] %v28111_v8  ;;  %v9540_v29 = vmax.f32 %v9420_v48, 0.0  ;;  %22403 = vmatmul.mubr.msk.bf16.gmra.mrb[228].mxu0 %vm9629_vm5, %v28108_v12 }
 0xa03   :  { %v9538_v61 = vmax.f32 %v9418_v36, 0.0  ;;  %22406 = vmatprep.mubr.msk.bf16.mxu0 %vm9629_vm5, %v28111_v8 }
 0xa04   :  { %v9614_v0 = vpack.c.bf16 %v9540_v29, %v9539_v13 }
 0xa05   :  { %v9613_v44 = vpack.c.bf16 %v9538_v61, %v9537_v38  ;;  %v22296_v17 = vpop.f32.mrb[92].mxu1  ;;  %v28117_v62 = vld [vmem:[#allocation3 + $0x158] sm:$0xff] }
 0xa06   :  { %9675 = vst.msk [vmem:[#allocation3 + $0x168] sm:$0xff] %vm9629_vm5, %v9614_v0  ;;  %v9423_v57 = vadd.f32 %v28059_v56, %v22296_v17  ;;  %v8851_v5 = vpop.f32.mrb[93].mxu1  ;;  %v28121_v23 = vld [vmem:[#allocation3 + $0x150] sm:$0xff]  ;;  %v28124_v24 = vrot.slane %v28117_v62, 4 }
 0xa07   :  { %9674 = vst.msk [vmem:[#allocation3 + $0x160] sm:$0xff] %vm9629_vm5, %v9613_v44  ;;  %v9421_v52 = vadd.f32 %v28059_v56, %v8851_v5  ;;  %v22297_v48 = vpop.f32.mrb[94].mxu1  ;;  %v9873_v40 = vrot.slane %v28121_v23, 4 }
 0xa08   :  { %30263 = vst [vmem:[#allocation11_spill] sm:$0xff] %v28124_v24  ;;  %v9424_v36 = vadd.f32 %v28059_v56, %v22297_v48  ;;  %v8854_v13 = vpop.f32.mrb[95].mxu1  ;;  %v9543_v0 = vmax.f32 %v9423_v57, 0.0 }
 0xa09   :  { %v9422_v29 = vadd.f32 %v28059_v56, %v8854_v13  ;;  %v28132_v38 = vsel %vm1909_vm4, %v9871_v18, %v9873_v40  ;;  %v28136_v61 = vsel %vm1909_vm4, %v9873_v40, %v28124_v24  ;;  %v9541_v44 = vmax.f32 %v9421_v52, 0.0 }
 0xa0a   :  { %30264 = vst [vmem:[#allocation12_spill] sm:$0xff] %v28132_v38  ;;  %30265 = vst [vmem:[#allocation13_spill] sm:$0xff] %v28136_v61  ;;  %v9544_v17 = vmax.f32 %v9424_v36, 0.0  ;;  %22407 = vmatmul.mubr.msk.bf16.gmra.mrb[232].mxu0 %vm9629_vm5, %v28132_v38 }
 0xa0b   :  { %v9542_v5 = vmax.f32 %v9422_v29, 0.0  ;;  %22410 = vmatprep.mubr.msk.bf16.mxu0 %vm9629_vm5, %v28136_v61 }
 0xa0c   :  { %v9616_v48 = vpack.c.bf16 %v9544_v17, %v9543_v0 }
 0xa0d   :  { %v9615_v8 = vpack.c.bf16 %v9542_v5, %v9541_v44  ;;  %v22300_v13 = vpop.f32.mrb[96].mxu1  ;;  %v9690_v5 = vld [vmem:[#allocation3] sm:$0xff] }
 0xa0e   :  { %9677 = vst.msk [vmem:[#allocation3 + $0x178] sm:$0xff] %vm9629_vm5, %v9616_v48  ;;  %v9427_v18 = vadd.f32 %v28059_v56, %v22300_v13  ;;  %v8867_v12 = vpop.f32.mrb[97].mxu1  ;;  %v9739_v40 = vld [vmem:[#allocation3 + $0x160] sm:$0xf] }
 0xa0f   :  { %9676 = vst.msk [vmem:[#allocation3 + $0x170] sm:$0xff] %vm9629_vm5, %v9615_v8  ;;  %v9425_v57 = vadd.f32 %v28059_v56, %v8867_v12  ;;  %v22301_v36 = vpop.f32.mrb[98].mxu1  ;;  %v9877_v38 = vrot.slane %v9739_v40, 4 }
 0xa10   :  { %v9428_v52 = vadd.f32 %v28059_v56, %v22301_v36  ;;  %v8870_v29 = vpop.f32.mrb[99].mxu1  ;;  %v9547_v17 = vmax.f32 %v9427_v18, 0.0 }
 0xa11   :  { %v9426_v61 = vadd.f32 %v28059_v56, %v8870_v29  ;;  %v9878_v0 = vsel %vm1909_vm4, %v28124_v24, %v9877_v38  ;;  %v9545_v48 = vmax.f32 %v9425_v57, 0.0 }
 0xa12   :  { %v9548_v44 = vmax.f32 %v9428_v52, 0.0  ;;  %22411 = vmatmul.mubr.msk.bf16.gmra.mrb[236].mxu0 %vm9629_vm5, %v9878_v0 }
 0xa13   :  { %v9546_v13 = vmax.f32 %v9426_v61, 0.0  ;;  %22418 = vmatprep.mubr.msk.bf16.mxu0 %vm9629_vm5, %v9690_v5  ;;  %v24954_v61 = vld [vmem:[%s30055_s5 + $0x28] sm:$0xff]  }
 0xa14   :  { %v9618_v12 = vpack.c.bf16 %v9548_v44, %v9547_v17  ;;  %v28161_v5 = vld [vmem:[#allocation3 + $0x8] sm:$0xff] }
 0xa15   :  { %v9617_v8 = vpack.c.bf16 %v9546_v13, %v9545_v48  ;;  %v22304_v40 = vpop.f32.mrb[100].mxu1 }
 0xa16   :  { %9679 = vst.msk [vmem:[#allocation3 + $0x188] sm:$0xff] %vm9629_vm5, %v9618_v12  ;;  %v9431_v36 = vadd.f32 %v28059_v56, %v22304_v40  ;;  %v8883_v29 = vpop.f32.mrb[101].mxu1  ;;  %v28166_v12 = vld [vmem:[#allocation3 + $0x10] sm:$0xff] }
 0xa17   :  { %9678 = vst.msk [vmem:[#allocation3 + $0x180] sm:$0xff] %vm9629_vm5, %v9617_v8  ;;  %v9429_v38 = vadd.f32 %v28059_v56, %v8883_v29  ;;  %v22305_v18 = vpop.f32.mrb[102].mxu1 }
 0xa18   :  { %v9432_v52 = vadd.f32 %v28059_v56, %v22305_v18  ;;  %v8886_v0 = vpop.f32.mrb[103].mxu1  ;;  %v9551_v17 = vmax.f32 %v9431_v36, 0.0 }
 0xa19   :  { %v9430_v57 = vadd.f32 %v28059_v56, %v8886_v0  ;;  %v9549_v48 = vmax.f32 %v9429_v38, 0.0 }
 0xa1a   :  { %v9552_v44 = vmax.f32 %v9432_v52, 0.0  ;;  %22419 = vmatmul.mubr.msk.bf16.vlgmr.msra.gmra.mrb[152].mxu0 %vm9629_vm5, %v28161_v5 }
 0xa1b   :  { %v9550_v13 = vmax.f32 %v9430_v57, 0.0  ;;  %22507 = vmatpush3.bf16.msra.mxu0 %v27856_v50  ;;  %22422 = vmatprep.mubr.msk.bf16.mxu0 %vm9629_vm5, %v28166_v12 }
 0xa1c   :  { %v9620_v8 = vpack.c.bf16 %v9552_v44, %v9551_v17  ;;  %22508 = vmatprep.subr.bf16.mxu0 %v24954_v61 }
 0xa1d   :  { %v9619_v40 = vpack.c.bf16 %v9550_v13, %v9549_v48  ;;  %v22308_v29 = vpop.f32.mrb[104].mxu1  ;;  %v28176_v48 = vld [vmem:[#allocation3 + $0x18] sm:$0xff] }
 0xa1e   :  { %9681 = vst.msk [vmem:[#allocation3 + $0x198] sm:$0xff] %vm9629_vm5, %v9620_v8  ;;  %v9435_v36 = vadd.f32 %v28059_v56, %v22308_v29  ;;  %v8899_v18 = vpop.f32.mrb[105].mxu1  ;;  %v28180_v29 = vld [vmem:[#allocation3 + $0x20] sm:$0xff] }
 0xa1f   :  { %9680 = vst.msk [vmem:[#allocation3 + $0x190] sm:$0xff] %vm9629_vm5, %v9619_v40  ;;  %v9433_v38 = vadd.f32 %v28059_v56, %v8899_v18  ;;  %v22309_v52 = vpop.f32.mrb[106].mxu1  ;;  %22509 = vmatpush3.bf16.msra.mxu0 %v24954_v61 }
 0xa20   :  { %v9436_v50 = vadd.f32 %v28059_v56, %v22309_v52  ;;  %v8902_v0 = vpop.f32.mrb[107].mxu1  ;;  %v9555_v17 = vmax.f32 %v9435_v36, 0.0 }
 0xa21   :  { %v9434_v57 = vadd.f32 %v28059_v56, %v8902_v0  ;;  %v9553_v13 = vmax.f32 %v9433_v38, 0.0 }
 0xa22   :  { %v9556_v44 = vmax.f32 %v9436_v50, 0.0  ;;  %22423 = vmatmul.mubr.msk.bf16.gmra.mrb[156].mxu0 %vm9629_vm5, %v28176_v48 }
 0xa23   :  { %v9554_v8 = vmax.f32 %v9434_v57, 0.0  ;;  %22426 = vmatprep.mubr.msk.bf16.mxu0 %vm9629_vm5, %v28180_v29 }
 0xa24   :  { %v9622_v61 = vpack.c.bf16 %v9556_v44, %v9555_v17  ;;  %v28190_v17 = vld [vmem:[#allocation3 + $0x28] sm:$0xff] }
 0xa25   :  { %v9621_v40 = vpack.c.bf16 %v9554_v8, %v9553_v13  ;;  %v22312_v18 = vpop.f32.mrb[108].mxu1  ;;  %v28194_v8 = vld [vmem:[#allocation3 + $0x30] sm:$0xff] }
 0xa26   :  { %9683 = vst.msk [vmem:[#allocation3 + $0x1a8] sm:$0xff] %vm9629_vm5, %v9622_v61  ;;  %v9439_v36 = vadd.f32 %v28059_v56, %v22312_v18  ;;  %v8915_v52 = vpop.f32.mrb[109].mxu1 }
 0xa27   :  { %9682 = vst.msk [vmem:[#allocation3 + $0x1a0] sm:$0xff] %vm9629_vm5, %v9621_v40  ;;  %v9437_v50 = vadd.f32 %v28059_v56, %v8915_v52  ;;  %v22313_v0 = vpop.f32.mrb[110].mxu1 }
 0xa28   :  { %v9440_v38 = vadd.f32 %v28059_v56, %v22313_v0  ;;  %v8918_v57 = vpop.f32.mrb[111].mxu1  ;;  %v9559_v6 = vmax.f32 %v9439_v36, 0.0 }
 0xa29   :  { %v9438_v24 = vadd.f32 %v28059_v56, %v8918_v57  ;;  %v9557_v44 = vmax.f32 %v9437_v50, 0.0 }
 0xa2a   :  { %v9560_v9 = vmax.f32 %v9440_v38, 0.0  ;;  %22427 = vmatmul.mubr.msk.bf16.gmra.mrb[160].mxu0 %vm9629_vm5, %v28190_v17 }
 0xa2b   :  { %v9558_v13 = vmax.f32 %v9438_v24, 0.0  ;;  %22430 = vmatprep.mubr.msk.bf16.mxu0 %vm9629_vm5, %v28194_v8 }
 0xa2c   :  { %v9624_v61 = vpack.c.bf16 %v9560_v9, %v9559_v6  ;;  %v28204_v9 = vld [vmem:[#allocation3 + $0x38] sm:$0xff] }
 0xa2d   :  { %v9623_v40 = vpack.c.bf16 %v9558_v13, %v9557_v44  ;;  %v22316_v18 = vpop.f32.mrb[112].mxu1  ;;  %v28208_v13 = vld [vmem:[#allocation3 + $0x40] sm:$0xff] }
 0xa2e   :  { %9685 = vst.msk [vmem:[#allocation3 + $0x1b8] sm:$0xff] %vm9629_vm5, %v9624_v61  ;;  %v9443_v36 = vadd.f32 %v28059_v56, %v22316_v18  ;;  %v8931_v52 = vpop.f32.mrb[113].mxu1 }
 0xa2f   :  { %9684 = vst.msk [vmem:[#allocation3 + $0x1b0] sm:$0xff] %vm9629_vm5, %v9623_v40  ;;  %v9441_v0 = vadd.f32 %v28059_v56, %v8931_v52  ;;  %v22317_v38 = vpop.f32.mrb[114].mxu1 }
 0xa30   :  { %v9444_v24 = vadd.f32 %v28059_v56, %v22317_v38  ;;  %v8934_v50 = vpop.f32.mrb[115].mxu1  ;;  %v9563_v37 = vmax.f32 %v9443_v36, 0.0  ;;  %v25267_v38 = vld [vmem:[#allocation3 + $0x48] sm:$0xff] }
 0xa31   :  { %v9442_v57 = vadd.f32 %v28059_v56, %v8934_v50  ;;  %v9561_v6 = vmax.f32 %v9441_v0, 0.0  ;;  %v25268_v0 = vld [vmem:[#allocation3 + $0x50] sm:$0xff]  ;;  %v25270_v50 = vld [vmem:[#allocation3 + $0x60] sm:$0xff] }
 0xa32   :  { %v9564_v16 = vmax.f32 %v9444_v24, 0.0  ;;  %22431 = vmatmul.mubr.msk.bf16.gmra.mrb[164].mxu0 %vm9629_vm5, %v28204_v9  ;;  %v25269_v24 = vld [vmem:[#allocation3 + $0x58] sm:$0xff] }
 0xa33   :  { %v9562_v44 = vmax.f32 %v9442_v57, 0.0  ;;  %22434 = vmatprep.mubr.msk.bf16.mxu0 %vm9629_vm5, %v28208_v13  ;;  %v25272_v57 = vld [vmem:[#allocation3 + $0x78] sm:$0xff] }
 0xa34   :  { %v9626_v61 = vpack.c.bf16 %v9564_v16, %v9563_v37  ;;  %v24955_v16 = vld [vmem:[%s30055_s5 + $0x40] sm:$0xff]   ;;  %v25271_v37 = vld [vmem:[#allocation3 + $0x68] sm:$0xff] }
 0xa35   :  { %v9625_v40 = vpack.c.bf16 %v9562_v44, %v9561_v6  ;;  %v22320_v18 = vpop.f32.mrb[116].mxu1  ;;  %22598 = vmatprep.subr.bf16.mxu0 %v24955_v16  ;;  %v28397_v6 = vld [vmem:[#allocation3 + $0x70] sm:$0xff]  ;;  %v28401_v44 = vld [vmem:[#allocation3 + $0x78] sm:$0xff] }
 0xa36   :  { %9687 = vst.msk [vmem:[#allocation3 + $0x1c8] sm:$0xff] %vm9629_vm5, %v9626_v61  ;;  %v8947_v56 = vpop.f32.mrb[117].mxu1  ;;  %v28409_v61 = vld [vmem:[#allocation3 + $0x88] sm:$0xff]  ;;  %v28417_v18 = vld [vmem:[#allocation3 + $0x98] sm:$0xff] }
 0xa37   :  { %9686 = vst.msk [vmem:[#allocation3 + $0x1c0] sm:$0xff] %vm9629_vm5, %v9625_v40  ;;  %v22321_v36 = vpop.f32.mrb[118].mxu1  ;;  %v28413_v40 = vld [vmem:[#allocation3 + $0x90] sm:$0xff] }
 0xa38   :  { %v8950_v52 = vpop.f32.mrb[119].mxu1  ;;  %v24959_v56 = vld [vmem:[%s30055_s5 + $0x50] sm:$0xff]   ;;  %v28424_v36 = vld [vmem:[#allocation3 + $0xa0] sm:$0xff] }
 0xa39   :  { %v28428_v52 = vld [vmem:[#allocation3 + $0xa8] sm:$0xff] }
 0xa3a   :  { %22435 = vmatmul.mubr.msk.bf16.gmra.mrb[168].mxu0 %vm9629_vm5, %v25267_v38 }
 0xa3b   :  { %22438 = vmatprep.mubr.msk.bf16.mxu0 %vm9629_vm5, %v25268_v0 }
 0xa42   :  { %22439 = vmatmul.mubr.msk.bf16.gmra.mrb[172].mxu0 %vm9629_vm5, %v25269_v24 }
 0xa43   :  { %22442 = vmatprep.mubr.msk.bf16.mxu0 %vm9629_vm5, %v25270_v50 }
 0xa4a   :  { %22443 = vmatmul.mubr.msk.bf16.gmra.mrb[176].mxu0 %vm9629_vm5, %v25271_v37 }
 0xa4b   :  { %22446 = vmatprep.mubr.msk.bf16.mxu0 %vm9629_vm5, %v27832_v32  ;;  %v24956_v32 = vld [vmem:[%s30055_s5 + $0x48] sm:$0xff]  }
 0xa52   :  { %22447 = vmatmul.mubr.msk.bf16.gmra.mrb[180].mxu0 %vm9629_vm5, %v25272_v57 }
 0xa53   :  { %22450 = vmatprep.mubr.msk.bf16.mxu0 %vm9629_vm5, %v27847_v26  ;;  %v25273_v26 = vld [vmem:[#allocation3 + $0x70] sm:$0xff] }
 0xa5a   :  { %22451 = vmatmul.mubr.msk.bf16.gmra.mrb[184].mxu0 %vm9629_vm5, %v27843_v20  ;;  %v24957_v20 = vld [vmem:[%s30055_s5 + $0x30] sm:$0xff]  }
 0xa5b   :  { %22454 = vmatprep.mubr.msk.bf16.mxu0 %vm9629_vm5, %v27869_v60  ;;  %v25275_v60 = vld [vmem:[#allocation3 + $0x88] sm:$0xff] }
 0xa62   :  { %22455 = vmatmul.mubr.msk.bf16.gmra.mrb[188].mxu0 %vm9629_vm5, %v27865_v25  ;;  %v25274_v25 = vld [vmem:[#allocation3 + $0x80] sm:$0xff] }
 0xa63   :  { %22458 = vmatprep.mubr.msk.bf16.mxu0 %vm9629_vm5, %v27885_v41 }
 0xa6a   :  { %22459 = vmatmul.mubr.msk.bf16.gmra.mrb[192].mxu0 %vm9629_vm5, %v27881_v34 }
 0xa6b   :  { %22462 = vmatprep.mubr.msk.bf16.mxu0 %vm9629_vm5, %v27901_v15 }
 0xa72   :  { %22463 = vmatmul.mubr.msk.bf16.gmra.mrb[196].mxu0 %vm9629_vm5, %v27897_v2 }
 0xa73   :  { %22466 = vmatprep.mubr.msk.bf16.mxu0 %vm9629_vm5, %v27917_v31 }
 0xa7a   :  { %22467 = vmatmul.mubr.msk.bf16.gmra.mrb[200].mxu0 %vm9629_vm5, %v27913_v51 }
 0xa7b   :  { %22470 = vmatprep.mubr.msk.bf16.mxu0 %vm9629_vm5, %v27940_v33 }
 0xa82   :  { %22471 = vmatmul.mubr.msk.bf16.gmra.mrb[204].mxu0 %vm9629_vm5, %v27936_v54 }
 0xa83   :  { %22474 = vmatprep.mubr.msk.bf16.mxu0 %vm9629_vm5, %v27962_v19 }
 0xa8a   :  { %22475 = vmatmul.mubr.msk.bf16.gmra.mrb[208].mxu0 %vm9629_vm5, %v27958_v22 }
 0xa8b   :  { %22478 = vmatprep.mubr.msk.bf16.mxu0 %vm9629_vm5, %v27984_v59 }
 0xa92   :  { %22479 = vmatmul.mubr.msk.bf16.gmra.mrb[212].mxu0 %vm9629_vm5, %v27980_v63 }
 0xa93   :  { %22482 = vmatprep.mubr.msk.bf16.mxu0 %vm9629_vm5, %v28006_v47 }
 0xa9a   :  { %22483 = vmatmul.mubr.msk.bf16.gmra.mrb[216].mxu0 %vm9629_vm5, %v28002_v3 }
 0xa9b   :  { %22486 = vmatprep.mubr.msk.bf16.mxu0 %vm9629_vm5, %v28028_v14 }
 0xaa2   :  { %22487 = vmatmul.mubr.msk.bf16.gmra.mrb[220].mxu0 %vm9629_vm5, %v28024_v30 }
 0xaa3   :  { %22490 = vmatprep.mubr.msk.bf16.mxu0 %vm9629_vm5, %v28050_v11 }
 0xaaa   :  { %22491 = vmatmul.mubr.msk.bf16.gmra.mrb[224].mxu0 %vm9629_vm5, %v28046_v49 }
 0xaab   :  { %22494 = vmatprep.mubr.msk.bf16.mxu0 %vm9629_vm5, %v28077_v43 }
 0xab2   :  { %22495 = vmatmul.mubr.msk.bf16.gmra.mrb[228].mxu0 %vm9629_vm5, %v28073_v35 }
 0xab3   :  { %22498 = vmatprep.mubr.msk.bf16.mxu0 %vm9629_vm5, %v28099_v1 }
 0xaba   :  { %22499 = vmatmul.mubr.msk.bf16.gmra.mrb[232].mxu0 %vm9629_vm5, %v28095_v10 }
 0xabb   :  { %22502 = vmatprep.mubr.msk.bf16.mxu0 %vm9629_vm5, %v28121_v23 }
 0xac2   :  { %22503 = vmatmul.mubr.msk.bf16.gmra.mrb[236].mxu0 %vm9629_vm5, %v28117_v62 }
 0xac3   :  { %22510 = vmatprep.mubr.msk.bf16.mxu0 %vm9629_vm5, %v28161_v5  ;;  %v25276_v5 = vld [vmem:[#allocation3 + $0x90] sm:$0xff] }
 0xaca   :  { %22511 = vmatmul.mubr.msk.bf16.vlgmr.msra.gmra.mrb[152].mxu0 %vm9629_vm5, %v28166_v12  ;;  %v25277_v12 = vld [vmem:[#allocation3 + $0x98] sm:$0xff] }
 0xacb   :  { %22599 = vmatpush3.bf16.msra.mxu0 %v24955_v16  ;;  %22514 = vmatprep.mubr.msk.bf16.mxu0 %vm9629_vm5, %v28176_v48  ;;  %v28377_v48 = vld [vmem:[#allocation3 + $0x48] sm:$0xff] }
 0xacc   :  { %22600 = vmatprep.subr.bf16.mxu0 %v24956_v32 }
 0xacf   :  { %22601 = vmatpush3.bf16.msra.mxu0 %v24956_v32 }
 0xad0   :  { %22690 = vmatprep.subr.bf16.mxu0 %v24957_v20 }
 0xad2   :  { %22515 = vmatmul.mubr.msk.bf16.gmra.mrb[156].mxu0 %vm9629_vm5, %v28180_v29  ;;  %v28381_v29 = vld [vmem:[#allocation3 + $0x50] sm:$0xff] }
 0xad3   :  { %22518 = vmatprep.mubr.msk.bf16.mxu0 %vm9629_vm5, %v28190_v17  ;;  %v28385_v17 = vld [vmem:[#allocation3 + $0x58] sm:$0xff] }
 0xada   :  { %22519 = vmatmul.mubr.msk.bf16.gmra.mrb[160].mxu0 %vm9629_vm5, %v28194_v8  ;;  %v28389_v8 = vld [vmem:[#allocation3 + $0x60] sm:$0xff] }
 0xadb   :  { %22522 = vmatprep.mubr.msk.bf16.mxu0 %vm9629_vm5, %v28204_v9  ;;  %v28393_v9 = vld [vmem:[#allocation3 + $0x68] sm:$0xff] }
 0xae2   :  { %22523 = vmatmul.mubr.msk.bf16.gmra.mrb[164].mxu0 %vm9629_vm5, %v28208_v13  ;;  %v28405_v13 = vld [vmem:[#allocation3 + $0x80] sm:$0xff] }
 0xae3   :  { %22526 = vmatprep.mubr.msk.bf16.mxu0 %vm9629_vm5, %v25267_v38  ;;  %v28432_v38 = vld [vmem:[#allocation3 + $0xb0] sm:$0xff] }
 0xaea   :  { %22527 = vmatmul.mubr.msk.bf16.gmra.mrb[168].mxu0 %vm9629_vm5, %v25268_v0  ;;  %v28436_v0 = vld [vmem:[#allocation3 + $0xb8] sm:$0xff] }
 0xaeb   :  { %22530 = vmatprep.mubr.msk.bf16.mxu0 %vm9629_vm5, %v25269_v24  ;;  %v12074_v24 = vrot.slane %v28393_v9, 4 }
 0xaf2   :  { %22531 = vmatmul.mubr.msk.bf16.gmra.mrb[172].mxu0 %vm9629_vm5, %v25270_v50 }
 0xaf3   :  { %22534 = vmatprep.mubr.msk.bf16.mxu0 %vm9629_vm5, %v25271_v37  ;;  %v28550_v37 = vrot.slane %v28397_v6, 4 }
 0xaf5   :  { %v28555_v32 = vsel %vm1909_vm4, %v12074_v24, %v28550_v37 }
 0xafa   :  { %22535 = vmatmul.mubr.msk.bf16.gmra.mrb[176].mxu0 %vm9629_vm5, %v25273_v26  ;;  %v12080_v26 = vrot.slane %v28405_v13, 4 }
 0xafb   :  { %22538 = vmatprep.mubr.msk.bf16.mxu0 %vm9629_vm5, %v25272_v57  ;;  %v12078_v57 = vrot.slane %v28401_v44, 4 }
 0xb02   :  { %22539 = vmatmul.mubr.msk.bf16.gmra.mrb[180].mxu0 %vm9629_vm5, %v25274_v25  ;;  %v12082_v25 = vrot.slane %v28409_v61, 4 }
 0xb03   :  { %22542 = vmatprep.mubr.msk.bf16.mxu0 %vm9629_vm5, %v25275_v60  ;;  %v28568_v60 = vsel %vm1909_vm4, %v12078_v57, %v12080_v26 }
 0xb0a   :  { %22543 = vmatmul.mubr.msk.bf16.gmra.mrb[184].mxu0 %vm9629_vm5, %v25276_v5  ;;  %v28573_v5 = vsel %vm1909_vm4, %v12080_v26, %v12082_v25  ;;  %v11475_v26 = vld [vmem:[#allocation3 + $0x190] sm:$0xf] }
 0xb0b   :  { %22546 = vmatprep.mubr.msk.bf16.mxu0 %vm9629_vm5, %v25277_v12  ;;  %v12084_v12 = vrot.slane %v28413_v40, 4 }
 0xb12   :  { %22547 = vmatmul.mubr.msk.bf16.gmra.mrb[188].mxu0 %vm9629_vm5, %v27885_v41  ;;  %v28366_v41 = vld [vmem:[#allocation3 + $0x38] sm:$0xff] }
 0xb13   :  { %22550 = vmatprep.mubr.msk.bf16.mxu0 %vm9629_vm5, %v27881_v34  ;;  %v28362_v34 = vld [vmem:[#allocation3 + $0x160] sm:$0xff] }
 0xb1a   :  { %22551 = vmatmul.mubr.msk.bf16.gmra.mrb[192].mxu0 %vm9629_vm5, %v27901_v15  ;;  %v28373_v15 = vld [vmem:[#allocation3 + $0x40] sm:$0xff] }
 0xb1b   :  { %22554 = vmatprep.mubr.msk.bf16.mxu0 %vm9629_vm5, %v27897_v2  ;;  %v24958_v2 = vld [vmem:[%s30055_s5 + $0x38] sm:$0xff]  }
 0xb22   :  { %22555 = vmatmul.mubr.msk.bf16.gmra.mrb[196].mxu0 %vm9629_vm5, %v27917_v31 }
 0xb23   :  { %22558 = vmatprep.mubr.msk.bf16.mxu0 %vm9629_vm5, %v27913_v51 }
 0xb2a   :  { %22559 = vmatmul.mubr.msk.bf16.gmra.mrb[200].mxu0 %vm9629_vm5, %v27940_v33 }
 0xb2b   :  { %22562 = vmatprep.mubr.msk.bf16.mxu0 %vm9629_vm5, %v27936_v54 }
 0xb32   :  { %22563 = vmatmul.mubr.msk.bf16.gmra.mrb[204].mxu0 %vm9629_vm5, %v27962_v19 }
 0xb33   :  { %22566 = vmatprep.mubr.msk.bf16.mxu0 %vm9629_vm5, %v27958_v22 }
 0xb3a   :  { %22567 = vmatmul.mubr.msk.bf16.gmra.mrb[208].mxu0 %vm9629_vm5, %v27984_v59 }
 0xb3b   :  { %22570 = vmatprep.mubr.msk.bf16.mxu0 %vm9629_vm5, %v27980_v63 }
 0xb42   :  { %22571 = vmatmul.mubr.msk.bf16.gmra.mrb[212].mxu0 %vm9629_vm5, %v28006_v47 }
 0xb43   :  { %22574 = vmatprep.mubr.msk.bf16.mxu0 %vm9629_vm5, %v28002_v3 }
 0xb4a   :  { %22575 = vmatmul.mubr.msk.bf16.gmra.mrb[216].mxu0 %vm9629_vm5, %v28028_v14 }
 0xb4b   :  { %22578 = vmatprep.mubr.msk.bf16.mxu0 %vm9629_vm5, %v28024_v30 }
 0xb52   :  { %22579 = vmatmul.mubr.msk.bf16.gmra.mrb[220].mxu0 %vm9629_vm5, %v28050_v11 }
 0xb53   :  { %22582 = vmatprep.mubr.msk.bf16.mxu0 %vm9629_vm5, %v28046_v49 }
 0xb5a   :  { %22583 = vmatmul.mubr.msk.bf16.gmra.mrb[224].mxu0 %vm9629_vm5, %v28077_v43 }
 0xb5b   :  { %22586 = vmatprep.mubr.msk.bf16.mxu0 %vm9629_vm5, %v28073_v35 }
 0xb62   :  { %22587 = vmatmul.mubr.msk.bf16.gmra.mrb[228].mxu0 %vm9629_vm5, %v28099_v1 }
 0xb63   :  { %22590 = vmatprep.mubr.msk.bf16.mxu0 %vm9629_vm5, %v28095_v10 }
 0xb6a   :  { %22591 = vmatmul.mubr.msk.bf16.gmra.mrb[232].mxu0 %vm9629_vm5, %v28121_v23 }
 0xb6b   :  { %22594 = vmatprep.mubr.msk.bf16.mxu0 %vm9629_vm5, %v28117_v62 }
 0xb72   :  { %22595 = vmatmul.mubr.msk.bf16.gmra.mrb[236].mxu0 %vm9629_vm5, %v28362_v34 }
 0xb73   :  { %22602 = vmatprep.mubr.msk.bf16.mxu0 %vm9629_vm5, %v28366_v41 }
 0xb7a   :  { %22603 = vmatmul.mubr.msk.bf16.vlgmr.msra.gmra.mrb[152].mxu0 %vm9629_vm5, %v28373_v15 }
 0xb7b   :  { %22691 = vmatpush3.bf16.msra.mxu0 %v24957_v20  ;;  %22606 = vmatprep.mubr.msk.bf16.mxu0 %vm9629_vm5, %v28377_v48  ;;  %v28561_v20 = vsel %vm1909_vm4, %v28550_v37, %v12078_v57 }
 0xb7c   :  { %22692 = vmatprep.subr.bf16.mxu0 %v24958_v2 }
 0xb7f   :  { %22693 = vmatpush3.bf16.msra.mxu0 %v24958_v2  ;;  %v28580_v2 = vsel %vm1909_vm4, %v12082_v25, %v12084_v12  ;;  %v12148_v25 = vrot.slane %v11475_v26, 4  ;;  %v28814_v26 = vld [vmem:[#allocation3 + $0x100] sm:$0xff] }
 0xb80   :  { %22782 = vmatprep.subr.bf16.mxu0 %v24959_v56  ;;  %30282 = vst [vmem:[#allocation21_spill] sm:$0xff] %v28814_v26 }
 0xb82   :  { %22607 = vmatmul.mubr.msk.bf16.gmra.mrb[156].mxu0 %vm9629_vm5, %v28381_v29 }
 0xb83   :  { %22610 = vmatprep.mubr.msk.bf16.mxu0 %vm9629_vm5, %v28385_v17 }
 0xb8a   :  { %22611 = vmatmul.mubr.msk.bf16.gmra.mrb[160].mxu0 %vm9629_vm5, %v28389_v8 }
 0xb8b   :  { %22614 = vmatprep.mubr.msk.bf16.mxu0 %vm9629_vm5, %v28393_v9 }
 0xb92   :  { %22615 = vmatmul.mubr.msk.bf16.gmra.mrb[164].mxu0 %vm9629_vm5, %v28397_v6 }
 0xb93   :  { %22618 = vmatprep.mubr.msk.bf16.mxu0 %vm9629_vm5, %v28401_v44 }
 0xb9a   :  { %22619 = vmatmul.mubr.msk.bf16.gmra.mrb[168].mxu0 %vm9629_vm5, %v28405_v13 }
 0xb9b   :  { %22622 = vmatprep.mubr.msk.bf16.mxu0 %vm9629_vm5, %v28409_v61 }
 0xba2   :  { %22623 = vmatmul.mubr.msk.bf16.gmra.mrb[172].mxu0 %vm9629_vm5, %v28413_v40 }
 0xba3   :  { %22626 = vmatprep.mubr.msk.bf16.mxu0 %vm9629_vm5, %v28417_v18 }
 0xbaa   :  { %22627 = vmatmul.mubr.msk.bf16.gmra.mrb[176].mxu0 %vm9629_vm5, %v28424_v36 }
 0xbab   :  { %22630 = vmatprep.mubr.msk.bf16.mxu0 %vm9629_vm5, %v28428_v52 }
 0xbb2   :  { %22631 = vmatmul.mubr.msk.bf16.gmra.mrb[180].mxu0 %vm9629_vm5, %v28432_v38 }
 0xbb3   :  { %22634 = vmatprep.mubr.msk.bf16.mxu0 %vm9629_vm5, %v28436_v0 }
 0xbba   :  { %22635 = vmatmul.mubr.msk.bf16.gmra.mrb[184].mxu0 %vm9629_vm5, %v27917_v31  ;;  %v28486_v31 = vld [vmem:[#allocation3 + $0x170] sm:$0xff] }
 0xbbb   :  { %22638 = vmatprep.mubr.msk.bf16.mxu0 %vm9629_vm5, %v27913_v51  ;;  %v28482_v51 = vld [vmem:[#allocation3 + $0x168] sm:$0xff]  ;;  %30267 = vst [vmem:[#allocation15_spill] sm:$0xff] %v28486_v31 }
 0xbbc   :  { %30266 = vst [vmem:[#allocation14_spill] sm:$0xff] %v28482_v51 }
 0xbc2   :  { %22639 = vmatmul.mubr.msk.bf16.gmra.mrb[188].mxu0 %vm9629_vm5, %v27940_v33  ;;  %v28494_v33 = vld [vmem:[#allocation3 + $0x180] sm:$0xff] }
 0xbc3   :  { %22642 = vmatprep.mubr.msk.bf16.mxu0 %vm9629_vm5, %v27936_v54  ;;  %v28490_v54 = vld [vmem:[#allocation3 + $0x178] sm:$0xff]  ;;  %30269 = vst [vmem:[#allocation17_spill] sm:$0xff] %v28494_v33 }
 0xbc4   :  { %30268 = vst [vmem:[#allocation16_spill] sm:$0xff] %v28490_v54 }
 0xbca   :  { %22643 = vmatmul.mubr.msk.bf16.gmra.mrb[192].mxu0 %vm9629_vm5, %v27962_v19  ;;  %v11431_v19 = vld [vmem:[#allocation3 + $0x30] sm:$0xf0] }
 0xbcb   :  { %22646 = vmatprep.mubr.msk.bf16.mxu0 %vm9629_vm5, %v27958_v22  ;;  %v28498_v22 = vld [vmem:[#allocation3 + $0x188] sm:$0xff] }
 0xbcc   :  { %30270 = vst [vmem:[#allocation18_spill] sm:$0xff] %v28498_v22 }
 0xbd2   :  { %22647 = vmatmul.mubr.msk.bf16.gmra.mrb[196].mxu0 %vm9629_vm5, %v27984_v59  ;;  %v12061_v59 = vrot.slane %v11431_v19, 4  ;;  %v28609_v19 = vrot.slane %v28436_v0, 4 }
 0xbd3   :  { %22650 = vmatprep.mubr.msk.bf16.mxu0 %vm9629_vm5, %v27980_v63  ;;  %v12062_v63 = vrot.slane %v28366_v41, 4  ;;  %v12086_v41 = vrot.slane %v28417_v18, 4 }
 0xbda   :  { %22651 = vmatmul.mubr.msk.bf16.gmra.mrb[200].mxu0 %vm9629_vm5, %v28006_v47  ;;  %v12063_v47 = vsel %vm1909_vm4, %v12061_v59, %v12062_v63 }
 0xbdb   :  { %22654 = vmatprep.mubr.msk.bf16.mxu0 %vm9629_vm5, %v28002_v3  ;;  %v28503_v3 = vld [vmem:[#allocation3 + $0x190] sm:$0xff] }
 0xbdc   :  { %30271 = vst [vmem:[#allocation19_spill] sm:$0xff] %v28503_v3 }
 0xbe2   :  { %22655 = vmatmul.mubr.msk.bf16.gmra.mrb[204].mxu0 %vm9629_vm5, %v28028_v14  ;;  %v12066_v14 = vrot.slane %v28377_v48, 4  ;;  %v28592_v48 = vld [vmem:[%s30055_s5 + $0x70] sm:$0xff]  }
 0xbe3   :  { %22658 = vmatprep.mubr.msk.bf16.mxu0 %vm9629_vm5, %v28024_v30  ;;  %v28510_v30 = vrot.slane %v28373_v15, 4  ;;  %v28585_v15 = vsel %vm1909_vm4, %v12084_v12, %v12086_v41  ;;  %v12679_v12 = vld [vmem:[#allocation3 + $0x38] sm:$0xf0] }
 0xbea   :  { %22659 = vmatmul.mubr.msk.bf16.gmra.mrb[208].mxu0 %vm9629_vm5, %v28050_v11  ;;  %v12065_v11 = vsel %vm1909_vm4, %v12062_v63, %v28510_v30 }
 0xbeb   :  { %22662 = vmatprep.mubr.msk.bf16.mxu0 %vm9629_vm5, %v28046_v49  ;;  %v24960_v49 = vld [vmem:[%s30055_s5 + $0x58] sm:$0xff]  }
 0xbf2   :  { %22663 = vmatmul.mubr.msk.bf16.gmra.mrb[212].mxu0 %vm9629_vm5, %v28077_v43  ;;  %v12068_v43 = vrot.slane %v28381_v29, 4  ;;  %v12088_v29 = vrot.slane %v28424_v36, 4 }
 0xbf3   :  { %22666 = vmatprep.mubr.msk.bf16.mxu0 %vm9629_vm5, %v28073_v35  ;;  %v28521_v35 = vsel %vm1909_vm4, %v28510_v30, %v12066_v14 }
 0xbfa   :  { %22667 = vmatmul.mubr.msk.bf16.gmra.mrb[216].mxu0 %vm9629_vm5, %v28099_v1  ;;  %v28528_v1 = vsel %vm1909_vm4, %v12066_v14, %v12068_v43 }
 0xbfb   :  { %22670 = vmatprep.mubr.msk.bf16.mxu0 %vm9629_vm5, %v28095_v10  ;;  %v12070_v10 = vrot.slane %v28385_v17, 4  ;;  %v12090_v17 = vrot.slane %v28428_v52, 4 }
 0xbfd   :  { %v28603_v9 = vsel %vm1909_vm4, %v12088_v29, %v12090_v17 }
 0xc02   :  { %22671 = vmatmul.mubr.msk.bf16.gmra.mrb[220].mxu0 %vm9629_vm5, %v28121_v23  ;;  %v12072_v23 = vrot.slane %v28389_v8, 4  ;;  %v28598_v8 = vsel %vm1909_vm4, %v12086_v41, %v12088_v29  ;;  %v12774_v41 = vrot.slane %v12679_v12, 4  ;;  %v12823_v12 = vrot.slane %v28814_v26, 4  ;;  %v28901_v26 = vld [vmem:[#allocation3 + $0x158] sm:$0xff] }
 0xc03   :  { %22674 = vmatprep.mubr.msk.bf16.mxu0 %vm9629_vm5, %v28117_v62  ;;  %v28533_v62 = vsel %vm1909_vm4, %v12068_v43, %v12070_v10 }
 0xc04   :  { %v28540_v50 = vsel %vm1909_vm4, %v12070_v10, %v12072_v23  ;;  %v28545_v16 = vsel %vm1909_vm4, %v12072_v23, %v12074_v24  ;;  %v12144_v10 = vrot.slane %v28494_v33, 4  ;;  %v28696_v23 = vrot.slane %v28498_v22, 4 }
 0xc06   :  { %v28705_v57 = vsel %vm1909_vm4, %v12144_v10, %v28696_v23  ;;  %v12149_v29 = vsel %vm1909_vm4, %v28696_v23, %v12148_v25 }
 0xc0a   :  { %22675 = vmatmul.mubr.msk.bf16.gmra.mrb[224].mxu0 %vm9629_vm5, %v28362_v34 }
 0xc0b   :  { %22678 = vmatprep.mubr.msk.bf16.mxu0 %vm9629_vm5, %v28482_v51 }
 0xc12   :  { %22679 = vmatmul.mubr.msk.bf16.gmra.mrb[228].mxu0 %vm9629_vm5, %v28486_v31 }
 0xc13   :  { %22682 = vmatprep.mubr.msk.bf16.mxu0 %vm9629_vm5, %v28490_v54 }
 0xc1a   :  { %22683 = vmatmul.mubr.msk.bf16.gmra.mrb[232].mxu0 %vm9629_vm5, %v28494_v33  ;;  %v28862_v33 = vld [vmem:[#allocation3 + $0x130] sm:$0xff] }
 0xc1b   :  { %22686 = vmatprep.mubr.msk.bf16.mxu0 %vm9629_vm5, %v28498_v22  ;;  %v28858_v22 = vld [vmem:[#allocation3 + $0x128] sm:$0xff]  ;;  %30288 = vst [vmem:[#allocation27_spill] sm:$0xff] %v28862_v33 }
 0xc1c   :  { %30287 = vst [vmem:[#allocation26_spill] sm:$0xff] %v28858_v22 }
 0xc22   :  { %22687 = vmatmul.mubr.msk.bf16.gmra.mrb[236].mxu0 %vm9629_vm5, %v28503_v3 }
 0xc23   :  { %22694 = vmatprep.mubr.msk.bf16.mxu0 %vm9629_vm5, %v12063_v47  ;;  %v12097_v47 = vsel %vm1909_vm4, %v28609_v19, %v27923_v21  ;;  %v30272_v21 = vld [vmem:[#allocation29_spill] sm:$0xff] }
 0xc2a   :  { %22695 = vmatmul.mubr.msk.bf16.vlgmr.msra.gmra.mrb[152].mxu0 %vm9629_vm5, %v12065_v11 }
 0xc2b   :  { %22783 = vmatpush3.bf16.msra.mxu0 %v24959_v56  ;;  %22698 = vmatprep.mubr.msk.bf16.mxu0 %vm9629_vm5, %v28521_v35  ;;  %v12092_v56 = vrot.slane %v28432_v38, 4 }
 0xc2c   :  { %22784 = vmatprep.subr.bf16.mxu0 %v24960_v49 }
 0xc2d   :  { %v28612_v63 = vsel %vm1909_vm4, %v12090_v17, %v12092_v56  ;;  %v28618_v59 = vsel %vm1909_vm4, %v12092_v56, %v28609_v19  ;;  %v12776_v17 = vsel %vm1909_vm4, %v12774_v41, %v28510_v30  ;;  %v24962_v56 = vld [vmem:[%s30055_s5 + $0x78] sm:$0xff]   ;;  %v28746_v30 = vld [vmem:[%s30055_s5 + $0x60] sm:$0xff]  }
 0xc2f   :  { %22785 = vmatpush3.bf16.msra.mxu0 %v24960_v49  ;;  %v12142_v49 = vrot.slane %v28490_v54, 4  ;;  %v12833_v54 = vrot.slane %v28858_v22, 4 }
 0xc30   :  { %22874 = vmatprep.subr.bf16.mxu0 %v28592_v48 }
 0xc31   :  { %v28699_v24 = vsel %vm1909_vm4, %v12142_v49, %v12144_v10  ;;  %v28810_v10 = vld [vmem:[#allocation3 + $0xf8] sm:$0xff] }
 0xc32   :  { %22699 = vmatmul.mubr.msk.bf16.gmra.mrb[156].mxu0 %vm9629_vm5, %v28528_v1  ;;  %30281 = vst [vmem:[#allocation20_spill] sm:$0xff] %v28810_v10  ;;  %v12821_v25 = vrot.slane %v28810_v10, 4 }
 0xc33   :  { %22702 = vmatprep.mubr.msk.bf16.mxu0 %vm9629_vm5, %v28533_v62 }
 0xc3a   :  { %22703 = vmatmul.mubr.msk.bf16.gmra.mrb[160].mxu0 %vm9629_vm5, %v28540_v50 }
 0xc3b   :  { %22706 = vmatprep.mubr.msk.bf16.mxu0 %vm9629_vm5, %v28545_v16 }
 0xc42   :  { %22707 = vmatmul.mubr.msk.bf16.gmra.mrb[164].mxu0 %vm9629_vm5, %v28555_v32 }
 0xc43   :  { %22710 = vmatprep.mubr.msk.bf16.mxu0 %vm9629_vm5, %v28561_v20 }
 0xc4a   :  { %22711 = vmatmul.mubr.msk.bf16.gmra.mrb[168].mxu0 %vm9629_vm5, %v28568_v60 }
 0xc4b   :  { %22714 = vmatprep.mubr.msk.bf16.mxu0 %vm9629_vm5, %v28573_v5 }
 0xc52   :  { %22715 = vmatmul.mubr.msk.bf16.gmra.mrb[172].mxu0 %vm9629_vm5, %v28580_v2 }
 0xc53   :  { %22718 = vmatprep.mubr.msk.bf16.mxu0 %vm9629_vm5, %v28585_v15 }
 0xc5a   :  { %22719 = vmatmul.mubr.msk.bf16.gmra.mrb[176].mxu0 %vm9629_vm5, %v28598_v8 }
 0xc5b   :  { %22722 = vmatprep.mubr.msk.bf16.mxu0 %vm9629_vm5, %v28603_v9 }
 0xc62   :  { %22723 = vmatmul.mubr.msk.bf16.gmra.mrb[180].mxu0 %vm9629_vm5, %v28612_v63 }
 0xc63   :  { %22726 = vmatprep.mubr.msk.bf16.mxu0 %vm9629_vm5, %v28618_v59 }
 0xc6a   :  { %22727 = vmatmul.mubr.msk.bf16.gmra.mrb[184].mxu0 %vm9629_vm5, %v12097_v47 }
 0xc6b   :  { %22730 = vmatprep.mubr.msk.bf16.mxu0 %vm9629_vm5, %v27931_v45  ;;  %v30273_v45 = vld [vmem:[#allocation6_spill] sm:$0xff] }
 0xc72   :  { %22731 = vmatmul.mubr.msk.bf16.gmra.mrb[188].mxu0 %vm9629_vm5, %v27949_v39  ;;  %v30274_v39 = vld [vmem:[#allocation7_spill] sm:$0xff] }
 0xc73   :  { %22734 = vmatprep.mubr.msk.bf16.mxu0 %vm9629_vm5, %v27952_v27  ;;  %v30275_v27 = vld [vmem:[#allocation8_spill] sm:$0xff]  ;;  %30292 = vst [vmem:[#allocation7_spill] sm:$0xff] %v28901_v26 }
 0xc7a   :  { %22735 = vmatmul.mubr.msk.bf16.gmra.mrb[192].mxu0 %vm9629_vm5, %v27971_v46  ;;  %v30276_v46 = vld [vmem:[#allocation9_spill] sm:$0xff] }
 0xc7b   :  { %22738 = vmatprep.mubr.msk.bf16.mxu0 %vm9629_vm5, %v27974_v28  ;;  %v30277_v28 = vld [vmem:[#allocation10_spill] sm:$0xff] }
 0xc82   :  { %22739 = vmatmul.mubr.msk.bf16.gmra.mrb[196].mxu0 %vm9629_vm5, %v27993_v55  ;;  %v30278_v55 = vld [vmem:[#allocation12_spill] sm:$0xff] }
 0xc83   :  { %22742 = vmatprep.mubr.msk.bf16.mxu0 %vm9629_vm5, %v27996_v4  ;;  %v30279_v4 = vld [vmem:[#allocation13_spill] sm:$0xff] }
 0xc8a   :  { %22743 = vmatmul.mubr.msk.bf16.gmra.mrb[200].mxu0 %vm9629_vm5, %v28015_v7  ;;  %v28665_v7 = vrot.slane %v28362_v34, 4  ;;  %v12140_v34 = vrot.slane %v28486_v31, 4  ;;  %v12835_v31 = vrot.slane %v28862_v33, 4 }
 0xc8b   :  { %22746 = vmatprep.mubr.msk.bf16.mxu0 %vm9629_vm5, %v28018_v58  ;;  %v28668_v58 = vrot.slane %v28482_v51, 4  ;;  %v28874_v51 = vld [vmem:[#allocation3 + $0x138] sm:$0xff] }
 0xc8c   :  { %v28690_v43 = vsel %vm1909_vm4, %v12140_v34, %v12142_v49  ;;  %30289 = vst [vmem:[#allocation28_spill] sm:$0xff] %v28874_v51  ;;  %v12837_v22 = vrot.slane %v28874_v51, 4 }
 0xc8d   :  { %v28677_v14 = vsel %vm1909_vm4, %v28665_v7, %v28668_v58  ;;  %v28685_v11 = vsel %vm1909_vm4, %v28668_v58, %v12140_v34 }
 0xc92   :  { %22747 = vmatmul.mubr.msk.bf16.gmra.mrb[204].mxu0 %vm9629_vm5, %v28037_v42  ;;  %v30280_v42 = vld [vmem:[#allocation11_spill] sm:$0xff] }
 0xc93   :  { %22750 = vmatprep.mubr.msk.bf16.mxu0 %vm9629_vm5, %v28040_v53  ;;  %v12137_v53 = vsel %vm1909_vm4, %v30280_v42, %v28665_v7 }
 0xc9a   :  { %22751 = vmatmul.mubr.msk.bf16.gmra.mrb[208].mxu0 %vm9629_vm5, %v30272_v21  ;;  %v28778_v21 = vld [vmem:[#allocation3 + $0xd8] sm:$0xff] }
 0xc9b   :  { %22754 = vmatprep.mubr.msk.bf16.mxu0 %vm9629_vm5, %v30273_v45  ;;  %v28782_v45 = vld [vmem:[#allocation3 + $0xe0] sm:$0xff] }
 0xca2   :  { %22755 = vmatmul.mubr.msk.bf16.gmra.mrb[212].mxu0 %vm9629_vm5, %v30274_v39  ;;  %v12813_v39 = vrot.slane %v28778_v21, 4 }
 0xca3   :  { %22758 = vmatprep.mubr.msk.bf16.mxu0 %vm9629_vm5, %v30275_v27  ;;  %v12815_v27 = vrot.slane %v28782_v45, 4 }
 0xcaa   :  { %22759 = vmatmul.mubr.msk.bf16.gmra.mrb[216].mxu0 %vm9629_vm5, %v30276_v46 }
 0xcab   :  { %22762 = vmatprep.mubr.msk.bf16.mxu0 %vm9629_vm5, %v30277_v28  ;;  %v28792_v28 = vsel %vm1909_vm4, %v12813_v39, %v12815_v27 }
 0xcb2   :  { %22763 = vmatmul.mubr.msk.bf16.gmra.mrb[220].mxu0 %vm9629_vm5, %v30278_v55  ;;  %v28794_v55 = vld [vmem:[#allocation3 + $0xe8] sm:$0xff] }
 0xcb3   :  { %22766 = vmatprep.mubr.msk.bf16.mxu0 %vm9629_vm5, %v30279_v4  ;;  %v28798_v4 = vld [vmem:[#allocation3 + $0xf0] sm:$0xff]  ;;  %v12817_v42 = vrot.slane %v28794_v55, 4 }
 0xcb5   :  { %v28803_v34 = vsel %vm1909_vm4, %v12815_v27, %v12817_v42  ;;  %v28842_v27 = vld [vmem:[#allocation3 + $0x118] sm:$0xff] }
 0xcb6   :  { %30285 = vst [vmem:[#allocation22_spill] sm:$0xff] %v28842_v27 }
 0xcba   :  { %22767 = vmatmul.mubr.msk.bf16.gmra.mrb[224].mxu0 %vm9629_vm5, %v12137_v53  ;;  %v12819_v53 = vrot.slane %v28798_v4, 4 }
 0xcbb   :  { %22770 = vmatprep.mubr.msk.bf16.mxu0 %vm9629_vm5, %v28677_v14 }
 0xcbc   :  { %v28808_v49 = vsel %vm1909_vm4, %v12817_v42, %v12819_v53  ;;  %v28819_v41 = vsel %vm1909_vm4, %v12819_v53, %v12821_v25  ;;  %v28846_v42 = vld [vmem:[#allocation3 + $0x120] sm:$0xff]  ;;  %v12829_v53 = vrot.slane %v28842_v27, 4  ;;  %v28890_v27 = vld [vmem:[#allocation3 + $0x148] sm:$0xff] }
 0xcbd   :  { %30286 = vst [vmem:[#allocation25_spill] sm:$0xff] %v28846_v42  ;;  %30291 = vst [vmem:[#allocation6_spill] sm:$0xff] %v28890_v27  ;;  %v12841_v51 = vrot.slane %v28890_v27, 4 }
 0xcc2   :  { %22771 = vmatmul.mubr.msk.bf16.gmra.mrb[228].mxu0 %vm9629_vm5, %v28685_v11 }
 0xcc3   :  { %22774 = vmatprep.mubr.msk.bf16.mxu0 %vm9629_vm5, %v28690_v43 }
 0xcca   :  { %22775 = vmatmul.mubr.msk.bf16.gmra.mrb[232].mxu0 %vm9629_vm5, %v28699_v24 }
 0xccb   :  { %22778 = vmatprep.mubr.msk.bf16.mxu0 %vm9629_vm5, %v28705_v57 }
 0xcd2   :  { %22779 = vmatmul.mubr.msk.bf16.gmra.mrb[236].mxu0 %vm9629_vm5, %v12149_v29  ;;  %v28824_v29 = vsel %vm1909_vm4, %v12821_v25, %v12823_v12  ;;  %v12831_v25 = vrot.slane %v28846_v42, 4  ;;  %v28878_v42 = vld [vmem:[#allocation3 + $0x140] sm:$0xff] }
 0xcd3   :  { %22786 = vmatprep.mubr.msk.bf16.mxu0 %vm9629_vm5, %v12776_v17  ;;  %v28826_v17 = vld [vmem:[#allocation3 + $0x108] sm:$0xff]  ;;  %30290 = vst [vmem:[#allocation29_spill] sm:$0xff] %v28878_v42  ;;  %v12839_v33 = vrot.slane %v28878_v42, 4 }
 0xcd4   :  { %30283 = vst [vmem:[#allocation23_spill] sm:$0xff] %v28826_v17 }
 0xcda   :  { %22787 = vmatmul.mubr.msk.bf16.vlgmr.msra.gmra.mrb[152].mxu0 %vm9629_vm5, %v28521_v35  ;;  %v28753_v35 = vld [vmem:[#allocation3 + $0xc0] sm:$0xff] }
 0xcdb   :  { %22875 = vmatpush3.bf16.msra.mxu0 %v28592_v48  ;;  %22790 = vmatprep.mubr.msk.bf16.mxu0 %vm9629_vm5, %v28528_v1  ;;  %v12807_v1 = vrot.slane %v28753_v35, 4 }
 0xcdc   :  { %22876 = vmatprep.subr.bf16.mxu0 %v24962_v56 }
 0xcdf   :  { %22877 = vmatpush3.bf16.msra.mxu0 %v24962_v56  ;;  %v28830_v56 = vld [vmem:[#allocation3 + $0x110] sm:$0xff] }
 0xce0   :  { %22966 = vmatprep.subr.bf16.mxu0 %v28746_v30  ;;  %30284 = vst [vmem:[#allocation24_spill] sm:$0xff] %v28830_v56 }
 0xce2   :  { %22791 = vmatmul.mubr.msk.bf16.gmra.mrb[156].mxu0 %vm9629_vm5, %v28533_v62  ;;  %v28760_v62 = vsel %vm1909_vm4, %v28609_v19, %v12807_v1 }
 0xce3   :  { %22794 = vmatprep.mubr.msk.bf16.mxu0 %vm9629_vm5, %v28540_v50  ;;  %v28762_v50 = vld [vmem:[#allocation3 + $0xc8] sm:$0xff] }
 0xcea   :  { %22795 = vmatmul.mubr.msk.bf16.gmra.mrb[160].mxu0 %vm9629_vm5, %v28545_v16  ;;  %v28766_v16 = vld [vmem:[#allocation3 + $0xd0] sm:$0xff] }
 0xceb   :  { %22798 = vmatprep.mubr.msk.bf16.mxu0 %vm9629_vm5, %v28555_v32  ;;  %v12809_v32 = vrot.slane %v28762_v50, 4  ;;  %v12811_v48 = vrot.slane %v28766_v16, 4 }
 0xced   :  { %v28771_v47 = vsel %vm1909_vm4, %v12807_v1, %v12809_v32  ;;  %v28776_v19 = vsel %vm1909_vm4, %v12809_v32, %v12811_v48  ;;  %v28787_v46 = vsel %vm1909_vm4, %v12811_v48, %v12813_v39  ;;  %v12825_v1 = vrot.slane %v28826_v17, 4 }
 0xcee   :  { %v12827_v32 = vrot.slane %v28830_v56, 4  ;;  %v28894_v56 = vld [vmem:[#allocation3 + $0x150] sm:$0xff] }
 0xcef   :  { %v28835_v48 = vsel %vm1909_vm4, %v12823_v12, %v12825_v1  ;;  %v12843_v42 = vrot.slane %v28894_v56, 4 }
 0xcf0   :  { %v28840_v39 = vsel %vm1909_vm4, %v12825_v1, %v12827_v32  ;;  %v28851_v12 = vsel %vm1909_vm4, %v12827_v32, %v12829_v53  ;;  %v28856_v1 = vsel %vm1909_vm4, %v12829_v53, %v12831_v25  ;;  %v28867_v32 = vsel %vm1909_vm4, %v12831_v25, %v12833_v54 }
 0xcf1   :  { %v28872_v53 = vsel %vm1909_vm4, %v12833_v54, %v12835_v31  ;;  %v28883_v25 = vsel %vm1909_vm4, %v12835_v31, %v12837_v22  ;;  %v28888_v54 = vsel %vm1909_vm4, %v12837_v22, %v12839_v33  ;;  %v12842_v31 = vsel %vm1909_vm4, %v12839_v33, %v12841_v51 }
 0xcf2   :  { %22799 = vmatmul.mubr.msk.bf16.gmra.mrb[164].mxu0 %vm9629_vm5, %v28561_v20  ;;  %v12844_v17 = vsel %vm1909_vm4, %v12841_v51, %v12843_v42  ;;  %v12845_v22 = vrot.slane %v28901_v26, 4  ;;  %v28919_v51 = vrot.slane %v28503_v3, 4 }
 0xcf3   :  { %22802 = vmatprep.mubr.msk.bf16.mxu0 %vm9629_vm5, %v28568_v60 }
 0xcf4   :  { %v12846_v10 = vsel %vm1909_vm4, %v12843_v42, %v12845_v22  ;;  %v12848_v27 = vsel %vm1909_vm4, %v12845_v22, %v28665_v7  ;;  %v12860_v33 = vsel %vm1909_vm4, %v28696_v23, %v28919_v51  ;;  %v12723_v7 = vld [vmem:[#allocation3 + $0x198] sm:$0xf]  ;;  %v24964_v23 = vld [vmem:[%s30055_s5 + $0x68] sm:$0xff]  }
 0xcfa   :  { %22803 = vmatmul.mubr.msk.bf16.gmra.mrb[168].mxu0 %vm9629_vm5, %v28573_v5 }
 0xcfb   :  { %22806 = vmatprep.mubr.msk.bf16.mxu0 %vm9629_vm5, %v28580_v2 }
 0xd02   :  { %22807 = vmatmul.mubr.msk.bf16.gmra.mrb[172].mxu0 %vm9629_vm5, %v28585_v15 }
 0xd03   :  { %22810 = vmatprep.mubr.msk.bf16.mxu0 %vm9629_vm5, %v28598_v8 }
 0xd0a   :  { %22811 = vmatmul.mubr.msk.bf16.gmra.mrb[176].mxu0 %vm9629_vm5, %v28603_v9 }
 0xd0b   :  { %22814 = vmatprep.mubr.msk.bf16.mxu0 %vm9629_vm5, %v28612_v63 }
 0xd12   :  { %22815 = vmatmul.mubr.msk.bf16.gmra.mrb[180].mxu0 %vm9629_vm5, %v28618_v59 }
 0xd13   :  { %22818 = vmatprep.mubr.msk.bf16.mxu0 %vm9629_vm5, %v28760_v62 }
 0xd1a   :  { %22819 = vmatmul.mubr.msk.bf16.gmra.mrb[184].mxu0 %vm9629_vm5, %v28771_v47 }
 0xd1b   :  { %22822 = vmatprep.mubr.msk.bf16.mxu0 %vm9629_vm5, %v28776_v19 }
 0xd22   :  { %22823 = vmatmul.mubr.msk.bf16.gmra.mrb[188].mxu0 %vm9629_vm5, %v28787_v46 }
 0xd23   :  { %22826 = vmatprep.mubr.msk.bf16.mxu0 %vm9629_vm5, %v28792_v28 }
 0xd2a   :  { %22827 = vmatmul.mubr.msk.bf16.gmra.mrb[192].mxu0 %vm9629_vm5, %v28803_v34 }
 0xd2b   :  { %22830 = vmatprep.mubr.msk.bf16.mxu0 %vm9629_vm5, %v28808_v49 }
 0xd32   :  { %22831 = vmatmul.mubr.msk.bf16.gmra.mrb[196].mxu0 %vm9629_vm5, %v28819_v41 }
 0xd33   :  { %22834 = vmatprep.mubr.msk.bf16.mxu0 %vm9629_vm5, %v28824_v29 }
 0xd3a   :  { %22835 = vmatmul.mubr.msk.bf16.gmra.mrb[200].mxu0 %vm9629_vm5, %v28835_v48 }
 0xd3b   :  { %22838 = vmatprep.mubr.msk.bf16.mxu0 %vm9629_vm5, %v28840_v39 }
 0xd42   :  { %22839 = vmatmul.mubr.msk.bf16.gmra.mrb[204].mxu0 %vm9629_vm5, %v28851_v12 }
 0xd43   :  { %22842 = vmatprep.mubr.msk.bf16.mxu0 %vm9629_vm5, %v28856_v1 }
 0xd4a   :  { %22843 = vmatmul.mubr.msk.bf16.gmra.mrb[208].mxu0 %vm9629_vm5, %v28867_v32 }
 0xd4b   :  { %22846 = vmatprep.mubr.msk.bf16.mxu0 %vm9629_vm5, %v28872_v53 }
 0xd52   :  { %22847 = vmatmul.mubr.msk.bf16.gmra.mrb[212].mxu0 %vm9629_vm5, %v28883_v25 }
 0xd53   :  { %22850 = vmatprep.mubr.msk.bf16.mxu0 %vm9629_vm5, %v28888_v54 }
 0xd5a   :  { %22851 = vmatmul.mubr.msk.bf16.gmra.mrb[216].mxu0 %vm9629_vm5, %v12842_v31 }
 0xd5b   :  { %22854 = vmatprep.mubr.msk.bf16.mxu0 %vm9629_vm5, %v12844_v17 }
 0xd62   :  { %22855 = vmatmul.mubr.msk.bf16.gmra.mrb[220].mxu0 %vm9629_vm5, %v12846_v10 }
 0xd63   :  { %22858 = vmatprep.mubr.msk.bf16.mxu0 %vm9629_vm5, %v12848_v27  ;;  %v13529_v27 = vld [vmem:[#allocation3 + $0x68] sm:$0xf0] }
 0xd64   :  { %v13581_v42 = vrot.slane %v13529_v27, 4  ;;  %v30308_v27 = vld [vmem:[#allocation17_spill] sm:$0xff] }
 0xd66   :  { %v13583_v3 = vsel %vm1909_vm4, %v13581_v42, %v28550_v37  ;;  %v28994_v37 = vld [vmem:[#allocation3 + $0x160] sm:$0xff] }
 0xd67   :  { %v30309_v42 = vld [vmem:[#allocation18_spill] sm:$0xff] }
 0xd6a   :  { %22859 = vmatmul.mubr.msk.bf16.gmra.mrb[224].mxu0 %vm9629_vm5, %v28677_v14  ;;  %v12861_v14 = vrot.slane %v12723_v7, 4  ;;  %v30306_v7 = vld [vmem:[#allocation15_spill] sm:$0xff] }
 0xd6b   :  { %22862 = vmatprep.mubr.msk.bf16.mxu0 %vm9629_vm5, %v28685_v11 }
 0xd6c   :  { %v12862_v26 = vsel %vm1909_vm4, %v28919_v51, %v12861_v14  ;;  %v30307_v14 = vld [vmem:[#allocation16_spill] sm:$0xff] }
 0xd72   :  { %22863 = vmatmul.mubr.msk.bf16.gmra.mrb[228].mxu0 %vm9629_vm5, %v28690_v43 }
 0xd73   :  { %22866 = vmatprep.mubr.msk.bf16.mxu0 %vm9629_vm5, %v28699_v24 }
 0xd7a   :  { %22867 = vmatmul.mubr.msk.bf16.gmra.mrb[232].mxu0 %vm9629_vm5, %v28705_v57 }
 0xd7b   :  { %22870 = vmatprep.mubr.msk.bf16.mxu0 %vm9629_vm5, %v12860_v33 }
 0xd82   :  { %22871 = vmatmul.mubr.msk.bf16.gmra.mrb[236].mxu0 %vm9629_vm5, %v12862_v26 }
 0xd83   :  { %22878 = vmatprep.mubr.msk.bf16.mxu0 %vm9629_vm5, %v13583_v3  ;;  %v24965_v3 = vld [vmem:[%s30055_s5 + $0x80] sm:$0xff]  }
 0xd8a   :  { %22879 = vmatmul.mubr.msk.bf16.vlgmr.msra.gmra.mrb[152].mxu0 %vm9629_vm5, %v28561_v20  ;;  %v13642_v20 = vrot.slane %v28994_v37, 4 }
 0xd8b   :  { %22967 = vmatpush3.bf16.msra.mxu0 %v28746_v30  ;;  %22882 = vmatprep.mubr.msk.bf16.mxu0 %vm9629_vm5, %v28568_v60 }
 0xd8c   :  { %22968 = vmatprep.subr.bf16.mxu0 %v24964_v23  ;;  %v13643_v60 = vsel %vm1909_vm4, %v12845_v22, %v13642_v20  ;;  %v30303_v22 = vld [vmem:[#allocation6_spill] sm:$0xff] }
 0xd8f   :  { %22969 = vmatpush3.bf16.msra.mxu0 %v24964_v23  ;;  %v30310_v23 = vld [vmem:[#allocation19_spill] sm:$0xff] }
 0xd90   :  { %23058 = vmatprep.subr.bf16.mxu0 %v24965_v3 }
 0xd92   :  { %22883 = vmatmul.mubr.msk.bf16.gmra.mrb[156].mxu0 %vm9629_vm5, %v28573_v5  ;;  %v13645_v5 = vsel %vm1909_vm4, %v13642_v20, %v28668_v58  ;;  %v29022_v58 = vld [vmem:[#allocation3 + $0x1a8] sm:$0xff]  ;;  %v24993_v20 = vld [vmem:[%s30057_s7 + $0x30] sm:$0xff]  }
 0xd93   :  { %22886 = vmatprep.mubr.msk.bf16.mxu0 %vm9629_vm5, %v28580_v2  ;;  %v29011_v2 = vld [vmem:[#allocation3 + $0x198] sm:$0xff] }
 0xd9a   :  { %22887 = vmatmul.mubr.msk.bf16.gmra.mrb[160].mxu0 %vm9629_vm5, %v28585_v15  ;;  %v29014_v15 = vld [vmem:[#allocation3 + $0x1a0] sm:$0xff] }
 0xd9b   :  { %22890 = vmatprep.mubr.msk.bf16.mxu0 %vm9629_vm5, %v28598_v8  ;;  %v13656_v8 = vrot.slane %v29011_v2, 4 }
 0xda2   :  { %22891 = vmatmul.mubr.msk.bf16.gmra.mrb[164].mxu0 %vm9629_vm5, %v28603_v9  ;;  %v13658_v9 = vrot.slane %v29014_v15, 4 }
 0xda3   :  { %22894 = vmatprep.mubr.msk.bf16.mxu0 %vm9629_vm5, %v28612_v63  ;;  %v13657_v63 = vsel %vm1909_vm4, %v28919_v51, %v13656_v8  ;;  %v30304_v51 = vld [vmem:[#allocation7_spill] sm:$0xff] }
 0xdaa   :  { %22895 = vmatmul.mubr.msk.bf16.gmra.mrb[168].mxu0 %vm9629_vm5, %v28618_v59  ;;  %v13659_v59 = vsel %vm1909_vm4, %v13656_v8, %v13658_v9 }
 0xdab   :  { %22898 = vmatprep.mubr.msk.bf16.mxu0 %vm9629_vm5, %v28760_v62  ;;  %v29032_v62 = vld [vmem:[#allocation3 + $0x1b8] sm:$0xff] }
 0xdb2   :  { %22899 = vmatmul.mubr.msk.bf16.gmra.mrb[172].mxu0 %vm9629_vm5, %v28771_v47  ;;  %v29035_v47 = vld [vmem:[#allocation3 + $0x1c0] sm:$0xff] }
 0xdb3   :  { %22902 = vmatprep.mubr.msk.bf16.mxu0 %vm9629_vm5, %v28776_v19  ;;  %v13664_v19 = vrot.slane %v29032_v62, 4 }
 0xdba   :  { %22903 = vmatmul.mubr.msk.bf16.gmra.mrb[176].mxu0 %vm9629_vm5, %v28787_v46  ;;  %v13666_v46 = vrot.slane %v29035_v47, 4 }
 0xdbb   :  { %22906 = vmatprep.mubr.msk.bf16.mxu0 %vm9629_vm5, %v28792_v28 }
 0xdc2   :  { %22907 = vmatmul.mubr.msk.bf16.gmra.mrb[180].mxu0 %vm9629_vm5, %v28803_v34  ;;  %v13667_v34 = vsel %vm1909_vm4, %v13664_v19, %v13666_v46 }
 0xdc3   :  { %22910 = vmatprep.mubr.msk.bf16.mxu0 %vm9629_vm5, %v28808_v49  ;;  %v13530_v49 = vld [vmem:[#allocation3 + $0x1c8] sm:$0xf] }
 0xdca   :  { %22911 = vmatmul.mubr.msk.bf16.gmra.mrb[184].mxu0 %vm9629_vm5, %v28819_v41  ;;  %v13480_v41 = vld [vmem:[#allocation3 + $0x68] sm:$0xff] }
 0xdcb   :  { %22914 = vmatprep.mubr.msk.bf16.mxu0 %vm9629_vm5, %v28824_v29  ;;  %v24966_v29 = vld [vmem:[%s30055_s5 + $0x88] sm:$0xff]  }
 0xdd2   :  { %22915 = vmatmul.mubr.msk.bf16.gmra.mrb[188].mxu0 %vm9629_vm5, %v28835_v48  ;;  %v30294_v48 = vld [vmem:[#allocation21_spill] sm:$0xff] }
 0xdd3   :  { %22918 = vmatprep.mubr.msk.bf16.mxu0 %vm9629_vm5, %v28840_v39  ;;  %v30295_v39 = vld [vmem:[#allocation23_spill] sm:$0xff] }
 0xdda   :  { %22919 = vmatmul.mubr.msk.bf16.gmra.mrb[192].mxu0 %vm9629_vm5, %v28851_v12  ;;  %v30296_v12 = vld [vmem:[#allocation24_spill] sm:$0xff] }
 0xddb   :  { %22922 = vmatprep.mubr.msk.bf16.mxu0 %vm9629_vm5, %v28856_v1  ;;  %v30297_v1 = vld [vmem:[#allocation22_spill] sm:$0xff] }
 0xde2   :  { %22923 = vmatmul.mubr.msk.bf16.gmra.mrb[196].mxu0 %vm9629_vm5, %v28867_v32  ;;  %v30298_v32 = vld [vmem:[#allocation25_spill] sm:$0xff] }
 0xde3   :  { %22926 = vmatprep.mubr.msk.bf16.mxu0 %vm9629_vm5, %v28872_v53  ;;  %v30299_v53 = vld [vmem:[#allocation26_spill] sm:$0xff] }
 0xdea   :  { %22927 = vmatmul.mubr.msk.bf16.gmra.mrb[200].mxu0 %vm9629_vm5, %v28883_v25  ;;  %v30300_v25 = vld [vmem:[#allocation27_spill] sm:$0xff] }
 0xdeb   :  { %22930 = vmatprep.mubr.msk.bf16.mxu0 %vm9629_vm5, %v28888_v54  ;;  %v30301_v54 = vld [vmem:[#allocation28_spill] sm:$0xff] }
 0xdf2   :  { %22931 = vmatmul.mubr.msk.bf16.gmra.mrb[204].mxu0 %vm9629_vm5, %v12842_v31  ;;  %v30302_v31 = vld [vmem:[#allocation29_spill] sm:$0xff] }
 0xdf3   :  { %22934 = vmatprep.mubr.msk.bf16.mxu0 %vm9629_vm5, %v12844_v17  ;;  %v30293_v17 = vld [vmem:[#allocation20_spill] sm:$0xff] }
 0xdfa   :  { %22935 = vmatmul.mubr.msk.bf16.gmra.mrb[208].mxu0 %vm9629_vm5, %v12846_v10  ;;  %v13668_v10 = vrot.slane %v13530_v49, 4 }
 0xdfb   :  { %22938 = vmatprep.mubr.msk.bf16.mxu0 %vm9629_vm5, %v13643_v60  ;;  %v29261_v60 = vld [vmem:[%s30058_s6] ss:$0 sm:$0xff] }
 0xdfc   :  { %v13669_v26 = vsel %vm1909_vm4, %v13666_v46, %v13668_v10 }
 0xe02   :  { %22939 = vmatmul.mubr.msk.bf16.gmra.mrb[212].mxu0 %vm9629_vm5, %v13645_v5 }
 0xe03   :  { %22942 = vmatprep.mubr.msk.bf16.mxu0 %vm9629_vm5, %v28685_v11  ;;  %v29025_v11 = vld [vmem:[#allocation3 + $0x1b0] sm:$0xff] }
 0xe0a   :  { %22943 = vmatmul.mubr.msk.bf16.gmra.mrb[216].mxu0 %vm9629_vm5, %v28690_v43  ;;  %v13660_v43 = vrot.slane %v29022_v58, 4 }
 0xe0b   :  { %22946 = vmatprep.mubr.msk.bf16.mxu0 %vm9629_vm5, %v28699_v24  ;;  %v13662_v24 = vrot.slane %v29025_v11, 4 }
 0xe0d   :  { %v13663_v30 = vsel %vm1909_vm4, %v13660_v43, %v13662_v24  ;;  %v13665_v28 = vsel %vm1909_vm4, %v13662_v24, %v13664_v19 }
 0xe12   :  { %22947 = vmatmul.mubr.msk.bf16.gmra.mrb[220].mxu0 %vm9629_vm5, %v28705_v57  ;;  %v13661_v57 = vsel %vm1909_vm4, %v13658_v9, %v13660_v43 }
 0xe13   :  { %22950 = vmatprep.mubr.msk.bf16.mxu0 %vm9629_vm5, %v12860_v33  ;;  %v30305_v33 = vld [vmem:[#allocation14_spill] sm:$0xff] }
 0xe1a   :  { %22951 = vmatmul.mubr.msk.bf16.gmra.mrb[224].mxu0 %vm9629_vm5, %v13657_v63  ;;  %v24997_v63 = vld [vmem:[%s30057_s7 + $0x78] sm:$0xff]  }
 0xe1b   :  { %22954 = vmatprep.mubr.msk.bf16.mxu0 %vm9629_vm5, %v13659_v59 }
 0xe22   :  { %22955 = vmatmul.mubr.msk.bf16.gmra.mrb[228].mxu0 %vm9629_vm5, %v13661_v57 }
 0xe23   :  { %22958 = vmatprep.mubr.msk.bf16.mxu0 %vm9629_vm5, %v13663_v30 }
 0xe2a   :  { %22959 = vmatmul.mubr.msk.bf16.gmra.mrb[232].mxu0 %vm9629_vm5, %v13665_v28 }
 0xe2b   :  { %22962 = vmatprep.mubr.msk.bf16.mxu0 %vm9629_vm5, %v13667_v34 }
 0xe32   :  { %22963 = vmatmul.mubr.msk.bf16.gmra.mrb[236].mxu0 %vm9629_vm5, %v13669_v26 }
 0xe33   :  { %22970 = vmatprep.mubr.msk.bf16.mxu0 %vm9629_vm5, %v13480_v41 }
 0xe3a   :  { %22971 = vmatmul.mubr.msk.bf16.vlgmr.msra.gmra.mrb[152].mxu0 %vm9629_vm5, %v28397_v6 }
 0xe3b   :  { %23059 = vmatpush3.bf16.msra.mxu0 %v24965_v3  ;;  %22974 = vmatprep.mubr.msk.bf16.mxu0 %vm9629_vm5, %v28401_v44  ;;  %v24988_v3 = vld [vmem:[%s30057_s7 + $0x28] sm:$0xff]  }
 0xe3c   :  { %23060 = vmatprep.subr.bf16.mxu0 %v24966_v29 }
 0xe3f   :  { %23061 = vmatpush3.bf16.msra.mxu0 %v24966_v29 }
 0xe42   :  { %22975 = vmatmul.mubr.msk.bf16.gmra.mrb[156].mxu0 %vm9629_vm5, %v28405_v13 }
 0xe43   :  { %22978 = vmatprep.mubr.msk.bf16.mxu0 %vm9629_vm5, %v28409_v61 }
 0xe4a   :  { %22979 = vmatmul.mubr.msk.bf16.gmra.mrb[160].mxu0 %vm9629_vm5, %v28413_v40 }
 0xe4b   :  { %22982 = vmatprep.mubr.msk.bf16.mxu0 %vm9629_vm5, %v28417_v18 }
 0xe52   :  { %22983 = vmatmul.mubr.msk.bf16.gmra.mrb[164].mxu0 %vm9629_vm5, %v28424_v36 }
 0xe53   :  { %22986 = vmatprep.mubr.msk.bf16.mxu0 %vm9629_vm5, %v28428_v52 }
 0xe5a   :  { %22987 = vmatmul.mubr.msk.bf16.gmra.mrb[168].mxu0 %vm9629_vm5, %v28432_v38 }
 0xe5b   :  { %22990 = vmatprep.mubr.msk.bf16.mxu0 %vm9629_vm5, %v28436_v0 }
 0xe62   :  { %22991 = vmatmul.mubr.msk.bf16.gmra.mrb[172].mxu0 %vm9629_vm5, %v28753_v35 }
 0xe63   :  { %22994 = vmatprep.mubr.msk.bf16.mxu0 %vm9629_vm5, %v28762_v50 }
 0xe6a   :  { %22995 = vmatmul.mubr.msk.bf16.gmra.mrb[176].mxu0 %vm9629_vm5, %v28766_v16 }
 0xe6b   :  { %22998 = vmatprep.mubr.msk.bf16.mxu0 %vm9629_vm5, %v28778_v21 }
 0xe72   :  { %22999 = vmatmul.mubr.msk.bf16.gmra.mrb[180].mxu0 %vm9629_vm5, %v28782_v45 }
 0xe73   :  { %23002 = vmatprep.mubr.msk.bf16.mxu0 %vm9629_vm5, %v28794_v55 }
 0xe7a   :  { %23003 = vmatmul.mubr.msk.bf16.gmra.mrb[184].mxu0 %vm9629_vm5, %v28798_v4 }
 0xe7b   :  { %23006 = vmatprep.mubr.msk.bf16.mxu0 %vm9629_vm5, %v30293_v17 }
 0xe82   :  { %23007 = vmatmul.mubr.msk.bf16.gmra.mrb[188].mxu0 %vm9629_vm5, %v30294_v48 }
 0xe83   :  { %23010 = vmatprep.mubr.msk.bf16.mxu0 %vm9629_vm5, %v30295_v39 }
 0xe8a   :  { %23011 = vmatmul.mubr.msk.bf16.gmra.mrb[192].mxu0 %vm9629_vm5, %v30296_v12 }
 0xe8b   :  { %23014 = vmatprep.mubr.msk.bf16.mxu0 %vm9629_vm5, %v30297_v1 }
 0xe92   :  { %23015 = vmatmul.mubr.msk.bf16.gmra.mrb[196].mxu0 %vm9629_vm5, %v30298_v32 }
 0xe93   :  { %23018 = vmatprep.mubr.msk.bf16.mxu0 %vm9629_vm5, %v30299_v53 }
 0xe9a   :  { %23019 = vmatmul.mubr.msk.bf16.gmra.mrb[200].mxu0 %vm9629_vm5, %v30300_v25 }
 0xe9b   :  { %23022 = vmatprep.mubr.msk.bf16.mxu0 %vm9629_vm5, %v30301_v54 }
 0xea2   :  { %23023 = vmatmul.mubr.msk.bf16.gmra.mrb[204].mxu0 %vm9629_vm5, %v30302_v31 }
 0xea3   :  { %23026 = vmatprep.mubr.msk.bf16.mxu0 %vm9629_vm5, %v30303_v22 }
 0xeaa   :  { %23027 = vmatmul.mubr.msk.bf16.gmra.mrb[208].mxu0 %vm9629_vm5, %v28894_v56 }
 0xeab   :  { %23030 = vmatprep.mubr.msk.bf16.mxu0 %vm9629_vm5, %v30304_v51 }
 0xeb2   :  { %23031 = vmatmul.mubr.msk.bf16.gmra.mrb[212].mxu0 %vm9629_vm5, %v28994_v37 }
 0xeb3   :  { %23034 = vmatprep.mubr.msk.bf16.mxu0 %vm9629_vm5, %v30305_v33 }
 0xeba   :  { %23035 = vmatmul.mubr.msk.bf16.gmra.mrb[216].mxu0 %vm9629_vm5, %v30306_v7 }
 0xebb   :  { %23038 = vmatprep.mubr.msk.bf16.mxu0 %vm9629_vm5, %v30307_v14  ;;  %v25004_v14 = vld [vmem:[%s30057_s7 + $0xc0] sm:$0xff]  }
 0xec2   :  { %23039 = vmatmul.mubr.msk.bf16.gmra.mrb[220].mxu0 %vm9629_vm5, %v30308_v27 }
 0xec3   :  { %23042 = vmatprep.mubr.msk.bf16.mxu0 %vm9629_vm5, %v30309_v42 }
 0xeca   :  { %23043 = vmatmul.mubr.msk.bf16.gmra.mrb[224].mxu0 %vm9629_vm5, %v30310_v23 }
 0xecb   :  { %23046 = vmatprep.mubr.msk.bf16.mxu0 %vm9629_vm5, %v29011_v2 }
 0xed2   :  { %23047 = vmatmul.mubr.msk.bf16.gmra.mrb[228].mxu0 %vm9629_vm5, %v29014_v15 }
 0xed3   :  { %23050 = vmatprep.mubr.msk.bf16.mxu0 %vm9629_vm5, %v29022_v58 }
 0xeda   :  { %23051 = vmatmul.mubr.msk.bf16.gmra.mrb[232].mxu0 %vm9629_vm5, %v29025_v11 }
 0xedb   :  { %23054 = vmatprep.mubr.msk.bf16.mxu0 %vm9629_vm5, %v29032_v62 }
 0xee2   :  { %23055 = vmatmul.mubr.msk.bf16.gmra.mrb[236].mxu0 %vm9629_vm5, %v29035_v47 }
 0xee3   :  { %23062 = vmatprep.mubr.msk.bf16.mxu0 %vm9629_vm5, %v28397_v6  ;;  %v24967_v6 = vld [vmem:[%s30057_s7 + $0x40] sm:$0xff]  }
 0xee4   :  { %20785 = vmatprep.subr.bf16.mxu0 %v24967_v6 }
 0xeea   :  { %23063 = vmatmul.mubr.msk.bf16.vlgmr.msra.gmra.mrb[152].mxu0 %vm9629_vm5, %v28401_v44  ;;  %v24968_v44 = vld [vmem:[%s30057_s7] sm:$0xff]  }
 0xeeb   :  { %23066 = vmatprep.mubr.msk.bf16.mxu0 %vm9629_vm5, %v28405_v13  ;;  %v24969_v13 = vld [vmem:[%s30057_s7 + $0x48] sm:$0xff]   ;;  %20786 = vmatpush3.bf16.msra.mxu0 %v24968_v44 }
 0xeec   :  { %20787 = vmatprep.subr.bf16.mxu0 %v24969_v13 }
 0xef2   :  { %23067 = vmatmul.mubr.msk.bf16.gmra.mrb[156].mxu0 %vm9629_vm5, %v28409_v61  ;;  %v24970_v61 = vld [vmem:[%s30057_s7 + $0x8] sm:$0xff]  }
 0xef3   :  { %23070 = vmatprep.mubr.msk.bf16.mxu0 %vm9629_vm5, %v28413_v40  ;;  %20788 = vmatpush3.bf16.msra.mxu0 %v24970_v61  ;;  %v24971_v40 = vld [vmem:[%s30057_s7 + $0x50] sm:$0xff]  }
 0xef4   :  { %20789 = vmatprep.subr.bf16.mxu0 %v24971_v40 }
 0xefa   :  { %23071 = vmatmul.mubr.msk.bf16.gmra.mrb[160].mxu0 %vm9629_vm5, %v28417_v18  ;;  %v24972_v18 = vld [vmem:[%s30057_s7 + $0x10] sm:$0xff]  }
 0xefb   :  { %23074 = vmatprep.mubr.msk.bf16.mxu0 %vm9629_vm5, %v28424_v36  ;;  %20790 = vmatpush3.bf16.msra.mxu0 %v24972_v18  ;;  %v25278_v36 = vld [vmem:[#allocation3 + $0x168] sm:$0xff] }
 0xf02   :  { %23075 = vmatmul.mubr.msk.bf16.gmra.mrb[164].mxu0 %vm9629_vm5, %v28428_v52  ;;  %v25279_v52 = vld [vmem:[#allocation3 + $0x170] sm:$0xff] }
 0xf03   :  { %23078 = vmatprep.mubr.msk.bf16.mxu0 %vm9629_vm5, %v28432_v38  ;;  %v24976_v38 = vld [vmem:[%s30057_s7 + $0x58] sm:$0xff]  }
 0xf04   :  { %20791 = vmatprep.subr.bf16.mxu0 %v24976_v38 }
 0xf0a   :  { %23079 = vmatmul.mubr.msk.bf16.gmra.mrb[168].mxu0 %vm9629_vm5, %v28436_v0  ;;  %v24977_v0 = vld [vmem:[%s30057_s7 + $0x18] sm:$0xff]  }
 0xf0b   :  { %23082 = vmatprep.mubr.msk.bf16.mxu0 %vm9629_vm5, %v28753_v35  ;;  %v25280_v35 = vld [vmem:[#allocation3 + $0x178] sm:$0xff]  ;;  %20792 = vmatpush3.bf16.msra.mxu0 %v24977_v0 }
 0xf12   :  { %23083 = vmatmul.mubr.msk.bf16.gmra.mrb[172].mxu0 %vm9629_vm5, %v28762_v50  ;;  %v25281_v50 = vld [vmem:[#allocation3 + $0x180] sm:$0xff] }
 0xf13   :  { %23086 = vmatprep.mubr.msk.bf16.mxu0 %vm9629_vm5, %v28766_v16  ;;  %v25282_v16 = vld [vmem:[#allocation3 + $0x188] sm:$0xff] }
 0xf1a   :  { %23087 = vmatmul.mubr.msk.bf16.gmra.mrb[176].mxu0 %vm9629_vm5, %v28778_v21  ;;  %v25283_v21 = vld [vmem:[#allocation3 + $0x190] sm:$0xff] }
 0xf1b   :  { %23090 = vmatprep.mubr.msk.bf16.mxu0 %vm9629_vm5, %v28782_v45  ;;  %v24982_v45 = vld [vmem:[%s30057_s7 + $0x60] sm:$0xff]  }
 0xf1c   :  { %20793 = vmatprep.subr.bf16.mxu0 %v24982_v45 }
 0xf22   :  { %23091 = vmatmul.mubr.msk.bf16.gmra.mrb[180].mxu0 %vm9629_vm5, %v28794_v55  ;;  %v24983_v55 = vld [vmem:[%s30057_s7 + $0x20] sm:$0xff]  }
 0xf23   :  { %23094 = vmatprep.mubr.msk.bf16.mxu0 %vm9629_vm5, %v28798_v4  ;;  %20794 = vmatpush3.bf16.msra.mxu0 %v24983_v55  ;;  %v14728_v4 = vld [vmem:[#allocation3 + $0x1c8] sm:$0xff] }
 0xf2a   :  { %23095 = vmatmul.mubr.msk.bf16.gmra.mrb[184].mxu0 %vm9629_vm5, %v30293_v17 }
 0xf2b   :  { %23098 = vmatprep.mubr.msk.bf16.mxu0 %vm9629_vm5, %v30294_v48 }
 0xf32   :  { %23099 = vmatmul.mubr.msk.bf16.gmra.mrb[188].mxu0 %vm9629_vm5, %v30295_v39 }
 0xf33   :  { %23102 = vmatprep.mubr.msk.bf16.mxu0 %vm9629_vm5, %v30296_v12 }
 0xf3a   :  { %23103 = vmatmul.mubr.msk.bf16.gmra.mrb[192].mxu0 %vm9629_vm5, %v30297_v1 }
 0xf3b   :  { %23106 = vmatprep.mubr.msk.bf16.mxu0 %vm9629_vm5, %v30298_v32 }
 0xf42   :  { %23107 = vmatmul.mubr.msk.bf16.gmra.mrb[196].mxu0 %vm9629_vm5, %v30299_v53 }
 0xf43   :  { %23110 = vmatprep.mubr.msk.bf16.mxu0 %vm9629_vm5, %v30300_v25 }
 0xf4a   :  { %23111 = vmatmul.mubr.msk.bf16.gmra.mrb[200].mxu0 %vm9629_vm5, %v30301_v54 }
 0xf4b   :  { %23114 = vmatprep.mubr.msk.bf16.mxu0 %vm9629_vm5, %v30302_v31 }
 0xf52   :  { %23115 = vmatmul.mubr.msk.bf16.gmra.mrb[204].mxu0 %vm9629_vm5, %v30303_v22 }
 0xf53   :  { %23118 = vmatprep.mubr.msk.bf16.mxu0 %vm9629_vm5, %v28894_v56  ;;  %v24987_v56 = vld [vmem:[%s30057_s7 + $0x68] sm:$0xff]  }
 0xf54   :  { %20795 = vmatprep.subr.bf16.mxu0 %v24987_v56 }
 0xf55   :  { %20796 = vmatpush3.bf16.msra.mxu0 %v24988_v3 }
 0xf5a   :  { %23119 = vmatmul.mubr.msk.bf16.gmra.mrb[208].mxu0 %vm9629_vm5, %v30304_v51 }
 0xf5b   :  { %23122 = vmatprep.mubr.msk.bf16.mxu0 %vm9629_vm5, %v28994_v37  ;;  %v24992_v37 = vld [vmem:[%s30057_s7 + $0x70] sm:$0xff]  }
 0xf5c   :  { %20797 = vmatprep.subr.bf16.mxu0 %v24992_v37 }
 0xf5d   :  { %20798 = vmatpush3.bf16.msra.mxu0 %v24993_v20 }
 0xf5e   :  { %20799 = vmatprep.subr.bf16.mxu0 %v24997_v63 }
 0xf62   :  { %23123 = vmatmul.mubr.msk.bf16.gmra.mrb[212].mxu0 %vm9629_vm5, %v25278_v36 }
 0xf63   :  { %23126 = vmatprep.mubr.msk.bf16.mxu0 %vm9629_vm5, %v25279_v52 }
 0xf6a   :  { %23127 = vmatmul.mubr.msk.bf16.gmra.mrb[216].mxu0 %vm9629_vm5, %v25280_v35 }
 0xf6b   :  { %23130 = vmatprep.mubr.msk.bf16.mxu0 %vm9629_vm5, %v25281_v50 }
 0xf72   :  { %23131 = vmatmul.mubr.msk.bf16.gmra.mrb[220].mxu0 %vm9629_vm5, %v25282_v16 }
 0xf73   :  { %23134 = vmatprep.mubr.msk.bf16.mxu0 %vm9629_vm5, %v25283_v21 }
 0xf7a   :  { %23135 = vmatmul.mubr.msk.bf16.gmra.mrb[224].mxu0 %vm9629_vm5, %v29011_v2 }
 0xf7b   :  { %23138 = vmatprep.mubr.msk.bf16.mxu0 %vm9629_vm5, %v29014_v15 }
 0xf82   :  { %23139 = vmatmul.mubr.msk.bf16.gmra.mrb[228].mxu0 %vm9629_vm5, %v29022_v58 }
 0xf83   :  { %23142 = vmatprep.mubr.msk.bf16.mxu0 %vm9629_vm5, %v29025_v11  ;;  %v24998_v11 = vld [vmem:[%s30057_s7 + $0x38] sm:$0xff]  }
 0xf84   :  { %20800 = vmatpush3.bf16.msra.mxu0 %v24998_v11 }
 0xf85   :  { %20807 = vmatprep.subr.bf16.mxu0 %v25004_v14 }
 0xf8a   :  { %23143 = vmatmul.mubr.msk.bf16.gmra.mrb[232].mxu0 %vm9629_vm5, %v29032_v62 }
 0xf8b   :  { %23146 = vmatprep.mubr.msk.bf16.mxu0 %vm9629_vm5, %v29035_v47 }
 0xf92   :  { %23147 = vmatmul.mubr.msk.bf16.gmra.mrb[236].mxu0 %vm9629_vm5, %v14728_v4 }
 0xfbd   :  { %v23064_v5 = vpop.f32.mrb[152].mxu0 }
 0xfbe   :  { %v15407_v2 = vadd.f32 %v23064_v5, %v29261_v60  ;;  %v14783_v15 = vpop.f32.mrb[153].mxu0 }
 0xfbf   :  { %v15405_v8 = vadd.f32 %v29261_v60, %v14783_v15  ;;  %v23065_v9 = vpop.f32.mrb[154].mxu0 }
 0xfc0   :  { %v15408_v59 = vadd.f32 %v23065_v9, %v29261_v60  ;;  %v14786_v58 = vpop.f32.mrb[155].mxu0  ;;  %v15495_v24 = vmax.f32 %v15407_v2, 0.0 }
 0xfc1   :  { %v15406_v43 = vadd.f32 %v29261_v60, %v14786_v58  ;;  %v15493_v30 = vmax.f32 %v15405_v8, 0.0 }
 0xfc2   :  { %v15496_v57 = vmax.f32 %v15408_v59, 0.0 }
 0xfc3   :  { %v15494_v62 = vmax.f32 %v15406_v43, 0.0 }
 0xfc4   :  { %v15582_v47 = vpack.c.bf16 %v15496_v57, %v15495_v24 }
 0xfc5   :  { %v15581_v19 = vpack.c.bf16 %v15494_v62, %v15493_v30  ;;  %v23068_v46 = vpop.f32.mrb[156].mxu0 }
 0xfc6   :  { %15627 = vst.msk [vmem:[#allocation4 + $0x8] sm:$0xff] %vm15625_vm6, %v15582_v47  ;;  %v15411_v28 = vadd.f32 %v23068_v46, %v29261_v60  ;;  %v14799_v34 = vpop.f32.mrb[157].mxu0 }
 0xfc7   :  { %15626 = vst.msk [vmem:[#allocation4] sm:$0xff] %vm15625_vm6, %v15581_v19  ;;  %v15409_v49 = vadd.f32 %v29261_v60, %v14799_v34  ;;  %v23069_v10 = vpop.f32.mrb[158].mxu0 }
 0xfc8   :  { %v15412_v26 = vadd.f32 %v23069_v10, %v29261_v60  ;;  %v14802_v41 = vpop.f32.mrb[159].mxu0  ;;  %v15499_v17 = vmax.f32 %v15411_v28, 0.0 }
 0xfc9   :  { %v15410_v29 = vadd.f32 %v29261_v60, %v14802_v41  ;;  %v15497_v39 = vmax.f32 %v15409_v49, 0.0 }
 0xfca   :  { %v15500_v48 = vmax.f32 %v15412_v26, 0.0 }
 0xfcb   :  { %v15498_v12 = vmax.f32 %v15410_v29, 0.0 }
 0xfcc   :  { %v15584_v1 = vpack.c.bf16 %v15500_v48, %v15499_v17 }
 0xfcd   :  { %v15583_v32 = vpack.c.bf16 %v15498_v12, %v15497_v39  ;;  %v23072_v53 = vpop.f32.mrb[160].mxu0  ;;  %v15682_v51 = vld [vmem:[#allocation4 + $0x8] sm:$0xf]  ;;  %v24974_v7 = vld [vmem:[#allocation4 + $0xc] ss:$0 sps:$4 sm:$0xff]  }
 0xfce   :  { %15629 = vst.msk [vmem:[#allocation4 + $0x18] sm:$0xff] %vm15625_vm6, %v15584_v1  ;;  %v14815_v25 = vpop.f32.mrb[161].mxu0  ;;  %v24973_v54 = vld [vmem:[#allocation4 + $0x4] ss:$0 sps:$4 sm:$0xff]   ;;  %v15670_v22 = vld [vmem:[#allocation4] sm:$0xf] }
 0xfcf   :  { %15628 = vst.msk [vmem:[#allocation4 + $0x10] sm:$0xff] %vm15625_vm6, %v15583_v32  ;;  %v23073_v31 = vpop.f32.mrb[162].mxu0  ;;  %15677 = vrot.lane.b32.xlu0 %v24973_v54, %s25286_s0  ;;  %v25023_v54 = vld [vmem:[%s30057_s7 + $0x4c0] sm:$0xff]  }
 0xfd0   :  { %v14818_v33 = vpop.f32.mrb[163].mxu0  ;;  %15672 = vst.msk [vmem:[#allocation5] sm:$0xf] %vm15671_vm7, %v15670_v22  ;;  %15683 = vst.msk [vmem:[#allocation5 + $0x4] sm:$0xf] %vm15671_vm7, %v15682_v51  ;;  %v25025_v31 = vld [vmem:[%s30057_s7 + $0x480] sm:$0xff]   ;;  %20983 = vmatprep.subr.bf16.mxu1 %v25023_v54 }
 0xfd1   :  { %20984 = vmatpush3.bf16.msra.mxu1 %v25025_v31 }
 0xfd3   :  { %15688 = vrot.lane.b32.xlu0 %v24974_v7, %s25286_s0 }
 0xfd5   :  { %v23076_v27 = vpop.f32.mrb[164].mxu0  ;;  %v15702_v42 = vld [vmem:[#allocation4 + $0x18] sm:$0xf] }
 0xfd6   :  { %v15419_v23 = vadd.f32 %v23076_v27, %v29261_v60  ;;  %v14831_v6 = vpop.f32.mrb[165].mxu0  ;;  %v24975_v44 = vld [vmem:[#allocation4 + $0x14] ss:$0 sps:$4 sm:$0xff]   ;;  %15703 = vst.msk [vmem:[#allocation5 + $0xc] sm:$0xf] %vm15671_vm7, %v15702_v42 }
 0xfd7   :  { %v15417_v13 = vadd.f32 %v29261_v60, %v14831_v6  ;;  %v23077_v61 = vpop.f32.mrb[166].mxu0  ;;  %v15692_v40 = vld [vmem:[#allocation4 + $0x10] sm:$0xf]  ;;  %15698 = vrot.lane.b32.xlu1 %v24975_v44, %s25286_s0 }
 0xfd8   :  { %v15420_v18 = vadd.f32 %v23077_v61, %v29261_v60  ;;  %v14834_v36 = vpop.f32.mrb[167].mxu0  ;;  %15693 = vst.msk [vmem:[#allocation5 + $0x8] sm:$0xf] %vm15671_vm7, %v15692_v40  ;;  %v15507_v38 = vmax.f32 %v15419_v23, 0.0 }
 0xfd9   :  { %v15418_v52 = vadd.f32 %v29261_v60, %v14834_v36  ;;  %v15505_v35 = vmax.f32 %v15417_v13, 0.0 }
 0xfda   :  { %v15508_v0 = vmax.f32 %v15420_v18, 0.0 }
 0xfdb   :  { %v15506_v50 = vmax.f32 %v15418_v52, 0.0 }
 0xfdc   :  { %v15588_v16 = vpack.c.bf16 %v15508_v0, %v15507_v38 }
 0xfdd   :  { %v15587_v21 = vpack.c.bf16 %v15506_v50, %v15505_v35  ;;  %v23080_v45 = vpop.f32.mrb[168].mxu0 }
 0xfde   :  { %15633 = vst.msk [vmem:[#allocation4 + $0x38] sm:$0xff] %vm15625_vm6, %v15588_v16  ;;  %v15423_v55 = vadd.f32 %v23080_v45, %v29261_v60  ;;  %v14847_v4 = vpop.f32.mrb[169].mxu0 }
 0xfdf   :  { %15632 = vst.msk [vmem:[#allocation4 + $0x30] sm:$0xff] %vm15625_vm6, %v15587_v21  ;;  %v15421_v56 = vadd.f32 %v29261_v60, %v14847_v4  ;;  %v23081_v3 = vpop.f32.mrb[170].mxu0 }
 0xfe0   :  { %v15424_v37 = vadd.f32 %v23081_v3, %v29261_v60  ;;  %v14850_v20 = vpop.f32.mrb[171].mxu0  ;;  %v15511_v2 = vmax.f32 %v15423_v55, 0.0 }
 0xfe1   :  { %v15422_v5 = vadd.f32 %v29261_v60, %v14850_v20  ;;  %v15509_v8 = vmax.f32 %v15421_v56, 0.0 }
 0xfe2   :  { %v15512_v15 = vmax.f32 %v15424_v37, 0.0 }
 0xfe3   :  { %v15510_v9 = vmax.f32 %v15422_v5, 0.0 }
 0xfe4   :  { %v15590_v63 = vpack.c.bf16 %v15512_v15, %v15511_v2 }
 0xfe5   :  { %v15589_v59 = vpack.c.bf16 %v15510_v9, %v15509_v8  ;;  %v23084_v58 = vpop.f32.mrb[172].mxu0  ;;  %v24978_v11 = vld [vmem:[#allocation4 + $0x3c] ss:$0 sps:$4 sm:$0xff]   ;;  %v15712_v30 = vld [vmem:[#allocation4 + $0x38] sm:$0xf]  ;;  %v25045_v8 = vld [vmem:[%s30057_s7 + $0x4c8] sm:$0xff]  }
 0xfe6   :  { %15635 = vst.msk [vmem:[#allocation4 + $0x48] sm:$0xff] %vm15625_vm6, %v15590_v63  ;;  %v14863_v43 = vpop.f32.mrb[173].mxu0  ;;  %v24979_v24 = vld [vmem:[#allocation4 + $0x34] ss:$0 sps:$4 sm:$0xff]   ;;  %15718 = vrot.lane.b32.xlu0 %v24978_v11, %s25286_s0  ;;  %v25046_v9 = vld [vmem:[%s30057_s7 + $0x488] sm:$0xff]   ;;  %20985 = vmatprep.subr.bf16.mxu1 %v25045_v8 }
 0xfe7   :  { %15634 = vst.msk [vmem:[#allocation4 + $0x40] sm:$0xff] %vm15625_vm6, %v15589_v59  ;;  %v23085_v57 = vpop.f32.mrb[174].mxu0  ;;  %15708 = vrot.lane.b32.xlu1 %v24979_v24, %s25286_s0  ;;  %20986 = vmatpush3.bf16.msra.mxu1 %v25046_v9 }
 0xfe8   :  { %v14866_v62 = vpop.f32.mrb[175].mxu0  ;;  %15713 = vst.msk [vmem:[#allocation5 + $0x10] sm:$0xf] %vm15671_vm7, %v15712_v30 }
 0xfed   :  { %v23088_v47 = vpop.f32.mrb[176].mxu0  ;;  %v24980_v19 = vld [vmem:[#allocation4 + $0x4c] ss:$0 sps:$4 sm:$0xff]   ;;  %v15732_v10 = vld [vmem:[#allocation4 + $0x48] sm:$0xf] }
 0xfee   :  { %v15431_v46 = vadd.f32 %v23088_v47, %v29261_v60  ;;  %v14879_v28 = vpop.f32.mrb[177].mxu0  ;;  %v24981_v34 = vld [vmem:[#allocation4 + $0x44] ss:$0 sps:$4 sm:$0xff]   ;;  %15738 = vrot.lane.b32.xlu0 %v24980_v19, %s25286_s0  ;;  %v15722_v26 = vld [vmem:[#allocation4 + $0x40] sm:$0xf] }
 0xfef   :  { %v23089_v49 = vpop.f32.mrb[178].mxu0  ;;  %15728 = vrot.lane.b32.xlu1 %v24981_v34, %s25286_s0  ;;  %15733 = vst.msk [vmem:[#allocation5 + $0x18] sm:$0xf] %vm15671_vm7, %v15732_v10  ;;  %15723 = vst.msk [vmem:[#allocation5 + $0x14] sm:$0xf] %vm15671_vm7, %v15722_v26 }
 0xff0   :  { %v15432_v41 = vadd.f32 %v23089_v49, %v29261_v60  ;;  %v14882_v29 = vpop.f32.mrb[179].mxu0  ;;  %v15519_v17 = vmax.f32 %v15431_v46, 0.0 }
 0xff2   :  { %v15520_v48 = vmax.f32 %v15432_v41, 0.0 }
 0xff4   :  { %v15594_v39 = vpack.c.bf16 %v15520_v48, %v15519_v17 }
 0xff5   :  { %v23092_v12 = vpop.f32.mrb[180].mxu0 }
 0xff6   :  { %15639 = vst.msk [vmem:[#allocation4 + $0x68] sm:$0xff] %vm15625_vm6, %v15594_v39  ;;  %v15435_v1 = vadd.f32 %v23092_v12, %v29261_v60  ;;  %v14895_v32 = vpop.f32.mrb[181].mxu0 }
 0xff7   :  { %v15433_v53 = vadd.f32 %v29261_v60, %v14895_v32  ;;  %v23093_v25 = vpop.f32.mrb[182].mxu0 }
 0xff8   :  { %v15436_v22 = vadd.f32 %v23093_v25, %v29261_v60  ;;  %v14898_v51 = vpop.f32.mrb[183].mxu0  ;;  %v15523_v7 = vmax.f32 %v15435_v1, 0.0 }
 0xff9   :  { %v15434_v33 = vadd.f32 %v29261_v60, %v14898_v51  ;;  %v15521_v27 = vmax.f32 %v15433_v53, 0.0 }
 0xffa   :  { %v15524_v14 = vmax.f32 %v15436_v22, 0.0 }
 0xffb   :  { %v15522_v42 = vmax.f32 %v15434_v33, 0.0 }
 0xffc   :  { %v15596_v23 = vpack.c.bf16 %v15524_v14, %v15523_v7 }
 0xffd   :  { %v15595_v6 = vpack.c.bf16 %v15522_v42, %v15521_v27  ;;  %v23096_v44 = vpop.f32.mrb[184].mxu0  ;;  %v24984_v13 = vld [vmem:[#allocation4 + $0x6c] ss:$0 sps:$4 sm:$0xff]   ;;  %v15742_v40 = vld [vmem:[#allocation4 + $0x68] sm:$0xf] }
 0xffe   :  { %15641 = vst.msk [vmem:[#allocation4 + $0x78] sm:$0xff] %vm15625_vm6, %v15596_v23  ;;  %v14911_v61 = vpop.f32.mrb[185].mxu0  ;;  %15748 = vrot.lane.b32.xlu1 %v24984_v13, %s25286_s0 }
 0xfff   :  { %15640 = vst.msk [vmem:[#allocation4 + $0x70] sm:$0xff] %vm15625_vm6, %v15595_v6  ;;  %v15437_v18 = vadd.f32 %v29261_v60, %v14911_v61  ;;  %v23097_v36 = vpop.f32.mrb[186].mxu0 }
0x1000   :  { %15743 = vst.msk [vmem:[#allocation5 + $0x1c] sm:$0xf] %vm15671_vm7, %v15742_v40  ;;  %v14914_v52 = vpop.f32.mrb[187].mxu0  ;;  %v25063_v40 = vld [vmem:[%s30057_s7 + $0x4d0] sm:$0xff]  }
0x1001   :  { %v15438_v38 = vadd.f32 %v29261_v60, %v14914_v52  ;;  %v15525_v0 = vmax.f32 %v15437_v18, 0.0  ;;  %v25065_v52 = vld [vmem:[%s30057_s7 + $0x490] sm:$0xff]   ;;  %20987 = vmatprep.subr.bf16.mxu1 %v25063_v40  ;;  %v25088_v40 = vld [vmem:[%s30057_s7 + $0x4e8] sm:$0xff]  }
0x1002   :  { %20988 = vmatpush3.bf16.msra.mxu1 %v25065_v52 }
0x1003   :  { %v15526_v35 = vmax.f32 %v15438_v38, 0.0 }
0x1005   :  { %v15597_v50 = vpack.c.bf16 %v15526_v35, %v15525_v0  ;;  %v23100_v16 = vpop.f32.mrb[188].mxu0  ;;  %v24985_v21 = vld [vmem:[#allocation4 + $0x7c] ss:$0 sps:$4 sm:$0xff]   ;;  %v15762_v3 = vld [vmem:[#allocation4 + $0x78] sm:$0xf] }
0x1006   :  { %v15443_v45 = vadd.f32 %v23100_v16, %v29261_v60  ;;  %v14927_v55 = vpop.f32.mrb[189].mxu0  ;;  %v24986_v4 = vld [vmem:[#allocation4 + $0x74] ss:$0 sps:$4 sm:$0xff]   ;;  %15768 = vrot.lane.b32.xlu1 %v24985_v21, %s25286_s0  ;;  %v15752_v37 = vld [vmem:[#allocation4 + $0x70] sm:$0xf] }
0x1007   :  { %15642 = vst.msk [vmem:[#allocation4 + $0x80] sm:$0xff] %vm15625_vm6, %v15597_v50  ;;  %v23101_v56 = vpop.f32.mrb[190].mxu0  ;;  %15758 = vrot.lane.b32.xlu0 %v24986_v4, %s25286_s0 }
0x1008   :  { %v15444_v20 = vadd.f32 %v23101_v56, %v29261_v60  ;;  %v14930_v5 = vpop.f32.mrb[191].mxu0  ;;  %15763 = vst.msk [vmem:[#allocation5 + $0x24] sm:$0xf] %vm15671_vm7, %v15762_v3  ;;  %15753 = vst.msk [vmem:[#allocation5 + $0x20] sm:$0xf] %vm15671_vm7, %v15752_v37  ;;  %v15531_v2 = vmax.f32 %v15443_v45, 0.0 }
0x100a   :  { %v15532_v15 = vmax.f32 %v15444_v20, 0.0 }
0x100c   :  { %v15600_v63 = vpack.c.bf16 %v15532_v15, %v15531_v2 }
0x100d   :  { %v23104_v59 = vpop.f32.mrb[192].mxu0 }
0x100e   :  { %15645 = vst.msk [vmem:[#allocation4 + $0x98] sm:$0xff] %vm15625_vm6, %v15600_v63  ;;  %v15447_v58 = vadd.f32 %v23104_v59, %v29261_v60  ;;  %v14943_v11 = vpop.f32.mrb[193].mxu0  ;;  %v15772_v43 = vld [vmem:[#allocation4 + $0x80] sm:$0xf] }
0x100f   :  { %v15445_v24 = vadd.f32 %v29261_v60, %v14943_v11  ;;  %v23105_v57 = vpop.f32.mrb[194].mxu0  ;;  %15773 = vst.msk [vmem:[#allocation5 + $0x28] sm:$0xf] %vm15671_vm7, %v15772_v43 }
0x1010   :  { %v15448_v30 = vadd.f32 %v23105_v57, %v29261_v60  ;;  %v14946_v62 = vpop.f32.mrb[195].mxu0  ;;  %v15535_v19 = vmax.f32 %v15447_v58, 0.0 }
0x1011   :  { %v15446_v47 = vadd.f32 %v29261_v60, %v14946_v62  ;;  %v15533_v28 = vmax.f32 %v15445_v24, 0.0 }
0x1012   :  { %v15536_v46 = vmax.f32 %v15448_v30, 0.0 }
0x1013   :  { %v15534_v34 = vmax.f32 %v15446_v47, 0.0 }
0x1014   :  { %v15602_v49 = vpack.c.bf16 %v15536_v46, %v15535_v19 }
0x1015   :  { %v15601_v10 = vpack.c.bf16 %v15534_v34, %v15533_v28  ;;  %v23108_v26 = vpop.f32.mrb[196].mxu0  ;;  %v24989_v41 = vld [vmem:[#allocation4 + $0x9c] ss:$0 sps:$4 sm:$0xff]  }
0x1016   :  { %15647 = vst.msk [vmem:[#allocation4 + $0xa8] sm:$0xff] %vm15625_vm6, %v15602_v49  ;;  %v14959_v29 = vpop.f32.mrb[197].mxu0  ;;  %15778 = vrot.lane.b32.xlu0 %v24989_v41, %s25286_s0 }
0x1017   :  { %15646 = vst.msk [vmem:[#allocation4 + $0xa0] sm:$0xff] %vm15625_vm6, %v15601_v10  ;;  %v15449_v17 = vadd.f32 %v29261_v60, %v14959_v29  ;;  %v23109_v48 = vpop.f32.mrb[198].mxu0 }
0x1018   :  { %v14962_v39 = vpop.f32.mrb[199].mxu0 }
0x1019   :  { %v15450_v12 = vadd.f32 %v29261_v60, %v14962_v39  ;;  %v15537_v1 = vmax.f32 %v15449_v17, 0.0  ;;  %v25080_v39 = vld [vmem:[%s30057_s7 + $0x4d8] sm:$0xff]  }
0x101a   :  { %20989 = vmatprep.subr.bf16.mxu1 %v25080_v39 }
0x101b   :  { %v15538_v32 = vmax.f32 %v15450_v12, 0.0 }
0x101d   :  { %v15603_v53 = vpack.c.bf16 %v15538_v32, %v15537_v1  ;;  %v23112_v25 = vpop.f32.mrb[200].mxu0  ;;  %v24990_v54 = vld [vmem:[#allocation4 + $0xac] ss:$0 sps:$4 sm:$0xff]   ;;  %v15792_v33 = vld [vmem:[#allocation4 + $0xa8] sm:$0xf] }
0x101e   :  { %v14975_v31 = vpop.f32.mrb[201].mxu0  ;;  %v24991_v22 = vld [vmem:[#allocation4 + $0xa4] ss:$0 sps:$4 sm:$0xff]   ;;  %15798 = vrot.lane.b32.xlu0 %v24990_v54, %s25286_s0  ;;  %v15782_v7 = vld [vmem:[#allocation4 + $0xa0] sm:$0xf] }
0x101f   :  { %15648 = vst.msk [vmem:[#allocation4 + $0xb0] sm:$0xff] %vm15625_vm6, %v15603_v53  ;;  %v23113_v51 = vpop.f32.mrb[202].mxu0  ;;  %15788 = vrot.lane.b32.xlu1 %v24991_v22, %s25286_s0  ;;  %v25082_v31 = vld [vmem:[%s30057_s7 + $0x498] sm:$0xff]  }
0x1020   :  { %v14978_v14 = vpop.f32.mrb[203].mxu0  ;;  %15793 = vst.msk [vmem:[#allocation5 + $0x30] sm:$0xf] %vm15671_vm7, %v15792_v33  ;;  %15783 = vst.msk [vmem:[#allocation5 + $0x2c] sm:$0xf] %vm15671_vm7, %v15782_v7  ;;  %v25084_v51 = vld [vmem:[%s30057_s7 + $0x4e0] sm:$0xff]   ;;  %20990 = vmatpush3.bf16.msra.mxu1 %v25082_v31 }
0x1021   :  { %20991 = vmatprep.subr.bf16.mxu1 %v25084_v51 }
0x1025   :  { %v23116_v27 = vpop.f32.mrb[204].mxu0 }
0x1026   :  { %v15459_v42 = vadd.f32 %v23116_v27, %v29261_v60  ;;  %v14991_v23 = vpop.f32.mrb[205].mxu0  ;;  %v24994_v6 = vld [vmem:[#allocation4 + $0xb4] ss:$0 sps:$4 sm:$0xff]   ;;  %v15802_v61 = vld [vmem:[#allocation4 + $0xb0] sm:$0xf] }
0x1027   :  { %v15457_v44 = vadd.f32 %v29261_v60, %v14991_v23  ;;  %v23117_v13 = vpop.f32.mrb[206].mxu0  ;;  %15808 = vrot.lane.b32.xlu1 %v24994_v6, %s25286_s0  ;;  %15803 = vst.msk [vmem:[#allocation5 + $0x34] sm:$0xf] %vm15671_vm7, %v15802_v61 }
0x1028   :  { %v15460_v18 = vadd.f32 %v23117_v13, %v29261_v60  ;;  %v14994_v36 = vpop.f32.mrb[207].mxu0  ;;  %v15547_v0 = vmax.f32 %v15459_v42, 0.0 }
0x1029   :  { %v15458_v38 = vadd.f32 %v29261_v60, %v14994_v36  ;;  %v15545_v50 = vmax.f32 %v15457_v44, 0.0  ;;  %v25086_v44 = vld [vmem:[%s30057_s7 + $0x4a0] sm:$0xff]  }
0x102a   :  { %v15548_v35 = vmax.f32 %v15460_v18, 0.0  ;;  %20992 = vmatpush3.bf16.msra.mxu1 %v25086_v44 }
0x102b   :  { %v15546_v16 = vmax.f32 %v15458_v38, 0.0  ;;  %20993 = vmatprep.subr.bf16.mxu1 %v25088_v40 }
0x102c   :  { %v15608_v21 = vpack.c.bf16 %v15548_v35, %v15547_v0 }
0x102d   :  { %v15607_v45 = vpack.c.bf16 %v15546_v16, %v15545_v50  ;;  %v23120_v55 = vpop.f32.mrb[208].mxu0  ;;  %v25090_v50 = vld [vmem:[%s30057_s7 + $0x4a8] sm:$0xff]  }
0x102e   :  { %15653 = vst.msk [vmem:[#allocation4 + $0xd8] sm:$0xff] %vm15625_vm6, %v15608_v21  ;;  %v15463_v4 = vadd.f32 %v23120_v55, %v29261_v60  ;;  %v15007_v56 = vpop.f32.mrb[209].mxu0  ;;  %v25092_v21 = vld [vmem:[%s30057_s7 + $0x4f0] sm:$0xff]   ;;  %20994 = vmatpush3.bf16.msra.mxu1 %v25090_v50 }
0x102f   :  { %15652 = vst.msk [vmem:[#allocation4 + $0xd0] sm:$0xff] %vm15625_vm6, %v15607_v45  ;;  %v15461_v3 = vadd.f32 %v29261_v60, %v15007_v56  ;;  %v23121_v37 = vpop.f32.mrb[210].mxu0  ;;  %20995 = vmatprep.subr.bf16.mxu1 %v25092_v21 }
0x1030   :  { %v15464_v20 = vadd.f32 %v23121_v37, %v29261_v60  ;;  %v15010_v5 = vpop.f32.mrb[211].mxu0  ;;  %v15551_v15 = vmax.f32 %v15463_v4, 0.0 }
0x1031   :  { %v15462_v2 = vadd.f32 %v29261_v60, %v15010_v5  ;;  %v15549_v9 = vmax.f32 %v15461_v3, 0.0 }
0x1032   :  { %v15552_v8 = vmax.f32 %v15464_v20, 0.0 }
0x1033   :  { %v15550_v63 = vmax.f32 %v15462_v2, 0.0 }
0x1034   :  { %v15610_v59 = vpack.c.bf16 %v15552_v8, %v15551_v15  ;;  %v25005_v15 = vld [vmem:[%s30057_s7 + $0x80] sm:$0xff]  }
0x1035   :  { %v15609_v58 = vpack.c.bf16 %v15550_v63, %v15549_v9  ;;  %v23124_v11 = vpop.f32.mrb[212].mxu0  ;;  %v24995_v43 = vld [vmem:[#allocation4 + $0xdc] ss:$0 sps:$4 sm:$0xff]   ;;  %v15822_v62 = vld [vmem:[#allocation4 + $0xd8] sm:$0xf]  ;;  %v25094_v9 = vld [vmem:[%s30057_s7 + $0x4b0] sm:$0xff]  }
0x1036   :  { %15655 = vst.msk [vmem:[#allocation4 + $0xe8] sm:$0xff] %vm15625_vm6, %v15610_v59  ;;  %v15023_v24 = vpop.f32.mrb[213].mxu0  ;;  %v24996_v57 = vld [vmem:[#allocation4 + $0xd4] ss:$0 sps:$4 sm:$0xff]   ;;  %15828 = vrot.lane.b32.xlu1 %v24995_v43, %s25286_s0  ;;  %v15812_v47 = vld [vmem:[#allocation4 + $0xd0] sm:$0xf]  ;;  %20996 = vmatpush3.bf16.msra.mxu1 %v25094_v9 }
0x1037   :  { %15654 = vst.msk [vmem:[#allocation4 + $0xe0] sm:$0xff] %vm15625_vm6, %v15609_v58  ;;  %v23125_v30 = vpop.f32.mrb[214].mxu0  ;;  %15818 = vrot.lane.b32.xlu0 %v24996_v57, %s25286_s0  ;;  %v25006_v59 = vld [vmem:[%s30057_s7 + $0xc8] sm:$0xff]   ;;  %v25096_v58 = vld [vmem:[%s30057_s7 + $0x4f8] sm:$0xff]   ;;  %v25010_v24 = vld [vmem:[%s30057_s7 + $0xd0] sm:$0xff]  }
0x1038   :  { %v15026_v19 = vpop.f32.mrb[215].mxu0  ;;  %15823 = vst.msk [vmem:[#allocation5 + $0x3c] sm:$0xf] %vm15671_vm7, %v15822_v62  ;;  %15813 = vst.msk [vmem:[#allocation5 + $0x38] sm:$0xf] %vm15671_vm7, %v15812_v47  ;;  %v25007_v11 = vld [vmem:[%s30057_s7 + $0x88] sm:$0xff]   ;;  %20997 = vmatprep.subr.bf16.mxu1 %v25096_v58 }
0x1039   :  { %v25100_v43 = vld [vmem:[%s30057_s7 + $0x4b8] sm:$0xff]   ;;  %v25104_v62 = vld [vmem:[%s30057_s7 + $0x5c0] sm:$0xff]  }
0x103a   :  { %20998 = vmatpush3.bf16.msra.mxu1 %v25100_v43 }
0x103b   :  { %21027 = vmatprep.subr.bf16.mxu1 %v25104_v62 }
0x103d   :  { %v23128_v46 = vpop.f32.mrb[216].mxu0  ;;  %v15842_v28 = vld [vmem:[#allocation4 + $0xe8] sm:$0xf] }
0x103e   :  { %v15471_v34 = vadd.f32 %v23128_v46, %v29261_v60  ;;  %v15039_v49 = vpop.f32.mrb[217].mxu0  ;;  %v24999_v10 = vld [vmem:[#allocation4 + $0xe4] ss:$0 sps:$4 sm:$0xff]   ;;  %15843 = vst.msk [vmem:[#allocation5 + $0x44] sm:$0xf] %vm15671_vm7, %v15842_v28 }
0x103f   :  { %v15469_v26 = vadd.f32 %v29261_v60, %v15039_v49  ;;  %v23129_v41 = vpop.f32.mrb[218].mxu0  ;;  %v15832_v29 = vld [vmem:[#allocation4 + $0xe0] sm:$0xf]  ;;  %15838 = vrot.lane.b32.xlu0 %v24999_v10, %s25286_s0 }
0x1040   :  { %v15472_v17 = vadd.f32 %v23129_v41, %v29261_v60  ;;  %v15042_v48 = vpop.f32.mrb[219].mxu0  ;;  %15833 = vst.msk [vmem:[#allocation5 + $0x40] sm:$0xf] %vm15671_vm7, %v15832_v29  ;;  %v15559_v1 = vmax.f32 %v15471_v34, 0.0  ;;  %v25011_v34 = vld [vmem:[%s30057_s7 + $0x90] sm:$0xff]   ;;  %v25012_v29 = vld [vmem:[%s30057_s7 + $0xd8] sm:$0xff]  }
0x1041   :  { %v15470_v12 = vadd.f32 %v29261_v60, %v15042_v48  ;;  %v15678_v53 = vpop.permute.xlu0 %15677  ;;  %v15557_v25 = vmax.f32 %v15469_v26, 0.0 }
0x1042   :  { %v15560_v32 = vmax.f32 %v15472_v17, 0.0  ;;  %15681 = vst.msk [vmem:[#allocation5] sm:$0xf] %vm15680_vm8, %v15678_v53  ;;  %v25014_v53 = vld [vmem:[%s30057_s7 + $0xe0] sm:$0xff]  }
0x1043   :  { %v15558_v54 = vmax.f32 %v15470_v12, 0.0 }
0x1044   :  { %v15614_v22 = vpack.c.bf16 %v15560_v32, %v15559_v1  ;;  %v25013_v1 = vld [vmem:[%s30057_s7 + $0x98] sm:$0xff]  }
0x1045   :  { %v15613_v33 = vpack.c.bf16 %v15558_v54, %v15557_v25  ;;  %v23132_v7 = vpop.f32.mrb[220].mxu0  ;;  %v15689_v42 = vpop.permute.xlu0 %15688 }
0x1046   :  { %15659 = vst.msk [vmem:[#allocation4 + $0x108] sm:$0xff] %vm15625_vm6, %v15614_v22  ;;  %v15475_v14 = vadd.f32 %v23132_v7, %v29261_v60  ;;  %v15055_v27 = vpop.f32.mrb[221].mxu0 }
0x1047   :  { %15658 = vst.msk [vmem:[#allocation4 + $0x100] sm:$0xff] %vm15625_vm6, %v15613_v33  ;;  %v15473_v23 = vadd.f32 %v29261_v60, %v15055_v27  ;;  %v23133_v6 = vpop.f32.mrb[222].mxu0  ;;  %v25015_v33 = vld [vmem:[%s30057_s7 + $0xa0] sm:$0xff]   ;;  %v25016_v27 = vld [vmem:[%s30057_s7 + $0xe8] sm:$0xff]  }
0x1048   :  { %15691 = vst.msk [vmem:[#allocation5 + $0x4] sm:$0xf] %vm15680_vm8, %v15689_v42  ;;  %v15476_v13 = vadd.f32 %v23133_v6, %v29261_v60  ;;  %v15058_v61 = vpop.f32.mrb[223].mxu0  ;;  %v15563_v36 = vmax.f32 %v15475_v14, 0.0 }
0x1049   :  { %v15474_v18 = vadd.f32 %v29261_v60, %v15058_v61  ;;  %v15699_v38 = vpop.permute.xlu1 %15698  ;;  %v15561_v0 = vmax.f32 %v15473_v23, 0.0 }
0x104a   :  { %v15564_v52 = vmax.f32 %v15476_v13, 0.0  ;;  %15701 = vst.msk [vmem:[#allocation5 + $0x8] sm:$0xf] %vm15680_vm8, %v15699_v38 }
0x104b   :  { %v15562_v35 = vmax.f32 %v15474_v18, 0.0 }
0x104c   :  { %v15616_v16 = vpack.c.bf16 %v15564_v52, %v15563_v36  ;;  %v25019_v52 = vld [vmem:[%s30057_s7 + $0xa8] sm:$0xff]  }
0x104d   :  { %v15615_v45 = vpack.c.bf16 %v15562_v35, %v15561_v0  ;;  %v23136_v55 = vpop.f32.mrb[224].mxu0  ;;  %v25000_v4 = vld [vmem:[#allocation4 + $0x10c] ss:$0 sps:$4 sm:$0xff]   ;;  %v15852_v8 = vld [vmem:[#allocation4 + $0x108] sm:$0xf] }
0x104e   :  { %15661 = vst.msk [vmem:[#allocation4 + $0x118] sm:$0xff] %vm15625_vm6, %v15616_v16  ;;  %v15071_v56 = vpop.f32.mrb[225].mxu0  ;;  %v25001_v3 = vld [vmem:[#allocation4 + $0x104] ss:$0 sps:$4 sm:$0xff]   ;;  %15858 = vrot.lane.b32.xlu0 %v25000_v4, %s25286_s0  ;;  %v25284_v16 = vld [vmem:[%s30058_s6] ss:$0 sm:$0xff] }
0x104f   :  { %v15914_v37 = vld [vmem:[#allocation5] sm:$0xff]  ;;  %15660 = vst.msk [vmem:[#allocation4 + $0x110] sm:$0xff] %vm15625_vm6, %v15615_v45  ;;  %v23137_v20 = vpop.f32.mrb[226].mxu0  ;;  %15848 = vrot.lane.b32.xlu1 %v25001_v3, %s25286_s0  ;;  %v25022_v56 = vld [vmem:[%s30057_s7 + $0xb0] sm:$0xff]  }
0x1050   :  { %v19507_v5 = vcombine.low %v15914_v37, %v15914_v37  ;;  %v19508_v2 = vcombine.high %v15914_v37, %v15914_v37  ;;  %v15074_v63 = vpop.f32.mrb[227].mxu0  ;;  %15853 = vst.msk [vmem:[#allocation5 + $0x48] sm:$0xf] %vm15671_vm7, %v15852_v8  ;;  %v25024_v37 = vld [vmem:[%s30057_s7 + $0xf8] sm:$0xff]   ;;  %v25029_v8 = vld [vmem:[%s30057_s7 + $0x140] sm:$0xff]  }
0x1052   :  { %17624 = vmatprep.mubr.bf16.mxu0 %v19508_v2 }
0x1053   :  { %17625 = vmatmul.mubr.bf16.vlgmr.msra.gmra.mrb[240].mxu0 %v19507_v5 }
0x1054   :  { %20808 = vmatpush3.bf16.msra.mxu0 %v25005_v15  ;;  %v25026_v15 = vld [vmem:[%s30057_s7 + $0xb8] sm:$0xff]  }
0x1055   :  { %20809 = vmatprep.subr.bf16.mxu0 %v25006_v59  ;;  %v23140_v57 = vpop.f32.mrb[228].mxu0  ;;  %v25008_v30 = vld [vmem:[#allocation4 + $0x11c] ss:$0 sps:$4 sm:$0xff]   ;;  %v15872_v49 = vld [vmem:[#allocation4 + $0x118] sm:$0xf] }
0x1056   :  { %v15483_v47 = vadd.f32 %v23140_v57, %v29261_v60  ;;  %v15087_v19 = vpop.f32.mrb[229].mxu0  ;;  %v25009_v46 = vld [vmem:[#allocation4 + $0x114] ss:$0 sps:$4 sm:$0xff]   ;;  %15878 = vrot.lane.b32.xlu0 %v25008_v30, %s25286_s0  ;;  %v15862_v10 = vld [vmem:[#allocation4 + $0x110] sm:$0xf]  ;;  %v25033_v30 = vld [vmem:[%s30057_s7 + $0x148] sm:$0xff]  }
0x1057   :  { %v23141_v28 = vpop.f32.mrb[230].mxu0  ;;  %15868 = vrot.lane.b32.xlu1 %v25009_v46, %s25286_s0  ;;  %15873 = vst.msk [vmem:[#allocation5 + $0x50] sm:$0xf] %vm15671_vm7, %v15872_v49  ;;  %15863 = vst.msk [vmem:[#allocation5 + $0x4c] sm:$0xf] %vm15671_vm7, %v15862_v10  ;;  %v25034_v19 = vld [vmem:[%s30057_s7 + $0x108] sm:$0xff]  }
0x1058   :  { %20810 = vmatpush3.bf16.msra.mxu0 %v25007_v11  ;;  %v15484_v26 = vadd.f32 %v23141_v28, %v29261_v60  ;;  %v15090_v41 = vpop.f32.mrb[231].mxu0  ;;  %v15719_v17 = vpop.permute.xlu0 %15718  ;;  %v15571_v48 = vmax.f32 %v15483_v47, 0.0  ;;  %v25035_v46 = vld [vmem:[%s30057_s7 + $0x150] sm:$0xff]   ;;  %v25037_v49 = vld [vmem:[%s30057_s7 + $0x158] sm:$0xff]  }
0x1059   :  { %20811 = vmatprep.subr.bf16.mxu0 %v25010_v24  ;;  %15721 = vst.msk [vmem:[#allocation5 + $0x10] sm:$0xf] %vm15680_vm8, %v15719_v17  ;;  %v15709_v12 = vpop.permute.xlu1 %15708  ;;  %v25030_v24 = vld [vmem:[%s30057_s7 + $0x100] sm:$0xff]   ;;  %v25038_v41 = vld [vmem:[%s30057_s7 + $0x118] sm:$0xff]  }
0x105a   :  { %v15572_v39 = vmax.f32 %v15484_v26, 0.0  ;;  %15711 = vst.msk [vmem:[#allocation5 + $0xc] sm:$0xf] %vm15680_vm8, %v15709_v12  ;;  %v25040_v17 = vld [vmem:[%s30057_s7 + $0x120] sm:$0xff]   ;;  %v25043_v12 = vld [vmem:[%s30057_s7 + $0x170] sm:$0xff]  }
0x105c   :  { %20812 = vmatpush3.bf16.msra.mxu0 %v25011_v34  ;;  %v15620_v32 = vpack.c.bf16 %v15572_v39, %v15571_v48  ;;  %v25036_v34 = vld [vmem:[%s30057_s7 + $0x110] sm:$0xff]   ;;  %v25041_v48 = vld [vmem:[%s30057_s7 + $0x168] sm:$0xff]  }
0x105d   :  { %20813 = vmatprep.subr.bf16.mxu0 %v25012_v29  ;;  %v23144_v25 = vpop.f32.mrb[232].mxu0  ;;  %v25039_v29 = vld [vmem:[%s30057_s7 + $0x160] sm:$0xff]   ;;  %v25042_v39 = vld [vmem:[%s30057_s7 + $0x128] sm:$0xff]  }
0x105e   :  { %15665 = vst.msk [vmem:[#allocation4 + $0x138] sm:$0xff] %vm15625_vm6, %v15620_v32  ;;  %v15487_v54 = vadd.f32 %v23144_v25, %v29261_v60  ;;  %v15103_v31 = vpop.f32.mrb[233].mxu0  ;;  %v25047_v32 = vld [vmem:[%s30057_s7 + $0x178] sm:$0xff]  }
0x105f   :  { %v15485_v22 = vadd.f32 %v29261_v60, %v15103_v31  ;;  %v23145_v51 = vpop.f32.mrb[234].mxu0  ;;  %v25048_v25 = vld [vmem:[%s30057_s7 + $0x138] sm:$0xff]  }
0x1060   :  { %20814 = vmatpush3.bf16.msra.mxu0 %v25013_v1  ;;  %v15488_v7 = vadd.f32 %v23145_v51, %v29261_v60  ;;  %v15106_v14 = vpop.f32.mrb[235].mxu0  ;;  %v15739_v23 = vpop.permute.xlu0 %15738  ;;  %v15575_v6 = vmax.f32 %v15487_v54, 0.0  ;;  %v25044_v1 = vld [vmem:[%s30057_s7 + $0x130] sm:$0xff]   ;;  %v25049_v54 = vld [vmem:[%s30057_s7 + $0x1c0] sm:$0xff]  }
0x1061   :  { %20815 = vmatprep.subr.bf16.mxu0 %v25014_v53  ;;  %v15486_v42 = vadd.f32 %v29261_v60, %v15106_v14  ;;  %15741 = vst.msk [vmem:[#allocation5 + $0x18] sm:$0xf] %vm15680_vm8, %v15739_v23  ;;  %v15729_v13 = vpop.permute.xlu1 %15728  ;;  %v15915_v61 = vld [vmem:[#allocation5 + $0x8] sm:$0xff]  ;;  %v15573_v40 = vmax.f32 %v15485_v22, 0.0  ;;  %v25021_v60 = vld [vmem:[%s30057_s7 + $0xf0] sm:$0xff]   ;;  %v25050_v22 = vld [vmem:[%s30057_s7 + $0x180] sm:$0xff]  }
0x1062   :  { %v15576_v44 = vmax.f32 %v15488_v7, 0.0  ;;  %15731 = vst.msk [vmem:[#allocation5 + $0x14] sm:$0xf] %vm15680_vm8, %v15729_v13  ;;  %v19510_v36 = vcombine.high %v15915_v61, %v15915_v61  ;;  %v19509_v57 = vcombine.low %v15915_v61, %v15915_v61  ;;  %v25055_v23 = vld [vmem:[%s30057_s7 + $0x1d0] sm:$0xff]   ;;  %v25058_v61 = vld [vmem:[%s30057_s7 + $0x198] sm:$0xff]  }
0x1063   :  { %v15574_v18 = vmax.f32 %v15486_v42, 0.0  ;;  %v25054_v42 = vld [vmem:[%s30057_s7 + $0x188] sm:$0xff]  }
0x1064   :  { %20816 = vmatpush3.bf16.msra.mxu0 %v25015_v33  ;;  %v15622_v38 = vpack.c.bf16 %v15576_v44, %v15575_v6  ;;  %17664 = vmatprep.mubr.bf16.mxu0 %v19510_v36  ;;  %v25053_v33 = vld [vmem:[%s30057_s7 + $0x1c8] sm:$0xff]   ;;  %v25056_v6 = vld [vmem:[%s30057_s7 + $0x190] sm:$0xff]   ;;  %v25057_v44 = vld [vmem:[%s30057_s7 + $0x1d8] sm:$0xff]  }
0x1065   :  { %20817 = vmatprep.subr.bf16.mxu0 %v25016_v27  ;;  %v15621_v0 = vpack.c.bf16 %v15574_v18, %v15573_v40  ;;  %v23148_v35 = vpop.f32.mrb[236].mxu0  ;;  %v25020_v50 = vld [vmem:[#allocation4 + $0x13c] ss:$0 sps:$4 sm:$0xff]   ;;  %v15882_v45 = vld [vmem:[#allocation4 + $0x138] sm:$0xf]  ;;  %v25059_v40 = vld [vmem:[%s30057_s7 + $0x1e0] sm:$0xff]  }
0x1066   :  { %15667 = vst.msk [vmem:[#allocation4 + $0x148] sm:$0xff] %vm15625_vm6, %v15622_v38  ;;  %v15119_v21 = vpop.f32.mrb[237].mxu0  ;;  %15888 = vrot.lane.b32.xlu1 %v25020_v50, %s25286_s0  ;;  %v25060_v18 = vld [vmem:[%s30057_s7 + $0x1a0] sm:$0xff]   ;;  %v25061_v36 = vld [vmem:[%s30057_s7 + $0x1e8] sm:$0xff]   ;;  %v25064_v38 = vld [vmem:[%s30057_s7 + $0x1f0] sm:$0xff]  }
0x1067   :  { %15666 = vst.msk [vmem:[#allocation4 + $0x140] sm:$0xff] %vm15625_vm6, %v15621_v0  ;;  %v15489_v55 = vadd.f32 %v25284_v16, %v15119_v21  ;;  %v23149_v4 = vpop.f32.mrb[238].mxu0  ;;  %v25067_v0 = vld [vmem:[%s30057_s7 + $0x1f8] sm:$0xff]   ;;  %v25069_v21 = vld [vmem:[%s30057_s7 + $0x240] sm:$0xff]  }
0x1068   :  { %20818 = vmatpush3.bf16.msra.mxu0 %v25019_v52  ;;  %15883 = vst.msk [vmem:[#allocation5 + $0x54] sm:$0xf] %vm15671_vm7, %v15882_v45  ;;  %v15122_v3 = vpop.f32.mrb[239].mxu0  ;;  %v25062_v52 = vld [vmem:[%s30057_s7 + $0x1a8] sm:$0xff]  }
0x1069   :  { %20819 = vmatprep.subr.bf16.mxu0 %v25021_v60  ;;  %v15490_v20 = vadd.f32 %v25284_v16, %v15122_v3  ;;  %v15577_v5 = vmax.f32 %v15489_v55, 0.0  ;;  %v29506_v9 = vld [vmem:[#allocation5 + $0x10] sm:$0xff]  ;;  %v25068_v16 = vld [vmem:[%s30057_s7 + $0x1b8] sm:$0xff]   ;;  %v25070_v55 = vld [vmem:[%s30057_s7 + $0x200] sm:$0xff]  }
0x106a   :  { %v19512_v47 = vcombine.high %v29506_v9, %v29506_v9  ;;  %v19511_v51 = vcombine.low %v29506_v9, %v29506_v9  ;;  %v25066_v60 = vld [vmem:[%s30057_s7 + $0x1b0] sm:$0xff]   ;;  %v25079_v9 = vld [vmem:[%s30057_s7 + $0x260] sm:$0xff]  }
0x106b   :  { %v15578_v2 = vmax.f32 %v15490_v20, 0.0  ;;  %v25074_v20 = vld [vmem:[%s30057_s7 + $0x208] sm:$0xff]  }
0x106c   :  { %20820 = vmatpush3.bf16.msra.mxu0 %v25022_v56  ;;  %v25073_v56 = vld [vmem:[%s30057_s7 + $0x248] sm:$0xff]  }
0x106d   :  { %20821 = vmatprep.subr.bf16.mxu0 %v25024_v37  ;;  %v15623_v63 = vpack.c.bf16 %v15578_v2, %v15577_v5  ;;  %v25027_v59 = vld [vmem:[#allocation4 + $0x14c] ss:$0 sps:$4 sm:$0xff]   ;;  %v15902_v58 = vld [vmem:[#allocation4 + $0x148] sm:$0xf]  ;;  %v25075_v5 = vld [vmem:[%s30057_s7 + $0x250] sm:$0xff]  }
0x106e   :  { %v25028_v11 = vld [vmem:[#allocation4 + $0x144] ss:$0 sps:$4 sm:$0xff]   ;;  %15903 = vst.msk [vmem:[#allocation5 + $0x5c] sm:$0xf] %vm15671_vm7, %v15902_v58  ;;  %v15892_v43 = vld [vmem:[#allocation4 + $0x140] sm:$0xf]  ;;  %15908 = vrot.lane.b32.xlu1 %v25027_v59, %s25286_s0 }
0x106f   :  { %15668 = vst.msk [vmem:[#allocation4 + $0x150] sm:$0xff] %vm15625_vm6, %v15623_v63  ;;  %15898 = vrot.lane.b32.xlu0 %v25028_v11, %s25286_s0  ;;  %v25076_v2 = vld [vmem:[%s30057_s7 + $0x210] sm:$0xff]   ;;  %v25081_v63 = vld [vmem:[%s30057_s7 + $0x220] sm:$0xff]   ;;  %v25083_v59 = vld [vmem:[%s30057_s7 + $0x268] sm:$0xff]  }
0x1070   :  { %20822 = vmatpush3.bf16.msra.mxu0 %v25026_v15  ;;  %15893 = vst.msk [vmem:[#allocation5 + $0x58] sm:$0xf] %vm15671_vm7, %v15892_v43  ;;  %v15749_v62 = vpop.permute.xlu1 %15748  ;;  %v25077_v15 = vld [vmem:[%s30057_s7 + $0x258] sm:$0xff]   ;;  %v25085_v43 = vld [vmem:[%s30057_s7 + $0x228] sm:$0xff]  }
0x1071   :  { %20829 = vmatprep.subr.bf16.mxu0 %v25029_v8  ;;  %15751 = vst.msk [vmem:[#allocation5 + $0x1c] sm:$0xf] %vm15680_vm8, %v15749_v62  ;;  %v25078_v8 = vld [vmem:[%s30057_s7 + $0x218] sm:$0xff]  }
0x1073   :  { %17665 = vmatmul.mubr.bf16.vlgmr.msra.gmra.mrb[244].mxu0 %v19509_v57  ;;  %v25089_v57 = vld [vmem:[%s30057_s7 + $0x230] sm:$0xff]  }
0x1074   :  { %20830 = vmatpush3.bf16.msra.mxu0 %v25030_v24  ;;  %17704 = vmatprep.mubr.bf16.mxu0 %v19512_v47  ;;  %v25087_v24 = vld [vmem:[%s30057_s7 + $0x270] sm:$0xff]  }
0x1075   :  { %20831 = vmatprep.subr.bf16.mxu0 %v25033_v30  ;;  %v25091_v30 = vld [vmem:[%s30057_s7 + $0x278] sm:$0xff]  }
0x1076   :  { %v15912_v28 = vld [vmem:[#allocation4 + $0x150] sm:$0xf] }
0x1077   :  { %15913 = vst.msk [vmem:[#allocation5 + $0x60] sm:$0xf] %vm15671_vm7, %v15912_v28 }
0x1078   :  { %20832 = vmatpush3.bf16.msra.mxu0 %v25034_v19  ;;  %v15769_v10 = vpop.permute.xlu1 %15768  ;;  %v15917_v31 = vld [vmem:[#allocation5 + $0x18] sm:$0xff] }
0x1079   :  { %20833 = vmatprep.subr.bf16.mxu0 %v25035_v46  ;;  %15771 = vst.msk [vmem:[#allocation5 + $0x24] sm:$0xf] %vm15680_vm8, %v15769_v10  ;;  %v15759_v26 = vpop.permute.xlu0 %15758  ;;  %v19514_v14 = vcombine.high %v15917_v31, %v15917_v31  ;;  %v19513_v4 = vcombine.low %v15917_v31, %v15917_v31  ;;  %v25093_v19 = vld [vmem:[%s30057_s7 + $0x238] sm:$0xff]   ;;  %v25095_v46 = vld [vmem:[%s30057_s7 + $0x2c0] sm:$0xff]   ;;  %v25101_v10 = vld [vmem:[%s30057_s7 + $0x2c8] sm:$0xff]  }
0x107a   :  { %15761 = vst.msk [vmem:[#allocation5 + $0x20] sm:$0xf] %vm15680_vm8, %v15759_v26 }
0x107c   :  { %20834 = vmatpush3.bf16.msra.mxu0 %v25036_v34  ;;  %v25097_v34 = vld [vmem:[%s30057_s7 + $0x280] sm:$0xff]  }
0x107d   :  { %20835 = vmatprep.subr.bf16.mxu0 %v25037_v49 }
0x1080   :  { %20836 = vmatpush3.bf16.msra.mxu0 %v25038_v41 }
0x1081   :  { %20837 = vmatprep.subr.bf16.mxu0 %v25039_v29  ;;  %v15918_v45 = vld [vmem:[#allocation5 + $0x20] sm:$0xff] }
0x1082   :  { %v19516_v3 = vcombine.high %v15918_v45, %v15918_v45  ;;  %v19515_v49 = vcombine.low %v15918_v45, %v15918_v45  ;;  %v25134_v45 = vld [vmem:[%s30057_s7 + $0x5f8] sm:$0xff]  }
0x1084   :  { %20838 = vmatpush3.bf16.msra.mxu0 %v25040_v17 }
0x1085   :  { %20839 = vmatprep.subr.bf16.mxu0 %v25041_v48  ;;  %v25105_v48 = vld [vmem:[%s30057_s7 + $0x288] sm:$0xff]  }
0x1088   :  { %20840 = vmatpush3.bf16.msra.mxu0 %v25042_v39  ;;  %v15779_v53 = vpop.permute.xlu0 %15778  ;;  %v25106_v39 = vld [vmem:[%s30057_s7 + $0x580] sm:$0xff]  }
0x1089   :  { %20841 = vmatprep.subr.bf16.mxu0 %v25043_v12  ;;  %15781 = vst.msk [vmem:[#allocation5 + $0x28] sm:$0xf] %vm15680_vm8, %v15779_v53  ;;  %v25107_v12 = vld [vmem:[%s30057_s7 + $0x2d0] sm:$0xff]   ;;  %v25110_v53 = vld [vmem:[%s30057_s7 + $0x588] sm:$0xff]  }
0x108c   :  { %20842 = vmatpush3.bf16.msra.mxu0 %v25044_v1  ;;  %v25108_v1 = vld [vmem:[%s30057_s7 + $0x5c8] sm:$0xff]  }
0x108d   :  { %20843 = vmatprep.subr.bf16.mxu0 %v25047_v32  ;;  %v25109_v32 = vld [vmem:[%s30057_s7 + $0x290] sm:$0xff]  }
0x1090   :  { %20844 = vmatpush3.bf16.msra.mxu0 %v25048_v25  ;;  %v15799_v7 = vpop.permute.xlu0 %15798  ;;  %v25111_v25 = vld [vmem:[%s30057_s7 + $0x2d8] sm:$0xff]  }
0x1091   :  { %20851 = vmatprep.subr.bf16.mxu0 %v25049_v54  ;;  %15801 = vst.msk [vmem:[#allocation5 + $0x30] sm:$0xf] %vm15680_vm8, %v15799_v7  ;;  %v15789_v27 = vpop.permute.xlu1 %15788  ;;  %v25112_v54 = vld [vmem:[%s30057_s7 + $0x5d0] sm:$0xff]   ;;  %v25116_v7 = vld [vmem:[%s30057_s7 + $0x5d8] sm:$0xff]  }
0x1092   :  { %15791 = vst.msk [vmem:[#allocation5 + $0x2c] sm:$0xf] %vm15680_vm8, %v15789_v27  ;;  %v25118_v27 = vld [vmem:[%s30057_s7 + $0x598] sm:$0xff]  }
0x1093   :  { %17705 = vmatmul.mubr.bf16.vlgmr.msra.gmra.mrb[248].mxu0 %v19511_v51  ;;  %v25114_v51 = vld [vmem:[%s30057_s7 + $0x590] sm:$0xff]  }
0x1094   :  { %20852 = vmatpush3.bf16.msra.mxu0 %v25050_v22  ;;  %17744 = vmatprep.mubr.bf16.mxu0 %v19514_v14  ;;  %v25113_v22 = vld [vmem:[%s30057_s7 + $0x298] sm:$0xff]   ;;  %v25117_v14 = vld [vmem:[%s30057_s7 + $0x2a0] sm:$0xff]  }
0x1095   :  { %20853 = vmatprep.subr.bf16.mxu0 %v25053_v33  ;;  %v25115_v33 = vld [vmem:[%s30057_s7 + $0x2e0] sm:$0xff]  }
0x1098   :  { %20854 = vmatpush3.bf16.msra.mxu0 %v25054_v42  ;;  %v25119_v42 = vld [vmem:[%s30057_s7 + $0x2e8] sm:$0xff]  }
0x1099   :  { %20855 = vmatprep.subr.bf16.mxu0 %v25055_v23  ;;  %v15809_v13 = vpop.permute.xlu1 %15808  ;;  %v29676_v28 = vld [vmem:[#allocation5 + $0x28] sm:$0xff]  ;;  %v25120_v23 = vld [vmem:[%s30057_s7 + $0x5e0] sm:$0xff]  }
0x109a   :  { %15811 = vst.msk [vmem:[#allocation5 + $0x34] sm:$0xf] %vm15680_vm8, %v15809_v13  ;;  %v19518_v26 = vcombine.high %v29676_v28, %v29676_v28  ;;  %v25121_v13 = vld [vmem:[%s30057_s7 + $0x2a8] sm:$0xff]  }
0x109c   :  { %20856 = vmatpush3.bf16.msra.mxu0 %v25056_v6 }
0x109d   :  { %20857 = vmatprep.subr.bf16.mxu0 %v25057_v44 }
0x10a0   :  { %20858 = vmatpush3.bf16.msra.mxu0 %v25058_v61  ;;  %v25122_v61 = vld [vmem:[%s30057_s7 + $0x5a0] sm:$0xff]  }
0x10a1   :  { %20859 = vmatprep.subr.bf16.mxu0 %v25059_v40  ;;  %v25123_v40 = vld [vmem:[%s30057_s7 + $0x2f0] sm:$0xff]  }
0x10a4   :  { %20860 = vmatpush3.bf16.msra.mxu0 %v25060_v18  ;;  %v25124_v18 = vld [vmem:[%s30057_s7 + $0x5e8] sm:$0xff]  }
0x10a5   :  { %20861 = vmatprep.subr.bf16.mxu0 %v25061_v36  ;;  %v25125_v36 = vld [vmem:[%s30057_s7 + $0x2b0] sm:$0xff]  }
0x10a8   :  { %20862 = vmatpush3.bf16.msra.mxu0 %v25062_v52  ;;  %v15829_v35 = vpop.permute.xlu1 %15828  ;;  %v25126_v52 = vld [vmem:[%s30057_s7 + $0x5a8] sm:$0xff]  }
0x10a9   :  { %20863 = vmatprep.subr.bf16.mxu0 %v25064_v38  ;;  %15831 = vst.msk [vmem:[#allocation5 + $0x3c] sm:$0xf] %vm15680_vm8, %v15829_v35  ;;  %v15819_v50 = vpop.permute.xlu0 %15818  ;;  %v25127_v38 = vld [vmem:[%s30057_s7 + $0x2f8] sm:$0xff]  }
0x10aa   :  { %15821 = vst.msk [vmem:[#allocation5 + $0x38] sm:$0xf] %vm15680_vm8, %v15819_v50  ;;  %v25131_v50 = vld [vmem:[%s30057_s7 + $0x2b8] sm:$0xff]  }
0x10ac   :  { %20864 = vmatpush3.bf16.msra.mxu0 %v25066_v60  ;;  %v25128_v60 = vld [vmem:[%s30057_s7 + $0x5f0] sm:$0xff]  }
0x10ad   :  { %20865 = vmatprep.subr.bf16.mxu0 %v25067_v0 }
0x10b0   :  { %20866 = vmatpush3.bf16.msra.mxu0 %v25068_v16  ;;  %v25132_v16 = vld [vmem:[%s30057_s7 + $0x5b0] sm:$0xff]  }
0x10b1   :  { %20873 = vmatprep.subr.bf16.mxu0 %v25069_v21  ;;  %v15839_v37 = vpop.permute.xlu0 %15838  ;;  %v25133_v21 = vld [vmem:[%s30057_s7 + $0x340] sm:$0xff]  }
0x10b2   :  { %15841 = vst.msk [vmem:[#allocation5 + $0x40] sm:$0xf] %vm15680_vm8, %v15839_v37  ;;  %v25139_v37 = vld [vmem:[%s30057_s7 + $0x348] sm:$0xff]  }
0x10b3   :  { %17745 = vmatmul.mubr.bf16.vlgmr.msra.gmra.mrb[252].mxu0 %v19513_v4  ;;  %v25135_v4 = vld [vmem:[%s30057_s7 + $0x300] sm:$0xff]  }
0x10b4   :  { %20874 = vmatpush3.bf16.msra.mxu0 %v25070_v55  ;;  %17784 = vmatprep.mubr.bf16.mxu0 %v19516_v3  ;;  %v15920_v55 = vld [vmem:[#allocation5 + $0x30] sm:$0xff]  ;;  %v25138_v3 = vld [vmem:[%s30057_s7 + $0x5b8] sm:$0xff]  }
0x10b5   :  { %20875 = vmatprep.subr.bf16.mxu0 %v25073_v56  ;;  %v19517_v56 = vcombine.low %v29676_v28, %v29676_v28  ;;  %v25154_v28 = vld [vmem:[%s30057_s7 + $0x380] sm:$0xff]  }
0x10b8   :  { %20876 = vmatpush3.bf16.msra.mxu0 %v25074_v20  ;;  %v19520_v20 = vcombine.high %v15920_v55, %v15920_v55 }
0x10b9   :  { %20877 = vmatprep.subr.bf16.mxu0 %v25075_v5  ;;  %v25140_v5 = vld [vmem:[%s30057_s7 + $0x308] sm:$0xff]  }
0x10bc   :  { %20878 = vmatpush3.bf16.msra.mxu0 %v25076_v2  ;;  %v25141_v2 = vld [vmem:[%s30057_s7 + $0x350] sm:$0xff]  }
0x10bd   :  { %20879 = vmatprep.subr.bf16.mxu0 %v25077_v15 }
0x10c0   :  { %20880 = vmatpush3.bf16.msra.mxu0 %v25078_v8  ;;  %v15859_v58 = vpop.permute.xlu0 %15858  ;;  %v25287_v8 = vmov 0.0  }
0x10c1   :  { %20881 = vmatprep.subr.bf16.mxu0 %v25079_v9  ;;  %15861 = vst.msk [vmem:[#allocation5 + $0x48] sm:$0xf] %vm15680_vm8, %v15859_v58  ;;  %v15849_v11 = vpop.permute.xlu1 %15848  ;;  %v25142_v9 = vld [vmem:[%s30057_s7 + $0x310] sm:$0xff]   ;;  %v25145_v58 = vld [vmem:[%s30057_s7 + $0x360] sm:$0xff]  }
0x10c2   :  { %15851 = vst.msk [vmem:[#allocation5 + $0x44] sm:$0xf] %vm15680_vm8, %v15849_v11  ;;  %v25146_v11 = vld [vmem:[%s30057_s7 + $0x320] sm:$0xff]  }
0x10c4   :  { %20882 = vmatpush3.bf16.msra.mxu0 %v25081_v63  ;;  %v25143_v63 = vld [vmem:[%s30057_s7 + $0x358] sm:$0xff]  }
0x10c5   :  { %20883 = vmatprep.subr.bf16.mxu0 %v25083_v59  ;;  %v25144_v59 = vld [vmem:[%s30057_s7 + $0x318] sm:$0xff]  }
0x10c8   :  { %20884 = vmatpush3.bf16.msra.mxu0 %v25085_v43  ;;  %v15879_v62 = vpop.permute.xlu0 %15878  ;;  %v25147_v43 = vld [vmem:[%s30057_s7 + $0x368] sm:$0xff]  }
0x10c9   :  { %20885 = vmatprep.subr.bf16.mxu0 %v25087_v24  ;;  %15881 = vst.msk [vmem:[#allocation5 + $0x50] sm:$0xf] %vm15680_vm8, %v15879_v62  ;;  %v15869_v47 = vpop.permute.xlu1 %15868  ;;  %v25148_v24 = vld [vmem:[%s30057_s7 + $0x328] sm:$0xff]   ;;  %v25151_v62 = vld [vmem:[%s30057_s7 + $0x378] sm:$0xff]  }
0x10ca   :  { %15871 = vst.msk [vmem:[#allocation5 + $0x4c] sm:$0xf] %vm15680_vm8, %v15869_v47  ;;  %v25152_v47 = vld [vmem:[%s30057_s7 + $0x338] sm:$0xff]  }
0x10cc   :  { %20886 = vmatpush3.bf16.msra.mxu0 %v25089_v57  ;;  %v25149_v57 = vld [vmem:[%s30057_s7 + $0x370] sm:$0xff]  }
0x10cd   :  { %20887 = vmatprep.subr.bf16.mxu0 %v25091_v30  ;;  %v25150_v30 = vld [vmem:[%s30057_s7 + $0x330] sm:$0xff]  }
0x10d0   :  { %20888 = vmatpush3.bf16.msra.mxu0 %v25093_v19  ;;  %v25153_v19 = vld [vmem:[%s30057_s7 + $0x3c0] sm:$0xff]  }
0x10d1   :  { %20895 = vmatprep.subr.bf16.mxu0 %v25095_v46  ;;  %v15923_v41 = vld [vmem:[#allocation5 + $0x48] sm:$0xff]  ;;  %v15921_v46 = vld [vmem:[#allocation5 + $0x38] sm:$0xff] }
0x10d2   :  { %v19525_v29 = vcombine.low %v15923_v41, %v15923_v41  ;;  %v19526_v17 = vcombine.high %v15923_v41, %v15923_v41  ;;  %v25159_v41 = vld [vmem:[%s30057_s7 + $0x3d0] sm:$0xff]  }
0x10d3   :  { %17785 = vmatmul.mubr.bf16.vlgmr.msra.gmra.mrb[0].mxu0 %v19515_v49  ;;  %v25157_v49 = vld [vmem:[%s30057_s7 + $0x3c8] sm:$0xff]  }
0x10d4   :  { %20896 = vmatpush3.bf16.msra.mxu0 %v25097_v34  ;;  %17824 = vmatprep.mubr.bf16.mxu0 %v19518_v26  ;;  %v19519_v34 = vcombine.low %v15920_v55, %v15920_v55  ;;  %v25158_v26 = vld [vmem:[%s30057_s7 + $0x388] sm:$0xff]  }
0x10d5   :  { %20897 = vmatprep.subr.bf16.mxu0 %v25101_v10  ;;  %17984 = vmatprep.mubr.bf16.mxu1 %v19526_v17  ;;  %v19522_v10 = vcombine.high %v15921_v46, %v15921_v46  ;;  %v25161_v17 = vld [vmem:[%s30057_s7 + $0x3d8] sm:$0xff]  }
0x10d6   :  { %17985 = vmatmul.mubr.bf16.vlgmr.msra.gmra.mrb[120].mxu1 %v19525_v29  ;;  %v25160_v29 = vld [vmem:[%s30057_s7 + $0x390] sm:$0xff]  }
0x10d7   :  { %21028 = vmatpush3.bf16.msra.mxu1 %v25106_v39  ;;  %v25163_v39 = vld [vmem:[%s30057_s7 + $0x3e0] sm:$0xff]  }
0x10d8   :  { %20898 = vmatpush3.bf16.msra.mxu0 %v25105_v48  ;;  %21029 = vmatprep.subr.bf16.mxu1 %v25108_v1  ;;  %v15889_v31 = vpop.permute.xlu1 %15888  ;;  %v25162_v48 = vld [vmem:[%s30057_s7 + $0x398] sm:$0xff]   ;;  %v25165_v1 = vld [vmem:[%s30057_s7 + $0x3e8] sm:$0xff]  }
0x10d9   :  { %20899 = vmatprep.subr.bf16.mxu0 %v25107_v12  ;;  %15891 = vst.msk [vmem:[#allocation5 + $0x54] sm:$0xf] %vm15680_vm8, %v15889_v31  ;;  %v25164_v12 = vld [vmem:[%s30057_s7 + $0x3a0] sm:$0xff]  }
0x10db   :  { %21030 = vmatpush3.bf16.msra.mxu1 %v25110_v53  ;;  %v25167_v53 = vld [vmem:[%s30057_s7 + $0x3f0] sm:$0xff]  }
0x10dc   :  { %20900 = vmatpush3.bf16.msra.mxu0 %v25109_v32  ;;  %21031 = vmatprep.subr.bf16.mxu1 %v25112_v54  ;;  %v25166_v32 = vld [vmem:[%s30057_s7 + $0x3a8] sm:$0xff]  }
0x10dd   :  { %20901 = vmatprep.subr.bf16.mxu0 %v25111_v25 }
0x10df   :  { %21032 = vmatpush3.bf16.msra.mxu1 %v25114_v51  ;;  %v25168_v51 = vld [vmem:[%s30057_s7 + $0x3b0] sm:$0xff]  }
0x10e0   :  { %20902 = vmatpush3.bf16.msra.mxu0 %v25113_v22  ;;  %21033 = vmatprep.subr.bf16.mxu1 %v25116_v7  ;;  %v15909_v6 = vpop.permute.xlu1 %15908  ;;  %v25169_v7 = vld [vmem:[%s30057_s7 + $0x3f8] sm:$0xff]  }
0x10e1   :  { %20903 = vmatprep.subr.bf16.mxu0 %v25115_v33  ;;  %15911 = vst.msk [vmem:[#allocation5 + $0x5c] sm:$0xf] %vm15680_vm8, %v15909_v6  ;;  %v15899_v44 = vpop.permute.xlu0 %15898  ;;  %v19521_v6 = vcombine.low %v15921_v46, %v15921_v46  ;;  %v25201_v46 = vld [vmem:[%s30057_s7 + $0x568] sm:$0xff]  }
0x10e2   :  { %15901 = vst.msk [vmem:[#allocation5 + $0x58] sm:$0xf] %vm15680_vm8, %v15899_v44  ;;  %v25175_v44 = vld [vmem:[%s30057_s7 + $0x448] sm:$0xff]  }
0x10e3   :  { %21034 = vmatpush3.bf16.msra.mxu1 %v25118_v27  ;;  %v25171_v27 = vld [vmem:[%s30057_s7 + $0x440] sm:$0xff]  }
0x10e4   :  { %20904 = vmatpush3.bf16.msra.mxu0 %v25117_v14  ;;  %21035 = vmatprep.subr.bf16.mxu1 %v25120_v23  ;;  %v25170_v14 = vld [vmem:[%s30057_s7 + $0x3b8] sm:$0xff]   ;;  %v25172_v23 = vld [vmem:[%s30057_s7 + $0x400] sm:$0xff]  }
0x10e5   :  { %20905 = vmatprep.subr.bf16.mxu0 %v25119_v42  ;;  %v15922_v42 = vld [vmem:[#allocation5 + $0x40] sm:$0xff] }
0x10e7   :  { %21036 = vmatpush3.bf16.msra.mxu1 %v25122_v61  ;;  %v25176_v61 = vld [vmem:[%s30057_s7 + $0x408] sm:$0xff]  }
0x10e8   :  { %20906 = vmatpush3.bf16.msra.mxu0 %v25121_v13  ;;  %21037 = vmatprep.subr.bf16.mxu1 %v25124_v18  ;;  %v19524_v13 = vcombine.high %v15922_v42, %v15922_v42  ;;  %v25178_v18 = vld [vmem:[%s30057_s7 + $0x410] sm:$0xff]  }
0x10e9   :  { %20907 = vmatprep.subr.bf16.mxu0 %v25123_v40  ;;  %v15925_v0 = vld [vmem:[#allocation5 + $0x58] sm:$0xff]  ;;  %v25177_v40 = vld [vmem:[%s30057_s7 + $0x450] sm:$0xff]  }
0x10ea   :  { %v19530_v35 = vcombine.high %v15925_v0, %v15925_v0  ;;  %v19529_v15 = vcombine.low %v15925_v0, %v15925_v0  ;;  %v25183_v0 = vld [vmem:[%s30057_s7 + $0x468] sm:$0xff]  }
0x10eb   :  { %21038 = vmatpush3.bf16.msra.mxu1 %v25126_v52  ;;  %v25180_v52 = vld [vmem:[%s30057_s7 + $0x418] sm:$0xff]  }
0x10ec   :  { %20908 = vmatpush3.bf16.msra.mxu0 %v25125_v36  ;;  %21039 = vmatprep.subr.bf16.mxu1 %v25128_v60  ;;  %v25179_v36 = vld [vmem:[%s30057_s7 + $0x458] sm:$0xff]   ;;  %v25182_v60 = vld [vmem:[%s30057_s7 + $0x420] sm:$0xff]  }
0x10ed   :  { %20909 = vmatprep.subr.bf16.mxu0 %v25127_v38  ;;  %18064 = vmatprep.mubr.bf16.mxu1 %v19530_v35  ;;  %v25181_v38 = vld [vmem:[%s30057_s7 + $0x460] sm:$0xff]   ;;  %v25184_v35 = vld [vmem:[%s30057_s7 + $0x428] sm:$0xff]  }
0x10ef   :  { %21040 = vmatpush3.bf16.msra.mxu1 %v25132_v16  ;;  %v25185_v16 = vld [vmem:[%s30057_s7 + $0x470] sm:$0xff]  }
0x10f0   :  { %20910 = vmatpush3.bf16.msra.mxu0 %v25131_v50  ;;  %21041 = vmatprep.subr.bf16.mxu1 %v25134_v45  ;;  %v19506_v50 = vld [vmem:[%s30059_s8] ss:$0 sm:$0xff] }
0x10f1   :  { %20917 = vmatprep.subr.bf16.mxu0 %v25133_v21 }
0x10f3   :  { %17825 = vmatmul.mubr.bf16.vlgmr.msra.gmra.mrb[4].mxu0 %v19517_v56  ;;  %21042 = vmatpush3.bf16.msra.mxu1 %v25138_v3  ;;  %v25186_v3 = vld [vmem:[%s30057_s7 + $0x430] sm:$0xff]  }
0x10f4   :  { %20918 = vmatpush3.bf16.msra.mxu0 %v25135_v4  ;;  %17864 = vmatprep.mubr.bf16.mxu0 %v19520_v20  ;;  %v25187_v20 = vld [vmem:[%s30057_s7 + $0x478] sm:$0xff]  }
0x10f5   :  { %20919 = vmatprep.subr.bf16.mxu0 %v25139_v37  ;;  %23162 = vmatprep.subr.bf16.mxu1 %v25287_v8 }
0x10f6   :  { %18065 = vmatmul.mubr.bf16.vlgmr.msra.gmra.mrb[124].mxu1 %v19529_v15  ;;  %v25189_v15 = vld [vmem:[%s30057_s7 + $0x540] sm:$0xff]  }
0x10f7   :  { %23178 = vmatprep.mubr.msk.bf16.mxu1 %vm25288_vm9, %v25287_v8 }
0x10f8   :  { %20920 = vmatpush3.bf16.msra.mxu0 %v25140_v5 }
0x10f9   :  { %20921 = vmatprep.subr.bf16.mxu0 %v25141_v2  ;;  %v25188_v2 = vld [vmem:[%s30057_s7 + $0x438] sm:$0xff]  }
0x10fc   :  { %20922 = vmatpush3.bf16.msra.mxu0 %v25142_v9  ;;  %v15924_v9 = vld [vmem:[#allocation5 + $0x50] sm:$0xff] }
0x10fd   :  { %20923 = vmatprep.subr.bf16.mxu0 %v25143_v63  ;;  %v25190_v63 = vld [vmem:[%s30057_s7 + $0x500] sm:$0xff]  }
0x1100   :  { %20924 = vmatpush3.bf16.msra.mxu0 %v25144_v59  ;;  %v19523_v59 = vcombine.low %v15922_v42, %v15922_v42 }
0x1101   :  { %20925 = vmatprep.subr.bf16.mxu0 %v25145_v58  ;;  %v25193_v58 = vld [vmem:[%s30057_s7 + $0x548] sm:$0xff]  }
0x1104   :  { %20926 = vmatpush3.bf16.msra.mxu0 %v25146_v11  ;;  %v19528_v11 = vcombine.high %v15924_v9, %v15924_v9 }
0x1105   :  { %20927 = vmatprep.subr.bf16.mxu0 %v25147_v43  ;;  %v25194_v43 = vld [vmem:[%s30057_s7 + $0x508] sm:$0xff]  }
0x1108   :  { %20928 = vmatpush3.bf16.msra.mxu0 %v25148_v24  ;;  %v25195_v24 = vld [vmem:[%s30057_s7 + $0x550] sm:$0xff]  }
0x1109   :  { %20929 = vmatprep.subr.bf16.mxu0 %v25149_v57  ;;  %v25196_v57 = vld [vmem:[%s30057_s7 + $0x510] sm:$0xff]  }
0x110c   :  { %20930 = vmatpush3.bf16.msra.mxu0 %v25150_v30  ;;  %v25197_v30 = vld [vmem:[%s30057_s7 + $0x558] sm:$0xff]  }
0x110d   :  { %20931 = vmatprep.subr.bf16.mxu0 %v25151_v62  ;;  %v25198_v62 = vld [vmem:[%s30057_s7 + $0x518] sm:$0xff]  }
0x1110   :  { %20932 = vmatpush3.bf16.msra.mxu0 %v25152_v47  ;;  %v25199_v47 = vld [vmem:[%s30057_s7 + $0x560] sm:$0xff]  }
0x1111   :  { %20939 = vmatprep.subr.bf16.mxu0 %v25153_v19  ;;  %v25200_v19 = vld [vmem:[%s30057_s7 + $0x520] sm:$0xff]  }
0x1113   :  { %17865 = vmatmul.mubr.bf16.vlgmr.msra.gmra.mrb[8].mxu0 %v19519_v34  ;;  %v25203_v34 = vld [vmem:[%s30057_s7 + $0x570] sm:$0xff]  }
0x1114   :  { %20940 = vmatpush3.bf16.msra.mxu0 %v25154_v28  ;;  %17904 = vmatprep.mubr.bf16.mxu0 %v19522_v10  ;;  %v25202_v28 = vld [vmem:[%s30057_s7 + $0x528] sm:$0xff]  }
0x1115   :  { %20941 = vmatprep.subr.bf16.mxu0 %v25157_v49 }
0x1118   :  { %20942 = vmatpush3.bf16.msra.mxu0 %v25158_v26 }
0x1119   :  { %20943 = vmatprep.subr.bf16.mxu0 %v25159_v41 }
0x111c   :  { %20944 = vmatpush3.bf16.msra.mxu0 %v25160_v29  ;;  %v25204_v29 = vld [vmem:[%s30057_s7 + $0x530] sm:$0xff]  }
0x111d   :  { %20945 = vmatprep.subr.bf16.mxu0 %v25161_v17 }
0x1120   :  { %20946 = vmatpush3.bf16.msra.mxu0 %v25162_v48  ;;  %v25205_v48 = vld [vmem:[%s30057_s7 + $0x578] sm:$0xff]  }
0x1121   :  { %20947 = vmatprep.subr.bf16.mxu0 %v25163_v39 }
0x1124   :  { %20948 = vmatpush3.bf16.msra.mxu0 %v25164_v12  ;;  %v25206_v12 = vld [vmem:[%s30057_s7 + $0x538] sm:$0xff]  }
0x1125   :  { %20949 = vmatprep.subr.bf16.mxu0 %v25165_v1  ;;  %v25207_v1 = vld [vmem:[%s30057_s7 + $0x600] sm:$0xff]  }
0x1126   :  { %v20801_v25 = vpop.f32.mrb[240].mxu0 }
0x1127   :  { %v20802_v54 = vpop.f32.mrb[241].mxu0 }
0x1128   :  { %v20803_v31 = vadd.f32 %v20802_v54, %v20801_v25  ;;  %20950 = vmatpush3.bf16.msra.mxu0 %v25166_v32  ;;  %v20804_v22 = vpop.f32.mrb[242].mxu0  ;;  %v19527_v32 = vcombine.low %v15924_v9, %v15924_v9  ;;  %v25209_v25 = vld [vmem:[%s30057_s7 + $0x610] sm:$0xff]   ;;  %v25210_v54 = vld [vmem:[%s30057_s7 + $0x618] sm:$0xff]   ;;  %v25217_v9 = vld [vmem:[%s30060_s9 + $0x28] sm:$0xff]  }
0x1129   :  { %v20805_v33 = vpop.f32.mrb[243].mxu0  ;;  %20951 = vmatprep.subr.bf16.mxu0 %v25167_v53  ;;  %v25208_v53 = vld [vmem:[%s30057_s7 + $0x608] sm:$0xff]  }
0x112a   :  { %v17627_v55 = vadd.f32 %v20803_v31, %v19506_v50  ;;  %v25211_v31 = vld [vmem:[#allocation5 + $0x60] ss:$0 sps:$4 sm:$0xff]   ;;  %v25214_v50 = vld [vmem:[%s30060_s9 + $0x10] sm:$0xff]  }
0x112c   :  { %20952 = vmatpush3.bf16.msra.mxu0 %v25168_v51 }
0x112d   :  { %20953 = vmatprep.subr.bf16.mxu0 %v25169_v7 }
0x1130   :  { %20954 = vmatpush3.bf16.msra.mxu0 %v25170_v14 }
0x1131   :  { %20961 = vmatprep.subr.bf16.mxu0 %v25171_v27 }
0x1133   :  { %17905 = vmatmul.mubr.bf16.vlgmr.msra.gmra.mrb[12].mxu0 %v19521_v6 }
0x1134   :  { %20962 = vmatpush3.bf16.msra.mxu0 %v25172_v23  ;;  %17944 = vmatprep.mubr.bf16.mxu0 %v19524_v13 }
0x1135   :  { %20963 = vmatprep.subr.bf16.mxu0 %v25175_v44 }
0x1138   :  { %20964 = vmatpush3.bf16.msra.mxu0 %v25176_v61 }
0x1139   :  { %20965 = vmatprep.subr.bf16.mxu0 %v25177_v40 }
0x113c   :  { %20966 = vmatpush3.bf16.msra.mxu0 %v25178_v18 }
0x113d   :  { %20967 = vmatprep.subr.bf16.mxu0 %v25179_v36  ;;  %v25212_v36 = vld [vmem:[%s30060_s9] sm:$0xff]  }
0x113e   :  { %23163 = vmatpush3.bf16.msra.mxu1 %v25212_v36 }
0x113f   :  { %23164 = vmatprep.subr.bf16.mxu1 %v25287_v8 }
0x1140   :  { %20968 = vmatpush3.bf16.msra.mxu0 %v25180_v52 }
0x1141   :  { %20969 = vmatprep.subr.bf16.mxu0 %v25181_v38 }
0x1144   :  { %20970 = vmatpush3.bf16.msra.mxu0 %v25182_v60 }
0x1145   :  { %20971 = vmatprep.subr.bf16.mxu0 %v25183_v0  ;;  %v25213_v0 = vld [vmem:[%s30060_s9 + $0x8] sm:$0xff]  }
0x1146   :  { %v20823_v21 = vpop.f32.mrb[244].mxu0  ;;  %23165 = vmatpush3.bf16.msra.mxu1 %v25213_v0 }
0x1147   :  { %v20824_v45 = vpop.f32.mrb[245].mxu0  ;;  %23166 = vmatprep.subr.bf16.mxu1 %v25287_v8 }
0x1148   :  { %v20825_v4 = vadd.f32 %v20824_v45, %v20823_v21  ;;  %v20826_v56 = vpop.f32.mrb[246].mxu0  ;;  %20972 = vmatpush3.bf16.msra.mxu0 %v25184_v35 }
0x1149   :  { %v20827_v37 = vpop.f32.mrb[247].mxu0  ;;  %20973 = vmatprep.subr.bf16.mxu0 %v25185_v16  ;;  %v25215_v56 = vld [vmem:[%s30060_s9 + $0x18] sm:$0xff]  }
0x114a   :  { %v17667_v5 = vadd.f32 %v20825_v4, %v17627_v55  ;;  %23167 = vmatpush3.bf16.msra.mxu1 %v25214_v50 }
0x114b   :  { %23168 = vmatprep.subr.bf16.mxu1 %v25287_v8 }
0x114c   :  { %20974 = vmatpush3.bf16.msra.mxu0 %v25186_v3 }
0x114d   :  { %20975 = vmatprep.subr.bf16.mxu0 %v25187_v20  ;;  %v25216_v20 = vld [vmem:[%s30060_s9 + $0x20] sm:$0xff]  }
0x114e   :  { %23169 = vmatpush3.bf16.msra.mxu1 %v25215_v56 }
0x114f   :  { %23170 = vmatprep.subr.bf16.mxu1 %v25287_v8 }
0x1150   :  { %20976 = vmatpush3.bf16.msra.mxu0 %v25188_v2 }
0x1151   :  { %21005 = vmatprep.subr.bf16.mxu0 %v25189_v15 }
0x1152   :  { %23171 = vmatpush3.bf16.msra.mxu1 %v25216_v20 }
0x1153   :  { %17945 = vmatmul.mubr.bf16.vlgmr.msra.gmra.mrb[16].mxu0 %v19523_v59  ;;  %23172 = vmatprep.subr.bf16.mxu1 %v25287_v8  ;;  %v25219_v59 = vld [vmem:[%s30060_s9 + $0x38] sm:$0xff]  }
0x1154   :  { %21006 = vmatpush3.bf16.msra.mxu0 %v25190_v63  ;;  %18024 = vmatprep.mubr.bf16.mxu0 %v19528_v11  ;;  %v25218_v63 = vld [vmem:[%s30060_s9 + $0x30] sm:$0xff]   ;;  %v25221_v11 = vld [vmem:[%s30061_s11 + $0x8] sm:$0xff]  }
0x1155   :  { %21007 = vmatprep.subr.bf16.mxu0 %v25193_v58  ;;  %v25220_v58 = vld [vmem:[%s30061_s11] sm:$0xff]  }
0x1156   :  { %23173 = vmatpush3.bf16.msra.mxu1 %v25217_v9 }
0x1157   :  { %23174 = vmatprep.subr.bf16.mxu1 %v25287_v8 }
0x1158   :  { %21008 = vmatpush3.bf16.msra.mxu0 %v25194_v43 }
0x1159   :  { %21009 = vmatprep.subr.bf16.mxu0 %v25195_v24 }
0x115a   :  { %23175 = vmatpush3.bf16.msra.mxu1 %v25218_v63 }
0x115b   :  { %23176 = vmatprep.subr.bf16.mxu1 %v25287_v8 }
0x115c   :  { %21010 = vmatpush3.bf16.msra.mxu0 %v25196_v57 }
0x115d   :  { %21011 = vmatprep.subr.bf16.mxu0 %v25197_v30 }
0x115e   :  { %23177 = vmatpush3.bf16.msra.mxu1 %v25219_v59 }
0x1160   :  { %21012 = vmatpush3.bf16.msra.mxu0 %v25198_v62 }
0x1161   :  { %21013 = vmatprep.subr.bf16.mxu0 %v25199_v47 }
0x1164   :  { %21014 = vmatpush3.bf16.msra.mxu0 %v25200_v19 }
0x1165   :  { %21015 = vmatprep.subr.bf16.mxu0 %v25201_v46 }
0x1166   :  { %v20845_v49 = vpop.f32.mrb[248].mxu0 }
0x1167   :  { %v20846_v10 = vpop.f32.mrb[249].mxu0 }
0x1168   :  { %v20847_v26 = vadd.f32 %v20846_v10, %v20845_v49  ;;  %v20848_v41 = vpop.f32.mrb[250].mxu0  ;;  %21016 = vmatpush3.bf16.msra.mxu0 %v25202_v28 }
0x1169   :  { %v20849_v17 = vpop.f32.mrb[251].mxu0  ;;  %21017 = vmatprep.subr.bf16.mxu0 %v25203_v34 }
0x116a   :  { %v17707_v39 = vadd.f32 %v20847_v26, %v17667_v5 }
0x116c   :  { %21018 = vmatpush3.bf16.msra.mxu0 %v25204_v29 }
0x116d   :  { %21019 = vmatprep.subr.bf16.mxu0 %v25205_v48 }
0x1170   :  { %21020 = vmatpush3.bf16.msra.mxu0 %v25206_v12 }
0x1171   :  { %23150 = vmatprep.subr.bf16.mxu0 %v25287_v8 }
0x1173   :  { %18025 = vmatmul.mubr.bf16.vlgmr.msra.gmra.mrb[20].mxu0 %v19527_v32 }
0x1174   :  { %23151 = vmatpush3.bf16.msra.mxu0 %v25207_v1  ;;  %23158 = vmatprep.mubr.msk.bf16.mxu0 %vm25288_vm9, %v25287_v8 }
0x1175   :  { %23152 = vmatprep.subr.bf16.mxu0 %v25287_v8 }
0x1178   :  { %23153 = vmatpush3.bf16.msra.mxu0 %v25208_v53 }
0x1179   :  { %23154 = vmatprep.subr.bf16.mxu0 %v25287_v8 }
0x117c   :  { %23155 = vmatpush3.bf16.msra.mxu0 %v25209_v25 }
0x117d   :  { %23156 = vmatprep.subr.bf16.mxu0 %v25287_v8 }
0x1180   :  { %23157 = vmatpush3.bf16.msra.mxu0 %v25210_v54 }
0x1181   :  { %23182 = vmatprep.subr.bf16.mxu0 %v25287_v8 }
0x1183   :  { %23159 = vmatmul.mubr.msk.bf16.vlgmr.msra.gmra.mrb[24].mxu0 %vm15625_vm6, %v25211_v31 }
0x1184   :  { %23190 = vmatprep.mubr.msk.bf16.mxu0 %vm25288_vm9, %v25287_v8  ;;  %23183 = vmatpush3.bf16.msra.mxu0 %v25220_v58 }
0x1185   :  { %23184 = vmatprep.subr.bf16.mxu0 %v25287_v8 }
0x1186   :  { %v20867_v22 = vpop.f32.mrb[252].mxu0 }
0x1187   :  { %v20868_v51 = vpop.f32.mrb[253].mxu0 }
0x1188   :  { %v20869_v33 = vadd.f32 %v20868_v51, %v20867_v22  ;;  %v20870_v7 = vpop.f32.mrb[254].mxu0  ;;  %23185 = vmatpush3.bf16.msra.mxu0 %v25221_v11 }
0x1189   :  { %v20871_v14 = vpop.f32.mrb[255].mxu0  ;;  %23186 = vmatprep.subr.bf16.mxu0 %v25287_v8 }
0x118a   :  { %v17747_v27 = vadd.f32 %v20869_v33, %v17707_v39 }
0x11a6   :  { %v20889_v42 = vpop.f32.mrb[0].mxu0 }
0x11a7   :  { %v20890_v23 = vpop.f32.mrb[1].mxu0 }
0x11a8   :  { %v20891_v6 = vadd.f32 %v20890_v23, %v20889_v42  ;;  %v20892_v44 = vpop.f32.mrb[2].mxu0 }
0x11a9   :  { %v20893_v13 = vpop.f32.mrb[3].mxu0  ;;  %v20999_v40 = vpop.f32.mrb[120].mxu1  ;;  %v25223_v44 = vld [vmem:[%s30061_s11 + $0x18] sm:$0xff]  }
0x11aa   :  { %v17787_v61 = vadd.f32 %v20891_v6, %v17747_v27  ;;  %v21000_v18 = vpop.f32.mrb[121].mxu1  ;;  %v25222_v6 = vld [vmem:[%s30061_s11 + $0x10] sm:$0xff]   ;;  %v19729_v13 = vld [vmem:[%s30062_s10] ss:$0 sm:$0xff] }
0x11ab   :  { %v21001_v52 = vadd.f32 %v21000_v18, %v20999_v40  ;;  %v21002_v38 = vpop.f32.mrb[122].mxu1  ;;  %23187 = vmatpush3.bf16.msra.mxu0 %v25222_v6 }
0x11ac   :  { %v21003_v60 = vpop.f32.mrb[123].mxu1  ;;  %23188 = vmatprep.subr.bf16.mxu0 %v25287_v8  ;;  %v19738_v8 = vld [vmem:[%s30063_s12] ss:$0 sm:$0xff] }
0x11af   :  { %23189 = vmatpush3.bf16.msra.mxu0 %v25223_v44 }
0x11c6   :  { %v20911_v35 = vpop.f32.mrb[4].mxu0 }
0x11c7   :  { %v20912_v16 = vpop.f32.mrb[5].mxu0 }
0x11c8   :  { %v20913_v21 = vadd.f32 %v20912_v16, %v20911_v35  ;;  %v20914_v45 = vpop.f32.mrb[6].mxu0 }
0x11c9   :  { %v20915_v55 = vpop.f32.mrb[7].mxu0  ;;  %v21043_v3 = vpop.f32.mrb[124].mxu1 }
0x11ca   :  { %v17827_v4 = vadd.f32 %v20913_v21, %v17787_v61  ;;  %v21044_v37 = vpop.f32.mrb[125].mxu1 }
0x11cb   :  { %v21045_v5 = vadd.f32 %v21044_v37, %v21043_v3  ;;  %v21046_v2 = vpop.f32.mrb[126].mxu1 }
0x11cc   :  { %v21047_v15 = vpop.f32.mrb[127].mxu1 }
0x11e6   :  { %v20933_v43 = vpop.f32.mrb[8].mxu0 }
0x11e7   :  { %v20934_v24 = vpop.f32.mrb[9].mxu0 }
0x11e8   :  { %v20935_v57 = vadd.f32 %v20934_v24, %v20933_v43  ;;  %v20936_v30 = vpop.f32.mrb[10].mxu0 }
0x11e9   :  { %v20937_v62 = vpop.f32.mrb[11].mxu0 }
0x11ea   :  { %v17867_v47 = vadd.f32 %v20935_v57, %v17827_v4 }
0x1206   :  { %v20955_v19 = vpop.f32.mrb[12].mxu0 }
0x1207   :  { %v20956_v46 = vpop.f32.mrb[13].mxu0 }
0x1208   :  { %v20957_v28 = vadd.f32 %v20956_v46, %v20955_v19  ;;  %v20958_v34 = vpop.f32.mrb[14].mxu0 }
0x1209   :  { %v20959_v49 = vpop.f32.mrb[15].mxu0 }
0x120a   :  { %v17907_v10 = vadd.f32 %v20957_v28, %v17867_v47 }
0x1226   :  { %v20977_v26 = vpop.f32.mrb[16].mxu0 }
0x1227   :  { %v20978_v41 = vpop.f32.mrb[17].mxu0 }
0x1228   :  { %v20979_v29 = vadd.f32 %v20978_v41, %v20977_v26  ;;  %v20980_v17 = vpop.f32.mrb[18].mxu0 }
0x1229   :  { %v20981_v48 = vpop.f32.mrb[19].mxu0 }
0x122a   :  { %v17947_v39 = vadd.f32 %v20979_v29, %v17907_v10 }
0x122c   :  { %v17987_v12 = vadd.f32 %v21001_v52, %v17947_v39 }
0x1246   :  { %v21021_v1 = vpop.f32.mrb[20].mxu0 }
0x1247   :  { %v21022_v32 = vpop.f32.mrb[21].mxu0 }
0x1248   :  { %v21023_v53 = vadd.f32 %v21022_v32, %v21021_v1  ;;  %v21024_v25 = vpop.f32.mrb[22].mxu0 }
0x1249   :  { %v21025_v54 = vpop.f32.mrb[23].mxu0 }
0x124a   :  { %v18027_v31 = vadd.f32 %v21023_v53, %v17987_v12 }
0x124c   :  { %v18067_v22 = vadd.f32 %v21045_v5, %v18027_v31 }
0x1256   :  { %v18106_v51 = vpop.f32.mrb[24].mxu0 }
0x1257   :  { %v18107_v33 = vadd.f32 %v18106_v51, %v18067_v22  ;;  %v23160_v7 = vpop.f32.mrb[25].mxu0 }
0x1258   :  { %v18109_v14 = vpop.f32.mrb[26].mxu0 }
0x1259   :  { %v18112_v27 = vmax.f32 %v18107_v33, 0.0  ;;  %v23161_v42 = vpop.f32.mrb[27].mxu0 }
0x125b   :  { %v18113_v23 = vpack.c.bf16 %v18112_v27, %v18112_v27 }
0x125d   :  { %23179 = vmatmul.mubr.bf16.vlgmr.msra.gmra.mrb[128].mxu1 %v18113_v23 }
0x1330   :  { %v18219_v61 = vpop.f32.mrb[128].mxu1 }
0x1331   :  { %v18220_v40 = vadd.f32 %v19729_v13, %v18219_v61  ;;  %v23180_v18 = vpop.f32.mrb[129].mxu1 }
0x1332   :  { %v18222_v36 = vpop.f32.mrb[130].mxu1 }
0x1333   :  { %v18225_v52 = vmax.f32 %v18220_v40, 0.0  ;;  %v23181_v38 = vpop.f32.mrb[131].mxu1 }
0x1335   :  { %v18226_v60 = vpack.c.bf16 %v18225_v52, %v18225_v52 }
0x1337   :  { %23191 = vmatmul.mubr.msk.bf16.vlgmr.msra.gmra.mrb[28].mxu0 %vm15625_vm6, %v18226_v60 }
0x140a   :  { %v18303_v0 = vpop.f32.mrb[28].mxu0 }
0x140b   :  { %v18304_v35 = vadd.f32 %v19738_v8, %v18303_v0  ;;  %v23192_v50 = vpop.f32.mrb[29].mxu0 }
0x140c   :  { %v18306_v16 = vpop.f32.mrb[30].mxu0 }
0x140d   :  { %18309 = vst [vmem:[%s30064_s13] sm:$0xff] %v18304_v35  ;;  %v23193_v21 = vpop.f32.mrb[31].mxu0 }

</bundles_post_ra>
